<compile_context>
chip_gen: v6e
topology: v6e:2x2x1
jax: 0.10.0
libtpu: 0.0.40
codegen_flags: <defaults>
</compile_context>

<pallas_src>
import types

import jax
import jax.numpy as jnp
from jax.experimental import pallas as pl
from jax.experimental.pallas import tpu as pltpu

MXU_DTYPE = jnp.bfloat16            # MXU operand dtype (f32 accumulation everywhere)
VMEM_LIMIT = 48 * 1024 * 1024       # headroom on v7x (64 MiB/TC), > defaults on v5e/v6e


def _init_w_f32(key, shape):
    return 0.02 * jax.random.normal(key, shape, jnp.float32)


# ---------------------------------------------------------------------------
# Fully fused sequence kernel (all layers, GHU, conv_last, blend, SSE)
# ---------------------------------------------------------------------------

def _make_rnn_kernel(num_layers, num_hidden, nf, k, Wp):
    """Builds the fused kernel.  Spatial layout is the zero-padded flat layout
    (rows = B * (H+2p) * (W+2p), y-major / x-minor per batch element)."""
    L = num_layers
    p = k // 2

    def conv(x, w_ref, R):
        # 'same' conv via per-tap sublane roll + accumulated MXU dots.  Wrapped rows
        # only ever feed border output rows (discarded / re-zeroed), so no tap mask.
        acc = None
        for dy in range(k):
            for dx in range(k):
                tap = dy * k + dx
                shift = (dy - p) * Wp + (dx - p)
                src = x if shift == 0 else pltpu.roll(x, shift=(-shift) % R, axis=0)
                part = jnp.dot(src.astype(w_ref.dtype), w_ref[tap],
                               preferred_element_type=jnp.float32)
                acc = part if acc is None else acc + part
        return acc

    def kernel(*refs):
        it = iter(refs)
        frames_ref = next(it)          # (1, R, C) block of the (Tm1, R, C) sequence
        maskseq_ref = next(it)         # (1, R, C) scheduled-sampling mask
        target_ref = next(it)          # (1, R, C) frames[t+1] (for the SSE)
        interior_ref = next(it)        # (R, 1) 1.0 on interior rows, 0.0 on border
        cell_w = [tuple(next(it) for _ in range(6)) for _ in range(L)]
        wg_ref = next(it)
        bg_ref = next(it)
        wcl_ref = next(it)
        gen_ref = next(it)             # output: (1, R, C) generated frame
        sse_ref = next(it)             # output: (1, 1) resident SSE accumulator
        states = [tuple(next(it) for _ in range(3)) for _ in range(L)]   # (h, c, m)
        z_ref = next(it)
        xgen_ref = next(it)

        t = pl.program_id(0)

        @pl.when(t == 0)
        def _init():
            for h_r, c_r, m_r in states:
                h_r[...] = jnp.zeros_like(h_r)
                c_r[...] = jnp.zeros_like(c_r)
                m_r[...] = jnp.zeros_like(m_r)
            z_ref[...] = jnp.zeros_like(z_ref)
            xgen_ref[...] = jnp.zeros_like(xgen_ref)
            sse_ref[...] = jnp.zeros_like(sse_ref)

        interior = interior_ref[...]                    # (R, 1)
        R = interior.shape[0]

        # Scheduled-sampling blend (net == frames[t] on the teacher-forced prefix).
        frame = frames_ref[0]
        msk = maskseq_ref[0]
        net = msk * frame + (1.0 - msk) * xgen_ref[...]

        def cell_step(i, x_in):
            w_xhm, b_xhm, w_o, b_o, w_last, b_last = cell_w[i]
            h_r, c_r, m_r = states[i]
            nh = num_hidden[i]
            h = h_r[...]
            c = c_r[...]
            m = m_r[...]

            # One block-structured conv over concat([x, h, m]) replaces the separate
            # x/h/m convolutions (fused biases are pre-folded into b_xhm).
            xhm = jnp.concatenate([x_in, h, m], axis=-1)
            pre = conv(xhm, w_xhm, R) + b_xhm[...]      # (R, 7*nh)

            fb = jnp.float32(1.0)                       # forget-gate bias
            i_t = jax.nn.sigmoid(pre[:, 0 * nh:1 * nh])
            f_t = jax.nn.sigmoid(pre[:, 1 * nh:2 * nh] + fb)
            g_t = jnp.tanh(pre[:, 2 * nh:3 * nh])
            c_new = (f_t * c + i_t * g_t) * interior    # keep border rows zero

            i_m = jax.nn.sigmoid(pre[:, 3 * nh:4 * nh])
            f_m = jax.nn.sigmoid(pre[:, 4 * nh:5 * nh] + fb)
            g_m = jnp.tanh(pre[:, 5 * nh:6 * nh])
            m_new = (f_m * m + i_m * g_m) * interior

            mem = jnp.concatenate([c_new, m_new], axis=-1)          # (R, 2*nh)
            o_pre = conv(mem, w_o, R) + b_o[...]
            o_t = jax.nn.sigmoid(pre[:, 6 * nh:7 * nh] + o_pre)
            last = jnp.dot(mem.astype(w_last.dtype), w_last[...],
                           preferred_element_type=jnp.float32) + b_last[...]
            h_new = (o_t * jnp.tanh(last)) * interior

            h_r[...] = h_new
            c_r[...] = c_new
            m_r[...] = m_new
            return h_new

        h_t = cell_step(0, net)

        # GHU between layer 0 and layer 1 (fused conv over concat([h, z])).
        z_prev = z_ref[...]
        xz = jnp.concatenate([h_t, z_prev], axis=-1)
        g = conv(xz, wg_ref, R) + bg_ref[...]           # (R, 2*nf)
        p_t = jnp.tanh(g[:, :nf])
        u_t = jax.nn.sigmoid(g[:, nf:])
        z_new = (u_t * p_t + (1.0 - u_t) * z_prev) * interior
        z_ref[...] = z_new

        h_t = cell_step(1, z_new)
        for i in range(2, L):
            h_t = cell_step(i, h_t)

        # conv_last: 1x1 conv, no bias (border rows stay exactly zero).
        x_gen = jnp.dot(h_t.astype(wcl_ref.dtype), wcl_ref[...],
                        preferred_element_type=jnp.float32)
        xgen_ref[...] = x_gen
        gen_ref[0] = x_gen

        # Fused MSE: border rows are zero in both pred and target -> contribute 0.
        d = x_gen - target_ref[0]
        sse_ref[...] = sse_ref[...] + jnp.sum(d * d, keepdims=True)

    return kernel


# ---------------------------------------------------------------------------
# Parameter containers (plain Python; all compute happens in the fused kernel)
# ---------------------------------------------------------------------------

class CausalmLSTMCellPallas:
    """PredRNN-style spatio-temporal LSTM cell parameters (block-structured fused conv)."""

    def __init__(self, key, in_channel, num_hidden, width, filter_size, stride,
                 layer_norm):
        del layer_norm, width   # TODO(synk): layer_norm path not implemented
        assert stride == 1, "only stride-1 'same' convolutions are supported"
        k = filter_size
        kk = k * k
        nh = num_hidden
        cin = in_channel
        keys = jax.random.split(key, 5)

        w_x = _init_w_f32(keys[0], (kk, cin, 7 * nh))
        w_h = _init_w_f32(keys[1], (kk, nh, 4 * nh))      # gates i, f, g, o
        w_m = _init_w_f32(keys[2], (kk, nh, 3 * nh))      # gates i', f', g'
        # Fused weight over concat([x, h, m]) channels: h rows feed gate columns
        # {0:3nh, 6nh:7nh}, m rows feed {3nh:6nh}, zeros elsewhere.
        w_h_full = jnp.concatenate(
            [w_h[:, :, :3 * nh], jnp.zeros((kk, nh, 3 * nh), jnp.float32),
             w_h[:, :, 3 * nh:]], axis=2)
        w_m_full = jnp.concatenate(
            [jnp.zeros((kk, nh, 3 * nh), jnp.float32), w_m,
             jnp.zeros((kk, nh, nh), jnp.float32)], axis=2)
        self.w_xhm = jnp.concatenate([w_x, w_h_full, w_m_full], axis=1).astype(MXU_DTYPE)
        self.b_xhm = jnp.zeros((1, 7 * nh), jnp.float32)   # b_x + mapped b_h / b_m (zero init)

        self.w_o = _init_w_f32(keys[3], (kk, 2 * nh, nh)).astype(MXU_DTYPE)
        self.b_o = jnp.zeros((1, nh), jnp.float32)
        self.w_last = _init_w_f32(keys[4], (2 * nh, nh)).astype(MXU_DTYPE)  # 1x1 over [c|m]
        self.b_last = jnp.zeros((1, nh), jnp.float32)

        self.nh = nh
        self.cin = cin
        self.k = k


class GHUPallas:
    """PredRNN++ Gradient Highway Unit parameters (fused conv over concat([x, z]))."""

    def __init__(self, key, layer_name, filter_size, num_features, input_channels,
                 width, tln):
        del layer_name, tln, width
        k = filter_size
        kk = k * k
        nf = num_features
        k1, k2 = jax.random.split(key)
        w_x = _init_w_f32(k1, (kk, input_channels, 2 * nf))
        w_z = _init_w_f32(k2, (kk, nf, 2 * nf))
        self.w_xz = jnp.concatenate([w_x, w_z], axis=1).astype(MXU_DTYPE)
        self.b_xz = jnp.zeros((1, 2 * nf), jnp.float32)
        self.nf = nf


class RNNPallas:
    def __init__(self, num_layers, num_hidden, configs, key):
        assert num_layers >= 2, "forward hard-codes cell 0 -> GHU -> cell 1"
        self.configs = configs
        self.frame_channel = configs.patch_size * configs.patch_size * configs.img_channel
        self.num_layers = num_layers
        self.num_hidden = num_hidden
        width = configs.img_width // configs.patch_size
        self.width = width

        keys = jax.random.split(key, num_layers + 2)
        self.cell_list = []
        for i in range(num_layers):
            in_channel = self.frame_channel if i == 0 else num_hidden[i - 1]
            self.cell_list.append(
                CausalmLSTMCellPallas(keys[i], in_channel, num_hidden[i], width,
                                      configs.filter_size, configs.stride,
                                      configs.layer_norm))
        # conv_last: 1x1 conv, bias=False
        self.w_conv_last = _init_w_f32(
            keys[num_layers], (num_hidden[num_layers - 1], self.frame_channel)
        ).astype(MXU_DTYPE)
        self.ghu = GHUPallas(keys[num_layers + 1], 'highway', configs.filter_size,
                             num_hidden[0], num_hidden[0], width, configs.layer_norm)

    def __call__(self, frames_tensor, mask_true):
        cfg = self.configs
        B, T, H, W, C = frames_tensor.shape
        k = cfg.filter_size
        p = k // 2
        Hp, Wp = H + 2 * p, W + 2 * p
        R = B * Hp * Wp
        Tm1 = cfg.total_length - 1
        L = self.num_layers
        nf = self.num_hidden[0]

        frames_f = frames_tensor.astype(jnp.float32)
        # Scheduled-sampling blend reduces (for both sampling modes) to
        #   net_t = mask_seq[t] * frames[t] + (1 - mask_seq[t]) * x_gen,
        # with mask_seq == 1 on the teacher-forced prefix.
        lead = 1 if cfg.reverse_scheduled_sampling == 1 else cfg.input_length
        mask_seq = jnp.concatenate(
            [jnp.ones((B, lead, H, W, C), jnp.float32),
             mask_true.astype(jnp.float32)[:, :Tm1 - lead]], axis=1)

        def to_flat(x):
            # (B, Tx, H, W, C) -> (Tx, B*Hp*Wp, C), zero-padded spatial border.
            tx = x.shape[1]
            xp = jnp.pad(x, ((0, 0), (0, 0), (p, p), (p, p), (0, 0)))
            return jnp.moveaxis(xp, 1, 0).reshape(tx, R, C)

        frames_in = to_flat(frames_f[:, :Tm1])
        mask_in = to_flat(mask_seq)
        target_in = to_flat(frames_f[:, 1:])

        interior2d = jnp.zeros((Hp, Wp), jnp.float32).at[p:p + H, p:p + W].set(1.0)
        interior = jnp.tile(interior2d.reshape(1, Hp * Wp), (B, 1)).reshape(R, 1)

        kernel = _make_rnn_kernel(L, tuple(self.num_hidden), nf, k, Wp)

        seq_spec = pl.BlockSpec((1, R, C), lambda t: (t, 0, 0))

        def full(arr):
            nd = arr.ndim
            return pl.BlockSpec(arr.shape, lambda t: (0,) * nd)   # VMEM-resident

        inputs = [frames_in, mask_in, target_in, interior]
        in_specs = [seq_spec, seq_spec, seq_spec, full(interior)]
        for cell in self.cell_list:
            ws = [cell.w_xhm, cell.b_xhm, cell.w_o, cell.b_o, cell.w_last, cell.b_last]
            inputs += ws
            in_specs += [full(w) for w in ws]
        inputs += [self.ghu.w_xz, self.ghu.b_xz, self.w_conv_last]
        in_specs += [full(self.ghu.w_xz), full(self.ghu.b_xz), full(self.w_conv_last)]

        scratch = []
        for nh in self.num_hidden:
            scratch += [pltpu.VMEM((R, nh), jnp.float32)] * 3      # h, c, m per layer
        scratch += [pltpu.VMEM((R, nf), jnp.float32),              # GHU z carry
                    pltpu.VMEM((R, C), jnp.float32)]               # x_gen carry

        gen_flat, sse = pl.pallas_call(
            kernel,
            grid=(Tm1,),
            out_shape=(jax.ShapeDtypeStruct((Tm1, R, C), jnp.float32),
                       jax.ShapeDtypeStruct((1, 1), jnp.float32)),
            in_specs=in_specs,
            out_specs=(pl.BlockSpec((1, R, C), lambda t: (t, 0, 0)),
                       pl.BlockSpec((1, 1), lambda t: (0, 0))),    # resident SSE acc
            scratch_shapes=scratch,
            compiler_params=pltpu.CompilerParams(
                dimension_semantics=("arbitrary",),                # sequential recurrence
                vmem_limit_bytes=VMEM_LIMIT),
        )(*inputs)

        gen = gen_flat.reshape(Tm1, B, Hp, Wp, C)[:, :, p:p + H, p:p + W, :]
        next_frames = jnp.moveaxis(gen, 0, 1)                      # (B, Tm1, H, W, C)
        loss = sse[0, 0] / jnp.float32(B * Tm1 * H * W * C)
        return next_frames, loss


# ---------------------------------------------------------------------------
# Demo
# ---------------------------------------------------------------------------

if __name__ == "__main__":
    configs = types.SimpleNamespace(
        patch_size=2,
        img_channel=1,
        img_width=8,
        filter_size=3,
        stride=1,
        layer_norm=0,
        total_length=8,
        input_length=4,
        reverse_scheduled_sampling=0,
    )
    num_layers = 2
    num_hidden = [32, 32]

    key = jax.random.PRNGKey(0)
    k_param, k_frames, k_mask = jax.random.split(key, 3)

    model = RNNPallas(num_layers, num_hidden, configs, k_param)

    B = 2
    Hs = configs.img_width // configs.patch_size                          # 4
    Cc = configs.patch_size * configs.patch_size * configs.img_channel    # 4

    frames = jax.random.normal(
        k_frames, (B, configs.total_length, Hs, Hs, Cc), jnp.float32)
    mask_true = (jax.random.uniform(
        k_mask,
        (B, configs.total_length - configs.input_length - 1, Hs, Hs, Cc)) > 0.5
    ).astype(jnp.float32)

    fwd = jax.jit(lambda f, m: model(f, m))
    next_frames, loss = fwd(frames, mask_true)
    jax.block_until_ready((next_frames, loss))

    assert next_frames.shape == (B, configs.total_length - 1, Hs, Hs, Cc)
    assert loss.shape == ()
    assert bool(jnp.isfinite(loss))
    print("KERNEL_OK")
</pallas_src>

<mosaic_0001>
module attributes {stable_mosaic.version = 11 : i64} {
  func.func @kernel(%arg0: i32, %arg1: memref<1x72x4xf32, #tpu.memory_space<vmem>>, %arg2: memref<1x72x4xf32, #tpu.memory_space<vmem>>, %arg3: memref<1x72x4xf32, #tpu.memory_space<vmem>>, %arg4: memref<72x1xf32, #tpu.memory_space<vmem>>, %arg5: memref<9x68x224xbf16, #tpu.memory_space<vmem>>, %arg6: memref<1x224xf32, #tpu.memory_space<vmem>>, %arg7: memref<9x64x32xbf16, #tpu.memory_space<vmem>>, %arg8: memref<1x32xf32, #tpu.memory_space<vmem>>, %arg9: memref<64x32xbf16, #tpu.memory_space<vmem>>, %arg10: memref<1x32xf32, #tpu.memory_space<vmem>>, %arg11: memref<9x96x224xbf16, #tpu.memory_space<vmem>>, %arg12: memref<1x224xf32, #tpu.memory_space<vmem>>, %arg13: memref<9x64x32xbf16, #tpu.memory_space<vmem>>, %arg14: memref<1x32xf32, #tpu.memory_space<vmem>>, %arg15: memref<64x32xbf16, #tpu.memory_space<vmem>>, %arg16: memref<1x32xf32, #tpu.memory_space<vmem>>, %arg17: memref<9x64x64xbf16, #tpu.memory_space<vmem>>, %arg18: memref<1x64xf32, #tpu.memory_space<vmem>>, %arg19: memref<32x4xbf16, #tpu.memory_space<vmem>>, %arg20: memref<1x72x4xf32, #tpu.memory_space<vmem>>, %arg21: memref<1x1xf32, #tpu.memory_space<vmem>>, %arg22: memref<72x32xf32, #tpu.memory_space<vmem>>, %arg23: memref<72x32xf32, #tpu.memory_space<vmem>>, %arg24: memref<72x32xf32, #tpu.memory_space<vmem>>, %arg25: memref<72x32xf32, #tpu.memory_space<vmem>>, %arg26: memref<72x32xf32, #tpu.memory_space<vmem>>, %arg27: memref<72x32xf32, #tpu.memory_space<vmem>>, %arg28: memref<72x32xf32, #tpu.memory_space<vmem>>, %arg29: memref<72x4xf32, #tpu.memory_space<vmem>>) attributes {dimension_semantics = [#tpu.dimension_semantics<arbitrary>], iteration_bounds = array<i64: 7>, scalar_prefetch = 0 : i64, scratch_operands = 8 : i64, tpu.core_type = #tpu.core_type<tc>, window_params = [{transform_indices = @transform_0, window_bounds = array<i64: 1, 72, 4>}, {transform_indices = @transform_1, window_bounds = array<i64: 1, 72, 4>}, {transform_indices = @transform_2, window_bounds = array<i64: 1, 72, 4>}, {pipeline_mode = #tpu.pipeline_mode<synchronous>, transform_indices = @transform_3, window_bounds = array<i64: 72, 1>}, {pipeline_mode = #tpu.pipeline_mode<synchronous>, transform_indices = @transform_4, window_bounds = array<i64: 9, 68, 224>}, {pipeline_mode = #tpu.pipeline_mode<synchronous>, transform_indices = @transform_5, window_bounds = array<i64: 1, 224>}, {pipeline_mode = #tpu.pipeline_mode<synchronous>, transform_indices = @transform_6, window_bounds = array<i64: 9, 64, 32>}, {pipeline_mode = #tpu.pipeline_mode<synchronous>, transform_indices = @transform_7, window_bounds = array<i64: 1, 32>}, {pipeline_mode = #tpu.pipeline_mode<synchronous>, transform_indices = @transform_8, window_bounds = array<i64: 64, 32>}, {pipeline_mode = #tpu.pipeline_mode<synchronous>, transform_indices = @transform_9, window_bounds = array<i64: 1, 32>}, {pipeline_mode = #tpu.pipeline_mode<synchronous>, transform_indices = @transform_10, window_bounds = array<i64: 9, 96, 224>}, {pipeline_mode = #tpu.pipeline_mode<synchronous>, transform_indices = @transform_11, window_bounds = array<i64: 1, 224>}, {pipeline_mode = #tpu.pipeline_mode<synchronous>, transform_indices = @transform_12, window_bounds = array<i64: 9, 64, 32>}, {pipeline_mode = #tpu.pipeline_mode<synchronous>, transform_indices = @transform_13, window_bounds = array<i64: 1, 32>}, {pipeline_mode = #tpu.pipeline_mode<synchronous>, transform_indices = @transform_14, window_bounds = array<i64: 64, 32>}, {pipeline_mode = #tpu.pipeline_mode<synchronous>, transform_indices = @transform_15, window_bounds = array<i64: 1, 32>}, {pipeline_mode = #tpu.pipeline_mode<synchronous>, transform_indices = @transform_16, window_bounds = array<i64: 9, 64, 64>}, {pipeline_mode = #tpu.pipeline_mode<synchronous>, transform_indices = @transform_17, window_bounds = array<i64: 1, 64>}, {pipeline_mode = #tpu.pipeline_mode<synchronous>, transform_indices = @transform_18, window_bounds = array<i64: 32, 4>}, {transform_indices = @transform_19, window_bounds = array<i64: 1, 72, 4>}, {pipeline_mode = #tpu.pipeline_mode<synchronous>, transform_indices = @transform_20, window_bounds = array<i64: 1, 1>}]} {
    %c0_i32 = arith.constant 0 : i32
    %0 = arith.cmpi eq, %arg0, %c0_i32 : i32
    %1 = arith.extui %0 : i1 to i32
    %c0_i32_0 = arith.constant 0 : i32
    %2 = arith.cmpi ne, %1, %c0_i32_0 : i32
    scf.if %2 {
      %cst_294 = arith.constant 0.000000e+00 : f32
      %460 = vector.broadcast %cst_294 : f32 to vector<72x32xf32>
      %c0_295 = arith.constant 0 : index
      %c0_296 = arith.constant 0 : index
      %461 = vector.load %arg22[%c0_295, %c0_296] : memref<72x32xf32, #tpu.memory_space<vmem>>, vector<72x32xf32>
      tpu.vector_store %arg22[%c0_295, %c0_296], %460 {strides = array<i32>} : memref<72x32xf32, #tpu.memory_space<vmem>>, vector<72x32xf32>,
      %cst_297 = arith.constant 0.000000e+00 : f32
      %462 = vector.broadcast %cst_297 : f32 to vector<72x32xf32>
      %c0_298 = arith.constant 0 : index
      %c0_299 = arith.constant 0 : index
      %463 = vector.load %arg23[%c0_298, %c0_299] : memref<72x32xf32, #tpu.memory_space<vmem>>, vector<72x32xf32>
      tpu.vector_store %arg23[%c0_298, %c0_299], %462 {strides = array<i32>} : memref<72x32xf32, #tpu.memory_space<vmem>>, vector<72x32xf32>,
      %cst_300 = arith.constant 0.000000e+00 : f32
      %464 = vector.broadcast %cst_300 : f32 to vector<72x32xf32>
      %c0_301 = arith.constant 0 : index
      %c0_302 = arith.constant 0 : index
      %465 = vector.load %arg24[%c0_301, %c0_302] : memref<72x32xf32, #tpu.memory_space<vmem>>, vector<72x32xf32>
      tpu.vector_store %arg24[%c0_301, %c0_302], %464 {strides = array<i32>} : memref<72x32xf32, #tpu.memory_space<vmem>>, vector<72x32xf32>,
      %cst_303 = arith.constant 0.000000e+00 : f32
      %466 = vector.broadcast %cst_303 : f32 to vector<72x32xf32>
      %c0_304 = arith.constant 0 : index
      %c0_305 = arith.constant 0 : index
      %467 = vector.load %arg25[%c0_304, %c0_305] : memref<72x32xf32, #tpu.memory_space<vmem>>, vector<72x32xf32>
      tpu.vector_store %arg25[%c0_304, %c0_305], %466 {strides = array<i32>} : memref<72x32xf32, #tpu.memory_space<vmem>>, vector<72x32xf32>,
      %cst_306 = arith.constant 0.000000e+00 : f32
      %468 = vector.broadcast %cst_306 : f32 to vector<72x32xf32>
      %c0_307 = arith.constant 0 : index
      %c0_308 = arith.constant 0 : index
      %469 = vector.load %arg26[%c0_307, %c0_308] : memref<72x32xf32, #tpu.memory_space<vmem>>, vector<72x32xf32>
      tpu.vector_store %arg26[%c0_307, %c0_308], %468 {strides = array<i32>} : memref<72x32xf32, #tpu.memory_space<vmem>>, vector<72x32xf32>,
      %cst_309 = arith.constant 0.000000e+00 : f32
      %470 = vector.broadcast %cst_309 : f32 to vector<72x32xf32>
      %c0_310 = arith.constant 0 : index
      %c0_311 = arith.constant 0 : index
      %471 = vector.load %arg27[%c0_310, %c0_311] : memref<72x32xf32, #tpu.memory_space<vmem>>, vector<72x32xf32>
      tpu.vector_store %arg27[%c0_310, %c0_311], %470 {strides = array<i32>} : memref<72x32xf32, #tpu.memory_space<vmem>>, vector<72x32xf32>,
      %cst_312 = arith.constant 0.000000e+00 : f32
      %472 = vector.broadcast %cst_312 : f32 to vector<72x32xf32>
      %c0_313 = arith.constant 0 : index
      %c0_314 = arith.constant 0 : index
      %473 = vector.load %arg28[%c0_313, %c0_314] : memref<72x32xf32, #tpu.memory_space<vmem>>, vector<72x32xf32>
      tpu.vector_store %arg28[%c0_313, %c0_314], %472 {strides = array<i32>} : memref<72x32xf32, #tpu.memory_space<vmem>>, vector<72x32xf32>,
      %cst_315 = arith.constant 0.000000e+00 : f32
      %474 = vector.broadcast %cst_315 : f32 to vector<72x4xf32>
      %c0_316 = arith.constant 0 : index
      %c0_317 = arith.constant 0 : index
      %475 = vector.load %arg29[%c0_316, %c0_317] : memref<72x4xf32, #tpu.memory_space<vmem>>, vector<72x4xf32>
      tpu.vector_store %arg29[%c0_316, %c0_317], %474 {strides = array<i32>} : memref<72x4xf32, #tpu.memory_space<vmem>>, vector<72x4xf32>,
      %cst_318 = arith.constant 0.000000e+00 : f32
      %476 = vector.broadcast %cst_318 : f32 to vector<1x1xf32>
      %c0_319 = arith.constant 0 : index
      %c0_320 = arith.constant 0 : index
      %477 = vector.load %arg21[%c0_319, %c0_320] : memref<1x1xf32, #tpu.memory_space<vmem>>, vector<1x1xf32>
      tpu.vector_store %arg21[%c0_319, %c0_320], %476 {strides = array<i32>} : memref<1x1xf32, #tpu.memory_space<vmem>>, vector<1x1xf32>,
    } else {
    }
    %c0 = arith.constant 0 : index
    %c0_1 = arith.constant 0 : index
    %3 = vector.load %arg4[%c0, %c0_1] : memref<72x1xf32, #tpu.memory_space<vmem>>, vector<72x1xf32>
    %c0_2 = arith.constant 0 : index
    %c0_3 = arith.constant 0 : index
    %c0_4 = arith.constant 0 : index
    %4 = vector.load %arg1[%c0_2, %c0_3, %c0_4] : memref<1x72x4xf32, #tpu.memory_space<vmem>>, vector<1x72x4xf32>
    %5 = vector.shape_cast %4 : vector<1x72x4xf32> to vector<72x4xf32>
    %c0_5 = arith.constant 0 : index
    %c0_6 = arith.constant 0 : index
    %c0_7 = arith.constant 0 : index
    %6 = vector.load %arg2[%c0_5, %c0_6, %c0_7] : memref<1x72x4xf32, #tpu.memory_space<vmem>>, vector<1x72x4xf32>
    %7 = vector.shape_cast %6 : vector<1x72x4xf32> to vector<72x4xf32>
    %8 = arith.mulf %7, %5 : vector<72x4xf32>
    %cst = arith.constant 1.000000e+00 : f32
    %9 = vector.broadcast %cst : f32 to vector<72x4xf32>
    %10 = arith.subf %9, %7 : vector<72x4xf32>
    %c0_8 = arith.constant 0 : index
    %c0_9 = arith.constant 0 : index
    %11 = vector.load %arg29[%c0_8, %c0_9] : memref<72x4xf32, #tpu.memory_space<vmem>>, vector<72x4xf32>
    %12 = arith.mulf %10, %11 : vector<72x4xf32>
    %13 = arith.addf %8, %12 : vector<72x4xf32>
    %c0_10 = arith.constant 0 : index
    %c0_11 = arith.constant 0 : index
    %14 = vector.load %arg22[%c0_10, %c0_11] : memref<72x32xf32, #tpu.memory_space<vmem>>, vector<72x32xf32>
    %c0_12 = arith.constant 0 : index
    %c0_13 = arith.constant 0 : index
    %15 = vector.load %arg23[%c0_12, %c0_13] : memref<72x32xf32, #tpu.memory_space<vmem>>, vector<72x32xf32>
    %c0_14 = arith.constant 0 : index
    %c0_15 = arith.constant 0 : index
    %16 = vector.load %arg24[%c0_14, %c0_15] : memref<72x32xf32, #tpu.memory_space<vmem>>, vector<72x32xf32>
    %17 = tpu.concatenate %13, %14, %16 in 1 : vector<72x4xf32>, vector<72x32xf32>, vector<72x32xf32> -> vector<72x68xf32>
    %c7_i32 = arith.constant 7 : i32
    %18 = tpu.dynamic_rotate %17 by %c7_i32 dim 0 : vector<72x68xf32>, i32 -> vector<72x68xf32>
    %19 = arith.truncf %18 : vector<72x68xf32> to vector<72x68xbf16>
    %c0_16 = arith.constant 0 : index
    %c0_17 = arith.constant 0 : index
    %c0_18 = arith.constant 0 : index
    %20 = vector.load %arg5[%c0_16, %c0_17, %c0_18] : memref<9x68x224xbf16, #tpu.memory_space<vmem>>, vector<1x68x224xbf16>
    %21 = vector.shape_cast %20 : vector<1x68x224xbf16> to vector<68x224xbf16>
    %cst_19 = arith.constant dense<0.000000e+00> : vector<72x224xf32>
    %22 = tpu.matmul %19, %21, %cst_19 {dimension_numbers = #tpu.dot_dimension_numbers<[1], [0], [0], [1], [0, 0, 1, 1], [], []>} : vector<72x68xbf16>, vector<68x224xbf16>, vector<72x224xf32> -> vector<72x224xf32>
    %c6_i32 = arith.constant 6 : i32
    %23 = tpu.dynamic_rotate %17 by %c6_i32 dim 0 : vector<72x68xf32>, i32 -> vector<72x68xf32>
    %24 = arith.truncf %23 : vector<72x68xf32> to vector<72x68xbf16>
    %c1 = arith.constant 1 : index
    %c0_20 = arith.constant 0 : index
    %c0_21 = arith.constant 0 : index
    %25 = vector.load %arg5[%c1, %c0_20, %c0_21] : memref<9x68x224xbf16, #tpu.memory_space<vmem>>, vector<1x68x224xbf16>
    %26 = vector.shape_cast %25 : vector<1x68x224xbf16> to vector<68x224xbf16>
    %cst_22 = arith.constant dense<0.000000e+00> : vector<72x224xf32>
    %27 = tpu.matmul %24, %26, %cst_22 {dimension_numbers = #tpu.dot_dimension_numbers<[1], [0], [0], [1], [0, 0, 1, 1], [], []>} : vector<72x68xbf16>, vector<68x224xbf16>, vector<72x224xf32> -> vector<72x224xf32>
    %28 = arith.addf %22, %27 : vector<72x224xf32>
    %c5_i32 = arith.constant 5 : i32
    %29 = tpu.dynamic_rotate %17 by %c5_i32 dim 0 : vector<72x68xf32>, i32 -> vector<72x68xf32>
    %30 = arith.truncf %29 : vector<72x68xf32> to vector<72x68xbf16>
    %c2 = arith.constant 2 : index
    %c0_23 = arith.constant 0 : index
    %c0_24 = arith.constant 0 : index
    %31 = vector.load %arg5[%c2, %c0_23, %c0_24] : memref<9x68x224xbf16, #tpu.memory_space<vmem>>, vector<1x68x224xbf16>
    %32 = vector.shape_cast %31 : vector<1x68x224xbf16> to vector<68x224xbf16>
    %cst_25 = arith.constant dense<0.000000e+00> : vector<72x224xf32>
    %33 = tpu.matmul %30, %32, %cst_25 {dimension_numbers = #tpu.dot_dimension_numbers<[1], [0], [0], [1], [0, 0, 1, 1], [], []>} : vector<72x68xbf16>, vector<68x224xbf16>, vector<72x224xf32> -> vector<72x224xf32>
    %34 = arith.addf %28, %33 : vector<72x224xf32>
    %c1_i32 = arith.constant 1 : i32
    %35 = tpu.dynamic_rotate %17 by %c1_i32 dim 0 : vector<72x68xf32>, i32 -> vector<72x68xf32>
    %36 = arith.truncf %35 : vector<72x68xf32> to vector<72x68xbf16>
    %c3 = arith.constant 3 : index
    %c0_26 = arith.constant 0 : index
    %c0_27 = arith.constant 0 : index
    %37 = vector.load %arg5[%c3, %c0_26, %c0_27] : memref<9x68x224xbf16, #tpu.memory_space<vmem>>, vector<1x68x224xbf16>
    %38 = vector.shape_cast %37 : vector<1x68x224xbf16> to vector<68x224xbf16>
    %cst_28 = arith.constant dense<0.000000e+00> : vector<72x224xf32>
    %39 = tpu.matmul %36, %38, %cst_28 {dimension_numbers = #tpu.dot_dimension_numbers<[1], [0], [0], [1], [0, 0, 1, 1], [], []>} : vector<72x68xbf16>, vector<68x224xbf16>, vector<72x224xf32> -> vector<72x224xf32>
    %40 = arith.addf %34, %39 : vector<72x224xf32>
    %41 = arith.truncf %17 : vector<72x68xf32> to vector<72x68xbf16>
    %c4 = arith.constant 4 : index
    %c0_29 = arith.constant 0 : index
    %c0_30 = arith.constant 0 : index
    %42 = vector.load %arg5[%c4, %c0_29, %c0_30] : memref<9x68x224xbf16, #tpu.memory_space<vmem>>, vector<1x68x224xbf16>
    %43 = vector.shape_cast %42 : vector<1x68x224xbf16> to vector<68x224xbf16>
    %cst_31 = arith.constant dense<0.000000e+00> : vector<72x224xf32>
    %44 = tpu.matmul %41, %43, %cst_31 {dimension_numbers = #tpu.dot_dimension_numbers<[1], [0], [0], [1], [0, 0, 1, 1], [], []>} : vector<72x68xbf16>, vector<68x224xbf16>, vector<72x224xf32> -> vector<72x224xf32>
    %45 = arith.addf %40, %44 : vector<72x224xf32>
    %c71_i32 = arith.constant 71 : i32
    %46 = tpu.dynamic_rotate %17 by %c71_i32 dim 0 : vector<72x68xf32>, i32 -> vector<72x68xf32>
    %47 = arith.truncf %46 : vector<72x68xf32> to vector<72x68xbf16>
    %c5 = arith.constant 5 : index
    %c0_32 = arith.constant 0 : index
    %c0_33 = arith.constant 0 : index
    %48 = vector.load %arg5[%c5, %c0_32, %c0_33] : memref<9x68x224xbf16, #tpu.memory_space<vmem>>, vector<1x68x224xbf16>
    %49 = vector.shape_cast %48 : vector<1x68x224xbf16> to vector<68x224xbf16>
    %cst_34 = arith.constant dense<0.000000e+00> : vector<72x224xf32>
    %50 = tpu.matmul %47, %49, %cst_34 {dimension_numbers = #tpu.dot_dimension_numbers<[1], [0], [0], [1], [0, 0, 1, 1], [], []>} : vector<72x68xbf16>, vector<68x224xbf16>, vector<72x224xf32> -> vector<72x224xf32>
    %51 = arith.addf %45, %50 : vector<72x224xf32>
    %c67_i32 = arith.constant 67 : i32
    %52 = tpu.dynamic_rotate %17 by %c67_i32 dim 0 : vector<72x68xf32>, i32 -> vector<72x68xf32>
    %53 = arith.truncf %52 : vector<72x68xf32> to vector<72x68xbf16>
    %c6 = arith.constant 6 : index
    %c0_35 = arith.constant 0 : index
    %c0_36 = arith.constant 0 : index
    %54 = vector.load %arg5[%c6, %c0_35, %c0_36] : memref<9x68x224xbf16, #tpu.memory_space<vmem>>, vector<1x68x224xbf16>
    %55 = vector.shape_cast %54 : vector<1x68x224xbf16> to vector<68x224xbf16>
    %cst_37 = arith.constant dense<0.000000e+00> : vector<72x224xf32>
    %56 = tpu.matmul %53, %55, %cst_37 {dimension_numbers = #tpu.dot_dimension_numbers<[1], [0], [0], [1], [0, 0, 1, 1], [], []>} : vector<72x68xbf16>, vector<68x224xbf16>, vector<72x224xf32> -> vector<72x224xf32>
    %57 = arith.addf %51, %56 : vector<72x224xf32>
    %c66_i32 = arith.constant 66 : i32
    %58 = tpu.dynamic_rotate %17 by %c66_i32 dim 0 : vector<72x68xf32>, i32 -> vector<72x68xf32>
    %59 = arith.truncf %58 : vector<72x68xf32> to vector<72x68xbf16>
    %c7 = arith.constant 7 : index
    %c0_38 = arith.constant 0 : index
    %c0_39 = arith.constant 0 : index
    %60 = vector.load %arg5[%c7, %c0_38, %c0_39] : memref<9x68x224xbf16, #tpu.memory_space<vmem>>, vector<1x68x224xbf16>
    %61 = vector.shape_cast %60 : vector<1x68x224xbf16> to vector<68x224xbf16>
    %cst_40 = arith.constant dense<0.000000e+00> : vector<72x224xf32>
    %62 = tpu.matmul %59, %61, %cst_40 {dimension_numbers = #tpu.dot_dimension_numbers<[1], [0], [0], [1], [0, 0, 1, 1], [], []>} : vector<72x68xbf16>, vector<68x224xbf16>, vector<72x224xf32> -> vector<72x224xf32>
    %63 = arith.addf %57, %62 : vector<72x224xf32>
    %c65_i32 = arith.constant 65 : i32
    %64 = tpu.dynamic_rotate %17 by %c65_i32 dim 0 : vector<72x68xf32>, i32 -> vector<72x68xf32>
    %65 = arith.truncf %64 : vector<72x68xf32> to vector<72x68xbf16>
    %c8 = arith.constant 8 : index
    %c0_41 = arith.constant 0 : index
    %c0_42 = arith.constant 0 : index
    %66 = vector.load %arg5[%c8, %c0_41, %c0_42] : memref<9x68x224xbf16, #tpu.memory_space<vmem>>, vector<1x68x224xbf16>
    %67 = vector.shape_cast %66 : vector<1x68x224xbf16> to vector<68x224xbf16>
    %cst_43 = arith.constant dense<0.000000e+00> : vector<72x224xf32>
    %68 = tpu.matmul %65, %67, %cst_43 {dimension_numbers = #tpu.dot_dimension_numbers<[1], [0], [0], [1], [0, 0, 1, 1], [], []>} : vector<72x68xbf16>, vector<68x224xbf16>, vector<72x224xf32> -> vector<72x224xf32>
    %69 = arith.addf %63, %68 : vector<72x224xf32>
    %c0_44 = arith.constant 0 : index
    %c0_45 = arith.constant 0 : index
    %70 = vector.load %arg6[%c0_44, %c0_45] : memref<1x224xf32, #tpu.memory_space<vmem>>, vector<1x224xf32>
    %71 = vector.broadcast %70 : vector<1x224xf32> to vector<72x224xf32>
    %72 = arith.addf %69, %71 : vector<72x224xf32>
    %73 = vector.extract_strided_slice %72 {offsets = [0, 0], sizes = [72, 32], strides = [1, 1]} : vector<72x224xf32> to vector<72x32xf32>
    %74 = arith.negf %73 : vector<72x32xf32>
    %75 = math.exp %74 : vector<72x32xf32>
    %cst_46 = arith.constant 1.000000e+00 : f32
    %76 = vector.broadcast %cst_46 : f32 to vector<72x32xf32>
    %77 = arith.addf %76, %75 : vector<72x32xf32>
    %78 = arith.divf %76, %77 : vector<72x32xf32>
    %79 = vector.extract_strided_slice %72 {offsets = [0, 32], sizes = [72, 32], strides = [1, 1]} : vector<72x224xf32> to vector<72x32xf32>
    %cst_47 = arith.constant 1.000000e+00 : f32
    %80 = vector.broadcast %cst_47 : f32 to vector<72x32xf32>
    %81 = arith.addf %79, %80 : vector<72x32xf32>
    %82 = arith.negf %81 : vector<72x32xf32>
    %83 = math.exp %82 : vector<72x32xf32>
    %cst_48 = arith.constant 1.000000e+00 : f32
    %84 = vector.broadcast %cst_48 : f32 to vector<72x32xf32>
    %85 = arith.addf %84, %83 : vector<72x32xf32>
    %86 = arith.divf %84, %85 : vector<72x32xf32>
    %87 = vector.extract_strided_slice %72 {offsets = [0, 64], sizes = [72, 32], strides = [1, 1]} : vector<72x224xf32> to vector<72x32xf32>
    %88 = math.tanh %87 : vector<72x32xf32>
    %89 = arith.mulf %86, %15 : vector<72x32xf32>
    %90 = arith.mulf %78, %88 : vector<72x32xf32>
    %91 = arith.addf %89, %90 : vector<72x32xf32>
    %92 = vector.broadcast %3 : vector<72x1xf32> to vector<72x32xf32>
    %93 = arith.mulf %91, %92 : vector<72x32xf32>
    %94 = vector.extract_strided_slice %72 {offsets = [0, 96], sizes = [72, 32], strides = [1, 1]} : vector<72x224xf32> to vector<72x32xf32>
    %95 = arith.negf %94 : vector<72x32xf32>
    %96 = math.exp %95 : vector<72x32xf32>
    %cst_49 = arith.constant 1.000000e+00 : f32
    %97 = vector.broadcast %cst_49 : f32 to vector<72x32xf32>
    %98 = arith.addf %97, %96 : vector<72x32xf32>
    %99 = arith.divf %97, %98 : vector<72x32xf32>
    %100 = vector.extract_strided_slice %72 {offsets = [0, 128], sizes = [72, 32], strides = [1, 1]} : vector<72x224xf32> to vector<72x32xf32>
    %cst_50 = arith.constant 1.000000e+00 : f32
    %101 = vector.broadcast %cst_50 : f32 to vector<72x32xf32>
    %102 = arith.addf %100, %101 : vector<72x32xf32>
    %103 = arith.negf %102 : vector<72x32xf32>
    %104 = math.exp %103 : vector<72x32xf32>
    %cst_51 = arith.constant 1.000000e+00 : f32
    %105 = vector.broadcast %cst_51 : f32 to vector<72x32xf32>
    %106 = arith.addf %105, %104 : vector<72x32xf32>
    %107 = arith.divf %105, %106 : vector<72x32xf32>
    %108 = vector.extract_strided_slice %72 {offsets = [0, 160], sizes = [72, 32], strides = [1, 1]} : vector<72x224xf32> to vector<72x32xf32>
    %109 = math.tanh %108 : vector<72x32xf32>
    %110 = arith.mulf %107, %16 : vector<72x32xf32>
    %111 = arith.mulf %99, %109 : vector<72x32xf32>
    %112 = arith.addf %110, %111 : vector<72x32xf32>
    %113 = vector.broadcast %3 : vector<72x1xf32> to vector<72x32xf32>
    %114 = arith.mulf %112, %113 : vector<72x32xf32>
    %115 = tpu.concatenate %93, %114 in 1 : vector<72x32xf32>, vector<72x32xf32> -> vector<72x64xf32>
    %c7_i32_52 = arith.constant 7 : i32
    %116 = tpu.dynamic_rotate %115 by %c7_i32_52 dim 0 : vector<72x64xf32>, i32 -> vector<72x64xf32>
    %117 = arith.truncf %116 : vector<72x64xf32> to vector<72x64xbf16>
    %c0_53 = arith.constant 0 : index
    %c0_54 = arith.constant 0 : index
    %c0_55 = arith.constant 0 : index
    %118 = vector.load %arg7[%c0_53, %c0_54, %c0_55] : memref<9x64x32xbf16, #tpu.memory_space<vmem>>, vector<1x64x32xbf16>
    %119 = vector.shape_cast %118 : vector<1x64x32xbf16> to vector<64x32xbf16>
    %cst_56 = arith.constant dense<0.000000e+00> : vector<72x32xf32>
    %120 = tpu.matmul %117, %119, %cst_56 {dimension_numbers = #tpu.dot_dimension_numbers<[1], [0], [0], [1], [0, 0, 1, 1], [], []>} : vector<72x64xbf16>, vector<64x32xbf16>, vector<72x32xf32> -> vector<72x32xf32>
    %c6_i32_57 = arith.constant 6 : i32
    %121 = tpu.dynamic_rotate %115 by %c6_i32_57 dim 0 : vector<72x64xf32>, i32 -> vector<72x64xf32>
    %122 = arith.truncf %121 : vector<72x64xf32> to vector<72x64xbf16>
    %c1_58 = arith.constant 1 : index
    %c0_59 = arith.constant 0 : index
    %c0_60 = arith.constant 0 : index
    %123 = vector.load %arg7[%c1_58, %c0_59, %c0_60] : memref<9x64x32xbf16, #tpu.memory_space<vmem>>, vector<1x64x32xbf16>
    %124 = vector.shape_cast %123 : vector<1x64x32xbf16> to vector<64x32xbf16>
    %cst_61 = arith.constant dense<0.000000e+00> : vector<72x32xf32>
    %125 = tpu.matmul %122, %124, %cst_61 {dimension_numbers = #tpu.dot_dimension_numbers<[1], [0], [0], [1], [0, 0, 1, 1], [], []>} : vector<72x64xbf16>, vector<64x32xbf16>, vector<72x32xf32> -> vector<72x32xf32>
    %126 = arith.addf %120, %125 : vector<72x32xf32>
    %c5_i32_62 = arith.constant 5 : i32
    %127 = tpu.dynamic_rotate %115 by %c5_i32_62 dim 0 : vector<72x64xf32>, i32 -> vector<72x64xf32>
    %128 = arith.truncf %127 : vector<72x64xf32> to vector<72x64xbf16>
    %c2_63 = arith.constant 2 : index
    %c0_64 = arith.constant 0 : index
    %c0_65 = arith.constant 0 : index
    %129 = vector.load %arg7[%c2_63, %c0_64, %c0_65] : memref<9x64x32xbf16, #tpu.memory_space<vmem>>, vector<1x64x32xbf16>
    %130 = vector.shape_cast %129 : vector<1x64x32xbf16> to vector<64x32xbf16>
    %cst_66 = arith.constant dense<0.000000e+00> : vector<72x32xf32>
    %131 = tpu.matmul %128, %130, %cst_66 {dimension_numbers = #tpu.dot_dimension_numbers<[1], [0], [0], [1], [0, 0, 1, 1], [], []>} : vector<72x64xbf16>, vector<64x32xbf16>, vector<72x32xf32> -> vector<72x32xf32>
    %132 = arith.addf %126, %131 : vector<72x32xf32>
    %c1_i32_67 = arith.constant 1 : i32
    %133 = tpu.dynamic_rotate %115 by %c1_i32_67 dim 0 : vector<72x64xf32>, i32 -> vector<72x64xf32>
    %134 = arith.truncf %133 : vector<72x64xf32> to vector<72x64xbf16>
    %c3_68 = arith.constant 3 : index
    %c0_69 = arith.constant 0 : index
    %c0_70 = arith.constant 0 : index
    %135 = vector.load %arg7[%c3_68, %c0_69, %c0_70] : memref<9x64x32xbf16, #tpu.memory_space<vmem>>, vector<1x64x32xbf16>
    %136 = vector.shape_cast %135 : vector<1x64x32xbf16> to vector<64x32xbf16>
    %cst_71 = arith.constant dense<0.000000e+00> : vector<72x32xf32>
    %137 = tpu.matmul %134, %136, %cst_71 {dimension_numbers = #tpu.dot_dimension_numbers<[1], [0], [0], [1], [0, 0, 1, 1], [], []>} : vector<72x64xbf16>, vector<64x32xbf16>, vector<72x32xf32> -> vector<72x32xf32>
    %138 = arith.addf %132, %137 : vector<72x32xf32>
    %139 = arith.truncf %115 : vector<72x64xf32> to vector<72x64xbf16>
    %c4_72 = arith.constant 4 : index
    %c0_73 = arith.constant 0 : index
    %c0_74 = arith.constant 0 : index
    %140 = vector.load %arg7[%c4_72, %c0_73, %c0_74] : memref<9x64x32xbf16, #tpu.memory_space<vmem>>, vector<1x64x32xbf16>
    %141 = vector.shape_cast %140 : vector<1x64x32xbf16> to vector<64x32xbf16>
    %cst_75 = arith.constant dense<0.000000e+00> : vector<72x32xf32>
    %142 = tpu.matmul %139, %141, %cst_75 {dimension_numbers = #tpu.dot_dimension_numbers<[1], [0], [0], [1], [0, 0, 1, 1], [], []>} : vector<72x64xbf16>, vector<64x32xbf16>, vector<72x32xf32> -> vector<72x32xf32>
    %143 = arith.addf %138, %142 : vector<72x32xf32>
    %c71_i32_76 = arith.constant 71 : i32
    %144 = tpu.dynamic_rotate %115 by %c71_i32_76 dim 0 : vector<72x64xf32>, i32 -> vector<72x64xf32>
    %145 = arith.truncf %144 : vector<72x64xf32> to vector<72x64xbf16>
    %c5_77 = arith.constant 5 : index
    %c0_78 = arith.constant 0 : index
    %c0_79 = arith.constant 0 : index
    %146 = vector.load %arg7[%c5_77, %c0_78, %c0_79] : memref<9x64x32xbf16, #tpu.memory_space<vmem>>, vector<1x64x32xbf16>
    %147 = vector.shape_cast %146 : vector<1x64x32xbf16> to vector<64x32xbf16>
    %cst_80 = arith.constant dense<0.000000e+00> : vector<72x32xf32>
    %148 = tpu.matmul %145, %147, %cst_80 {dimension_numbers = #tpu.dot_dimension_numbers<[1], [0], [0], [1], [0, 0, 1, 1], [], []>} : vector<72x64xbf16>, vector<64x32xbf16>, vector<72x32xf32> -> vector<72x32xf32>
    %149 = arith.addf %143, %148 : vector<72x32xf32>
    %c67_i32_81 = arith.constant 67 : i32
    %150 = tpu.dynamic_rotate %115 by %c67_i32_81 dim 0 : vector<72x64xf32>, i32 -> vector<72x64xf32>
    %151 = arith.truncf %150 : vector<72x64xf32> to vector<72x64xbf16>
    %c6_82 = arith.constant 6 : index
    %c0_83 = arith.constant 0 : index
    %c0_84 = arith.constant 0 : index
    %152 = vector.load %arg7[%c6_82, %c0_83, %c0_84] : memref<9x64x32xbf16, #tpu.memory_space<vmem>>, vector<1x64x32xbf16>
    %153 = vector.shape_cast %152 : vector<1x64x32xbf16> to vector<64x32xbf16>
    %cst_85 = arith.constant dense<0.000000e+00> : vector<72x32xf32>
    %154 = tpu.matmul %151, %153, %cst_85 {dimension_numbers = #tpu.dot_dimension_numbers<[1], [0], [0], [1], [0, 0, 1, 1], [], []>} : vector<72x64xbf16>, vector<64x32xbf16>, vector<72x32xf32> -> vector<72x32xf32>
    %155 = arith.addf %149, %154 : vector<72x32xf32>
    %c66_i32_86 = arith.constant 66 : i32
    %156 = tpu.dynamic_rotate %115 by %c66_i32_86 dim 0 : vector<72x64xf32>, i32 -> vector<72x64xf32>
    %157 = arith.truncf %156 : vector<72x64xf32> to vector<72x64xbf16>
    %c7_87 = arith.constant 7 : index
    %c0_88 = arith.constant 0 : index
    %c0_89 = arith.constant 0 : index
    %158 = vector.load %arg7[%c7_87, %c0_88, %c0_89] : memref<9x64x32xbf16, #tpu.memory_space<vmem>>, vector<1x64x32xbf16>
    %159 = vector.shape_cast %158 : vector<1x64x32xbf16> to vector<64x32xbf16>
    %cst_90 = arith.constant dense<0.000000e+00> : vector<72x32xf32>
    %160 = tpu.matmul %157, %159, %cst_90 {dimension_numbers = #tpu.dot_dimension_numbers<[1], [0], [0], [1], [0, 0, 1, 1], [], []>} : vector<72x64xbf16>, vector<64x32xbf16>, vector<72x32xf32> -> vector<72x32xf32>
    %161 = arith.addf %155, %160 : vector<72x32xf32>
    %c65_i32_91 = arith.constant 65 : i32
    %162 = tpu.dynamic_rotate %115 by %c65_i32_91 dim 0 : vector<72x64xf32>, i32 -> vector<72x64xf32>
    %163 = arith.truncf %162 : vector<72x64xf32> to vector<72x64xbf16>
    %c8_92 = arith.constant 8 : index
    %c0_93 = arith.constant 0 : index
    %c0_94 = arith.constant 0 : index
    %164 = vector.load %arg7[%c8_92, %c0_93, %c0_94] : memref<9x64x32xbf16, #tpu.memory_space<vmem>>, vector<1x64x32xbf16>
    %165 = vector.shape_cast %164 : vector<1x64x32xbf16> to vector<64x32xbf16>
    %cst_95 = arith.constant dense<0.000000e+00> : vector<72x32xf32>
    %166 = tpu.matmul %163, %165, %cst_95 {dimension_numbers = #tpu.dot_dimension_numbers<[1], [0], [0], [1], [0, 0, 1, 1], [], []>} : vector<72x64xbf16>, vector<64x32xbf16>, vector<72x32xf32> -> vector<72x32xf32>
    %167 = arith.addf %161, %166 : vector<72x32xf32>
    %c0_96 = arith.constant 0 : index
    %c0_97 = arith.constant 0 : index
    %168 = vector.load %arg8[%c0_96, %c0_97] : memref<1x32xf32, #tpu.memory_space<vmem>>, vector<1x32xf32>
    %169 = vector.broadcast %168 : vector<1x32xf32> to vector<72x32xf32>
    %170 = arith.addf %167, %169 : vector<72x32xf32>
    %171 = vector.extract_strided_slice %72 {offsets = [0, 192], sizes = [72, 32], strides = [1, 1]} : vector<72x224xf32> to vector<72x32xf32>
    %172 = arith.addf %171, %170 : vector<72x32xf32>
    %173 = arith.negf %172 : vector<72x32xf32>
    %174 = math.exp %173 : vector<72x32xf32>
    %cst_98 = arith.constant 1.000000e+00 : f32
    %175 = vector.broadcast %cst_98 : f32 to vector<72x32xf32>
    %176 = arith.addf %175, %174 : vector<72x32xf32>
    %177 = arith.divf %175, %176 : vector<72x32xf32>
    %178 = arith.truncf %115 : vector<72x64xf32> to vector<72x64xbf16>
    %c0_99 = arith.constant 0 : index
    %c0_100 = arith.constant 0 : index
    %179 = vector.load %arg9[%c0_99, %c0_100] : memref<64x32xbf16, #tpu.memory_space<vmem>>, vector<64x32xbf16>
    %cst_101 = arith.constant dense<0.000000e+00> : vector<72x32xf32>
    %180 = tpu.matmul %178, %179, %cst_101 {dimension_numbers = #tpu.dot_dimension_numbers<[1], [0], [0], [1], [0, 0, 1, 1], [], []>} : vector<72x64xbf16>, vector<64x32xbf16>, vector<72x32xf32> -> vector<72x32xf32>
    %c0_102 = arith.constant 0 : index
    %c0_103 = arith.constant 0 : index
    %181 = vector.load %arg10[%c0_102, %c0_103] : memref<1x32xf32, #tpu.memory_space<vmem>>, vector<1x32xf32>
    %182 = vector.broadcast %181 : vector<1x32xf32> to vector<72x32xf32>
    %183 = arith.addf %180, %182 : vector<72x32xf32>
    %184 = math.tanh %183 : vector<72x32xf32>
    %185 = arith.mulf %177, %184 : vector<72x32xf32>
    %186 = vector.broadcast %3 : vector<72x1xf32> to vector<72x32xf32>
    %187 = arith.mulf %185, %186 : vector<72x32xf32>
    %c0_104 = arith.constant 0 : index
    %c0_105 = arith.constant 0 : index
    %188 = vector.load %arg22[%c0_104, %c0_105] : memref<72x32xf32, #tpu.memory_space<vmem>>, vector<72x32xf32>
    tpu.vector_store %arg22[%c0_104, %c0_105], %187 {strides = array<i32>} : memref<72x32xf32, #tpu.memory_space<vmem>>, vector<72x32xf32>,
    %c0_106 = arith.constant 0 : index
    %c0_107 = arith.constant 0 : index
    %189 = vector.load %arg23[%c0_106, %c0_107] : memref<72x32xf32, #tpu.memory_space<vmem>>, vector<72x32xf32>
    tpu.vector_store %arg23[%c0_106, %c0_107], %93 {strides = array<i32>} : memref<72x32xf32, #tpu.memory_space<vmem>>, vector<72x32xf32>,
    %c0_108 = arith.constant 0 : index
    %c0_109 = arith.constant 0 : index
    %190 = vector.load %arg24[%c0_108, %c0_109] : memref<72x32xf32, #tpu.memory_space<vmem>>, vector<72x32xf32>
    tpu.vector_store %arg24[%c0_108, %c0_109], %114 {strides = array<i32>} : memref<72x32xf32, #tpu.memory_space<vmem>>, vector<72x32xf32>,
    %c0_110 = arith.constant 0 : index
    %c0_111 = arith.constant 0 : index
    %191 = vector.load %arg28[%c0_110, %c0_111] : memref<72x32xf32, #tpu.memory_space<vmem>>, vector<72x32xf32>
    %192 = tpu.concatenate %187, %191 in 1 : vector<72x32xf32>, vector<72x32xf32> -> vector<72x64xf32>
    %c7_i32_112 = arith.constant 7 : i32
    %193 = tpu.dynamic_rotate %192 by %c7_i32_112 dim 0 : vector<72x64xf32>, i32 -> vector<72x64xf32>
    %194 = arith.truncf %193 : vector<72x64xf32> to vector<72x64xbf16>
    %c0_113 = arith.constant 0 : index
    %c0_114 = arith.constant 0 : index
    %c0_115 = arith.constant 0 : index
    %195 = vector.load %arg17[%c0_113, %c0_114, %c0_115] : memref<9x64x64xbf16, #tpu.memory_space<vmem>>, vector<1x64x64xbf16>
    %196 = vector.shape_cast %195 : vector<1x64x64xbf16> to vector<64x64xbf16>
    %cst_116 = arith.constant dense<0.000000e+00> : vector<72x64xf32>
    %197 = tpu.matmul %194, %196, %cst_116 {dimension_numbers = #tpu.dot_dimension_numbers<[1], [0], [0], [1], [0, 0, 1, 1], [], []>} : vector<72x64xbf16>, vector<64x64xbf16>, vector<72x64xf32> -> vector<72x64xf32>
    %c6_i32_117 = arith.constant 6 : i32
    %198 = tpu.dynamic_rotate %192 by %c6_i32_117 dim 0 : vector<72x64xf32>, i32 -> vector<72x64xf32>
    %199 = arith.truncf %198 : vector<72x64xf32> to vector<72x64xbf16>
    %c1_118 = arith.constant 1 : index
    %c0_119 = arith.constant 0 : index
    %c0_120 = arith.constant 0 : index
    %200 = vector.load %arg17[%c1_118, %c0_119, %c0_120] : memref<9x64x64xbf16, #tpu.memory_space<vmem>>, vector<1x64x64xbf16>
    %201 = vector.shape_cast %200 : vector<1x64x64xbf16> to vector<64x64xbf16>
    %cst_121 = arith.constant dense<0.000000e+00> : vector<72x64xf32>
    %202 = tpu.matmul %199, %201, %cst_121 {dimension_numbers = #tpu.dot_dimension_numbers<[1], [0], [0], [1], [0, 0, 1, 1], [], []>} : vector<72x64xbf16>, vector<64x64xbf16>, vector<72x64xf32> -> vector<72x64xf32>
    %203 = arith.addf %197, %202 : vector<72x64xf32>
    %c5_i32_122 = arith.constant 5 : i32
    %204 = tpu.dynamic_rotate %192 by %c5_i32_122 dim 0 : vector<72x64xf32>, i32 -> vector<72x64xf32>
    %205 = arith.truncf %204 : vector<72x64xf32> to vector<72x64xbf16>
    %c2_123 = arith.constant 2 : index
    %c0_124 = arith.constant 0 : index
    %c0_125 = arith.constant 0 : index
    %206 = vector.load %arg17[%c2_123, %c0_124, %c0_125] : memref<9x64x64xbf16, #tpu.memory_space<vmem>>, vector<1x64x64xbf16>
    %207 = vector.shape_cast %206 : vector<1x64x64xbf16> to vector<64x64xbf16>
    %cst_126 = arith.constant dense<0.000000e+00> : vector<72x64xf32>
    %208 = tpu.matmul %205, %207, %cst_126 {dimension_numbers = #tpu.dot_dimension_numbers<[1], [0], [0], [1], [0, 0, 1, 1], [], []>} : vector<72x64xbf16>, vector<64x64xbf16>, vector<72x64xf32> -> vector<72x64xf32>
    %209 = arith.addf %203, %208 : vector<72x64xf32>
    %c1_i32_127 = arith.constant 1 : i32
    %210 = tpu.dynamic_rotate %192 by %c1_i32_127 dim 0 : vector<72x64xf32>, i32 -> vector<72x64xf32>
    %211 = arith.truncf %210 : vector<72x64xf32> to vector<72x64xbf16>
    %c3_128 = arith.constant 3 : index
    %c0_129 = arith.constant 0 : index
    %c0_130 = arith.constant 0 : index
    %212 = vector.load %arg17[%c3_128, %c0_129, %c0_130] : memref<9x64x64xbf16, #tpu.memory_space<vmem>>, vector<1x64x64xbf16>
    %213 = vector.shape_cast %212 : vector<1x64x64xbf16> to vector<64x64xbf16>
    %cst_131 = arith.constant dense<0.000000e+00> : vector<72x64xf32>
    %214 = tpu.matmul %211, %213, %cst_131 {dimension_numbers = #tpu.dot_dimension_numbers<[1], [0], [0], [1], [0, 0, 1, 1], [], []>} : vector<72x64xbf16>, vector<64x64xbf16>, vector<72x64xf32> -> vector<72x64xf32>
    %215 = arith.addf %209, %214 : vector<72x64xf32>
    %216 = arith.truncf %192 : vector<72x64xf32> to vector<72x64xbf16>
    %c4_132 = arith.constant 4 : index
    %c0_133 = arith.constant 0 : index
    %c0_134 = arith.constant 0 : index
    %217 = vector.load %arg17[%c4_132, %c0_133, %c0_134] : memref<9x64x64xbf16, #tpu.memory_space<vmem>>, vector<1x64x64xbf16>
    %218 = vector.shape_cast %217 : vector<1x64x64xbf16> to vector<64x64xbf16>
    %cst_135 = arith.constant dense<0.000000e+00> : vector<72x64xf32>
    %219 = tpu.matmul %216, %218, %cst_135 {dimension_numbers = #tpu.dot_dimension_numbers<[1], [0], [0], [1], [0, 0, 1, 1], [], []>} : vector<72x64xbf16>, vector<64x64xbf16>, vector<72x64xf32> -> vector<72x64xf32>
    %220 = arith.addf %215, %219 : vector<72x64xf32>
    %c71_i32_136 = arith.constant 71 : i32
    %221 = tpu.dynamic_rotate %192 by %c71_i32_136 dim 0 : vector<72x64xf32>, i32 -> vector<72x64xf32>
    %222 = arith.truncf %221 : vector<72x64xf32> to vector<72x64xbf16>
    %c5_137 = arith.constant 5 : index
    %c0_138 = arith.constant 0 : index
    %c0_139 = arith.constant 0 : index
    %223 = vector.load %arg17[%c5_137, %c0_138, %c0_139] : memref<9x64x64xbf16, #tpu.memory_space<vmem>>, vector<1x64x64xbf16>
    %224 = vector.shape_cast %223 : vector<1x64x64xbf16> to vector<64x64xbf16>
    %cst_140 = arith.constant dense<0.000000e+00> : vector<72x64xf32>
    %225 = tpu.matmul %222, %224, %cst_140 {dimension_numbers = #tpu.dot_dimension_numbers<[1], [0], [0], [1], [0, 0, 1, 1], [], []>} : vector<72x64xbf16>, vector<64x64xbf16>, vector<72x64xf32> -> vector<72x64xf32>
    %226 = arith.addf %220, %225 : vector<72x64xf32>
    %c67_i32_141 = arith.constant 67 : i32
    %227 = tpu.dynamic_rotate %192 by %c67_i32_141 dim 0 : vector<72x64xf32>, i32 -> vector<72x64xf32>
    %228 = arith.truncf %227 : vector<72x64xf32> to vector<72x64xbf16>
    %c6_142 = arith.constant 6 : index
    %c0_143 = arith.constant 0 : index
    %c0_144 = arith.constant 0 : index
    %229 = vector.load %arg17[%c6_142, %c0_143, %c0_144] : memref<9x64x64xbf16, #tpu.memory_space<vmem>>, vector<1x64x64xbf16>
    %230 = vector.shape_cast %229 : vector<1x64x64xbf16> to vector<64x64xbf16>
    %cst_145 = arith.constant dense<0.000000e+00> : vector<72x64xf32>
    %231 = tpu.matmul %228, %230, %cst_145 {dimension_numbers = #tpu.dot_dimension_numbers<[1], [0], [0], [1], [0, 0, 1, 1], [], []>} : vector<72x64xbf16>, vector<64x64xbf16>, vector<72x64xf32> -> vector<72x64xf32>
    %232 = arith.addf %226, %231 : vector<72x64xf32>
    %c66_i32_146 = arith.constant 66 : i32
    %233 = tpu.dynamic_rotate %192 by %c66_i32_146 dim 0 : vector<72x64xf32>, i32 -> vector<72x64xf32>
    %234 = arith.truncf %233 : vector<72x64xf32> to vector<72x64xbf16>
    %c7_147 = arith.constant 7 : index
    %c0_148 = arith.constant 0 : index
    %c0_149 = arith.constant 0 : index
    %235 = vector.load %arg17[%c7_147, %c0_148, %c0_149] : memref<9x64x64xbf16, #tpu.memory_space<vmem>>, vector<1x64x64xbf16>
    %236 = vector.shape_cast %235 : vector<1x64x64xbf16> to vector<64x64xbf16>
    %cst_150 = arith.constant dense<0.000000e+00> : vector<72x64xf32>
    %237 = tpu.matmul %234, %236, %cst_150 {dimension_numbers = #tpu.dot_dimension_numbers<[1], [0], [0], [1], [0, 0, 1, 1], [], []>} : vector<72x64xbf16>, vector<64x64xbf16>, vector<72x64xf32> -> vector<72x64xf32>
    %238 = arith.addf %232, %237 : vector<72x64xf32>
    %c65_i32_151 = arith.constant 65 : i32
    %239 = tpu.dynamic_rotate %192 by %c65_i32_151 dim 0 : vector<72x64xf32>, i32 -> vector<72x64xf32>
    %240 = arith.truncf %239 : vector<72x64xf32> to vector<72x64xbf16>
    %c8_152 = arith.constant 8 : index
    %c0_153 = arith.constant 0 : index
    %c0_154 = arith.constant 0 : index
    %241 = vector.load %arg17[%c8_152, %c0_153, %c0_154] : memref<9x64x64xbf16, #tpu.memory_space<vmem>>, vector<1x64x64xbf16>
    %242 = vector.shape_cast %241 : vector<1x64x64xbf16> to vector<64x64xbf16>
    %cst_155 = arith.constant dense<0.000000e+00> : vector<72x64xf32>
    %243 = tpu.matmul %240, %242, %cst_155 {dimension_numbers = #tpu.dot_dimension_numbers<[1], [0], [0], [1], [0, 0, 1, 1], [], []>} : vector<72x64xbf16>, vector<64x64xbf16>, vector<72x64xf32> -> vector<72x64xf32>
    %244 = arith.addf %238, %243 : vector<72x64xf32>
    %c0_156 = arith.constant 0 : index
    %c0_157 = arith.constant 0 : index
    %245 = vector.load %arg18[%c0_156, %c0_157] : memref<1x64xf32, #tpu.memory_space<vmem>>, vector<1x64xf32>
    %246 = vector.broadcast %245 : vector<1x64xf32> to vector<72x64xf32>
    %247 = arith.addf %244, %246 : vector<72x64xf32>
    %248 = vector.extract_strided_slice %247 {offsets = [0, 0], sizes = [72, 32], strides = [1, 1]} : vector<72x64xf32> to vector<72x32xf32>
    %249 = math.tanh %248 : vector<72x32xf32>
    %250 = vector.extract_strided_slice %247 {offsets = [0, 32], sizes = [72, 32], strides = [1, 1]} : vector<72x64xf32> to vector<72x32xf32>
    %251 = arith.negf %250 : vector<72x32xf32>
    %252 = math.exp %251 : vector<72x32xf32>
    %cst_158 = arith.constant 1.000000e+00 : f32
    %253 = vector.broadcast %cst_158 : f32 to vector<72x32xf32>
    %254 = arith.addf %253, %252 : vector<72x32xf32>
    %255 = arith.divf %253, %254 : vector<72x32xf32>
    %256 = arith.mulf %255, %249 : vector<72x32xf32>
    %cst_159 = arith.constant 1.000000e+00 : f32
    %257 = vector.broadcast %cst_159 : f32 to vector<72x32xf32>
    %258 = arith.subf %257, %255 : vector<72x32xf32>
    %259 = arith.mulf %258, %191 : vector<72x32xf32>
    %260 = arith.addf %256, %259 : vector<72x32xf32>
    %261 = vector.broadcast %3 : vector<72x1xf32> to vector<72x32xf32>
    %262 = arith.mulf %260, %261 : vector<72x32xf32>
    %c0_160 = arith.constant 0 : index
    %c0_161 = arith.constant 0 : index
    %263 = vector.load %arg28[%c0_160, %c0_161] : memref<72x32xf32, #tpu.memory_space<vmem>>, vector<72x32xf32>
    tpu.vector_store %arg28[%c0_160, %c0_161], %262 {strides = array<i32>} : memref<72x32xf32, #tpu.memory_space<vmem>>, vector<72x32xf32>,
    %c0_162 = arith.constant 0 : index
    %c0_163 = arith.constant 0 : index
    %264 = vector.load %arg25[%c0_162, %c0_163] : memref<72x32xf32, #tpu.memory_space<vmem>>, vector<72x32xf32>
    %c0_164 = arith.constant 0 : index
    %c0_165 = arith.constant 0 : index
    %265 = vector.load %arg26[%c0_164, %c0_165] : memref<72x32xf32, #tpu.memory_space<vmem>>, vector<72x32xf32>
    %c0_166 = arith.constant 0 : index
    %c0_167 = arith.constant 0 : index
    %266 = vector.load %arg27[%c0_166, %c0_167] : memref<72x32xf32, #tpu.memory_space<vmem>>, vector<72x32xf32>
    %267 = tpu.concatenate %262, %264, %266 in 1 : vector<72x32xf32>, vector<72x32xf32>, vector<72x32xf32> -> vector<72x96xf32>
    %c7_i32_168 = arith.constant 7 : i32
    %268 = tpu.dynamic_rotate %267 by %c7_i32_168 dim 0 : vector<72x96xf32>, i32 -> vector<72x96xf32>
    %269 = arith.truncf %268 : vector<72x96xf32> to vector<72x96xbf16>
    %c0_169 = arith.constant 0 : index
    %c0_170 = arith.constant 0 : index
    %c0_171 = arith.constant 0 : index
    %270 = vector.load %arg11[%c0_169, %c0_170, %c0_171] : memref<9x96x224xbf16, #tpu.memory_space<vmem>>, vector<1x96x224xbf16>
    %271 = vector.shape_cast %270 : vector<1x96x224xbf16> to vector<96x224xbf16>
    %cst_172 = arith.constant dense<0.000000e+00> : vector<72x224xf32>
    %272 = tpu.matmul %269, %271, %cst_172 {dimension_numbers = #tpu.dot_dimension_numbers<[1], [0], [0], [1], [0, 0, 1, 1], [], []>} : vector<72x96xbf16>, vector<96x224xbf16>, vector<72x224xf32> -> vector<72x224xf32>
    %c6_i32_173 = arith.constant 6 : i32
    %273 = tpu.dynamic_rotate %267 by %c6_i32_173 dim 0 : vector<72x96xf32>, i32 -> vector<72x96xf32>
    %274 = arith.truncf %273 : vector<72x96xf32> to vector<72x96xbf16>
    %c1_174 = arith.constant 1 : index
    %c0_175 = arith.constant 0 : index
    %c0_176 = arith.constant 0 : index
    %275 = vector.load %arg11[%c1_174, %c0_175, %c0_176] : memref<9x96x224xbf16, #tpu.memory_space<vmem>>, vector<1x96x224xbf16>
    %276 = vector.shape_cast %275 : vector<1x96x224xbf16> to vector<96x224xbf16>
    %cst_177 = arith.constant dense<0.000000e+00> : vector<72x224xf32>
    %277 = tpu.matmul %274, %276, %cst_177 {dimension_numbers = #tpu.dot_dimension_numbers<[1], [0], [0], [1], [0, 0, 1, 1], [], []>} : vector<72x96xbf16>, vector<96x224xbf16>, vector<72x224xf32> -> vector<72x224xf32>
    %278 = arith.addf %272, %277 : vector<72x224xf32>
    %c5_i32_178 = arith.constant 5 : i32
    %279 = tpu.dynamic_rotate %267 by %c5_i32_178 dim 0 : vector<72x96xf32>, i32 -> vector<72x96xf32>
    %280 = arith.truncf %279 : vector<72x96xf32> to vector<72x96xbf16>
    %c2_179 = arith.constant 2 : index
    %c0_180 = arith.constant 0 : index
    %c0_181 = arith.constant 0 : index
    %281 = vector.load %arg11[%c2_179, %c0_180, %c0_181] : memref<9x96x224xbf16, #tpu.memory_space<vmem>>, vector<1x96x224xbf16>
    %282 = vector.shape_cast %281 : vector<1x96x224xbf16> to vector<96x224xbf16>
    %cst_182 = arith.constant dense<0.000000e+00> : vector<72x224xf32>
    %283 = tpu.matmul %280, %282, %cst_182 {dimension_numbers = #tpu.dot_dimension_numbers<[1], [0], [0], [1], [0, 0, 1, 1], [], []>} : vector<72x96xbf16>, vector<96x224xbf16>, vector<72x224xf32> -> vector<72x224xf32>
    %284 = arith.addf %278, %283 : vector<72x224xf32>
    %c1_i32_183 = arith.constant 1 : i32
    %285 = tpu.dynamic_rotate %267 by %c1_i32_183 dim 0 : vector<72x96xf32>, i32 -> vector<72x96xf32>
    %286 = arith.truncf %285 : vector<72x96xf32> to vector<72x96xbf16>
    %c3_184 = arith.constant 3 : index
    %c0_185 = arith.constant 0 : index
    %c0_186 = arith.constant 0 : index
    %287 = vector.load %arg11[%c3_184, %c0_185, %c0_186] : memref<9x96x224xbf16, #tpu.memory_space<vmem>>, vector<1x96x224xbf16>
    %288 = vector.shape_cast %287 : vector<1x96x224xbf16> to vector<96x224xbf16>
    %cst_187 = arith.constant dense<0.000000e+00> : vector<72x224xf32>
    %289 = tpu.matmul %286, %288, %cst_187 {dimension_numbers = #tpu.dot_dimension_numbers<[1], [0], [0], [1], [0, 0, 1, 1], [], []>} : vector<72x96xbf16>, vector<96x224xbf16>, vector<72x224xf32> -> vector<72x224xf32>
    %290 = arith.addf %284, %289 : vector<72x224xf32>
    %291 = arith.truncf %267 : vector<72x96xf32> to vector<72x96xbf16>
    %c4_188 = arith.constant 4 : index
    %c0_189 = arith.constant 0 : index
    %c0_190 = arith.constant 0 : index
    %292 = vector.load %arg11[%c4_188, %c0_189, %c0_190] : memref<9x96x224xbf16, #tpu.memory_space<vmem>>, vector<1x96x224xbf16>
    %293 = vector.shape_cast %292 : vector<1x96x224xbf16> to vector<96x224xbf16>
    %cst_191 = arith.constant dense<0.000000e+00> : vector<72x224xf32>
    %294 = tpu.matmul %291, %293, %cst_191 {dimension_numbers = #tpu.dot_dimension_numbers<[1], [0], [0], [1], [0, 0, 1, 1], [], []>} : vector<72x96xbf16>, vector<96x224xbf16>, vector<72x224xf32> -> vector<72x224xf32>
    %295 = arith.addf %290, %294 : vector<72x224xf32>
    %c71_i32_192 = arith.constant 71 : i32
    %296 = tpu.dynamic_rotate %267 by %c71_i32_192 dim 0 : vector<72x96xf32>, i32 -> vector<72x96xf32>
    %297 = arith.truncf %296 : vector<72x96xf32> to vector<72x96xbf16>
    %c5_193 = arith.constant 5 : index
    %c0_194 = arith.constant 0 : index
    %c0_195 = arith.constant 0 : index
    %298 = vector.load %arg11[%c5_193, %c0_194, %c0_195] : memref<9x96x224xbf16, #tpu.memory_space<vmem>>, vector<1x96x224xbf16>
    %299 = vector.shape_cast %298 : vector<1x96x224xbf16> to vector<96x224xbf16>
    %cst_196 = arith.constant dense<0.000000e+00> : vector<72x224xf32>
    %300 = tpu.matmul %297, %299, %cst_196 {dimension_numbers = #tpu.dot_dimension_numbers<[1], [0], [0], [1], [0, 0, 1, 1], [], []>} : vector<72x96xbf16>, vector<96x224xbf16>, vector<72x224xf32> -> vector<72x224xf32>
    %301 = arith.addf %295, %300 : vector<72x224xf32>
    %c67_i32_197 = arith.constant 67 : i32
    %302 = tpu.dynamic_rotate %267 by %c67_i32_197 dim 0 : vector<72x96xf32>, i32 -> vector<72x96xf32>
    %303 = arith.truncf %302 : vector<72x96xf32> to vector<72x96xbf16>
    %c6_198 = arith.constant 6 : index
    %c0_199 = arith.constant 0 : index
    %c0_200 = arith.constant 0 : index
    %304 = vector.load %arg11[%c6_198, %c0_199, %c0_200] : memref<9x96x224xbf16, #tpu.memory_space<vmem>>, vector<1x96x224xbf16>
    %305 = vector.shape_cast %304 : vector<1x96x224xbf16> to vector<96x224xbf16>
    %cst_201 = arith.constant dense<0.000000e+00> : vector<72x224xf32>
    %306 = tpu.matmul %303, %305, %cst_201 {dimension_numbers = #tpu.dot_dimension_numbers<[1], [0], [0], [1], [0, 0, 1, 1], [], []>} : vector<72x96xbf16>, vector<96x224xbf16>, vector<72x224xf32> -> vector<72x224xf32>
    %307 = arith.addf %301, %306 : vector<72x224xf32>
    %c66_i32_202 = arith.constant 66 : i32
    %308 = tpu.dynamic_rotate %267 by %c66_i32_202 dim 0 : vector<72x96xf32>, i32 -> vector<72x96xf32>
    %309 = arith.truncf %308 : vector<72x96xf32> to vector<72x96xbf16>
    %c7_203 = arith.constant 7 : index
    %c0_204 = arith.constant 0 : index
    %c0_205 = arith.constant 0 : index
    %310 = vector.load %arg11[%c7_203, %c0_204, %c0_205] : memref<9x96x224xbf16, #tpu.memory_space<vmem>>, vector<1x96x224xbf16>
    %311 = vector.shape_cast %310 : vector<1x96x224xbf16> to vector<96x224xbf16>
    %cst_206 = arith.constant dense<0.000000e+00> : vector<72x224xf32>
    %312 = tpu.matmul %309, %311, %cst_206 {dimension_numbers = #tpu.dot_dimension_numbers<[1], [0], [0], [1], [0, 0, 1, 1], [], []>} : vector<72x96xbf16>, vector<96x224xbf16>, vector<72x224xf32> -> vector<72x224xf32>
    %313 = arith.addf %307, %312 : vector<72x224xf32>
    %c65_i32_207 = arith.constant 65 : i32
    %314 = tpu.dynamic_rotate %267 by %c65_i32_207 dim 0 : vector<72x96xf32>, i32 -> vector<72x96xf32>
    %315 = arith.truncf %314 : vector<72x96xf32> to vector<72x96xbf16>
    %c8_208 = arith.constant 8 : index
    %c0_209 = arith.constant 0 : index
    %c0_210 = arith.constant 0 : index
    %316 = vector.load %arg11[%c8_208, %c0_209, %c0_210] : memref<9x96x224xbf16, #tpu.memory_space<vmem>>, vector<1x96x224xbf16>
    %317 = vector.shape_cast %316 : vector<1x96x224xbf16> to vector<96x224xbf16>
    %cst_211 = arith.constant dense<0.000000e+00> : vector<72x224xf32>
    %318 = tpu.matmul %315, %317, %cst_211 {dimension_numbers = #tpu.dot_dimension_numbers<[1], [0], [0], [1], [0, 0, 1, 1], [], []>} : vector<72x96xbf16>, vector<96x224xbf16>, vector<72x224xf32> -> vector<72x224xf32>
    %319 = arith.addf %313, %318 : vector<72x224xf32>
    %c0_212 = arith.constant 0 : index
    %c0_213 = arith.constant 0 : index
    %320 = vector.load %arg12[%c0_212, %c0_213] : memref<1x224xf32, #tpu.memory_space<vmem>>, vector<1x224xf32>
    %321 = vector.broadcast %320 : vector<1x224xf32> to vector<72x224xf32>
    %322 = arith.addf %319, %321 : vector<72x224xf32>
    %323 = vector.extract_strided_slice %322 {offsets = [0, 0], sizes = [72, 32], strides = [1, 1]} : vector<72x224xf32> to vector<72x32xf32>
    %324 = arith.negf %323 : vector<72x32xf32>
    %325 = math.exp %324 : vector<72x32xf32>
    %cst_214 = arith.constant 1.000000e+00 : f32
    %326 = vector.broadcast %cst_214 : f32 to vector<72x32xf32>
    %327 = arith.addf %326, %325 : vector<72x32xf32>
    %328 = arith.divf %326, %327 : vector<72x32xf32>
    %329 = vector.extract_strided_slice %322 {offsets = [0, 32], sizes = [72, 32], strides = [1, 1]} : vector<72x224xf32> to vector<72x32xf32>
    %cst_215 = arith.constant 1.000000e+00 : f32
    %330 = vector.broadcast %cst_215 : f32 to vector<72x32xf32>
    %331 = arith.addf %329, %330 : vector<72x32xf32>
    %332 = arith.negf %331 : vector<72x32xf32>
    %333 = math.exp %332 : vector<72x32xf32>
    %cst_216 = arith.constant 1.000000e+00 : f32
    %334 = vector.broadcast %cst_216 : f32 to vector<72x32xf32>
    %335 = arith.addf %334, %333 : vector<72x32xf32>
    %336 = arith.divf %334, %335 : vector<72x32xf32>
    %337 = vector.extract_strided_slice %322 {offsets = [0, 64], sizes = [72, 32], strides = [1, 1]} : vector<72x224xf32> to vector<72x32xf32>
    %338 = math.tanh %337 : vector<72x32xf32>
    %339 = arith.mulf %336, %265 : vector<72x32xf32>
    %340 = arith.mulf %328, %338 : vector<72x32xf32>
    %341 = arith.addf %339, %340 : vector<72x32xf32>
    %342 = vector.broadcast %3 : vector<72x1xf32> to vector<72x32xf32>
    %343 = arith.mulf %341, %342 : vector<72x32xf32>
    %344 = vector.extract_strided_slice %322 {offsets = [0, 96], sizes = [72, 32], strides = [1, 1]} : vector<72x224xf32> to vector<72x32xf32>
    %345 = arith.negf %344 : vector<72x32xf32>
    %346 = math.exp %345 : vector<72x32xf32>
    %cst_217 = arith.constant 1.000000e+00 : f32
    %347 = vector.broadcast %cst_217 : f32 to vector<72x32xf32>
    %348 = arith.addf %347, %346 : vector<72x32xf32>
    %349 = arith.divf %347, %348 : vector<72x32xf32>
    %350 = vector.extract_strided_slice %322 {offsets = [0, 128], sizes = [72, 32], strides = [1, 1]} : vector<72x224xf32> to vector<72x32xf32>
    %cst_218 = arith.constant 1.000000e+00 : f32
    %351 = vector.broadcast %cst_218 : f32 to vector<72x32xf32>
    %352 = arith.addf %350, %351 : vector<72x32xf32>
    %353 = arith.negf %352 : vector<72x32xf32>
    %354 = math.exp %353 : vector<72x32xf32>
    %cst_219 = arith.constant 1.000000e+00 : f32
    %355 = vector.broadcast %cst_219 : f32 to vector<72x32xf32>
    %356 = arith.addf %355, %354 : vector<72x32xf32>
    %357 = arith.divf %355, %356 : vector<72x32xf32>
    %358 = vector.extract_strided_slice %322 {offsets = [0, 160], sizes = [72, 32], strides = [1, 1]} : vector<72x224xf32> to vector<72x32xf32>
    %359 = math.tanh %358 : vector<72x32xf32>
    %360 = arith.mulf %357, %266 : vector<72x32xf32>
    %361 = arith.mulf %349, %359 : vector<72x32xf32>
    %362 = arith.addf %360, %361 : vector<72x32xf32>
    %363 = vector.broadcast %3 : vector<72x1xf32> to vector<72x32xf32>
    %364 = arith.mulf %362, %363 : vector<72x32xf32>
    %365 = tpu.concatenate %343, %364 in 1 : vector<72x32xf32>, vector<72x32xf32> -> vector<72x64xf32>
    %c7_i32_220 = arith.constant 7 : i32
    %366 = tpu.dynamic_rotate %365 by %c7_i32_220 dim 0 : vector<72x64xf32>, i32 -> vector<72x64xf32>
    %367 = arith.truncf %366 : vector<72x64xf32> to vector<72x64xbf16>
    %c0_221 = arith.constant 0 : index
    %c0_222 = arith.constant 0 : index
    %c0_223 = arith.constant 0 : index
    %368 = vector.load %arg13[%c0_221, %c0_222, %c0_223] : memref<9x64x32xbf16, #tpu.memory_space<vmem>>, vector<1x64x32xbf16>
    %369 = vector.shape_cast %368 : vector<1x64x32xbf16> to vector<64x32xbf16>
    %cst_224 = arith.constant dense<0.000000e+00> : vector<72x32xf32>
    %370 = tpu.matmul %367, %369, %cst_224 {dimension_numbers = #tpu.dot_dimension_numbers<[1], [0], [0], [1], [0, 0, 1, 1], [], []>} : vector<72x64xbf16>, vector<64x32xbf16>, vector<72x32xf32> -> vector<72x32xf32>
    %c6_i32_225 = arith.constant 6 : i32
    %371 = tpu.dynamic_rotate %365 by %c6_i32_225 dim 0 : vector<72x64xf32>, i32 -> vector<72x64xf32>
    %372 = arith.truncf %371 : vector<72x64xf32> to vector<72x64xbf16>
    %c1_226 = arith.constant 1 : index
    %c0_227 = arith.constant 0 : index
    %c0_228 = arith.constant 0 : index
    %373 = vector.load %arg13[%c1_226, %c0_227, %c0_228] : memref<9x64x32xbf16, #tpu.memory_space<vmem>>, vector<1x64x32xbf16>
    %374 = vector.shape_cast %373 : vector<1x64x32xbf16> to vector<64x32xbf16>
    %cst_229 = arith.constant dense<0.000000e+00> : vector<72x32xf32>
    %375 = tpu.matmul %372, %374, %cst_229 {dimension_numbers = #tpu.dot_dimension_numbers<[1], [0], [0], [1], [0, 0, 1, 1], [], []>} : vector<72x64xbf16>, vector<64x32xbf16>, vector<72x32xf32> -> vector<72x32xf32>
    %376 = arith.addf %370, %375 : vector<72x32xf32>
    %c5_i32_230 = arith.constant 5 : i32
    %377 = tpu.dynamic_rotate %365 by %c5_i32_230 dim 0 : vector<72x64xf32>, i32 -> vector<72x64xf32>
    %378 = arith.truncf %377 : vector<72x64xf32> to vector<72x64xbf16>
    %c2_231 = arith.constant 2 : index
    %c0_232 = arith.constant 0 : index
    %c0_233 = arith.constant 0 : index
    %379 = vector.load %arg13[%c2_231, %c0_232, %c0_233] : memref<9x64x32xbf16, #tpu.memory_space<vmem>>, vector<1x64x32xbf16>
    %380 = vector.shape_cast %379 : vector<1x64x32xbf16> to vector<64x32xbf16>
    %cst_234 = arith.constant dense<0.000000e+00> : vector<72x32xf32>
    %381 = tpu.matmul %378, %380, %cst_234 {dimension_numbers = #tpu.dot_dimension_numbers<[1], [0], [0], [1], [0, 0, 1, 1], [], []>} : vector<72x64xbf16>, vector<64x32xbf16>, vector<72x32xf32> -> vector<72x32xf32>
    %382 = arith.addf %376, %381 : vector<72x32xf32>
    %c1_i32_235 = arith.constant 1 : i32
    %383 = tpu.dynamic_rotate %365 by %c1_i32_235 dim 0 : vector<72x64xf32>, i32 -> vector<72x64xf32>
    %384 = arith.truncf %383 : vector<72x64xf32> to vector<72x64xbf16>
    %c3_236 = arith.constant 3 : index
    %c0_237 = arith.constant 0 : index
    %c0_238 = arith.constant 0 : index
    %385 = vector.load %arg13[%c3_236, %c0_237, %c0_238] : memref<9x64x32xbf16, #tpu.memory_space<vmem>>, vector<1x64x32xbf16>
    %386 = vector.shape_cast %385 : vector<1x64x32xbf16> to vector<64x32xbf16>
    %cst_239 = arith.constant dense<0.000000e+00> : vector<72x32xf32>
    %387 = tpu.matmul %384, %386, %cst_239 {dimension_numbers = #tpu.dot_dimension_numbers<[1], [0], [0], [1], [0, 0, 1, 1], [], []>} : vector<72x64xbf16>, vector<64x32xbf16>, vector<72x32xf32> -> vector<72x32xf32>
    %388 = arith.addf %382, %387 : vector<72x32xf32>
    %389 = arith.truncf %365 : vector<72x64xf32> to vector<72x64xbf16>
    %c4_240 = arith.constant 4 : index
    %c0_241 = arith.constant 0 : index
    %c0_242 = arith.constant 0 : index
    %390 = vector.load %arg13[%c4_240, %c0_241, %c0_242] : memref<9x64x32xbf16, #tpu.memory_space<vmem>>, vector<1x64x32xbf16>
    %391 = vector.shape_cast %390 : vector<1x64x32xbf16> to vector<64x32xbf16>
    %cst_243 = arith.constant dense<0.000000e+00> : vector<72x32xf32>
    %392 = tpu.matmul %389, %391, %cst_243 {dimension_numbers = #tpu.dot_dimension_numbers<[1], [0], [0], [1], [0, 0, 1, 1], [], []>} : vector<72x64xbf16>, vector<64x32xbf16>, vector<72x32xf32> -> vector<72x32xf32>
    %393 = arith.addf %388, %392 : vector<72x32xf32>
    %c71_i32_244 = arith.constant 71 : i32
    %394 = tpu.dynamic_rotate %365 by %c71_i32_244 dim 0 : vector<72x64xf32>, i32 -> vector<72x64xf32>
    %395 = arith.truncf %394 : vector<72x64xf32> to vector<72x64xbf16>
    %c5_245 = arith.constant 5 : index
    %c0_246 = arith.constant 0 : index
    %c0_247 = arith.constant 0 : index
    %396 = vector.load %arg13[%c5_245, %c0_246, %c0_247] : memref<9x64x32xbf16, #tpu.memory_space<vmem>>, vector<1x64x32xbf16>
    %397 = vector.shape_cast %396 : vector<1x64x32xbf16> to vector<64x32xbf16>
    %cst_248 = arith.constant dense<0.000000e+00> : vector<72x32xf32>
    %398 = tpu.matmul %395, %397, %cst_248 {dimension_numbers = #tpu.dot_dimension_numbers<[1], [0], [0], [1], [0, 0, 1, 1], [], []>} : vector<72x64xbf16>, vector<64x32xbf16>, vector<72x32xf32> -> vector<72x32xf32>
    %399 = arith.addf %393, %398 : vector<72x32xf32>
    %c67_i32_249 = arith.constant 67 : i32
    %400 = tpu.dynamic_rotate %365 by %c67_i32_249 dim 0 : vector<72x64xf32>, i32 -> vector<72x64xf32>
    %401 = arith.truncf %400 : vector<72x64xf32> to vector<72x64xbf16>
    %c6_250 = arith.constant 6 : index
    %c0_251 = arith.constant 0 : index
    %c0_252 = arith.constant 0 : index
    %402 = vector.load %arg13[%c6_250, %c0_251, %c0_252] : memref<9x64x32xbf16, #tpu.memory_space<vmem>>, vector<1x64x32xbf16>
    %403 = vector.shape_cast %402 : vector<1x64x32xbf16> to vector<64x32xbf16>
    %cst_253 = arith.constant dense<0.000000e+00> : vector<72x32xf32>
    %404 = tpu.matmul %401, %403, %cst_253 {dimension_numbers = #tpu.dot_dimension_numbers<[1], [0], [0], [1], [0, 0, 1, 1], [], []>} : vector<72x64xbf16>, vector<64x32xbf16>, vector<72x32xf32> -> vector<72x32xf32>
    %405 = arith.addf %399, %404 : vector<72x32xf32>
    %c66_i32_254 = arith.constant 66 : i32
    %406 = tpu.dynamic_rotate %365 by %c66_i32_254 dim 0 : vector<72x64xf32>, i32 -> vector<72x64xf32>
    %407 = arith.truncf %406 : vector<72x64xf32> to vector<72x64xbf16>
    %c7_255 = arith.constant 7 : index
    %c0_256 = arith.constant 0 : index
    %c0_257 = arith.constant 0 : index
    %408 = vector.load %arg13[%c7_255, %c0_256, %c0_257] : memref<9x64x32xbf16, #tpu.memory_space<vmem>>, vector<1x64x32xbf16>
    %409 = vector.shape_cast %408 : vector<1x64x32xbf16> to vector<64x32xbf16>
    %cst_258 = arith.constant dense<0.000000e+00> : vector<72x32xf32>
    %410 = tpu.matmul %407, %409, %cst_258 {dimension_numbers = #tpu.dot_dimension_numbers<[1], [0], [0], [1], [0, 0, 1, 1], [], []>} : vector<72x64xbf16>, vector<64x32xbf16>, vector<72x32xf32> -> vector<72x32xf32>
    %411 = arith.addf %405, %410 : vector<72x32xf32>
    %c65_i32_259 = arith.constant 65 : i32
    %412 = tpu.dynamic_rotate %365 by %c65_i32_259 dim 0 : vector<72x64xf32>, i32 -> vector<72x64xf32>
    %413 = arith.truncf %412 : vector<72x64xf32> to vector<72x64xbf16>
    %c8_260 = arith.constant 8 : index
    %c0_261 = arith.constant 0 : index
    %c0_262 = arith.constant 0 : index
    %414 = vector.load %arg13[%c8_260, %c0_261, %c0_262] : memref<9x64x32xbf16, #tpu.memory_space<vmem>>, vector<1x64x32xbf16>
    %415 = vector.shape_cast %414 : vector<1x64x32xbf16> to vector<64x32xbf16>
    %cst_263 = arith.constant dense<0.000000e+00> : vector<72x32xf32>
    %416 = tpu.matmul %413, %415, %cst_263 {dimension_numbers = #tpu.dot_dimension_numbers<[1], [0], [0], [1], [0, 0, 1, 1], [], []>} : vector<72x64xbf16>, vector<64x32xbf16>, vector<72x32xf32> -> vector<72x32xf32>
    %417 = arith.addf %411, %416 : vector<72x32xf32>
    %c0_264 = arith.constant 0 : index
    %c0_265 = arith.constant 0 : index
    %418 = vector.load %arg14[%c0_264, %c0_265] : memref<1x32xf32, #tpu.memory_space<vmem>>, vector<1x32xf32>
    %419 = vector.broadcast %418 : vector<1x32xf32> to vector<72x32xf32>
    %420 = arith.addf %417, %419 : vector<72x32xf32>
    %421 = vector.extract_strided_slice %322 {offsets = [0, 192], sizes = [72, 32], strides = [1, 1]} : vector<72x224xf32> to vector<72x32xf32>
    %422 = arith.addf %421, %420 : vector<72x32xf32>
    %423 = arith.negf %422 : vector<72x32xf32>
    %424 = math.exp %423 : vector<72x32xf32>
    %cst_266 = arith.constant 1.000000e+00 : f32
    %425 = vector.broadcast %cst_266 : f32 to vector<72x32xf32>
    %426 = arith.addf %425, %424 : vector<72x32xf32>
    %427 = arith.divf %425, %426 : vector<72x32xf32>
    %428 = arith.truncf %365 : vector<72x64xf32> to vector<72x64xbf16>
    %c0_267 = arith.constant 0 : index
    %c0_268 = arith.constant 0 : index
    %429 = vector.load %arg15[%c0_267, %c0_268] : memref<64x32xbf16, #tpu.memory_space<vmem>>, vector<64x32xbf16>
    %cst_269 = arith.constant dense<0.000000e+00> : vector<72x32xf32>
    %430 = tpu.matmul %428, %429, %cst_269 {dimension_numbers = #tpu.dot_dimension_numbers<[1], [0], [0], [1], [0, 0, 1, 1], [], []>} : vector<72x64xbf16>, vector<64x32xbf16>, vector<72x32xf32> -> vector<72x32xf32>
    %c0_270 = arith.constant 0 : index
    %c0_271 = arith.constant 0 : index
    %431 = vector.load %arg16[%c0_270, %c0_271] : memref<1x32xf32, #tpu.memory_space<vmem>>, vector<1x32xf32>
    %432 = vector.broadcast %431 : vector<1x32xf32> to vector<72x32xf32>
    %433 = arith.addf %430, %432 : vector<72x32xf32>
    %434 = math.tanh %433 : vector<72x32xf32>
    %435 = arith.mulf %427, %434 : vector<72x32xf32>
    %436 = vector.broadcast %3 : vector<72x1xf32> to vector<72x32xf32>
    %437 = arith.mulf %435, %436 : vector<72x32xf32>
    %c0_272 = arith.constant 0 : index
    %c0_273 = arith.constant 0 : index
    %438 = vector.load %arg25[%c0_272, %c0_273] : memref<72x32xf32, #tpu.memory_space<vmem>>, vector<72x32xf32>
    tpu.vector_store %arg25[%c0_272, %c0_273], %437 {strides = array<i32>} : memref<72x32xf32, #tpu.memory_space<vmem>>, vector<72x32xf32>,
    %c0_274 = arith.constant 0 : index
    %c0_275 = arith.constant 0 : index
    %439 = vector.load %arg26[%c0_274, %c0_275] : memref<72x32xf32, #tpu.memory_space<vmem>>, vector<72x32xf32>
    tpu.vector_store %arg26[%c0_274, %c0_275], %343 {strides = array<i32>} : memref<72x32xf32, #tpu.memory_space<vmem>>, vector<72x32xf32>,
    %c0_276 = arith.constant 0 : index
    %c0_277 = arith.constant 0 : index
    %440 = vector.load %arg27[%c0_276, %c0_277] : memref<72x32xf32, #tpu.memory_space<vmem>>, vector<72x32xf32>
    tpu.vector_store %arg27[%c0_276, %c0_277], %364 {strides = array<i32>} : memref<72x32xf32, #tpu.memory_space<vmem>>, vector<72x32xf32>,
    %441 = arith.truncf %437 : vector<72x32xf32> to vector<72x32xbf16>
    %c0_278 = arith.constant 0 : index
    %c0_279 = arith.constant 0 : index
    %442 = vector.load %arg19[%c0_278, %c0_279] : memref<32x4xbf16, #tpu.memory_space<vmem>>, vector<32x4xbf16>
    %cst_280 = arith.constant dense<0.000000e+00> : vector<72x4xf32>
    %443 = tpu.matmul %441, %442, %cst_280 {dimension_numbers = #tpu.dot_dimension_numbers<[1], [0], [0], [1], [0, 0, 1, 1], [], []>} : vector<72x32xbf16>, vector<32x4xbf16>, vector<72x4xf32> -> vector<72x4xf32>
    %c0_281 = arith.constant 0 : index
    %c0_282 = arith.constant 0 : index
    %444 = vector.load %arg29[%c0_281, %c0_282] : memref<72x4xf32, #tpu.memory_space<vmem>>, vector<72x4xf32>
    tpu.vector_store %arg29[%c0_281, %c0_282], %443 {strides = array<i32>} : memref<72x4xf32, #tpu.memory_space<vmem>>, vector<72x4xf32>,
    %c0_283 = arith.constant 0 : index
    %c0_284 = arith.constant 0 : index
    %c0_285 = arith.constant 0 : index
    %445 = vector.load %arg20[%c0_283, %c0_284, %c0_285] : memref<1x72x4xf32, #tpu.memory_space<vmem>>, vector<1x72x4xf32>
    %446 = vector.shape_cast %445 : vector<1x72x4xf32> to vector<72x4xf32>
    %447 = vector.shape_cast %443 : vector<72x4xf32> to vector<1x72x4xf32>
    tpu.vector_store %arg20[%c0_283, %c0_284, %c0_285], %447 {strides = array<i32>} : memref<1x72x4xf32, #tpu.memory_space<vmem>>, vector<1x72x4xf32>,
    %c0_286 = arith.constant 0 : index
    %c0_287 = arith.constant 0 : index
    %c0_288 = arith.constant 0 : index
    %448 = vector.load %arg3[%c0_286, %c0_287, %c0_288] : memref<1x72x4xf32, #tpu.memory_space<vmem>>, vector<1x72x4xf32>
    %449 = vector.shape_cast %448 : vector<1x72x4xf32> to vector<72x4xf32>
    %450 = arith.subf %443, %449 : vector<72x4xf32>
    %c0_289 = arith.constant 0 : index
    %c0_290 = arith.constant 0 : index
    %451 = vector.load %arg21[%c0_289, %c0_290] : memref<1x1xf32, #tpu.memory_space<vmem>>, vector<1x1xf32>
    %452 = arith.mulf %450, %450 : vector<72x4xf32>
    %453 = vector.shape_cast %452 : vector<72x4xf32> to vector<1x72x4xf32>
    %cst_291 = arith.constant dense<0.000000e+00> : vector<1xf32>
    %454 = vector.multi_reduction <add>, %453, %cst_291 [1, 2] : vector<1x72x4xf32> to vector<1xf32>
    %455 = vector.shape_cast %454 : vector<1xf32> to vector<1x1x1xf32>
    %456 = vector.extract %455[0, 0, 0] : f32 from vector<1x1x1xf32>
    %457 = vector.broadcast %456 : f32 to vector<1x1xf32>
    %458 = arith.addf %451, %457 : vector<1x1xf32>
    %c0_292 = arith.constant 0 : index
    %c0_293 = arith.constant 0 : index
    %459 = vector.load %arg21[%c0_292, %c0_293] : memref<1x1xf32, #tpu.memory_space<vmem>>, vector<1x1xf32>
    tpu.vector_store %arg21[%c0_292, %c0_293], %458 {strides = array<i32>} : memref<1x1xf32, #tpu.memory_space<vmem>>, vector<1x1xf32>,
    return
  }
  func.func @transform_0(%arg0: i32) -> (i32, i32, i32) {
    %c0_i32 = arith.constant 0 : i32
    %c0_i32_0 = arith.constant 0 : i32
    %c0_i32_1 = arith.constant 0 : i32
    return %arg0, %c0_i32, %c0_i32_0 : i32, i32, i32
  }
  func.func @transform_1(%arg0: i32) -> (i32, i32, i32) {
    %c0_i32 = arith.constant 0 : i32
    %c0_i32_0 = arith.constant 0 : i32
    %c0_i32_1 = arith.constant 0 : i32
    return %arg0, %c0_i32, %c0_i32_0 : i32, i32, i32
  }
  func.func @transform_2(%arg0: i32) -> (i32, i32, i32) {
    %c0_i32 = arith.constant 0 : i32
    %c0_i32_0 = arith.constant 0 : i32
    %c0_i32_1 = arith.constant 0 : i32
    return %arg0, %c0_i32, %c0_i32_0 : i32, i32, i32
  }
  func.func @transform_3(%arg0: i32) -> (i32, i32) {
    %c0_i32 = arith.constant 0 : i32
    %c0_i32_0 = arith.constant 0 : i32
    %c0_i32_1 = arith.constant 0 : i32
    return %c0_i32, %c0_i32_0 : i32, i32
  }
  func.func @transform_4(%arg0: i32) -> (i32, i32, i32) {
    %c0_i32 = arith.constant 0 : i32
    %c0_i32_0 = arith.constant 0 : i32
    %c0_i32_1 = arith.constant 0 : i32
    %c0_i32_2 = arith.constant 0 : i32
    return %c0_i32, %c0_i32_0, %c0_i32_1 : i32, i32, i32
  }
  func.func @transform_5(%arg0: i32) -> (i32, i32) {
    %c0_i32 = arith.constant 0 : i32
    %c0_i32_0 = arith.constant 0 : i32
    %c0_i32_1 = arith.constant 0 : i32
    return %c0_i32, %c0_i32_0 : i32, i32
  }
  func.func @transform_6(%arg0: i32) -> (i32, i32, i32) {
    %c0_i32 = arith.constant 0 : i32
    %c0_i32_0 = arith.constant 0 : i32
    %c0_i32_1 = arith.constant 0 : i32
    %c0_i32_2 = arith.constant 0 : i32
    return %c0_i32, %c0_i32_0, %c0_i32_1 : i32, i32, i32
  }
  func.func @transform_7(%arg0: i32) -> (i32, i32) {
    %c0_i32 = arith.constant 0 : i32
    %c0_i32_0 = arith.constant 0 : i32
    %c0_i32_1 = arith.constant 0 : i32
    return %c0_i32, %c0_i32_0 : i32, i32
  }
  func.func @transform_8(%arg0: i32) -> (i32, i32) {
    %c0_i32 = arith.constant 0 : i32
    %c0_i32_0 = arith.constant 0 : i32
    %c0_i32_1 = arith.constant 0 : i32
    return %c0_i32, %c0_i32_0 : i32, i32
  }
  func.func @transform_9(%arg0: i32) -> (i32, i32) {
    %c0_i32 = arith.constant 0 : i32
    %c0_i32_0 = arith.constant 0 : i32
    %c0_i32_1 = arith.constant 0 : i32
    return %c0_i32, %c0_i32_0 : i32, i32
  }
  func.func @transform_10(%arg0: i32) -> (i32, i32, i32) {
    %c0_i32 = arith.constant 0 : i32
    %c0_i32_0 = arith.constant 0 : i32
    %c0_i32_1 = arith.constant 0 : i32
    %c0_i32_2 = arith.constant 0 : i32
    return %c0_i32, %c0_i32_0, %c0_i32_1 : i32, i32, i32
  }
  func.func @transform_11(%arg0: i32) -> (i32, i32) {
    %c0_i32 = arith.constant 0 : i32
    %c0_i32_0 = arith.constant 0 : i32
    %c0_i32_1 = arith.constant 0 : i32
    return %c0_i32, %c0_i32_0 : i32, i32
  }
  func.func @transform_12(%arg0: i32) -> (i32, i32, i32) {
    %c0_i32 = arith.constant 0 : i32
    %c0_i32_0 = arith.constant 0 : i32
    %c0_i32_1 = arith.constant 0 : i32
    %c0_i32_2 = arith.constant 0 : i32
    return %c0_i32, %c0_i32_0, %c0_i32_1 : i32, i32, i32
  }
  func.func @transform_13(%arg0: i32) -> (i32, i32) {
    %c0_i32 = arith.constant 0 : i32
    %c0_i32_0 = arith.constant 0 : i32
    %c0_i32_1 = arith.constant 0 : i32
    return %c0_i32, %c0_i32_0 : i32, i32
  }
  func.func @transform_14(%arg0: i32) -> (i32, i32) {
    %c0_i32 = arith.constant 0 : i32
    %c0_i32_0 = arith.constant 0 : i32
    %c0_i32_1 = arith.constant 0 : i32
    return %c0_i32, %c0_i32_0 : i32, i32
  }
  func.func @transform_15(%arg0: i32) -> (i32, i32) {
    %c0_i32 = arith.constant 0 : i32
    %c0_i32_0 = arith.constant 0 : i32
    %c0_i32_1 = arith.constant 0 : i32
    return %c0_i32, %c0_i32_0 : i32, i32
  }
  func.func @transform_16(%arg0: i32) -> (i32, i32, i32) {
    %c0_i32 = arith.constant 0 : i32
    %c0_i32_0 = arith.constant 0 : i32
    %c0_i32_1 = arith.constant 0 : i32
    %c0_i32_2 = arith.constant 0 : i32
    return %c0_i32, %c0_i32_0, %c0_i32_1 : i32, i32, i32
  }
  func.func @transform_17(%arg0: i32) -> (i32, i32) {
    %c0_i32 = arith.constant 0 : i32
    %c0_i32_0 = arith.constant 0 : i32
    %c0_i32_1 = arith.constant 0 : i32
    return %c0_i32, %c0_i32_0 : i32, i32
  }
  func.func @transform_18(%arg0: i32) -> (i32, i32) {
    %c0_i32 = arith.constant 0 : i32
    %c0_i32_0 = arith.constant 0 : i32
    %c0_i32_1 = arith.constant 0 : i32
    return %c0_i32, %c0_i32_0 : i32, i32
  }
  func.func @transform_19(%arg0: i32) -> (i32, i32, i32) {
    %c0_i32 = arith.constant 0 : i32
    %c0_i32_0 = arith.constant 0 : i32
    %c0_i32_1 = arith.constant 0 : i32
    return %arg0, %c0_i32, %c0_i32_0 : i32, i32, i32
  }
  func.func @transform_20(%arg0: i32) -> (i32, i32) {
    %c0_i32 = arith.constant 0 : i32
    %c0_i32_0 = arith.constant 0 : i32
    %c0_i32_1 = arith.constant 0 : i32
    return %c0_i32, %c0_i32_0 : i32, i32
  }
}

</mosaic_0001>

<bundles_post_ra>
// kernel: tile.6
= control target key start
LH: loop header
LB: loop body
LE: loop exit
PB: predicated region body
PF: predicated region fallthrough
CT: control target
= control target key end

     0   :  { %s22_s0 = inlined_call_operand.vmem [shape: f32[36], index: 0, kind: input, shape index: {}]   ;;  %s23_s1 = inlined_call_operand.vmem [shape: f32[2,1,1,36], index: 1, kind: output, shape index: {}]  }
   0x1   :  { %v4_v0 = vld [vmem:[%s22_s0] ss:$0 sm:$0xff] }
   0x2   :  { %5 = vst [vmem:[%s23_s1] sm:$0x3] %v4_v0 }

// kernel: tile.0
= control target key start
LH: loop header
LB: loop body
LE: loop exit
PB: predicated region body
PF: predicated region fallthrough
CT: control target
= control target key end

     0   :  { %s299_s8 = smov 125   ;;  %s300_s9 = smov 126   ;;  %vm8_vm0 = vcmask 7168   ;;  %s490_s0 = inlined_call_operand.vmem [shape: f32[2,1,1,36], index: 0, kind: input, shape index: {}]   ;;  %s491_s1 = inlined_call_operand.vmem [shape: f32[72,1], index: 1, kind: output, shape index: {}]  }
   0x1   :  { %v5_v0 = vld [vmem:[%s490_s0] sm:$0x3]  ;;  %s298_s0 = smov 127   ;;  %s301_s10 = smov 124  }
   0x2   :  { %6 = vst [vmem:[#allocation0] sm:$0x3] %v5_v0  ;;  %s302_s11 = smov 123   ;;  %s303_s12 = smov 122  }
   0x3   :  { %s304_s13 = smov 121   ;;  %s305_s14 = smov 120  }
   0x4   :  { %s306_s15 = smov 119   ;;  %s307_s16 = smov 118  }
   0x5   :  { %s308_s17 = smov 117   ;;  %s309_s18 = smov 116  }
   0x6   :  { %s310_s19 = smov 115   ;;  %s311_s20 = smov 114  }
   0x7   :  { %s312_s21 = smov 113   ;;  %s313_s22 = smov 112  }
   0x8   :  { %s314_s23 = smov 111   ;;  %s315_s24 = smov 110  }
   0x9   :  { %v10_v1 = vld [vmem:[#allocation0] sm:$0x3]   ;;  %s316_s25 = smov 109   ;;  %s317_s26 = smov 108  }
   0xa   :  { %v22_v2 = vld [vmem:[#allocation0] sm:$0x3]   ;;  %11 = vrot.lane.b32.xlu0 %v10_v1, %s298_s0  ;;  %s318_s27 = smov 107   ;;  %s319_s28 = smov 106  }
   0xb   :  { %23 = vrot.lane.b32.xlu1 %v22_v2, %s299_s8  ;;  %v16_v3 = vld [vmem:[#allocation0] sm:$0x3]   ;;  %s320_s29 = smov 105   ;;  %s321_s30 = smov 104  }
   0xc   :  { %v28_v4 = vld [vmem:[#allocation0] sm:$0x3]   ;;  %s173_s2 = smov 3  ;;  %s322_s3 = smov 103  }
   0xd   :  { %v34_v5 = vld [vmem:[#allocation0] sm:$0x3]   ;;  %s323_s4 = smov 102   ;;  %s181_s5 = smov 3 }
   0xe   :  { %17 = vrot.lane.b32.xlu0 %v16_v3, %s300_s9  ;;  %v40_v6 = vld [vmem:[#allocation0] sm:$0x3]   ;;  %s189_s6 = smov 3  ;;  %s324_s7 = smov 101  }
   0xf   :  { %29 = vrot.lane.b32.xlu1 %v28_v4, %s301_s10  ;;  %v46_v7 = vld [vmem:[#allocation0] sm:$0x3]   ;;  %s325_s0 = smov 100   ;;  %s197_s8 = smov 3 }
  0x10   :  { %v52_v8 = vld [vmem:[#allocation0] sm:$0x3]  }
  0x11   :  { %v58_v9 = vld [vmem:[#allocation0] sm:$0x3]  }
  0x12   :  { %35 = vrot.lane.b32.xlu0 %v34_v5, %s302_s11  ;;  %v64_v10 = vld [vmem:[#allocation0] sm:$0x3]   ;;  %s326_s11 = smov 99  }
  0x13   :  { %41 = vrot.lane.b32.xlu1 %v40_v6, %s303_s12  ;;  %v70_v11 = vld [vmem:[#allocation0] sm:$0x3]   ;;  %s327_s12 = smov 98  }
  0x14   :  { %v76_v12 = vld [vmem:[#allocation0] sm:$0x3]  }
  0x15   :  { %v82_v13 = vld [vmem:[#allocation0] sm:$0x3]  }
  0x16   :  { %47 = vrot.lane.b32.xlu0 %v46_v7, %s304_s13  ;;  %v88_v14 = vld [vmem:[#allocation0] sm:$0x3]   ;;  %s328_s13 = smov 97  }
  0x17   :  { %53 = vrot.lane.b32.xlu1 %v52_v8, %s305_s14  ;;  %v94_v15 = vld [vmem:[#allocation0] sm:$0x3]   ;;  %s329_s14 = smov 96  }
  0x18   :  { %v100_v16 = vld [vmem:[#allocation0] sm:$0x3]  }
  0x19   :  { %v106_v17 = vld [vmem:[#allocation0] sm:$0x3]  }
  0x1a   :  { %59 = vrot.lane.b32.xlu0 %v58_v9, %s306_s15  ;;  %v112_v18 = vld [vmem:[#allocation0] sm:$0x3]   ;;  %s330_s15 = smov 95  }
  0x1b   :  { %65 = vrot.lane.b32.xlu1 %v64_v10, %s307_s16  ;;  %v118_v19 = vld [vmem:[#allocation0] sm:$0x3]   ;;  %s331_s16 = smov 94  }
  0x1c   :  { %v124_v20 = vld [vmem:[#allocation0] sm:$0x3]  }
  0x1d   :  { %v130_v21 = vld [vmem:[#allocation0] sm:$0x3]  }
  0x1e   :  { %71 = vrot.lane.b32.xlu0 %v70_v11, %s308_s17  ;;  %v136_v22 = vld [vmem:[#allocation0] sm:$0x3]   ;;  %s332_s17 = smov 93  }
  0x1f   :  { %77 = vrot.lane.b32.xlu1 %v76_v12, %s309_s18  ;;  %v142_v23 = vld [vmem:[#allocation0] sm:$0x3]  }
  0x20   :  { %v148_v24 = vld [vmem:[#allocation0] sm:$0x3]  }
  0x21   :  { %v154_v25 = vld [vmem:[#allocation0] sm:$0x3]  }
  0x22   :  { %83 = vrot.lane.b32.xlu0 %v82_v13, %s310_s19  ;;  %v160_v26 = vld [vmem:[#allocation0] sm:$0x3]  }
  0x23   :  { %89 = vrot.lane.b32.xlu1 %v88_v14, %s311_s20  ;;  %v166_v27 = vld [vmem:[#allocation0] sm:$0x3]  }
  0x24   :  { %v174_v28 = vld [vmem:[#allocation0 + $0x1] ss:$-1 sm:%s173_s2]  }
  0x25   :  { %v182_v29 = vld [vmem:[#allocation0 + $0x1] ss:$-1 sm:%s181_s5]  }
  0x26   :  { %95 = vrot.lane.b32.xlu0 %v94_v15, %s312_s21  ;;  %v190_v30 = vld [vmem:[#allocation0 + $0x1] ss:$-1 sm:%s189_s6]  }
  0x27   :  { %101 = vrot.lane.b32.xlu1 %v100_v16, %s313_s22  ;;  %v7_v31 = vld [vmem:[#allocation0] sm:$0x3]  }
  0x28   :  { %9 = vst.msk [vmem:[%s491_s1] ss:$36 sm:$0x3] %vm8_vm0, %v7_v31   ;;  %v198_v32 = vld [vmem:[#allocation0 + $0x1] ss:$-1 sm:%s197_s8]  }
  0x29   :  { %v204_v33 = vld [vmem:[#allocation0] sm:$0x3]  }
  0x2a   :  { %107 = vrot.lane.b32.xlu0 %v106_v17, %s314_s23  ;;  %v210_v34 = vld [vmem:[#allocation0] sm:$0x3]  }
  0x2b   :  { %113 = vrot.lane.b32.xlu1 %v112_v18, %s315_s24  ;;  %v216_v35 = vld [vmem:[#allocation0] sm:$0x3]  }
  0x2c   :  { %v222_v36 = vld [vmem:[#allocation0] sm:$0x3]  }
  0x2e   :  { %119 = vrot.lane.b32.xlu0 %v118_v19, %s316_s25 }
  0x2f   :  { %125 = vrot.lane.b32.xlu1 %v124_v20, %s317_s26 }
  0x32   :  { %131 = vrot.lane.b32.xlu0 %v130_v21, %s318_s27 }
  0x33   :  { %137 = vrot.lane.b32.xlu1 %v136_v22, %s319_s28 }
  0x36   :  { %143 = vrot.lane.b32.xlu0 %v142_v23, %s320_s29 }
  0x37   :  { %149 = vrot.lane.b32.xlu1 %v148_v24, %s321_s30 }
  0x3a   :  { %155 = vrot.lane.b32.xlu0 %v154_v25, %s322_s3 }
  0x3b   :  { %161 = vrot.lane.b32.xlu1 %v160_v26, %s323_s4 }
  0x3e   :  { %167 = vrot.lane.b32.xlu0 %v166_v27, %s324_s7 }
  0x3f   :  { %175 = vrot.lane.b32.xlu1 %v174_v28, %s325_s0 }
  0x42   :  { %183 = vrot.lane.b32.xlu0 %v182_v29, %s326_s11 }
  0x43   :  { %191 = vrot.lane.b32.xlu1 %v190_v30, %s327_s12 }
  0x46   :  { %199 = vrot.lane.b32.xlu0 %v198_v32, %s328_s13 }
  0x47   :  { %205 = vrot.lane.b32.xlu1 %v204_v33, %s329_s14 }
  0x4a   :  { %211 = vrot.lane.b32.xlu0 %v210_v34, %s330_s15 }
  0x4b   :  { %217 = vrot.lane.b32.xlu1 %v216_v35, %s331_s16 }
  0x4e   :  { %223 = vrot.lane.b32.xlu0 %v222_v36, %s332_s17 }
  0x7c   :  { %v12_v37 = vpop.permute.xlu0 %11  }
  0x7d   :  { %v24_v38 = vpop.permute.xlu1 %23   ;;  %228 = vst.msk [vmem:[%s491_s1 + $0x1] ss:$36 sm:$0x3] %vm8_vm0, %v12_v37  }
  0x7e   :  { %230 = vst.msk [vmem:[%s491_s1 + $0x3] ss:$36 sm:$0x3] %vm8_vm0, %v24_v38  }
  0x80   :  { %v18_v39 = vpop.permute.xlu0 %17  }
  0x81   :  { %v30_v40 = vpop.permute.xlu1 %29   ;;  %229 = vst.msk [vmem:[%s491_s1 + $0x2] ss:$36 sm:$0x3] %vm8_vm0, %v18_v39  }
  0x82   :  { %231 = vst.msk [vmem:[%s491_s1 + $0x4] ss:$36 sm:$0x3] %vm8_vm0, %v30_v40  }
  0x84   :  { %v36_v41 = vpop.permute.xlu0 %35  }
  0x85   :  { %v42_v42 = vpop.permute.xlu1 %41   ;;  %232 = vst.msk [vmem:[%s491_s1 + $0x5] ss:$36 sm:$0x3] %vm8_vm0, %v36_v41  }
  0x86   :  { %233 = vst.msk [vmem:[%s491_s1 + $0x6] ss:$36 sm:$0x3] %vm8_vm0, %v42_v42  }
  0x88   :  { %v48_v43 = vpop.permute.xlu0 %47  }
  0x89   :  { %v54_v44 = vpop.permute.xlu1 %53   ;;  %234 = vst.msk [vmem:[%s491_s1 + $0x7] ss:$36 sm:$0x3] %vm8_vm0, %v48_v43  }
  0x8a   :  { %235 = vst.msk [vmem:[%s491_s1 + $0x8] ss:$36 sm:$0x3] %vm8_vm0, %v54_v44  }
  0x8c   :  { %v60_v45 = vpop.permute.xlu0 %59  }
  0x8d   :  { %v66_v46 = vpop.permute.xlu1 %65   ;;  %236 = vst.msk [vmem:[%s491_s1 + $0x9] ss:$36 sm:$0x3] %vm8_vm0, %v60_v45  }
  0x8e   :  { %237 = vst.msk [vmem:[%s491_s1 + $0xa] ss:$36 sm:$0x3] %vm8_vm0, %v66_v46  }
  0x90   :  { %v72_v47 = vpop.permute.xlu0 %71  }
  0x91   :  { %v78_v48 = vpop.permute.xlu1 %77   ;;  %238 = vst.msk [vmem:[%s491_s1 + $0xb] ss:$36 sm:$0x3] %vm8_vm0, %v72_v47  }
  0x92   :  { %239 = vst.msk [vmem:[%s491_s1 + $0xc] ss:$36 sm:$0x3] %vm8_vm0, %v78_v48  }
  0x94   :  { %v84_v49 = vpop.permute.xlu0 %83  }
  0x95   :  { %v90_v50 = vpop.permute.xlu1 %89   ;;  %240 = vst.msk [vmem:[%s491_s1 + $0xd] ss:$36 sm:$0x3] %vm8_vm0, %v84_v49  }
  0x96   :  { %241 = vst.msk [vmem:[%s491_s1 + $0xe] ss:$36 sm:$0x3] %vm8_vm0, %v90_v50  }
  0x98   :  { %v96_v51 = vpop.permute.xlu0 %95  }
  0x99   :  { %v102_v52 = vpop.permute.xlu1 %101   ;;  %242 = vst.msk [vmem:[%s491_s1 + $0xf] ss:$36 sm:$0x3] %vm8_vm0, %v96_v51  }
  0x9a   :  { %243 = vst.msk [vmem:[%s491_s1 + $0x10] ss:$36 sm:$0x3] %vm8_vm0, %v102_v52  }
  0x9c   :  { %v108_v53 = vpop.permute.xlu0 %107  }
  0x9d   :  { %v114_v54 = vpop.permute.xlu1 %113   ;;  %244 = vst.msk [vmem:[%s491_s1 + $0x11] ss:$36 sm:$0x3] %vm8_vm0, %v108_v53  }
  0x9e   :  { %245 = vst.msk [vmem:[%s491_s1 + $0x12] ss:$36 sm:$0x3] %vm8_vm0, %v114_v54  }
  0xa0   :  { %v120_v55 = vpop.permute.xlu0 %119  }
  0xa1   :  { %v126_v56 = vpop.permute.xlu1 %125   ;;  %246 = vst.msk [vmem:[%s491_s1 + $0x13] ss:$36 sm:$0x3] %vm8_vm0, %v120_v55  }
  0xa2   :  { %247 = vst.msk [vmem:[%s491_s1 + $0x14] ss:$36 sm:$0x3] %vm8_vm0, %v126_v56  }
  0xa4   :  { %v132_v57 = vpop.permute.xlu0 %131  }
  0xa5   :  { %v138_v58 = vpop.permute.xlu1 %137   ;;  %248 = vst.msk [vmem:[%s491_s1 + $0x15] ss:$36 sm:$0x3] %vm8_vm0, %v132_v57  }
  0xa6   :  { %249 = vst.msk [vmem:[%s491_s1 + $0x16] ss:$36 sm:$0x3] %vm8_vm0, %v138_v58  }
  0xa8   :  { %v144_v59 = vpop.permute.xlu0 %143  }
  0xa9   :  { %v150_v60 = vpop.permute.xlu1 %149   ;;  %250 = vst.msk [vmem:[%s491_s1 + $0x17] ss:$36 sm:$0x3] %vm8_vm0, %v144_v59  }
  0xaa   :  { %251 = vst.msk [vmem:[%s491_s1 + $0x18] ss:$36 sm:$0x3] %vm8_vm0, %v150_v60  }
  0xac   :  { %v156_v61 = vpop.permute.xlu0 %155  }
  0xad   :  { %v162_v62 = vpop.permute.xlu1 %161   ;;  %252 = vst.msk [vmem:[%s491_s1 + $0x19] ss:$36 sm:$0x3] %vm8_vm0, %v156_v61  }
  0xae   :  { %253 = vst.msk [vmem:[%s491_s1 + $0x1a] ss:$36 sm:$0x3] %vm8_vm0, %v162_v62  }
  0xb0   :  { %v168_v63 = vpop.permute.xlu0 %167  }
  0xb1   :  { %v176_v0 = vpop.permute.xlu1 %175   ;;  %254 = vst.msk [vmem:[%s491_s1 + $0x1b] ss:$36 sm:$0x3] %vm8_vm0, %v168_v63  }
  0xb2   :  { %255 = vst.msk [vmem:[%s491_s1 + $0x40] ss:$-36 sm:$0x3] %vm8_vm0, %v176_v0  }
  0xb4   :  { %v184_v1 = vpop.permute.xlu0 %183  }
  0xb5   :  { %v192_v2 = vpop.permute.xlu1 %191   ;;  %256 = vst.msk [vmem:[%s491_s1 + $0x41] ss:$-36 sm:$0x3] %vm8_vm0, %v184_v1  }
  0xb6   :  { %257 = vst.msk [vmem:[%s491_s1 + $0x42] ss:$-36 sm:$0x3] %vm8_vm0, %v192_v2  }
  0xb8   :  { %v200_v3 = vpop.permute.xlu0 %199  }
  0xb9   :  { %v206_v4 = vpop.permute.xlu1 %205   ;;  %258 = vst.msk [vmem:[%s491_s1 + $0x43] ss:$-36 sm:$0x3] %vm8_vm0, %v200_v3  }
  0xba   :  { %259 = vst.msk [vmem:[%s491_s1 + $0x20] ss:$36 sm:$0x3] %vm8_vm0, %v206_v4  }
  0xbc   :  { %v212_v5 = vpop.permute.xlu0 %211  }
  0xbd   :  { %v218_v6 = vpop.permute.xlu1 %217   ;;  %260 = vst.msk [vmem:[%s491_s1 + $0x21] ss:$36 sm:$0x3] %vm8_vm0, %v212_v5  }
  0xbe   :  { %261 = vst.msk [vmem:[%s491_s1 + $0x22] ss:$36 sm:$0x3] %vm8_vm0, %v218_v6  }
  0xc0   :  { %v224_v7 = vpop.permute.xlu0 %223  }
  0xc1   :  { %262 = vst.msk [vmem:[%s491_s1 + $0x23] ss:$36 sm:$0x3] %vm8_vm0, %v224_v7  }

// kernel: _lambda_.1
= control target key start
LH: loop header
LB: loop body
LE: loop exit
PB: predicated region body
PF: predicated region fallthrough
CT: control target
= control target key end

     0   :  { %s19853_s0 = inlined_call_operand.vmem [shape: f32[7,72,4], index: 0, kind: input, shape index: {}]   ;;  %s19854_s1 = inlined_call_operand.vmem [shape: f32[7,72,4], index: 1, kind: input, shape index: {}]   ;;  %s19855_s2 = inlined_call_operand.vmem [shape: f32[7,72,4], index: 2, kind: input, shape index: {}]   ;;  %s19856_s3 = inlined_call_operand.vmem [shape: f32[72,1], index: 3, kind: input, shape index: {}]   ;;  %s19857_s4 = inlined_call_operand.vmem [shape: bf16[9,68,224], index: 4, kind: input, shape index: {}]   ;;  %s19858_s5 = inlined_call_operand.vmem [shape: f32[1,224], index: 5, kind: input, shape index: {}, may-alias: {5,11}]   ;;  %s19859_s6 = inlined_call_operand.vmem [shape: bf16[9,64,32], index: 6, kind: input, shape index: {}]   ;;  %s19860_s7 = inlined_call_operand.vmem [shape: f32[1,32], index: 7, kind: input, shape index: {}, may-alias: {7,9,13,15}]   ;;  %s19861_s8 = inlined_call_operand.vmem [shape: bf16[64,32], index: 8, kind: input, shape index: {}]   ;;  %s19862_s9 = inlined_call_operand.vmem [shape: f32[1,32], index: 9, kind: input, shape index: {}, may-alias: {7,9,13,15}]   ;;  %s19863_s10 = inlined_call_operand.vmem [shape: bf16[9,96,224], index: 10, kind: input, shape index: {}]   ;;  %s19864_s11 = inlined_call_operand.vmem [shape: f32[1,224], index: 11, kind: input, shape index: {}, may-alias: {5,11}]   ;;  %s19865_s12 = inlined_call_operand.vmem [shape: bf16[9,64,32], index: 12, kind: input, shape index: {}]   ;;  %s19866_s13 = inlined_call_operand.vmem [shape: f32[1,32], index: 13, kind: input, shape index: {}, may-alias: {7,9,13,15}]   ;;  %s19867_s14 = inlined_call_operand.vmem [shape: bf16[64,32], index: 14, kind: input, shape index: {}]   ;;  %s19868_s15 = inlined_call_operand.vmem [shape: f32[1,32], index: 15, kind: input, shape index: {}, may-alias: {7,9,13,15}]   ;;  %s19869_s16 = inlined_call_operand.vmem [shape: bf16[9,64,64], index: 16, kind: input, shape index: {}]   ;;  %s19870_s17 = inlined_call_operand.vmem [shape: f32[1,64], index: 17, kind: input, shape index: {}]   ;;  %s19871_s18 = inlined_call_operand.vmem [shape: bf16[32,4], index: 18, kind: input, shape index: {}]   ;;  %s19872_s19 = inlined_call_operand.vmem [shape: f32[7,72,4], index: 19, kind: output, shape index: {0}]   ;;  %s19873_s20 = inlined_call_operand.hbm [shape: f32[1,1], index: 20, kind: output, shape index: {1}]  }
   0x1   :  { %19957 = sst [smem:[#allocation31_spill]] %s19853_s0 }
   0x2   :  { %19958 = sst [smem:[#allocation32_spill]] %s19854_s1 }
   0x3   :  { %19959 = sst [smem:[#allocation33_spill]] %s19855_s2 }
   0x4   :  { %19960 = sst [smem:[#allocation34_spill]] %s19856_s3 }
   0x5   :  { %19961 = sst [smem:[#allocation35_spill]] %s19857_s4 }
   0x6   :  { %19962 = sst [smem:[#allocation36_spill]] %s19868_s15 }
   0x7   :  { %19963 = sst [smem:[#allocation37_spill]] %s19871_s18 }
   0x8   :  { %19964 = sst [smem:[#allocation38_spill]] %s19873_s20 }
   0x9   :  { %26 = vsyncpa [#allocation11], 0  ;;  %s14181_s1 = smov 0  }
   0xa LB: > { %19965 = sst [smem:[#allocation13_spill]] %s14064_s1  ;;  %s14187_s22 = sadd.s32 4294967295, %s14064_s1   ;;  %s14064_s1 = sphi %s14181_s1, %s32_s1  }
   0xb   : > { %p10882_p0 = scmp.ge.s32.totalorder %s14064_s1, 1  ;;  %p581_p1 = scmp.lt.s32.totalorder %s14064_s1, 8 }
   0xd   : > { %p582_p2 = pnand %p10882_p0, %p581_p1 }
   0xf   : > { %585 = sbr.rel (%p582_p2) target bundleno = 4151 (0x1037), region = 96 }
  0x14   : > { %p649_p3 = scmp.lt.s32.totalorder %s14187_s22, 6  ;;  %s19966_s3 = sld [smem:[#allocation31_spill]] }
  0x15   : > { %s19967_s4 = sld [smem:[#allocation32_spill]]  ;;  %p10887_p4 = scmp.ne.s32.totalorder %s14187_s22, 0 }
  0x16   : > { %s650_s23 = scalar_select %p649_p3, %s14187_s22, 6 }
  0x17   : > { %s19968_s21 = sld [smem:[#allocation33_spill]] }
  0x18   : > { %s13007_s24 = smul.u32 72, %s650_s23 }
  0x19   : > { %673 = sbr.rel (%p10887_p4) target bundleno = 69 (0x45), region = 100 }
  0x1a   : > { %s14196_s26 = scalar_lea.vmem %s19966_s3, %s13007_s24  ;;  %s14211_s15 = scalar_lea.vmem %s19872_s19, %s13007_s24 }
  0x1b   : > { %s14201_s29 = scalar_lea.vmem %s19967_s4, %s13007_s24 }
  0x1d   : > { %s14206_s1 = scalar_lea.vmem %s19968_s21, %s13007_s24 }
  0x1e   : > { %vm674_vm0 = vcmask 261120   ;;  %vm738_vm1 = vcmask 31744   ;;  %vm748_vm2 = vcmask 0   ;;  %v14066_v0 = vmov 0.0  }
  0x1f   : > { %675 = vst.msk [vmem:[#allocation2] sm:$0xff] %vm674_vm0, %v14066_v0  ;;  %676 = vst.msk [vmem:[#allocation2 + $0x8] sm:$0xff] %vm674_vm0, %v14066_v0 }
  0x20   : > { %677 = vst.msk [vmem:[#allocation2 + $0x10] sm:$0xff] %vm674_vm0, %v14066_v0  ;;  %678 = vst.msk [vmem:[#allocation2 + $0x18] sm:$0xff] %vm674_vm0, %v14066_v0 }
  0x21   : > { %679 = vst.msk [vmem:[#allocation2 + $0x20] sm:$0xff] %vm674_vm0, %v14066_v0  ;;  %680 = vst.msk [vmem:[#allocation2 + $0x28] sm:$0xff] %vm674_vm0, %v14066_v0 }
  0x22   : > { %681 = vst.msk [vmem:[#allocation2 + $0x30] sm:$0xff] %vm674_vm0, %v14066_v0  ;;  %682 = vst.msk [vmem:[#allocation2 + $0x38] sm:$0xff] %vm674_vm0, %v14066_v0 }
  0x23   : > { %683 = vst.msk [vmem:[#allocation2 + $0x40] sm:$0xff] %vm674_vm0, %v14066_v0  ;;  %684 = vst.msk [vmem:[#allocation3] sm:$0xff] %vm674_vm0, %v14066_v0 }
  0x24   : > { %685 = vst.msk [vmem:[#allocation3 + $0x8] sm:$0xff] %vm674_vm0, %v14066_v0  ;;  %686 = vst.msk [vmem:[#allocation3 + $0x10] sm:$0xff] %vm674_vm0, %v14066_v0 }
  0x25   : > { %687 = vst.msk [vmem:[#allocation3 + $0x18] sm:$0xff] %vm674_vm0, %v14066_v0  ;;  %688 = vst.msk [vmem:[#allocation3 + $0x20] sm:$0xff] %vm674_vm0, %v14066_v0 }
  0x26   : > { %689 = vst.msk [vmem:[#allocation3 + $0x28] sm:$0xff] %vm674_vm0, %v14066_v0  ;;  %690 = vst.msk [vmem:[#allocation3 + $0x30] sm:$0xff] %vm674_vm0, %v14066_v0 }
  0x27   : > { %691 = vst.msk [vmem:[#allocation3 + $0x38] sm:$0xff] %vm674_vm0, %v14066_v0  ;;  %692 = vst.msk [vmem:[#allocation3 + $0x40] sm:$0xff] %vm674_vm0, %v14066_v0 }
  0x28   : > { %693 = vst.msk [vmem:[#allocation4] sm:$0xff] %vm674_vm0, %v14066_v0  ;;  %694 = vst.msk [vmem:[#allocation4 + $0x8] sm:$0xff] %vm674_vm0, %v14066_v0 }
  0x29   : > { %695 = vst.msk [vmem:[#allocation4 + $0x10] sm:$0xff] %vm674_vm0, %v14066_v0  ;;  %696 = vst.msk [vmem:[#allocation4 + $0x18] sm:$0xff] %vm674_vm0, %v14066_v0 }
  0x2a   : > { %697 = vst.msk [vmem:[#allocation4 + $0x20] sm:$0xff] %vm674_vm0, %v14066_v0  ;;  %698 = vst.msk [vmem:[#allocation4 + $0x28] sm:$0xff] %vm674_vm0, %v14066_v0 }
  0x2b   : > { %699 = vst.msk [vmem:[#allocation4 + $0x30] sm:$0xff] %vm674_vm0, %v14066_v0  ;;  %700 = vst.msk [vmem:[#allocation4 + $0x38] sm:$0xff] %vm674_vm0, %v14066_v0 }
  0x2c   : > { %701 = vst.msk [vmem:[#allocation4 + $0x40] sm:$0xff] %vm674_vm0, %v14066_v0  ;;  %702 = vst.msk [vmem:[#allocation5] sm:$0xff] %vm674_vm0, %v14066_v0 }
  0x2d   : > { %703 = vst.msk [vmem:[#allocation5 + $0x8] sm:$0xff] %vm674_vm0, %v14066_v0  ;;  %704 = vst.msk [vmem:[#allocation5 + $0x10] sm:$0xff] %vm674_vm0, %v14066_v0 }
  0x2e   : > { %705 = vst.msk [vmem:[#allocation5 + $0x18] sm:$0xff] %vm674_vm0, %v14066_v0  ;;  %706 = vst.msk [vmem:[#allocation5 + $0x20] sm:$0xff] %vm674_vm0, %v14066_v0 }
  0x2f   : > { %707 = vst.msk [vmem:[#allocation5 + $0x28] sm:$0xff] %vm674_vm0, %v14066_v0  ;;  %708 = vst.msk [vmem:[#allocation5 + $0x30] sm:$0xff] %vm674_vm0, %v14066_v0 }
  0x30   : > { %709 = vst.msk [vmem:[#allocation5 + $0x38] sm:$0xff] %vm674_vm0, %v14066_v0  ;;  %710 = vst.msk [vmem:[#allocation5 + $0x40] sm:$0xff] %vm674_vm0, %v14066_v0 }
  0x31   : > { %711 = vst.msk [vmem:[#allocation6] sm:$0xff] %vm674_vm0, %v14066_v0  ;;  %712 = vst.msk [vmem:[#allocation6 + $0x8] sm:$0xff] %vm674_vm0, %v14066_v0 }
  0x32   : > { %713 = vst.msk [vmem:[#allocation6 + $0x10] sm:$0xff] %vm674_vm0, %v14066_v0  ;;  %714 = vst.msk [vmem:[#allocation6 + $0x18] sm:$0xff] %vm674_vm0, %v14066_v0 }
  0x33   : > { %715 = vst.msk [vmem:[#allocation6 + $0x20] sm:$0xff] %vm674_vm0, %v14066_v0  ;;  %716 = vst.msk [vmem:[#allocation6 + $0x28] sm:$0xff] %vm674_vm0, %v14066_v0 }
  0x34   : > { %717 = vst.msk [vmem:[#allocation6 + $0x30] sm:$0xff] %vm674_vm0, %v14066_v0  ;;  %718 = vst.msk [vmem:[#allocation6 + $0x38] sm:$0xff] %vm674_vm0, %v14066_v0 }
  0x35   : > { %719 = vst.msk [vmem:[#allocation6 + $0x40] sm:$0xff] %vm674_vm0, %v14066_v0  ;;  %720 = vst.msk [vmem:[#allocation7] sm:$0xff] %vm674_vm0, %v14066_v0 }
  0x36   : > { %721 = vst.msk [vmem:[#allocation7 + $0x8] sm:$0xff] %vm674_vm0, %v14066_v0  ;;  %722 = vst.msk [vmem:[#allocation7 + $0x10] sm:$0xff] %vm674_vm0, %v14066_v0 }
  0x37   : > { %723 = vst.msk [vmem:[#allocation7 + $0x18] sm:$0xff] %vm674_vm0, %v14066_v0  ;;  %724 = vst.msk [vmem:[#allocation7 + $0x20] sm:$0xff] %vm674_vm0, %v14066_v0 }
  0x38   : > { %725 = vst.msk [vmem:[#allocation7 + $0x28] sm:$0xff] %vm674_vm0, %v14066_v0  ;;  %726 = vst.msk [vmem:[#allocation7 + $0x30] sm:$0xff] %vm674_vm0, %v14066_v0 }
  0x39   : > { %727 = vst.msk [vmem:[#allocation7 + $0x38] sm:$0xff] %vm674_vm0, %v14066_v0  ;;  %728 = vst.msk [vmem:[#allocation7 + $0x40] sm:$0xff] %vm674_vm0, %v14066_v0 }
  0x3a   : > { %729 = vst.msk [vmem:[#allocation8] sm:$0xff] %vm674_vm0, %v14066_v0  ;;  %730 = vst.msk [vmem:[#allocation8 + $0x8] sm:$0xff] %vm674_vm0, %v14066_v0 }
  0x3b   : > { %731 = vst.msk [vmem:[#allocation8 + $0x10] sm:$0xff] %vm674_vm0, %v14066_v0  ;;  %732 = vst.msk [vmem:[#allocation8 + $0x18] sm:$0xff] %vm674_vm0, %v14066_v0 }
  0x3c   : > { %733 = vst.msk [vmem:[#allocation8 + $0x20] sm:$0xff] %vm674_vm0, %v14066_v0  ;;  %734 = vst.msk [vmem:[#allocation8 + $0x28] sm:$0xff] %vm674_vm0, %v14066_v0 }
  0x3d   : > { %735 = vst.msk [vmem:[#allocation8 + $0x30] sm:$0xff] %vm674_vm0, %v14066_v0  ;;  %736 = vst.msk [vmem:[#allocation8 + $0x38] sm:$0xff] %vm674_vm0, %v14066_v0 }
  0x3e   : > { %737 = vst.msk [vmem:[#allocation8 + $0x40] sm:$0xff] %vm674_vm0, %v14066_v0 }
  0x3f   : > { %739 = vst.msk [vmem:[#allocation9] sm:$0xff] %vm738_vm1, %v14066_v0  ;;  %740 = vst.msk [vmem:[#allocation9 + $0x8] sm:$0xff] %vm738_vm1, %v14066_v0 }
  0x40   : > { %741 = vst.msk [vmem:[#allocation9 + $0x10] sm:$0xff] %vm738_vm1, %v14066_v0  ;;  %742 = vst.msk [vmem:[#allocation9 + $0x18] sm:$0xff] %vm738_vm1, %v14066_v0 }
  0x41   : > { %743 = vst.msk [vmem:[#allocation9 + $0x20] sm:$0xff] %vm738_vm1, %v14066_v0  ;;  %744 = vst.msk [vmem:[#allocation9 + $0x28] sm:$0xff] %vm738_vm1, %v14066_v0 }
  0x42   : > { %745 = vst.msk [vmem:[#allocation9 + $0x30] sm:$0xff] %vm738_vm1, %v14066_v0  ;;  %746 = vst.msk [vmem:[#allocation9 + $0x38] sm:$0xff] %vm738_vm1, %v14066_v0 }
  0x43   : > { %747 = vst.msk [vmem:[#allocation9 + $0x40] sm:$0xff] %vm738_vm1, %v14066_v0 }
  0x44   : > { %749 = vst.msk [vmem:[#allocation10] sm:$0x1] %vm748_vm2, %v14066_v0 }
  0x45 PF: > { %v822_v1 = vld [vmem:[#allocation2] sm:$0xff]  ;;  %v823_v2 = vld [vmem:[#allocation2 + $0x8] sm:$0xff]  ;;  %v840_v3 = vld [vmem:[#allocation4] sm:$0xff]  ;;  %v19878_v7 = vmov 0   ;;  %s14068_s18 = smov 4   ;;  %s14069_s20 = smov 36  }
  0x46   : > { %v13034_v4 = vpack.i.bf16 %v823_v2, %v822_v1  ;;  %v841_v5 = vld [vmem:[#allocation4 + $0x8] sm:$0xff]  ;;  %1110 = vmatprep.mubr.bf16.mxu0 %v19878_v7  ;;  %1257 = vmatprep.mubr.bf16.mxu1 %v19878_v7  ;;  %v824_v8 = vld [vmem:[#allocation2 + $0x10] sm:$0xff]  ;;  %v830_v10 = vld [vmem:[#allocation2 + $0x40] sm:$0xff]  ;;  %s19969_s2 = sld [smem:[#allocation35_spill]]  ;;  %vm1071_vm3 = vcmask 1041408   ;;  %vm921_vm4 = vcmask 31744  }
  0x47   : > { %v13039_v6 = vpack.i.bf16 %v841_v5, %v840_v3  ;;  %v825_v9 = vld [vmem:[#allocation2 + $0x18] sm:$0xff]  ;;  %13075 = vset.pattern.permute.xlu1 %v19878_v7  ;;  %13074 = vset.pattern.permute.xlu0 %v19878_v7  ;;  %v848_v11 = vld [vmem:[#allocation4 + $0x40] sm:$0xff]  ;;  %v842_v12 = vld [vmem:[#allocation4 + $0x10] sm:$0xff]  ;;  %vm931_vm5 = vcmask 293888   ;;  %vm1055_vm7 = vcmask 556032   ;;  %s14071_s0 = smov 32  }
  0x48   : > { %13035 = vrot.lane.b32.xlu0 %v13034_v4, %s14068_s18  ;;  %v843_v13 = vld [vmem:[#allocation4 + $0x18] sm:$0xff]  ;;  %v13044_v14 = vpack.i.bf16 %v825_v9, %v824_v8  ;;  %v826_v15 = vld [vmem:[#allocation2 + $0x20] sm:$0xff]  ;;  %v844_v19 = vld [vmem:[#allocation4 + $0x20] sm:$0xff]  ;;  %vm3239_vm13 = vcmask 261120   ;;  %s14072_s27 = smov 96   ;;  %vm14074_vm14 = vmmov 0  }
  0x49   : > { %13040 = vrot.lane.b32.xlu1 %v13039_v6, %s14069_s20  ;;  %v827_v16 = vld [vmem:[#allocation2 + $0x28] sm:$0xff]  ;;  %v13049_v25 = vpack.i.bf16 %v843_v13, %v842_v12  ;;  %v845_v27 = vld [vmem:[#allocation4 + $0x28] sm:$0xff]  ;;  %v828_v35 = vld [vmem:[#allocation2 + $0x30] sm:$0xff]  ;;  %vm3336_vm15 = vcmask 523264   ;;  %vm6699_vm0 = vcmask 785408   ;;  %s20200_s25 = sld [smem:[#allocation36_spill]] }
  0x4a   : > { %v13054_v32 = vpack.i.bf16 %v827_v16, %v826_v15  ;;  %v13059_v34 = vpack.i.bf16 %v845_v27, %v844_v19  ;;  %v829_v36 = vld [vmem:[#allocation2 + $0x38] sm:$0xff]  ;;  %v846_v38 = vld [vmem:[#allocation4 + $0x30] sm:$0xff]  ;;  %v847_v39 = vld [vmem:[#allocation4 + $0x38] sm:$0xff]  ;;  %v950_v15 = vlaneseq  ;;  %vm10773_vm1 = vcmask 0   ;;  %p13014_p5 = scmp.eq.s32.totalorder %s14187_s22, 6 }
  0x4b   : > { %v13064_v42 = vpack.i.bf16 %v829_v36, %v828_v35  ;;  %v13069_v44 = vpack.i.bf16 %v847_v39, %v846_v38  ;;  %v768_v56 = vld [vmem:[%s14201_s29] sm:$0xff]  ;;  %v769_v57 = vld [vmem:[%s14201_s29 + $0x8] sm:$0xff]  ;;  %v795_v63 = vld [vmem:[#allocation9] sm:$0xff] }
  0x4c   : > { %v10896_v17 = vld [vmem:[%s19969_s2 + $0x88] sm:$0x33]  ;;  %v975_v18 = vld [vmem:[%s19969_s2 + $0x40] sm:$0x33]  ;;  %874 = vrot.lane.b32.xlu0 %v830_v10, %s14068_s18  ;;  %v13163_v26 = vld [vmem:[%s19969_s2 + $0x34] ss:$8 sps:$4 sm:$0xff]  }
  0x4d   : > { %v10906_v20 = vcombine.high %v10896_v17, %v10896_v17  ;;  %v10905_v21 = vcombine.low %v10896_v17, %v10896_v17  ;;  %v10922_v22 = vcombine.high %v975_v18, %v975_v18  ;;  %v10921_v23 = vcombine.low %v975_v18, %v975_v18  ;;  %v13160_v24 = vld [vmem:[%s19969_s2 + $0x7c] ss:$8 sps:$4 sm:$0xff]   ;;  %910 = vrot.lane.b32.xlu1 %v848_v11, %s14069_s20  ;;  %v13162_v30 = vld [vmem:[%s19969_s2 + $0x78] ss:$8 sps:$4 sm:$0xff]   ;;  %v13166_v33 = vld [vmem:[%s19969_s2 + $0x6c] ss:$8 sps:$4 sm:$0xff]  }
  0x4e   : > { %v13165_v31 = vld [vmem:[%s19969_s2 + $0x30] ss:$8 sps:$4 sm:$0xff]   ;;  %v13169_v37 = vld [vmem:[%s19969_s2 + $0x24] ss:$8 sps:$4 sm:$0xff]   ;;  %v13171_v41 = vld [vmem:[%s19969_s2 + $0x20] ss:$8 sps:$4 sm:$0xff]  }
  0x4f   : > { %10907 = vmatprep.subr.msk.bf16.mxu0 %vm1071_vm3, %v10906_v20  ;;  %v1073_v28 = vsel %vm1071_vm3, %v10905_v21, 0  ;;  %10923 = vmatprep.subr.msk.bf16.mxu1 %vm1071_vm3, %v10922_v22  ;;  %v1220_v29 = vsel %vm1071_vm3, %v10921_v23, 0  ;;  %v13168_v40 = vld [vmem:[%s19969_s2 + $0x68] ss:$8 sps:$4 sm:$0xff]   ;;  %v13172_v43 = vld [vmem:[%s19969_s2 + $0x5c] ss:$8 sps:$4 sm:$0xff]  }
  0x50   : > { %1085 = vmatpush1.bf16.msra.mxu0 %v1073_v28  ;;  %1232 = vmatpush1.bf16.msra.mxu1 %v1220_v29  ;;  %v13175_v45 = vld [vmem:[%s19969_s2 + $0x14] ss:$8 sps:$4 sm:$0xff]   ;;  %v13174_v46 = vld [vmem:[%s19969_s2 + $0x58] ss:$8 sps:$4 sm:$0xff]   ;;  %v13181_v49 = vld [vmem:[%s19969_s2 + $0x4] ss:$8 sps:$4 sm:$0xff]  }
  0x51   : > { %13045 = vrot.lane.b32.xlu0 %v13044_v14, %s14068_s18  ;;  %1086 = vmatprep.subr.bf16.mxu0 %v13160_v24  ;;  %v13177_v47 = vld [vmem:[%s19969_s2 + $0x10] ss:$8 sps:$4 sm:$0xff]   ;;  %v13178_v48 = vld [vmem:[%s19969_s2 + $0x4c] ss:$8 sps:$4 sm:$0xff]   ;;  %v13183_v51 = vld [vmem:[%s19969_s2] ss:$8 sps:$4 sm:$0xff]  }
  0x52   : > { %13050 = vrot.lane.b32.xlu1 %v13049_v25, %s14069_s20  ;;  %1233 = vmatprep.subr.bf16.mxu1 %v13163_v26  ;;  %v13180_v50 = vld [vmem:[%s19969_s2 + $0x48] ss:$8 sps:$4 sm:$0xff]   ;;  %v14443_v54 = vld [vmem:[%s19969_s2 + $0x118] sm:$0x33]  ;;  %v786_v58 = vsub.f32 1.0, %v768_v56  ;;  %v787_v59 = vsub.f32 1.0, %v769_v57 }
  0x53   : > { %v14435_v52 = vld [vmem:[%s19969_s2 + $0xd0] sm:$0x33]  ;;  %v10972_v55 = vcombine.high %v14443_v54, %v14443_v54  ;;  %v776_v60 = vld [vmem:[%s14201_s29 + $0x40] sm:$0xff]  ;;  %v760_v62 = vld [vmem:[%s14196_s26 + $0x8] sm:$0xff]  ;;  %v14462_v29 = vshrl.u32 %v950_v15, 7 }
  0x54   : > { %1087 = vmatpush1.bf16.msra.mxu0 %v13162_v30  ;;  %1234 = vmatpush1.bf16.msra.mxu1 %v13165_v31  ;;  %v10947_v53 = vcombine.high %v14435_v52, %v14435_v52  ;;  %v759_v61 = vld [vmem:[%s14196_s26] sm:$0xff]  ;;  %v794_v2 = vsub.f32 1.0, %v776_v60  ;;  %v803_v3 = vld [vmem:[#allocation9 + $0x40] sm:$0xff]  ;;  %v770_v4 = vld [vmem:[%s14201_s29 + $0x10] sm:$0xff]  ;;  %v778_v8 = vmul.f32 %v769_v57, %v760_v62  ;;  %v804_v9 = vmul.f32 %v795_v63, %v786_v58 }
  0x55   : > { %13055 = vrot.lane.b32.xlu0 %v13054_v32, %s14068_s18  ;;  %1088 = vmatprep.subr.bf16.mxu0 %v13166_v33  ;;  %v796_v0 = vld [vmem:[#allocation9 + $0x8] sm:$0xff]  ;;  %v771_v5 = vld [vmem:[%s14201_s29 + $0x18] sm:$0xff]  ;;  %v777_v6 = vmul.f32 %v768_v56, %v759_v61  ;;  %v761_v11 = vld [vmem:[%s14196_s26 + $0x10] sm:$0xff]  ;;  %v788_v16 = vsub.f32 1.0, %v770_v4  ;;  %vm985_vm6 = vcmp.lt.s32.totalorder %v14462_v29, 6  ;;  %vm952_vm8 = vcmp.lt.s32.totalorder %v14462_v29, 7 }
  0x56   : > { %13060 = vrot.lane.b32.xlu1 %v13059_v34, %s14069_s20  ;;  %1235 = vmatprep.subr.bf16.mxu1 %v13169_v37  ;;  %v767_v1 = vld [vmem:[%s14196_s26 + $0x40] sm:$0xff]  ;;  %v805_v10 = vmul.f32 %v796_v0, %v787_v59  ;;  %v762_v13 = vld [vmem:[%s14196_s26 + $0x18] sm:$0xff]  ;;  %v797_v14 = vld [vmem:[#allocation9 + $0x10] sm:$0xff]  ;;  %v789_v18 = vsub.f32 1.0, %v771_v5  ;;  %v812_v23 = vmul.f32 %v803_v3, %v794_v2  ;;  %v779_v26 = vmul.f32 %v770_v4, %v761_v11 }
  0x57   : > { %v772_v12 = vld [vmem:[%s14201_s29 + $0x20] sm:$0xff]  ;;  %v798_v17 = vld [vmem:[#allocation9 + $0x18] sm:$0xff]  ;;  %v773_v19 = vld [vmem:[%s14201_s29 + $0x28] sm:$0xff]  ;;  %v813_v20 = vadd.f32 %v804_v9, %v777_v6  ;;  %v785_v22 = vmul.f32 %v776_v60, %v767_v1  ;;  %v780_v33 = vmul.f32 %v771_v5, %v762_v13  ;;  %v806_v34 = vmul.f32 %v797_v14, %v788_v16 }
  0x58   : > { %1089 = vmatpush1.bf16.msra.mxu0 %v13168_v40  ;;  %1236 = vmatpush1.bf16.msra.mxu1 %v13171_v41  ;;  %v814_v21 = vadd.f32 %v805_v10, %v778_v8  ;;  %v763_v24 = vld [vmem:[%s14196_s26 + $0x20] sm:$0xff]  ;;  %v764_v27 = vld [vmem:[%s14196_s26 + $0x28] sm:$0xff]  ;;  %v790_v28 = vsub.f32 1.0, %v772_v12  ;;  %v799_v35 = vld [vmem:[#allocation9 + $0x20] sm:$0xff]  ;;  %v807_v40 = vmul.f32 %v798_v17, %v789_v18  ;;  %vm1514_vm9 = vcmp.lt.s32.totalorder %v14462_v29, 1 }
  0x59   : > { %13065 = vrot.lane.b32.xlu0 %v13064_v42, %s14068_s18  ;;  %1090 = vmatprep.subr.bf16.mxu0 %v13172_v43  ;;  %v765_v36 = vld [vmem:[%s14196_s26 + $0x30] sm:$0xff]  ;;  %v775_v37 = vld [vmem:[%s14201_s29 + $0x38] sm:$0xff]  ;;  %v800_v41 = vld [vmem:[#allocation9 + $0x28] sm:$0xff]  ;;  %v10946_v42 = vcombine.low %v14435_v52, %v14435_v52  ;;  %v815_v57 = vadd.f32 %v806_v34, %v779_v26  ;;  %v782_v52 = vmul.f32 %v773_v19, %v764_v27  ;;  %vm2073_vm10 = vcmp.lt.s32.totalorder %v14462_v29, 3  ;;  %s20201_s18 = sld [smem:[#allocation37_spill]] }
  0x5a   : > { %13070 = vrot.lane.b32.xlu1 %v13069_v44, %s14069_s20  ;;  %1237 = vmatprep.subr.bf16.mxu1 %v13175_v45  ;;  %v766_v43 = vld [vmem:[%s14196_s26 + $0x38] sm:$0xff]  ;;  %v774_v44 = vld [vmem:[%s14201_s29 + $0x30] sm:$0xff]  ;;  %v816_v60 = vadd.f32 %v807_v40, %v780_v33  ;;  %v801_v63 = vld [vmem:[#allocation9 + $0x30] sm:$0xff]  ;;  %v10971_v27 = vcombine.low %v14443_v54, %v14443_v54  ;;  %vm2272_vm11 = vcmp.lt.s32.totalorder %v14462_v29, 2  ;;  %vm1315_vm12 = vcmp.lt.s32.totalorder %v14462_v29, 5  ;;  %s14070_s20 = smov 64  }
  0x5b   : > { %v802_v58 = vld [vmem:[#allocation9 + $0x38] sm:$0xff]  ;;  %v1401_v61 = vsel %vm1071_vm3, %v10946_v42, 0  ;;  %v783_v62 = vmul.f32 %v774_v44, %v765_v36  ;;  %v784_v2 = vmul.f32 %v775_v37, %v766_v43  ;;  %v792_v3 = vsub.f32 1.0, %v774_v44  ;;  %v14518_v54 = vld [vmem:[%s19969_s2 + $0x1a8] sm:$0x33]  ;;  %s20029_s29 = sld [smem:[#allocation34_spill]] }
  0x5c   : > { %1091 = vmatpush1.bf16.msra.mxu0 %v13174_v46  ;;  %1238 = vmatpush1.bf16.msra.mxu1 %v13177_v47  ;;  %v821_v47 = vadd.f32 %v812_v23, %v785_v22  ;;  %v13186_v43 = vld [vmem:[%s19969_s2 + $0xc0] ss:$8 sps:$4 sm:$0xff]  }
  0x5d   : > { %1092 = vmatprep.subr.bf16.mxu0 %v13178_v48  ;;  %1239 = vmatprep.subr.bf16.mxu1 %v13181_v49  ;;  %v791_v48 = vsub.f32 1.0, %v773_v19  ;;  %v810_v22 = vmul.f32 %v801_v63, %v792_v3 }
  0x5f   : > { %v809_v1 = vmul.f32 %v800_v41, %v791_v48 }
  0x60   : > { %1093 = vmatpush1.bf16.msra.mxu0 %v13180_v50  ;;  %1240 = vmatpush1.bf16.msra.mxu1 %v13183_v51  ;;  %v781_v50 = vmul.f32 %v772_v12, %v763_v24  ;;  %v808_v51 = vmul.f32 %v799_v35, %v790_v28  ;;  %v14505_v28 = vld [vmem:[%s19969_s2 + $0x160] sm:$0x33] }
  0x61   : > { %10948 = vmatprep.subr.msk.bf16.mxu0 %vm1071_vm3, %v10947_v53  ;;  %10973 = vmatprep.subr.msk.bf16.mxu1 %vm1071_vm3, %v10972_v55  ;;  %v793_v53 = vsub.f32 1.0, %v775_v37  ;;  %v13188_v35 = vld [vmem:[%s19969_s2 + $0xc4] ss:$8 sps:$4 sm:$0xff]  }
  0x62   : > { %v817_v6 = vadd.f32 %v808_v51, %v781_v50 }
  0x63   : > { %v811_v9 = vmul.f32 %v802_v58, %v793_v53 }
  0xba   : > { %v13036_v25 = vpop.permute.xlu0 %13035 }
  0xbb   : > { %v13038_v30 = vunpack.i.h.bf16 %v13036_v25  ;;  %v13037_v31 = vunpack.i.l.bf16 %v13036_v25  ;;  %v13041_v32 = vpop.permute.xlu1 %13040  ;;  %v818_v25 = vadd.f32 %v809_v1, %v782_v52  ;;  %v10996_v52 = vcombine.low %v14505_v28, %v14505_v28 }
  0xbc   : > { %v13043_v38 = vunpack.i.h.bf16 %v13041_v32  ;;  %v13042_v39 = vunpack.i.l.bf16 %v13041_v32 }
  0xbd   : > { %v922_v45 = vsel %vm921_vm4, %v813_v20, %v13037_v31  ;;  %v923_v46 = vsel %vm921_vm4, %v814_v21, %v13038_v30 }
  0xbe   : > { %v875_v49 = vpop.permute.xlu0 %874  ;;  %v14474_v55 = vsel %vm931_vm5, %v922_v45, %v13042_v39  ;;  %v14478_v59 = vsel %vm931_vm5, %v923_v46, %v13043_v38  ;;  %v820_v39 = vadd.f32 %v811_v9, %v784_v2  ;;  %v13199_v45 = vld [vmem:[%s19969_s2 + $0x10c] ss:$8 sps:$4 sm:$0xff]   ;;  %v13189_v9 = vld [vmem:[%s19969_s2 + $0xb0] ss:$8 sps:$4 sm:$0xff]  }
  0xbf   : > { %v911_v56 = vpop.permute.xlu1 %910  ;;  %v930_v0 = vsel %vm921_vm4, %v821_v47, %v875_v49  ;;  %v976_v8 = vrot.slane %v14474_v55, 2  ;;  %v977_v13 = vrot.slane %v14478_v59, 2  ;;  %v941_v14 = vrot.slane %v14474_v55, 1 }
  0xc0   : > { %v14483_v4 = vsel %vm931_vm5, %v930_v0, %v911_v56  ;;  %v942_v18 = vrot.slane %v14478_v59, 1  ;;  %v11021_v0 = vcombine.low %v14518_v54, %v14518_v54 }
  0xc1   : > { %v984_v17 = vrot.slane %v14483_v4, 2  ;;  %v949_v21 = vrot.slane %v14483_v4, 1  ;;  %v993_v33 = vsel %vm985_vm6, %v976_v8, %v977_v13 }
  0xc2   : > { %v14522_v37 = vsel %vm952_vm8, %v941_v14, %v942_v18 }
  0xc3   : > { %v13046_v5 = vpop.permute.xlu0 %13045  ;;  %v994_v26 = vsel %vm985_vm6, %v984_v17, %v976_v8  ;;  %v14528_v38 = vsel %vm952_vm8, %v949_v21, %v941_v14  ;;  %v10997_v14 = vcombine.high %v14505_v28, %v14505_v28  ;;  %v2072_v8 = vrot.slane %v14483_v4, 5 }
  0xc4   : > { %v13048_v10 = vunpack.i.h.bf16 %v13046_v5  ;;  %v13047_v11 = vunpack.i.l.bf16 %v13046_v5  ;;  %v13051_v12 = vpop.permute.xlu1 %13050  ;;  %v995_v36 = vpack.c.bf16 %v993_v33, %v994_v26  ;;  %v962_v40 = vpack.c.bf16 %v14522_v37, %v14528_v38 }
  0xc5   : > { %v13053_v15 = vunpack.i.h.bf16 %v13051_v12  ;;  %v13052_v16 = vunpack.i.l.bf16 %v13051_v12  ;;  %v13196_v12 = vld [vmem:[%s19969_s2 + $0xa4] ss:$8 sps:$4 sm:$0xff]  }
  0xc6   : > { %v924_v19 = vsel %vm921_vm4, %v815_v57, %v13047_v11  ;;  %v925_v20 = vsel %vm921_vm4, %v816_v60, %v13048_v10  ;;  %10908 = vmatmul.mubr.msk.bf16.vlgmr.msra.gmra.mxu0 %vm1055_vm7, %v995_v36  ;;  %10924 = vmatmul.mubr.msk.bf16.vlgmr.msra.gmra.mxu1 %vm1055_vm7, %v962_v40  ;;  %v1600_v57 = vsel %vm1071_vm3, %v10971_v27, 0  ;;  %v819_v60 = vadd.f32 %v810_v22, %v783_v62  ;;  %v13202_v22 = vld [vmem:[%s19969_s2 + $0xfc] ss:$8 sps:$4 sm:$0xff]  }
  0xc7   : > { %v14494_v23 = vsel %vm931_vm5, %v924_v19, %v13052_v16  ;;  %v13056_v24 = vpop.permute.xlu0 %13055  ;;  %v14508_v30 = vsel %vm931_vm5, %v925_v20, %v13053_v15  ;;  %1413 = vmatpush1.bf16.msra.mxu0 %v1401_v61  ;;  %1120 = vmatprep.mubr.bf16.mxu0 %v19878_v7  ;;  %v13191_v61 = vld [vmem:[%s19969_s2 + $0xb4] ss:$8 sps:$4 sm:$0xff]   ;;  %v14594_v15 = vsel %vm1071_vm3, %v10996_v52, 0  ;;  %v14607_v27 = vsel %vm1071_vm3, %v11021_v0, 0 }
  0xc8   : > { %v13058_v31 = vunpack.i.h.bf16 %v13056_v24  ;;  %v13057_v32 = vunpack.i.l.bf16 %v13056_v24  ;;  %v13061_v34 = vpop.permute.xlu1 %13060  ;;  %v978_v44 = vrot.slane %v14494_v23, 2  ;;  %v979_v49 = vrot.slane %v14508_v30, 2  ;;  %1267 = vmatprep.mubr.bf16.mxu1 %v19878_v7  ;;  %1414 = vmatprep.subr.bf16.mxu0 %v13188_v35  ;;  %v13194_v35 = vld [vmem:[%s19969_s2 + $0xa0] ss:$8 sps:$4 sm:$0xff]  }
  0xc9   : > { %v13063_v41 = vunpack.i.h.bf16 %v13061_v34  ;;  %v13062_v42 = vunpack.i.l.bf16 %v13061_v34  ;;  %v943_v50 = vrot.slane %v14494_v23, 1  ;;  %v944_v56 = vrot.slane %v14508_v30, 1  ;;  %1612 = vmatpush1.bf16.msra.mxu1 %v1600_v57 }
  0xca   : > { %v926_v46 = vsel %vm921_vm4, %v817_v6, %v13057_v32  ;;  %v927_v47 = vsel %vm921_vm4, %v818_v25, %v13058_v31  ;;  %v991_v2 = vsel %vm985_vm6, %v978_v44, %v979_v49  ;;  %v992_v3 = vsel %vm985_vm6, %v977_v13, %v978_v44  ;;  %v13197_v13 = vld [vmem:[%s19969_s2 + $0x108] ss:$8 sps:$4 sm:$0xff]   ;;  %1613 = vmatprep.subr.bf16.mxu1 %v13199_v45 }
  0xcb   : > { %v13066_v48 = vpop.permute.xlu0 %13065  ;;  %v14553_v63 = vsel %vm952_vm8, %v942_v18, %v943_v50  ;;  %v14561_v1 = vsel %vm931_vm5, %v926_v46, %v13062_v42  ;;  %v14564_v62 = vsel %vm931_vm5, %v927_v47, %v13063_v41  ;;  %v14576_v6 = vsel %vm952_vm8, %v943_v50, %v944_v56  ;;  %1415 = vmatpush1.bf16.msra.mxu0 %v13186_v43  ;;  %v13200_v42 = vld [vmem:[%s19969_s2 + $0xf8] ss:$8 sps:$4 sm:$0xff]   ;;  %v13205_v43 = vld [vmem:[%s19969_s2 + $0x94] ss:$8 sps:$4 sm:$0xff]  }
  0xcc   : > { %v13068_v51 = vunpack.i.h.bf16 %v13066_v48  ;;  %v13071_v53 = vpop.permute.xlu1 %13070  ;;  %v13067_v58 = vunpack.i.l.bf16 %v13066_v48  ;;  %v996_v18 = vpack.c.bf16 %v991_v2, %v992_v3  ;;  %1416 = vmatprep.subr.bf16.mxu0 %v13191_v61  ;;  %v980_v19 = vrot.slane %v14561_v1, 2  ;;  %v13208_v48 = vld [vmem:[%s19969_s2 + $0xec] ss:$8 sps:$4 sm:$0xff]   ;;  %v13203_v61 = vld [vmem:[%s19969_s2 + $0x90] ss:$8 sps:$4 sm:$0xff]  }
  0xcd   : > { %v13073_v5 = vunpack.i.h.bf16 %v13071_v53  ;;  %v13072_v11 = vunpack.i.l.bf16 %v13071_v53  ;;  %v981_v20 = vrot.slane %v14564_v62, 2  ;;  %v1306_v24 = vrot.slane %v14474_v55, 3  ;;  %1614 = vmatpush1.bf16.msra.mxu1 %v13197_v13  ;;  %v13206_v3 = vld [vmem:[%s19969_s2 + $0xe8] ss:$8 sps:$4 sm:$0xff]  }
  0xce   : > { %v929_v10 = vsel %vm921_vm4, %v820_v39, %v13068_v51  ;;  %v928_v16 = vsel %vm921_vm4, %v819_v60, %v13067_v58  ;;  %v1307_v25 = vrot.slane %v14478_v59, 3  ;;  %v963_v26 = vpack.c.bf16 %v14576_v6, %v14553_v63  ;;  %10909 = vmatmul.mubr.msk.bf16.gmra.mxu0 %vm1055_vm7, %v996_v18  ;;  %1615 = vmatprep.subr.bf16.mxu1 %v13202_v22 }
  0xcf   : > { %v1505_v31 = vrot.slane %v14474_v55, 7  ;;  %v14611_v32 = vsel %vm931_vm5, %v929_v10, %v13073_v5  ;;  %v945_v33 = vrot.slane %v14561_v1, 1  ;;  %v946_v34 = vrot.slane %v14564_v62, 1  ;;  %1130 = vmatprep.mubr.bf16.mxu0 %v19878_v7  ;;  %1417 = vmatpush1.bf16.msra.mxu0 %v13189_v9 }
  0xd0   : > { %v1506_v36 = vrot.slane %v14478_v59, 7  ;;  %v2064_v39 = vrot.slane %v14474_v55, 5  ;;  %v2065_v40 = vrot.slane %v14478_v59, 5  ;;  %v14623_v41 = vsel %vm931_vm5, %v928_v16, %v13072_v11  ;;  %10925 = vmatmul.mubr.msk.bf16.gmra.mxu1 %vm1055_vm7, %v963_v26  ;;  %1418 = vmatprep.subr.bf16.mxu0 %v13196_v12  ;;  %v13211_v12 = vld [vmem:[%s19969_s2 + $0xdc] ss:$8 sps:$4 sm:$0xff]  }
  0xd1   : > { %v2263_v44 = vrot.slane %v14474_v55, 6  ;;  %1277 = vmatprep.mubr.bf16.mxu1 %v19878_v7  ;;  %v989_v45 = vsel %vm985_vm6, %v980_v19, %v981_v20  ;;  %v990_v46 = vsel %vm985_vm6, %v979_v49, %v980_v19  ;;  %v982_v47 = vrot.slane %v14623_v41, 2  ;;  %1616 = vmatpush1.bf16.msra.mxu1 %v13200_v42 }
  0xd2   : > { %v983_v50 = vrot.slane %v14611_v32, 2  ;;  %v948_v51 = vrot.slane %v14611_v32, 1  ;;  %v1507_v53 = vrot.slane %v14494_v23, 7  ;;  %v11022_v57 = vcombine.high %v14518_v54, %v14518_v54  ;;  %1617 = vmatprep.subr.bf16.mxu1 %v13208_v48 }
  0xd3   : > { %v2264_v49 = vrot.slane %v14478_v59, 6  ;;  %v14653_v52 = vsel %vm952_vm8, %v945_v33, %v946_v34  ;;  %v14659_v58 = vsel %vm952_vm8, %v944_v56, %v945_v33  ;;  %v947_v60 = vrot.slane %v14623_v41, 1  ;;  %1419 = vmatpush1.bf16.msra.mxu0 %v13194_v35 }
  0xd4   : > { %v1314_v0 = vrot.slane %v14483_v4, 3  ;;  %v997_v2 = vpack.c.bf16 %v989_v45, %v990_v46  ;;  %v14674_v56 = vsel %vm1514_vm9, %v1505_v31, %v1506_v36  ;;  %v14678_v5 = vsel %vm1514_vm9, %v1506_v36, %v1507_v53  ;;  %1420 = vmatprep.subr.bf16.mxu0 %v13205_v43  ;;  %v13209_v45 = vld [vmem:[%s19969_s2 + $0xd8] ss:$8 sps:$4 sm:$0xff]  }
  0xd5   : > { %v987_v9 = vsel %vm985_vm6, %v982_v47, %v983_v50  ;;  %v988_v10 = vsel %vm985_vm6, %v981_v20, %v982_v47  ;;  %v14687_v11 = vsel %vm952_vm8, %v946_v34, %v947_v60  ;;  %v964_v16 = vpack.c.bf16 %v14653_v52, %v14659_v58  ;;  %1618 = vmatpush1.bf16.msra.mxu1 %v13206_v3 }
  0xd6   : > { %v14700_v18 = vsel %vm985_vm6, %v983_v50, %v984_v17  ;;  %v14706_v19 = vsel %vm952_vm8, %v948_v51, %v949_v21  ;;  %v1508_v20 = vrot.slane %v14508_v30, 7  ;;  %v1513_v22 = vrot.slane %v14483_v4, 7  ;;  %10910 = vmatmul.mubr.msk.bf16.gmra.mxu0 %vm1055_vm7, %v997_v2  ;;  %1619 = vmatprep.subr.bf16.mxu1 %v13211_v12 }
  0xd7   : > { %v2066_v26 = vrot.slane %v14494_v23, 5  ;;  %v2265_v33 = vrot.slane %v14494_v23, 6  ;;  %v14715_v17 = vsel %vm952_vm8, %v947_v60, %v948_v51  ;;  %1140 = vmatprep.mubr.bf16.mxu0 %v19878_v7  ;;  %v998_v21 = vpack.c.bf16 %v987_v9, %v988_v10  ;;  %1421 = vmatpush1.bf16.msra.mxu0 %v13203_v61 }
  0xd8   : > { %10926 = vmatmul.mubr.msk.bf16.gmra.mxu1 %vm1055_vm7, %v964_v16  ;;  %v965_v34 = vpack.c.bf16 %v14715_v17, %v14687_v11  ;;  %v1509_v36 = vrot.slane %v14561_v1, 7  ;;  %v999_v42 = vpack.c.bf16 %v14700_v18, %v14700_v18  ;;  %v966_v43 = vpack.c.bf16 %v14706_v19, %v14706_v19  ;;  %10998 = vmatprep.subr.msk.bf16.mxu0 %vm1071_vm3, %v10997_v14  ;;  %v13224_v18 = vld [vmem:[%s19969_s2 + $0x134] ss:$8 sps:$4 sm:$0xff]  }
  0xd9   : > { %1287 = vmatprep.mubr.bf16.mxu1 %v19878_v7  ;;  %v1510_v47 = vrot.slane %v14564_v62, 7  ;;  %v14739_v48 = vsel %vm1514_vm9, %v1507_v53, %v1508_v20  ;;  %v1511_v60 = vrot.slane %v14623_v41, 7  ;;  %v1512_v61 = vrot.slane %v14611_v32, 7  ;;  %1620 = vmatpush1.bf16.msra.mxu1 %v13209_v45 }
  0xda   : > { %v2067_v28 = vrot.slane %v14508_v30, 5  ;;  %v2068_v14 = vrot.slane %v14561_v1, 5  ;;  %v14751_v53 = vsel %vm1514_vm9, %v1508_v20, %v1509_v36  ;;  %v14785_v20 = vsel %vm2073_vm10, %v2064_v39, %v2065_v40  ;;  %11023 = vmatprep.subr.msk.bf16.mxu1 %vm1071_vm3, %v11022_v57 }
  0xdb   : > { %v14761_v12 = vsel %vm1514_vm9, %v1509_v36, %v1510_v47  ;;  %v14771_v9 = vsel %vm1514_vm9, %v1510_v47, %v1511_v60  ;;  %v14777_v36 = vsel %vm2073_vm10, %v2065_v40, %v2066_v26  ;;  %v14791_v45 = vsel %vm2272_vm11, %v2264_v49, %v2265_v33 }
  0xdc   : > { %v14800_v47 = vsel %vm1514_vm9, %v1511_v60, %v1512_v61  ;;  %v14810_v13 = vsel %vm2272_vm11, %v2263_v44, %v2264_v49  ;;  %v14819_v57 = vsel %vm2073_vm10, %v2067_v28, %v2068_v14  ;;  %v14823_v60 = vsel %vm2073_vm10, %v2066_v26, %v2067_v28 }
  0xdd   : > { %v2267_v49 = vrot.slane %v14561_v1, 6  ;;  %v2069_v26 = vrot.slane %v14564_v62, 5  ;;  %v2070_v16 = vrot.slane %v14623_v41, 5  ;;  %v2268_v10 = vrot.slane %v14564_v62, 6 }
  0xde   : > { %10911 = vmatmul.mubr.msk.bf16.gmra.mxu0 %vm1055_vm7, %v998_v21  ;;  %v2266_v21 = vrot.slane %v14508_v30, 6  ;;  %v2270_v3 = vrot.slane %v14611_v32, 6  ;;  %v14892_v51 = vsel %vm2073_vm10, %v2072_v8, %v2064_v39 }
  0xdf   : > { %1150 = vmatprep.mubr.bf16.mxu0 %v19878_v7  ;;  %v14852_v54 = vsel %vm2073_vm10, %v2068_v14, %v2069_v26  ;;  %v14866_v50 = vsel %vm2272_vm11, %v2267_v49, %v2268_v10 }
  0xe0   : > { %10927 = vmatmul.mubr.msk.bf16.gmra.mxu1 %vm1055_vm7, %v965_v34  ;;  %v14832_v34 = vsel %vm1514_vm9, %v1512_v61, %v1513_v22  ;;  %v14838_v40 = vsel %vm2272_vm11, %v2265_v33, %v2266_v21  ;;  %v14843_v28 = vsel %vm2272_vm11, %v2266_v21, %v2267_v49  ;;  %v2269_v61 = vrot.slane %v14623_v41, 6 }
  0xe1   : > { %1297 = vmatprep.mubr.bf16.mxu1 %v19878_v7  ;;  %v2071_v33 = vrot.slane %v14611_v32, 5  ;;  %v14858_v21 = vsel %vm2073_vm10, %v2069_v26, %v2070_v16  ;;  %v2271_v49 = vrot.slane %v14483_v4, 6 }
  0xe2   : > { %v14862_v2 = vsel %vm2272_vm11, %v2268_v10, %v2269_v61  ;;  %v2085_v14 = vpack.c.bf16 %v14858_v21, %v14852_v54  ;;  %v14886_v46 = vsel %vm2272_vm11, %v2269_v61, %v2270_v3  ;;  %v13227_v61 = vld [vmem:[%s19969_s2 + $0x19c] ss:$8 sps:$4 sm:$0xff]  }
  0xe3   : > { %v14875_v26 = vsel %vm2073_vm10, %v2071_v33, %v2072_v8  ;;  %v14879_v35 = vsel %vm2073_vm10, %v2070_v16, %v2071_v33  ;;  %v14911_v8 = vsel %vm2272_vm11, %v2270_v3, %v2271_v49  ;;  %v14917_v39 = vsel %vm2272_vm11, %v2271_v49, %v2263_v44  ;;  %v13216_v3 = vld [vmem:[%s19969_s2 + $0x154] ss:$8 sps:$4 sm:$0xff]  }
  0xe4   : > { %v2086_v10 = vpack.c.bf16 %v14875_v26, %v14879_v35  ;;  %v14934_v44 = vsel %vm1514_vm9, %v1513_v22, %v1505_v31  ;;  %v13214_v22 = vld [vmem:[%s19969_s2 + $0x150] ss:$8 sps:$4 sm:$0xff]   ;;  %v19971_v33 = vrot.slane %v14494_v23, 3  ;;  %v19991_v54 = vpack.c.bf16 %v14911_v8, %v14886_v46 }
  0xe5   : > { %v1524_v31 = vpack.c.bf16 %v14674_v56, %v14934_v44  ;;  %v19992_v35 = vpack.c.bf16 %v14678_v5, %v14674_v56  ;;  %v19993_v46 = vpack.c.bf16 %v14751_v53, %v14739_v48  ;;  %v19995_v56 = vpack.c.bf16 %v14832_v34, %v14800_v47 }
  0xe6   : > { %10912 = vmatmul.mubr.msk.bf16.gmra.mxu0 %vm1055_vm7, %v999_v42  ;;  %v1324_v42 = vsel %vm1315_vm12, %v1314_v0, %v1306_v24 }
  0xe7   : > { %1438 = vmatprep.mubr.bf16.mxu0 %v19878_v7 }
  0xe8   : > { %10928 = vmatmul.mubr.msk.bf16.gmra.mxu1 %vm1055_vm7, %v966_v43  ;;  %v1323_v43 = vsel %vm1315_vm12, %v1306_v24, %v1307_v25  ;;  %v13219_v24 = vld [vmem:[%s19969_s2 + $0x144] ss:$8 sps:$4 sm:$0xff]  }
  0xe9   : > { %1637 = vmatprep.mubr.bf16.mxu1 %v19878_v7  ;;  %v1325_v49 = vpack.c.bf16 %v1323_v43, %v1324_v42  ;;  %v13225_v42 = vld [vmem:[%s19969_s2 + $0x198] ss:$8 sps:$4 sm:$0xff]   ;;  %v13230_v43 = vld [vmem:[%s19969_s2 + $0x18c] ss:$8 sps:$4 sm:$0xff]  }
  0xee   : > { %10949 = vmatmul.mubr.msk.bf16.vlgmr.msra.gmra.mxu0 %vm1055_vm7, %v1325_v49  ;;  %v19970_v49 = vrot.slane %v14508_v30, 3 }
  0xef   : > { %1792 = vmatpush1.bf16.msra.mxu0 %v14594_v15  ;;  %1448 = vmatprep.mubr.bf16.mxu0 %v19878_v7 }
  0xf0   : > { %10974 = vmatmul.mubr.msk.bf16.vlgmr.msra.gmra.mxu1 %vm1055_vm7, %v1524_v31  ;;  %1793 = vmatprep.subr.bf16.mxu0 %v13216_v3  ;;  %v1321_v15 = vsel %vm1315_vm12, %v19971_v33, %v19970_v49  ;;  %v19972_v31 = vmov %v19971_v33  ;;  %v13217_v3 = vld [vmem:[%s19969_s2 + $0x140] ss:$8 sps:$4 sm:$0xff]  }
  0xf1   : > { %1647 = vmatprep.mubr.bf16.mxu1 %v19878_v7  ;;  %v1322_v16 = vsel %vm1315_vm12, %v1307_v25, %v19972_v31  ;;  %1972 = vmatpush1.bf16.msra.mxu1 %v14607_v27  ;;  %v13228_v33 = vld [vmem:[%s19969_s2 + $0x188] ss:$8 sps:$4 sm:$0xff]   ;;  %v13236_v25 = vld [vmem:[%s19969_s2 + $0x17c] ss:$8 sps:$4 sm:$0xff]   ;;  %v1525_v27 = vpack.c.bf16 %v14739_v48, %v14678_v5  ;;  %v2466_v5 = vpack.c.bf16 %v14934_v44, %v14934_v44 }
  0xf2   : > { %1973 = vmatprep.subr.bf16.mxu1 %v13227_v61  ;;  %v1326_v49 = vpack.c.bf16 %v1321_v15, %v1322_v16  ;;  %v13222_v61 = vld [vmem:[%s19969_s2 + $0x130] ss:$8 sps:$4 sm:$0xff]   ;;  %v13233_v16 = vld [vmem:[%s19969_s2 + $0x124] ss:$8 sps:$4 sm:$0xff]   ;;  %v19976_v15 = vrot.slane %v14508_v30, 3 }
  0xf3   : > { %1794 = vmatpush1.bf16.msra.mxu0 %v13214_v22  ;;  %v19973_v22 = vrot.slane %v14564_v62, 3 }
  0xf4   : > { %1795 = vmatprep.subr.bf16.mxu0 %v13219_v24  ;;  %v19974_v24 = vrot.slane %v14561_v1, 3 }
  0xf5   : > { %1974 = vmatpush1.bf16.msra.mxu1 %v13225_v42 }
  0xf6   : > { %10950 = vmatmul.mubr.msk.bf16.gmra.mxu0 %vm1055_vm7, %v1326_v49  ;;  %1975 = vmatprep.subr.bf16.mxu1 %v13230_v43  ;;  %v1319_v42 = vsel %vm1315_vm12, %v19974_v24, %v19973_v22  ;;  %v19975_v43 = vmov %v19974_v24  ;;  %v13239_v49 = vld [vmem:[%s19969_s2 + $0x16c] ss:$8 sps:$4 sm:$0xff]   ;;  %v11062_v22 = vld [vmem:[%s19969_s2 + $0x238] sm:$0x33] }
  0xf7   : > { %1458 = vmatprep.mubr.bf16.mxu0 %v19878_v7  ;;  %1796 = vmatpush1.bf16.msra.mxu0 %v13217_v3  ;;  %v1320_v31 = vsel %vm1315_vm12, %v19976_v15, %v19975_v43  ;;  %v13234_v3 = vld [vmem:[%s19969_s2 + $0x178] ss:$8 sps:$4 sm:$0xff]   ;;  %v13237_v43 = vld [vmem:[%s19969_s2 + $0x168] ss:$8 sps:$4 sm:$0xff]  }
  0xf8   : > { %10975 = vmatmul.mubr.msk.bf16.gmra.mxu1 %vm1055_vm7, %v1525_v27  ;;  %1797 = vmatprep.subr.bf16.mxu0 %v13224_v18  ;;  %v11037_v27 = vld [vmem:[%s19969_s2 + $0x1f0] sm:$0x33]  ;;  %v1327_v24 = vpack.c.bf16 %v1319_v42, %v1320_v31  ;;  %v13231_v18 = vld [vmem:[%s19969_s2 + $0x120] ss:$8 sps:$4 sm:$0xff]   ;;  %v1313_v42 = vrot.slane %v14611_v32, 3  ;;  %v19977_v31 = vrot.slane %v14564_v62, 3 }
  0xf9   : > { %1657 = vmatprep.mubr.bf16.mxu1 %v19878_v7  ;;  %1976 = vmatpush1.bf16.msra.mxu1 %v13228_v33  ;;  %v1526_v33 = vpack.c.bf16 %v14761_v12, %v14751_v53  ;;  %v11047_v15 = vcombine.high %v11037_v27, %v11037_v27 }
  0xfa   : > { %1977 = vmatprep.subr.bf16.mxu1 %v13236_v25  ;;  %v1312_v25 = vrot.slane %v14623_v41, 3 }
  0xfb   : > { %1798 = vmatpush1.bf16.msra.mxu0 %v13222_v61  ;;  %v11072_v61 = vcombine.high %v11062_v22, %v11062_v22 }
  0xfc   : > { %1799 = vmatprep.subr.bf16.mxu0 %v13233_v16  ;;  %v1317_v16 = vsel %vm1315_vm12, %v1312_v25, %v1313_v42 }
  0xfd   : > { %1978 = vmatpush1.bf16.msra.mxu1 %v13234_v3  ;;  %v1318_v3 = vsel %vm1315_vm12, %v19977_v31, %v1312_v25  ;;  %v1528_v25 = vpack.c.bf16 %v14832_v34, %v14832_v34  ;;  %v13255_v31 = vld [vmem:[%s19969_s2 + $0x22c] ss:$8 sps:$4 sm:$0xff]  }
  0xfe   : > { %10951 = vmatmul.mubr.msk.bf16.gmra.mxu0 %vm1055_vm7, %v1327_v24  ;;  %1979 = vmatprep.subr.bf16.mxu1 %v13239_v49  ;;  %v1328_v49 = vpack.c.bf16 %v1317_v16, %v1318_v3  ;;  %v1527_v24 = vpack.c.bf16 %v14800_v47, %v14771_v9  ;;  %v13252_v3 = vld [vmem:[%s19969_s2 + $0x1c4] ss:$8 sps:$4 sm:$0xff]  }
  0xff   : > { %1468 = vmatprep.mubr.bf16.mxu0 %v19878_v7  ;;  %1800 = vmatpush1.bf16.msra.mxu0 %v13231_v18  ;;  %v1316_v18 = vsel %vm1315_vm12, %v1313_v42, %v1314_v0  ;;  %v13244_v0 = vld [vmem:[%s19969_s2 + $0x1e4] ss:$8 sps:$4 sm:$0xff]   ;;  %v19978_v42 = vpack.c.bf16 %v14478_v59, %v14474_v55  ;;  %v13247_v55 = vld [vmem:[%s19969_s2 + $0x1d4] ss:$8 sps:$4 sm:$0xff]   ;;  %v13253_v59 = vld [vmem:[%s19969_s2 + $0x228] ss:$8 sps:$4 sm:$0xff]  }
 0x100   : > { %10976 = vmatmul.mubr.msk.bf16.gmra.mxu1 %vm1055_vm7, %v1526_v33  ;;  %11048 = vmatprep.subr.msk.bf16.mxu0 %vm1071_vm3, %v11047_v15  ;;  %v1329_v33 = vpack.c.bf16 %v1316_v18, %v1316_v18  ;;  %v11071_v15 = vcombine.low %v11062_v22, %v11062_v22  ;;  %v13242_v22 = vld [vmem:[%s19969_s2 + $0x1e0] ss:$8 sps:$4 sm:$0xff]   ;;  %v13264_v18 = vld [vmem:[%s19969_s2 + $0x20c] ss:$8 sps:$4 sm:$0xff]  }
 0x101   : > { %1667 = vmatprep.mubr.bf16.mxu1 %v19878_v7  ;;  %1980 = vmatpush1.bf16.msra.mxu1 %v13237_v43  ;;  %v11046_v43 = vcombine.low %v11037_v27, %v11037_v27  ;;  %v19979_v27 = vpack.c.bf16 %v14553_v63, %v14522_v37  ;;  %v13258_v37 = vld [vmem:[%s19969_s2 + $0x21c] ss:$8 sps:$4 sm:$0xff]   ;;  %v13245_v63 = vld [vmem:[%s19969_s2 + $0x1d0] ss:$8 sps:$4 sm:$0xff]  }
 0x102   : > { %11073 = vmatprep.subr.msk.bf16.mxu1 %vm1071_vm3, %v11072_v61  ;;  %v2358_v16 = vsel %vm1071_vm3, %v11071_v15, 0  ;;  %v13265_v15 = vld [vmem:[%s19969_s2 + $0x1f8] ss:$8 sps:$4 sm:$0xff]  }
 0x103   : > { %v2159_v61 = vsel %vm1071_vm3, %v11046_v43, 0  ;;  %v13259_v43 = vld [vmem:[%s19969_s2 + $0x1b0] ss:$8 sps:$4 sm:$0xff]  }
 0x106   : > { %10952 = vmatmul.mubr.msk.bf16.gmra.mxu0 %vm1055_vm7, %v1328_v49  ;;  %v13256_v49 = vld [vmem:[%s19969_s2 + $0x218] ss:$8 sps:$4 sm:$0xff]  }
 0x107   : > { %1478 = vmatprep.mubr.bf16.mxu0 %v19878_v7 }
 0x108   : > { %10977 = vmatmul.mubr.msk.bf16.gmra.mxu1 %vm1055_vm7, %v1527_v24  ;;  %v19980_v24 = vpack.c.bf16 %v14508_v30, %v14494_v23  ;;  %v13250_v23 = vld [vmem:[%s19969_s2 + $0x1c0] ss:$8 sps:$4 sm:$0xff]   ;;  %v13261_v30 = vld [vmem:[%s19969_s2 + $0x1b4] ss:$8 sps:$4 sm:$0xff]  }
 0x109   : > { %1677 = vmatprep.mubr.bf16.mxu1 %v19878_v7 }
 0x10e   : > { %10953 = vmatmul.mubr.msk.bf16.gmra.mxu0 %vm1055_vm7, %v1329_v33  ;;  %v19981_v33 = vpack.c.bf16 %v14659_v58, %v14576_v6  ;;  %v13262_v6 = vld [vmem:[%s19969_s2 + $0x208] ss:$8 sps:$4 sm:$0xff]   ;;  %v13267_v58 = vld [vmem:[%s19969_s2 + $0x1fc] ss:$8 sps:$4 sm:$0xff]  }
 0x10f   : > { %1817 = vmatprep.mubr.bf16.mxu0 %v19878_v7 }
 0x110   : > { %10978 = vmatmul.mubr.msk.bf16.gmra.mxu1 %vm1055_vm7, %v1528_v25  ;;  %v11087_v25 = vld [vmem:[%s19969_s2 + $0x280] sm:$0x33] }
 0x111   : > { %1997 = vmatprep.mubr.bf16.mxu1 %v19878_v7 }
 0x116   : > { %10999 = vmatmul.mubr.msk.bf16.vlgmr.msra.gmra.mxu0 %vm1055_vm7, %v19978_v42  ;;  %v19983_v42 = vpack.c.bf16 %v14687_v11, %v14653_v52  ;;  %v1888_v52 = vpack.c.bf16 %v14528_v38, %v14528_v38  ;;  %v13272_v11 = vld [vmem:[%s19969_s2 + $0x274] ss:$8 sps:$4 sm:$0xff]   ;;  %v19987_v38 = vpack.c.bf16 %v14791_v45, %v14810_v13  ;;  %v13273_v13 = vld [vmem:[%s19969_s2 + $0x260] ss:$8 sps:$4 sm:$0xff]   ;;  %v19989_v45 = vpack.c.bf16 %v14843_v28, %v14838_v40 }
 0x117   : > { %2171 = vmatpush1.bf16.msra.mxu0 %v2159_v61  ;;  %1827 = vmatprep.mubr.bf16.mxu0 %v19878_v7  ;;  %v11097_v61 = vcombine.high %v11087_v25, %v11087_v25  ;;  %v13279_v40 = vld [vmem:[%s19969_s2 + $0x240] ss:$8 sps:$4 sm:$0xff]  }
 0x118   : > { %11024 = vmatmul.mubr.msk.bf16.vlgmr.msra.gmra.mxu1 %vm1055_vm7, %v19979_v27  ;;  %2172 = vmatprep.subr.bf16.mxu0 %v13244_v0  ;;  %v19982_v0 = vpack.c.bf16 %v14564_v62, %v14561_v1  ;;  %v19985_v1 = vpack.c.bf16 %v14706_v19, %v14715_v17  ;;  %v1708_v62 = vpack.c.bf16 %v14483_v4, %v14483_v4  ;;  %v13270_v19 = vld [vmem:[%s19969_s2 + $0x270] ss:$8 sps:$4 sm:$0xff]   ;;  %v13275_v17 = vld [vmem:[%s19969_s2 + $0x264] ss:$8 sps:$4 sm:$0xff]  }
 0x119   : > { %2007 = vmatprep.mubr.bf16.mxu1 %v19878_v7  ;;  %2370 = vmatpush1.bf16.msra.mxu1 %v2358_v16  ;;  %v19984_v16 = vpack.c.bf16 %v14611_v32, %v14623_v41  ;;  %v11096_v32 = vcombine.low %v11087_v25, %v11087_v25  ;;  %v19986_v4 = vpack.c.bf16 %v14777_v36, %v14785_v20  ;;  %v13278_v20 = vld [vmem:[%s19969_s2 + $0x254] ss:$8 sps:$4 sm:$0xff]  }
 0x11a   : > { %2371 = vmatprep.subr.bf16.mxu1 %v13255_v31  ;;  %v19988_v36 = vpack.c.bf16 %v14819_v57, %v14823_v60  ;;  %v13276_v31 = vld [vmem:[%s19969_s2 + $0x250] ss:$8 sps:$4 sm:$0xff]   ;;  %v13281_v57 = vld [vmem:[%s19969_s2 + $0x244] ss:$8 sps:$4 sm:$0xff]   ;;  %v19990_v60 = vpack.c.bf16 %v14862_v2, %v14866_v50  ;;  %v2087_v50 = vpack.c.bf16 %v14892_v51, %v14892_v51  ;;  %v2286_v2 = vpack.c.bf16 %v14917_v39, %v14917_v39 }
 0x11b   : > { %2173 = vmatpush1.bf16.msra.mxu0 %v13242_v22  ;;  %v2538_v41 = vsel %vm1071_vm3, %v11096_v32, 0  ;;  %v19994_v51 = vpack.c.bf16 %v14771_v9, %v14761_v12 }
 0x11c   : > { %2174 = vmatprep.subr.bf16.mxu0 %v13247_v55 }
 0x11d   : > { %2372 = vmatpush1.bf16.msra.mxu1 %v13253_v59 }
 0x11e   : > { %11000 = vmatmul.mubr.msk.bf16.gmra.mxu0 %vm1055_vm7, %v19980_v24  ;;  %2373 = vmatprep.subr.bf16.mxu1 %v13258_v37 }
 0x11f   : > { %1837 = vmatprep.mubr.bf16.mxu0 %v19878_v7  ;;  %2175 = vmatpush1.bf16.msra.mxu0 %v13245_v63 }
 0x120   : > { %11025 = vmatmul.mubr.msk.bf16.gmra.mxu1 %vm1055_vm7, %v19981_v33  ;;  %2176 = vmatprep.subr.bf16.mxu0 %v13252_v3 }
 0x121   : > { %2017 = vmatprep.mubr.bf16.mxu1 %v19878_v7  ;;  %2374 = vmatpush1.bf16.msra.mxu1 %v13256_v49 }
 0x122   : > { %2375 = vmatprep.subr.bf16.mxu1 %v13264_v18 }
 0x123   : > { %2177 = vmatpush1.bf16.msra.mxu0 %v13250_v23 }
 0x124   : > { %2178 = vmatprep.subr.bf16.mxu0 %v13261_v30 }
 0x125   : > { %2376 = vmatpush1.bf16.msra.mxu1 %v13262_v6 }
 0x126   : > { %11001 = vmatmul.mubr.msk.bf16.gmra.mxu0 %vm1055_vm7, %v19982_v0  ;;  %2377 = vmatprep.subr.bf16.mxu1 %v13267_v58 }
 0x127   : > { %1847 = vmatprep.mubr.bf16.mxu0 %v19878_v7  ;;  %2179 = vmatpush1.bf16.msra.mxu0 %v13259_v43 }
 0x128   : > { %11026 = vmatmul.mubr.msk.bf16.gmra.mxu1 %vm1055_vm7, %v19983_v42  ;;  %11098 = vmatprep.subr.msk.bf16.mxu0 %vm1071_vm3, %v11097_v61 }
 0x129   : > { %2027 = vmatprep.mubr.bf16.mxu1 %v19878_v7  ;;  %2378 = vmatpush1.bf16.msra.mxu1 %v13265_v15 }
 0x12e   : > { %11002 = vmatmul.mubr.msk.bf16.gmra.mxu0 %vm1055_vm7, %v19984_v16 }
 0x12f   : > { %1857 = vmatprep.mubr.bf16.mxu0 %v19878_v7 }
 0x130   : > { %11027 = vmatmul.mubr.msk.bf16.gmra.mxu1 %vm1055_vm7, %v19985_v1 }
 0x131   : > { %2037 = vmatprep.mubr.bf16.mxu1 %v19878_v7 }
 0x136   : > { %11003 = vmatmul.mubr.msk.bf16.gmra.mxu0 %vm1055_vm7, %v1708_v62 }
 0x137   : > { %2196 = vmatprep.mubr.bf16.mxu0 %v19878_v7 }
 0x138   : > { %11028 = vmatmul.mubr.msk.bf16.gmra.mxu1 %vm1055_vm7, %v1888_v52 }
 0x139   : > { %2395 = vmatprep.mubr.bf16.mxu1 %v19878_v7 }
 0x13e   : > { %11049 = vmatmul.mubr.msk.bf16.vlgmr.msra.gmra.mxu0 %vm1055_vm7, %v19986_v4 }
 0x13f   : > { %2550 = vmatpush1.bf16.msra.mxu0 %v2538_v41  ;;  %2206 = vmatprep.mubr.bf16.mxu0 %v19878_v7 }
 0x140   : > { %11074 = vmatmul.mubr.msk.bf16.vlgmr.msra.gmra.mxu1 %vm1055_vm7, %v19987_v38  ;;  %2551 = vmatprep.subr.bf16.mxu0 %v13272_v11 }
 0x141   : > { %2405 = vmatprep.mubr.bf16.mxu1 %v19878_v7 }
 0x143   : > { %2552 = vmatpush1.bf16.msra.mxu0 %v13270_v19 }
 0x144   : > { %2553 = vmatprep.subr.bf16.mxu0 %v13275_v17 }
 0x146   : > { %11050 = vmatmul.mubr.msk.bf16.gmra.mxu0 %vm1055_vm7, %v19988_v36 }
 0x147   : > { %2216 = vmatprep.mubr.bf16.mxu0 %v19878_v7  ;;  %2554 = vmatpush1.bf16.msra.mxu0 %v13273_v13 }
 0x148   : > { %11075 = vmatmul.mubr.msk.bf16.gmra.mxu1 %vm1055_vm7, %v19989_v45  ;;  %2555 = vmatprep.subr.bf16.mxu0 %v13278_v20 }
 0x149   : > { %2415 = vmatprep.mubr.bf16.mxu1 %v19878_v7 }
 0x14b   : > { %2556 = vmatpush1.bf16.msra.mxu0 %v13276_v31 }
 0x14c   : > { %2557 = vmatprep.subr.bf16.mxu0 %v13281_v57 }
 0x14e   : > { %11051 = vmatmul.mubr.msk.bf16.gmra.mxu0 %vm1055_vm7, %v2085_v14 }
 0x14f   : > { %2226 = vmatprep.mubr.bf16.mxu0 %v19878_v7  ;;  %2558 = vmatpush1.bf16.msra.mxu0 %v13279_v40 }
 0x150   : > { %11076 = vmatmul.mubr.msk.bf16.gmra.mxu1 %vm1055_vm7, %v19990_v60 }
 0x151   : > { %2425 = vmatprep.mubr.bf16.mxu1 %v19878_v7 }
 0x156   : > { %11052 = vmatmul.mubr.msk.bf16.gmra.mxu0 %vm1055_vm7, %v2086_v10 }
 0x157   : > { %2236 = vmatprep.mubr.bf16.mxu0 %v19878_v7 }
 0x158   : > { %11077 = vmatmul.mubr.msk.bf16.gmra.mxu1 %vm1055_vm7, %v19991_v54 }
 0x159   : > { %2435 = vmatprep.mubr.bf16.mxu1 %v19878_v7 }
 0x15e   : > { %11053 = vmatmul.mubr.msk.bf16.gmra.mxu0 %vm1055_vm7, %v2087_v50 }
 0x15f   : > { %2575 = vmatprep.mubr.bf16.mxu0 %v19878_v7 }
 0x160   : > { %11078 = vmatmul.mubr.msk.bf16.gmra.mxu1 %vm1055_vm7, %v2286_v2 }
 0x166   : > { %11099 = vmatmul.mubr.msk.bf16.vlgmr.msra.gmra.mxu0 %vm1055_vm7, %v19992_v35 }
 0x167   : > { %2585 = vmatprep.mubr.bf16.mxu0 %v19878_v7 }
 0x16e   : > { %11100 = vmatmul.mubr.msk.bf16.gmra.mxu0 %vm1055_vm7, %v19993_v46 }
 0x16f   : > { %2595 = vmatprep.mubr.bf16.mxu0 %v19878_v7 }
 0x176   : > { %11101 = vmatmul.mubr.msk.bf16.gmra.mxu0 %vm1055_vm7, %v19994_v51 }
 0x177   : > { %2605 = vmatprep.mubr.bf16.mxu0 %v19878_v7 }
 0x17e   : > { %11102 = vmatmul.mubr.msk.bf16.gmra.mxu0 %vm1055_vm7, %v19995_v56 }
 0x17f   : > { %2615 = vmatprep.mubr.bf16.mxu0 %v19878_v7 }
 0x186   : > { %v1112_v48 = vpop.f32.mrf.mxu0  ;;  %11103 = vmatmul.mubr.msk.bf16.gmra.mxu0 %vm1055_vm7, %v2466_v5  ;;  %v1259_v53 = vpop.f32.mrf.mxu1 }
 0x187   : > { %v1260_v28 = vadd.f32 %v1259_v53, %v1112_v48 }
 0x188   : > { %v1114_v9 = vpop.f32.mrf.mxu0  ;;  %v1261_v12 = vpop.f32.mrf.mxu1 }
 0x189   : > { %v1262_v21 = vadd.f32 %v1261_v12, %v1114_v9 }
 0x18a   : > { %v1116_v14 = vpop.f32.mrf.mxu0  ;;  %v1263_v26 = vpop.f32.mrf.mxu1 }
 0x18b   : > { %v1264_v10 = vadd.f32 %v1263_v26, %v1116_v14 }
 0x18c   : > { %v15263_v8 = vpop.f32.mrf.mxu0  ;;  %v15265_v47 = vpop.f32.mrf.mxu1 }
 0x18e   : > { %v1122_v34 = vpop.f32.mrf.mxu0 }
 0x190   : > { %v1269_v39 = vpop.f32.mrf.mxu1  ;;  %v1124_v22 = vpop.f32.mrf.mxu0 }
 0x191   : > { %v1270_v27 = vadd.f32 %v1269_v39, %v1122_v34 }
 0x192   : > { %v1271_v44 = vpop.f32.mrf.mxu1  ;;  %v1126_v59 = vpop.f32.mrf.mxu0 }
 0x193   : > { %v1272_v55 = vadd.f32 %v1271_v44, %v1124_v22 }
 0x194   : > { %v1273_v37 = vpop.f32.mrf.mxu1  ;;  %v15267_v3 = vpop.f32.mrf.mxu0 }
 0x195   : > { %v1274_v63 = vadd.f32 %v1273_v37, %v1126_v59 }
 0x196   : > { %v15269_v49 = vpop.f32.mrf.mxu1  ;;  %v1132_v24 = vpop.f32.mrf.mxu0 }
 0x198   : > { %v1279_v18 = vpop.f32.mrf.mxu1  ;;  %v1134_v23 = vpop.f32.mrf.mxu0 }
 0x199   : > { %v1280_v33 = vadd.f32 %v1279_v18, %v1132_v24 }
 0x19a   : > { %v1281_v30 = vpop.f32.mrf.mxu1  ;;  %v1136_v58 = vpop.f32.mrf.mxu0 }
 0x19b   : > { %v1282_v6 = vadd.f32 %v1281_v30, %v1134_v23 }
 0x19c   : > { %v1283_v25 = vpop.f32.mrf.mxu1  ;;  %v15271_v15 = vpop.f32.mrf.mxu0 }
 0x19d   : > { %v1284_v43 = vadd.f32 %v1283_v25, %v1136_v58  ;;  %19996 = vst [vmem:[#allocation14_spill] sm:$0xff] %v15271_v15 }
 0x19e   : > { %v15273_v61 = vpop.f32.mrf.mxu1  ;;  %v1142_v0 = vpop.f32.mrf.mxu0 }
 0x19f   : > { %19997 = vst [vmem:[#allocation15_spill] sm:$0xff] %v15273_v61 }
 0x1a0   : > { %v1289_v42 = vpop.f32.mrf.mxu1  ;;  %v1144_v1 = vpop.f32.mrf.mxu0 }
 0x1a1   : > { %v1290_v16 = vadd.f32 %v1289_v42, %v1142_v0 }
 0x1a2   : > { %v1291_v62 = vpop.f32.mrf.mxu1  ;;  %v1146_v32 = vpop.f32.mrf.mxu0 }
 0x1a3   : > { %v15275_v52 = vadd.f32 %v1291_v62, %v1144_v1 }
 0x1a4   : > { %v1293_v41 = vpop.f32.mrf.mxu1  ;;  %v15279_v4 = vpop.f32.mrf.mxu0 }
 0x1a5   : > { %v15277_v11 = vadd.f32 %v1293_v41, %v1146_v32  ;;  %19998 = vst [vmem:[#allocation16_spill] sm:$0xff] %v15279_v4 }
 0x1a6   : > { %v15281_v38 = vpop.f32.mrf.mxu1  ;;  %v1152_v19 = vpop.f32.mrf.mxu0 }
 0x1a7   : > { %19999 = vst [vmem:[#allocation17_spill] sm:$0xff] %v15281_v38 }
 0x1a8   : > { %v1299_v17 = vpop.f32.mrf.mxu1  ;;  %v1154_v20 = vpop.f32.mrf.mxu0 }
 0x1a9   : > { %v15283_v13 = vadd.f32 %v1299_v17, %v1152_v19 }
 0x1aa   : > { %v1301_v36 = vpop.f32.mrf.mxu1  ;;  %v1156_v31 = vpop.f32.mrf.mxu0 }
 0x1ab   : > { %v15285_v45 = vadd.f32 %v1301_v36, %v1154_v20 }
 0x1ac   : > { %v1303_v57 = vpop.f32.mrf.mxu1  ;;  %v1157_v40 = vpop.f32.mrf.mxu0 }
 0x1ae   : > { %v1304_v60 = vpop.f32.mrf.mxu1  ;;  %v1440_v54 = vpop.f32.mrf.mxu0 }
 0x1af   : > { %v1487_v50 = vadd.f32 %v1440_v54, %v1260_v28 }
 0x1b0   : > { %v1639_v2 = vpop.f32.mrf.mxu1  ;;  %v1442_v35 = vpop.f32.mrf.mxu0 }
 0x1b1   : > { %v15287_v46 = vadd.f32 %v1639_v2, %v1487_v50  ;;  %v1488_v51 = vadd.f32 %v1442_v35, %v1262_v21 }
 0x1b2   : > { %v1641_v56 = vpop.f32.mrf.mxu1  ;;  %v1444_v5 = vpop.f32.mrf.mxu0 }
 0x1b3   : > { %v15289_v48 = vadd.f32 %v1641_v56, %v1488_v51  ;;  %v1489_v53 = vadd.f32 %v1444_v5, %v1264_v10 }
 0x1b4   : > { %v1643_v9 = vpop.f32.mrf.mxu1  ;;  %v15291_v12 = vpop.f32.mrf.mxu0 }
 0x1b5   : > { %v15293_v14 = vadd.f32 %v1643_v9, %v1489_v53 }
 0x1b6   : > { %v15295_v26 = vpop.f32.mrf.mxu1  ;;  %v1450_v34 = vpop.f32.mrf.mxu0 }
 0x1b7   : > { %v1491_v39 = vadd.f32 %v1450_v34, %v1270_v27 }
 0x1b8   : > { %v1649_v28 = vpop.f32.mrf.mxu1  ;;  %v1452_v22 = vpop.f32.mrf.mxu0 }
 0x1b9   : > { %v15297_v44 = vadd.f32 %v1649_v28, %v1491_v39  ;;  %v1492_v59 = vadd.f32 %v1452_v22, %v1272_v55 }
 0x1ba   : > { %v1651_v21 = vpop.f32.mrf.mxu1  ;;  %v1454_v37 = vpop.f32.mrf.mxu0 }
 0x1bb   : > { %v15299_v24 = vadd.f32 %v1651_v21, %v1492_v59  ;;  %v1493_v18 = vadd.f32 %v1454_v37, %v1274_v63 }
 0x1bc   : > { %v1653_v10 = vpop.f32.mrf.mxu1  ;;  %v15301_v23 = vpop.f32.mrf.mxu0 }
 0x1bd   : > { %v15303_v30 = vadd.f32 %v1653_v10, %v1493_v18 }
 0x1be   : > { %v15305_v58 = vpop.f32.mrf.mxu1  ;;  %v1460_v25 = vpop.f32.mrf.mxu0 }
 0x1bf   : > { %v1495_v0 = vadd.f32 %v1460_v25, %v1280_v33 }
 0x1c0   : > { %v1659_v27 = vpop.f32.mrf.mxu1  ;;  %v1462_v42 = vpop.f32.mrf.mxu0 }
 0x1c1   : > { %v15307_v1 = vadd.f32 %v1659_v27, %v1495_v0  ;;  %v1496_v62 = vadd.f32 %v1462_v42, %v1282_v6 }
 0x1c2   : > { %v1661_v55 = vpop.f32.mrf.mxu1  ;;  %v1464_v32 = vpop.f32.mrf.mxu0 }
 0x1c3   : > { %v15309_v41 = vadd.f32 %v1661_v55, %v1496_v62  ;;  %v1497_v19 = vadd.f32 %v1464_v32, %v1284_v43 }
 0x1c4   : > { %v1663_v63 = vpop.f32.mrf.mxu1  ;;  %v15311_v17 = vpop.f32.mrf.mxu0 }
 0x1c5   : > { %20000 = vst [vmem:[#allocation18_spill] sm:$0xff] %v15311_v17  ;;  %v15313_v20 = vadd.f32 %v1663_v63, %v1497_v19 }
 0x1c6   : > { %v15315_v36 = vpop.f32.mrf.mxu1  ;;  %v1470_v31 = vpop.f32.mrf.mxu0 }
 0x1c7   : > { %20001 = vst [vmem:[#allocation19_spill] sm:$0xff] %v15315_v36  ;;  %v1499_v57 = vadd.f32 %v1470_v31, %v1290_v16 }
 0x1c8   : > { %v1669_v33 = vpop.f32.mrf.mxu1  ;;  %v1472_v40 = vpop.f32.mrf.mxu0 }
 0x1c9   : > { %v15317_v60 = vadd.f32 %v1669_v33, %v1499_v57  ;;  %v1500_v6 = vadd.f32 %v1472_v40, %v15275_v52 }
 0x1ca   : > { %v1671_v54 = vpop.f32.mrf.mxu1  ;;  %v1474_v50 = vpop.f32.mrf.mxu0 }
 0x1cb   : > { %v15320_v2 = vadd.f32 %v1671_v54, %v1500_v6  ;;  %v1501_v43 = vadd.f32 %v1474_v50, %v15277_v11 }
 0x1cc   : > { %v1673_v35 = vpop.f32.mrf.mxu1  ;;  %v15323_v51 = vpop.f32.mrf.mxu0 }
 0x1cd   : > { %20002 = vst [vmem:[#allocation20_spill] sm:$0xff] %v15323_v51  ;;  %v15325_v56 = vadd.f32 %v1673_v35, %v1501_v43 }
 0x1ce   : > { %v15327_v5 = vpop.f32.mrf.mxu1  ;;  %v1480_v16 = vpop.f32.mrf.mxu0 }
 0x1cf   : > { %20003 = vst [vmem:[#allocation21_spill] sm:$0xff] %v15327_v5  ;;  %v1503_v53 = vadd.f32 %v1480_v16, %v15283_v13 }
 0x1d0   : > { %v1679_v9 = vpop.f32.mrf.mxu1  ;;  %v1482_v34 = vpop.f32.mrf.mxu0 }
 0x1d1   : > { %v15330_v39 = vadd.f32 %v1679_v9, %v1503_v53  ;;  %v1504_v52 = vadd.f32 %v1482_v34, %v15285_v45 }
 0x1d2   : > { %v1681_v28 = vpop.f32.mrf.mxu1  ;;  %v1484_v22 = vpop.f32.mrf.mxu0 }
 0x1d3   : > { %v15333_v59 = vadd.f32 %v1681_v28, %v1504_v52 }
 0x1d4   : > { %v1683_v11 = vpop.f32.mrf.mxu1  ;;  %v1485_v21 = vpop.f32.mrf.mxu0 }
 0x1d6   : > { %v1684_v37 = vpop.f32.mrf.mxu1  ;;  %v1819_v18 = vpop.f32.mrf.mxu0 }
 0x1d7   : > { %v1866_v10 = vadd.f32 %v1819_v18, %v15287_v46 }
 0x1d8   : > { %v1999_v25 = vpop.f32.mrf.mxu1  ;;  %v1821_v0 = vpop.f32.mrf.mxu0 }
 0x1d9   : > { %v15336_v27 = vadd.f32 %v1999_v25, %v1866_v10  ;;  %v1867_v13 = vadd.f32 %v1821_v0, %v15289_v48 }
 0x1da   : > { %v2001_v42 = vpop.f32.mrf.mxu1  ;;  %v1823_v62 = vpop.f32.mrf.mxu0 }
 0x1db   : > { %v15339_v55 = vadd.f32 %v2001_v42, %v1867_v13  ;;  %v1868_v45 = vadd.f32 %v1823_v62, %v15293_v14 }
 0x1dc   : > { %v2003_v32 = vpop.f32.mrf.mxu1  ;;  %v15342_v19 = vpop.f32.mrf.mxu0 }
 0x1dd   : > { %v15344_v63 = vadd.f32 %v2003_v32, %v1868_v45 }
 0x1de   : > { %v15346_v31 = vpop.f32.mrf.mxu1  ;;  %v1829_v46 = vpop.f32.mrf.mxu0 }
 0x1df   : > { %v1870_v57 = vadd.f32 %v1829_v46, %v15297_v44 }
 0x1e0   : > { %v2009_v33 = vpop.f32.mrf.mxu1  ;;  %v1831_v40 = vpop.f32.mrf.mxu0 }
 0x1e1   : > { %v15349_v6 = vadd.f32 %v2009_v33, %v1870_v57  ;;  %v1871_v48 = vadd.f32 %v1831_v40, %v15299_v24 }
 0x1e2   : > { %v2011_v54 = vpop.f32.mrf.mxu1  ;;  %v1833_v50 = vpop.f32.mrf.mxu0 }
 0x1e3   : > { %v15352_v43 = vadd.f32 %v2011_v54, %v1871_v48  ;;  %v1872_v14 = vadd.f32 %v1833_v50, %v15303_v30 }
 0x1e4   : > { %v2013_v35 = vpop.f32.mrf.mxu1  ;;  %v15355_v16 = vpop.f32.mrf.mxu0 }
 0x1e5   : > { %v15357_v53 = vadd.f32 %v2013_v35, %v1872_v14 }
 0x1e6   : > { %v15359_v9 = vpop.f32.mrf.mxu1  ;;  %v1839_v44 = vpop.f32.mrf.mxu0 }
 0x1e7   : > { %v1874_v34 = vadd.f32 %v1839_v44, %v15307_v1 }
 0x1e8   : > { %v2019_v52 = vpop.f32.mrf.mxu1  ;;  %v1841_v28 = vpop.f32.mrf.mxu0 }
 0x1e9   : > { %v15362_v22 = vadd.f32 %v2019_v52, %v1874_v34  ;;  %v1875_v24 = vadd.f32 %v1841_v28, %v15309_v41 }
 0x1ea   : > { %v2021_v11 = vpop.f32.mrf.mxu1  ;;  %v1843_v21 = vpop.f32.mrf.mxu0 }
 0x1eb   : > { %v15365_v37 = vadd.f32 %v2021_v11, %v1875_v24  ;;  %v1876_v30 = vadd.f32 %v1843_v21, %v15313_v20 }
 0x1ec   : > { %v2023_v18 = vpop.f32.mrf.mxu1  ;;  %v15368_v10 = vpop.f32.mrf.mxu0 }
 0x1ed   : > { %20004 = vst [vmem:[#allocation22_spill] sm:$0xff] %v15368_v10  ;;  %v15370_v25 = vadd.f32 %v2023_v18, %v1876_v30 }
 0x1ee   : > { %v15372_v0 = vpop.f32.mrf.mxu1  ;;  %v1849_v1 = vpop.f32.mrf.mxu0 }
 0x1ef   : > { %20005 = vst [vmem:[#allocation23_spill] sm:$0xff] %v15372_v0  ;;  %v1878_v13 = vadd.f32 %v1849_v1, %v15317_v60  ;;  %v1266_v0 = vadd.f32 %v15265_v47, %v15263_v8 }
 0x1f0   : > { %v2029_v42 = vpop.f32.mrf.mxu1  ;;  %v1851_v62 = vpop.f32.mrf.mxu0 }
 0x1f1   : > { %v2058_v45 = vadd.f32 %v2029_v42, %v1878_v13  ;;  %v1879_v41 = vadd.f32 %v1851_v62, %v15320_v2  ;;  %v1490_v36 = vadd.f32 %v15291_v12, %v1266_v0 }
 0x1f2   : > { %v2031_v32 = vpop.f32.mrf.mxu1  ;;  %v1853_v46 = vpop.f32.mrf.mxu0 }
 0x1f3   : > { %v2059_v57 = vadd.f32 %v2031_v32, %v1879_v41  ;;  %v1880_v20 = vadd.f32 %v1853_v46, %v15325_v56  ;;  %v1689_v8 = vadd.f32 %v15295_v26, %v1490_v36 }
 0x1f4   : > { %v2033_v33 = vpop.f32.mrf.mxu1  ;;  %v15377_v40 = vpop.f32.mrf.mxu0 }
 0x1f5   : > { %20006 = vst [vmem:[#allocation24_spill] sm:$0xff] %v15377_v40  ;;  %v2060_v48 = vadd.f32 %v2033_v33, %v1880_v20  ;;  %v1869_v12 = vadd.f32 %v15342_v19, %v1689_v8 }
 0x1f6   : > { %v15379_v54 = vpop.f32.mrf.mxu1  ;;  %v1859_v50 = vpop.f32.mrf.mxu0 }
 0x1f7   : > { %20007 = vst [vmem:[#allocation25_spill] sm:$0xff] %v15379_v54  ;;  %v1882_v14 = vadd.f32 %v1859_v50, %v15330_v39  ;;  %v2049_v19 = vadd.f32 %v15346_v31, %v1869_v12 }
 0x1f8   : > { %v2039_v60 = vpop.f32.mrf.mxu1  ;;  %v1861_v35 = vpop.f32.mrf.mxu0 }
 0x1f9   : > { %v2062_v44 = vadd.f32 %v2039_v60, %v1882_v14  ;;  %v1883_v34 = vadd.f32 %v1861_v35, %v15333_v59 }
 0x1fa   : > { %v2041_v2 = vpop.f32.mrf.mxu1  ;;  %v1863_v52 = vpop.f32.mrf.mxu0 }
 0x1fb   : > { %v2063_v28 = vadd.f32 %v2041_v2, %v1883_v34 }
 0x1fc   : > { %v2043_v24 = vpop.f32.mrf.mxu1  ;;  %v1864_v11 = vpop.f32.mrf.mxu0 }
 0x1fe   : > { %v2044_v56 = vpop.f32.mrf.mxu1  ;;  %v2198_v21 = vpop.f32.mrf.mxu0 }
 0x200   : > { %v2397_v30 = vpop.f32.mrf.mxu1  ;;  %v2200_v18 = vpop.f32.mrf.mxu0 }
 0x201   : > { %v2246_v26 = vadd.f32 %v2200_v18, %v15339_v55 }
 0x202   : > { %v2399_v1 = vpop.f32.mrf.mxu1  ;;  %v2202_v13 = vpop.f32.mrf.mxu0 }
 0x203   : > { %v2247_v8 = vadd.f32 %v2202_v13, %v15344_v63  ;;  %v2445_v18 = vadd.f32 %v2399_v1, %v2246_v26 }
 0x204   : > { %v15383_v42 = vpop.f32.mrf.mxu1  ;;  %v2204_v62 = vpop.f32.mrf.mxu0 }
 0x206   : > { %v15385_v39 = vpop.f32.mrf.mxu1  ;;  %v15387_v41 = vpop.f32.mrf.mxu0 }
 0x208   : > { %v15389_v32 = vpop.f32.mrf.mxu1  ;;  %v15391_v59 = vpop.f32.mrf.mxu0 }
 0x20a   : > { %v15393_v46 = vpop.f32.mrf.mxu1  ;;  %v15395_v20 = vpop.f32.mrf.mxu0 }
 0x20c   : > { %v15397_v33 = vpop.f32.mrf.mxu1  ;;  %v15399_v50 = vpop.f32.mrf.mxu0 }
 0x20e   : > { %v15401_v14 = vpop.f32.mrf.mxu1  ;;  %v15403_v60 = vpop.f32.mrf.mxu0 }
 0x210   : > { %v15405_v35 = vpop.f32.mrf.mxu1  ;;  %v15407_v34 = vpop.f32.mrf.mxu0 }
 0x212   : > { %v15409_v2 = vpop.f32.mrf.mxu1  ;;  %v15411_v52 = vpop.f32.mrf.mxu0 }
 0x214   : > { %v15413_v24 = vpop.f32.mrf.mxu1  ;;  %v15415_v11 = vpop.f32.mrf.mxu0 }
 0x215   : > { %20008 = vst [vmem:[#allocation26_spill] sm:$0xff] %v15415_v11 }
 0x216   : > { %v15417_v56 = vpop.f32.mrf.mxu1  ;;  %v2228_v7 = vpop.f32.mrf.mxu0 }
 0x217   : > { %20009 = vst [vmem:[#allocation27_spill] sm:$0xff] %v15417_v56  ;;  %v2257_v54 = vadd.f32 %v2228_v7, %v2058_v45 }
 0x218   : > { %v2427_v40 = vpop.f32.mrf.mxu1  ;;  %v2230_v5 = vpop.f32.mrf.mxu0 }
 0x219   : > { %v15421_v51 = vadd.f32 %v2427_v40, %v2257_v54  ;;  %v2258_v38 = vadd.f32 %v2230_v5, %v2059_v57  ;;  %v19881_v57 = vsub.s32 0, %v14462_v29 }
 0x21a   : > { %v2429_v4 = vpop.f32.mrf.mxu1  ;;  %v2232_v10 = vpop.f32.mrf.mxu0 }
 0x21b   : > { %v15424_v17 = vadd.f32 %v2429_v4, %v2258_v38  ;;  %v2259_v61 = vadd.f32 %v2232_v10, %v2060_v48  ;;  %v2245_v4 = vadd.f32 %v2198_v21, %v15336_v27  ;;  %v2642_v48 = vld [vmem:[%s19858_s5] sm:$0x3] }
 0x21c   : > { %v2431_v11 = vpop.f32.mrf.mxu1  ;;  %v15426_v15 = vpop.f32.mrf.mxu0 }
 0x21d   : > { %v15428_v56 = vadd.f32 %v2431_v11, %v2259_v61  ;;  %v2444_v27 = vadd.f32 %v2397_v30, %v2245_v4 }
 0x21e   : > { %v15430_v7 = vpop.f32.mrf.mxu1  ;;  %v2238_v45 = vpop.f32.mrf.mxu0 }
 0x21f   : > { %v2261_v47 = vadd.f32 %v2238_v45, %v2062_v44  ;;  %v19880_v44 = vsub.s32 1, %v14462_v29  ;;  %v1276_v45 = vadd.f32 %v15269_v49, %v15267_v3  ;;  %v2249_v3 = vadd.f32 %v15387_v41, %v15349_v6 }
 0x220   : > { %v2437_v40 = vpop.f32.mrf.mxu1  ;;  %v2240_v5 = vpop.f32.mrf.mxu0 }
 0x221   : > { %v15436_v38 = vadd.f32 %v2437_v40, %v2261_v47  ;;  %v2262_v10 = vadd.f32 %v2240_v5, %v2063_v28  ;;  %v15448_v28 = vrot.slane %v2642_v48, %v19881_v57  ;;  %v2248_v47 = vadd.f32 %v2204_v62, %v2049_v19 }
 0x222   : > { %v2439_v0 = vpop.f32.mrf.mxu1  ;;  %v2242_v61 = vpop.f32.mrf.mxu0  ;;  %v15455_v5 = vrot.slane %v2642_v48, %v19880_v44  ;;  %v1494_v30 = vadd.f32 %v15301_v23, %v1276_v45 }
 0x223   : > { %v15442_v36 = vadd.f32 %v2439_v0, %v2262_v10  ;;  %v2446_v10 = vadd.f32 %v15383_v42, %v2247_v8  ;;  %v2447_v63 = vadd.f32 %v15385_v39, %v2248_v47  ;;  %v2448_v61 = vadd.f32 %v15389_v32, %v2249_v3 }
 0x224   : > { %v2441_v54 = vpop.f32.mrf.mxu1  ;;  %v2243_v11 = vpop.f32.mrf.mxu0  ;;  %v1693_v23 = vadd.f32 %v15305_v58, %v1494_v30  ;;  %v2250_v42 = vadd.f32 %v15391_v59, %v15352_v43  ;;  %v2251_v58 = vadd.f32 %v15395_v20, %v15357_v53 }
 0x226   : > { %v2442_v21 = vpop.f32.mrf.mxu1  ;;  %v2577_v55 = vpop.f32.mrf.mxu0  ;;  %v1873_v41 = vadd.f32 %v15355_v16, %v1693_v23  ;;  %v2449_v32 = vadd.f32 %v15393_v46, %v2250_v42  ;;  %v2450_v11 = vadd.f32 %v15397_v33, %v2251_v58  ;;  %v2255_v23 = vadd.f32 %v15411_v52, %v15370_v25 }
 0x227   : > { %v2624_v40 = vadd.f32 %v2577_v55, %v2444_v27 }
 0x228   : > { %v2579_v31 = vpop.f32.mrf.mxu0  ;;  %v2053_v59 = vadd.f32 %v15359_v9, %v1873_v41  ;;  %v2454_v25 = vadd.f32 %v15413_v24, %v2255_v23 }
 0x229   : > { %v15459_v12 = vadd.f32 %v15448_v28, %v2624_v40  ;;  %v2625_v4 = vadd.f32 %v2579_v31, %v2445_v18 }
 0x22a   : > { %v2581_v49 = vpop.f32.mrf.mxu0  ;;  %v2252_v53 = vadd.f32 %v15399_v50, %v2053_v59 }
 0x22b   : > { %13562 = vtanh.f32 %v15459_v12  ;;  %v15467_v1 = vadd.f32 %v15455_v5, %v2625_v4  ;;  %v2626_v13 = vadd.f32 %v2581_v49, %v2446_v10 }
 0x22c   : > { %v2583_v62 = vpop.f32.mrf.mxu0  ;;  %v2451_v8 = vadd.f32 %v15401_v14, %v2252_v53  ;;  %v2253_v14 = vadd.f32 %v15403_v60, %v15362_v22  ;;  %v2254_v22 = vadd.f32 %v15407_v34, %v15365_v37  ;;  %v20015_v53 = vld [vmem:[#allocation18_spill] sm:$0xff] }
 0x22d   : > { %v2627_v0 = vadd.f32 %v2583_v62, %v2447_v63  ;;  %13564 = vtanh.f32 %v15467_v1  ;;  %v15475_v6 = vadd.f32 %v15448_v28, %v2626_v13 }
 0x22e   : > { %v2587_v39 = vpop.f32.mrf.mxu0  ;;  %v2452_v62 = vadd.f32 %v15405_v35, %v2253_v14  ;;  %v2453_v35 = vadd.f32 %v15409_v2, %v2254_v22  ;;  %v20020_v14 = vld [vmem:[#allocation20_spill] sm:$0xff] }
 0x22f   : > { %v15479_v48 = vadd.f32 %v15455_v5, %v2627_v0  ;;  %v2628_v26 = vadd.f32 %v2587_v39, %v2448_v61  ;;  %13566 = vtanh.f32 %v15475_v6 }
 0x230   : > { %v2589_v54 = vpop.f32.mrf.mxu0 }
 0x231   : > { %13568 = vtanh.f32 %v15479_v48  ;;  %v15489_v16 = vadd.f32 %v15448_v28, %v2628_v26  ;;  %v2629_v19 = vadd.f32 %v2589_v54, %v2449_v32 }
 0x232   : > { %v2591_v43 = vpop.f32.mrf.mxu0 }
 0x233   : > { %v2630_v20 = vadd.f32 %v2591_v43, %v2450_v11  ;;  %13570 = vtanh.f32 %v15489_v16  ;;  %v15494_v46 = vadd.f32 %v15455_v5, %v2629_v19  ;;  %v20014_v19 = vld [vmem:[#allocation15_spill] sm:$0xff] }
 0x234   : > { %v2593_v27 = vpop.f32.mrf.mxu0 }
 0x235   : > { %v15499_v33 = vadd.f32 %v15448_v28, %v2630_v20  ;;  %v2631_v50 = vadd.f32 %v2593_v27, %v2451_v8  ;;  %13572 = vtanh.f32 %v15494_v46  ;;  %v20017_v8 = vld [vmem:[#allocation22_spill] sm:$0xff] }
 0x236   : > { %v2597_v21 = vpop.f32.mrf.mxu0 }
 0x237   : > { %13574 = vtanh.f32 %v15499_v33  ;;  %v15509_v30 = vadd.f32 %v15455_v5, %v2631_v50  ;;  %v2632_v0 = vadd.f32 %v2597_v21, %v2452_v62  ;;  %v20019_v50 = vld [vmem:[#allocation17_spill] sm:$0xff] }
 0x238   : > { %v13563_v45 = vpop.eup %13562  ;;  %v2599_v9 = vpop.f32.mrf.mxu0  ;;  %v20023_v62 = vld [vmem:[#allocation21_spill] sm:$0xff] }
 0x239   : > { %2852 = vrot.lane.b32.xlu0 %v13563_v45, %s14070_s20  ;;  %20010 = vst [vmem:[#allocation28_spill] sm:$0xff] %v15509_v30  ;;  %13576 = vtanh.f32 %v15509_v30  ;;  %v15536_v52 = vadd.f32 %v15448_v28, %v2632_v0  ;;  %v2633_v58 = vadd.f32 %v2599_v9, %v2453_v35  ;;  %v20016_v45 = vld [vmem:[#allocation19_spill] sm:$0xff]  ;;  %v20026_v35 = vld [vmem:[#allocation25_spill] sm:$0xff] }
 0x23a   : > { %v2601_v55 = vpop.f32.mrf.mxu0  ;;  %v13565_v18 = vpop.eup %13564  ;;  %v20025_v0 = vld [vmem:[#allocation27_spill] sm:$0xff] }
 0x23b   : > { %3077 = vrot.lane.b32.xlu1 %v13565_v18, %s14070_s20  ;;  %v2634_v54 = vadd.f32 %v2601_v55, %v2454_v25  ;;  %13578 = vtanh.f32 %v15536_v52  ;;  %v15546_v24 = vadd.f32 %v15455_v5, %v2633_v58  ;;  %v20018_v18 = vld [vmem:[#allocation16_spill] sm:$0xff] }
 0x23c   : > { %v15503_v47 = vpop.f32.mrf.mxu0  ;;  %v13567_v31 = vpop.eup %13566 }
 0x23d   : > { %20012 = vst [vmem:[#allocation30_spill] sm:$0xff] %v15546_v24  ;;  %v15552_v59 = vadd.f32 %v15448_v28, %v2634_v54  ;;  %13580 = vtanh.f32 %v15546_v24 }
 0x23e   : > { %v2607_v40 = vpop.f32.mrf.mxu0  ;;  %v13569_v10 = vpop.eup %13568 }
 0x23f   : > { %v2636_v4 = vadd.f32 %v2607_v40, %v15421_v51  ;;  %2854 = vrot.lane.b32.xlu1 %v13567_v31, %s14070_s20  ;;  %3079 = vrot.lane.b32.xlu0 %v13569_v10, %s14070_s20  ;;  %13582 = vtanh.f32 %v15552_v59  ;;  %v1296_v40 = vadd.f32 %v20019_v50, %v20018_v18  ;;  %v20021_v10 = vld [vmem:[#allocation23_spill] sm:$0xff]  ;;  %v11107_v18 = vmul.f32 -1.442695, %v15499_v33  ;;  %v833_v50 = vld [vmem:[#allocation3 + $0x10] sm:$0xff] }
 0x240   : > { %v2609_v3 = vpop.f32.mrf.mxu0  ;;  %v13571_v60 = vpop.eup %13570 }
 0x241   : > { %v15514_v49 = vadd.f32 %v15448_v28, %v2636_v4  ;;  %v2637_v63 = vadd.f32 %v2609_v3, %v15424_v17  ;;  %v1502_v4 = vadd.f32 %v20020_v14, %v1296_v40  ;;  %v836_v40 = vld [vmem:[#allocation3 + $0x28] sm:$0xff]  ;;  %v754_v14 = vld [vmem:[%s20029_s29 + $0x20] sm:$0xff] }
 0x242   : > { %v2611_v13 = vpop.f32.mrf.mxu0  ;;  %v13573_v41 = vpop.eup %13572 }
 0x243   : > { %v15525_v61 = vadd.f32 %v15455_v5, %v2637_v63  ;;  %v2638_v42 = vadd.f32 %v2611_v13, %v15428_v56  ;;  %2856 = vrot.lane.b32.xlu0 %v13571_v60, %s14070_s20  ;;  %v20022_v63 = vld [vmem:[#allocation26_spill] sm:$0xff]  ;;  %v1701_v22 = vadd.f32 %v20023_v62, %v1502_v4  ;;  %v20024_v60 = vld [vmem:[#allocation24_spill] sm:$0xff] }
 0x244   : > { %v2613_v51 = vpop.f32.mrf.mxu0  ;;  %v13575_v26 = vpop.eup %13574 }
 0x245   : > { %20011 = vst [vmem:[#allocation29_spill] sm:$0xff] %v15525_v61  ;;  %v15531_v37 = vadd.f32 %v15448_v28, %v2638_v42  ;;  %2858 = vrot.lane.b32.xlu1 %v13575_v26, %s14070_s20  ;;  %v1881_v23 = vadd.f32 %v20024_v60, %v1701_v22 }
 0x246   : > { %v2617_v17 = vpop.f32.mrf.mxu0  ;;  %v13577_v11 = vpop.eup %13576 }
 0x247   : > { %v2640_v34 = vadd.f32 %v2617_v17, %v15436_v38  ;;  %3081 = vrot.lane.b32.xlu0 %v13573_v41, %s14070_s20 }
 0x248   : > { %v2619_v39 = vpop.f32.mrf.mxu0  ;;  %v13579_v21 = vpop.eup %13578 }
 0x249   : > { %v15540_v2 = vadd.f32 %v15448_v28, %v2640_v34  ;;  %v2641_v32 = vadd.f32 %v2619_v39, %v15442_v36  ;;  %3083 = vrot.lane.b32.xlu1 %v13577_v11, %s14070_s20  ;;  %v20013_v36 = vld [vmem:[#allocation14_spill] sm:$0xff]  ;;  %v2061_v34 = vadd.f32 %v20026_v35, %v1881_v23 }
 0x24a   : > { %v2621_v56 = vpop.f32.mrf.mxu0  ;;  %v1286_v27 = vadd.f32 %v20014_v19, %v20013_v36  ;;  %v13581_v55 = vpop.eup %13580  ;;  %v751_v36 = vld [vmem:[%s20029_s29 + $0x8] sm:$0xff] }
 0x24b   : > { %v15549_v43 = vadd.f32 %v15455_v5, %v2641_v32  ;;  %2860 = vrot.lane.b32.xlu0 %v13579_v21, %s14070_s20  ;;  %13584 = vtanh.f32 %v15540_v2  ;;  %v2260_v39 = vadd.f32 %v15426_v15, %v2061_v34  ;;  %v831_v32 = vld [vmem:[#allocation3] sm:$0xff]  ;;  %v832_v21 = vld [vmem:[#allocation3 + $0x8] sm:$0xff] }
 0x24c   : > { %v2622_v38 = vpop.f32.mrf.mxu0  ;;  %v1498_v20 = vadd.f32 %v20015_v53, %v1286_v27  ;;  %v13583_v31 = vpop.eup %13582  ;;  %13586 = vtanh.f32 %v15514_v49  ;;  %v839_v19 = vld [vmem:[#allocation3 + $0x40] sm:$0xff]  ;;  %v11105_v27 = vmul.f32 -1.442695, %v15475_v6  ;;  %v758_v53 = vld [vmem:[%s20029_s29 + $0x40] sm:$0xff] }
 0x24d   : > { %2862 = vrot.lane.b32.xlu1 %v13583_v31, %s14070_s20  ;;  %13588 = vtanh.f32 %v15549_v43  ;;  %v2459_v25 = vadd.f32 %v15430_v7, %v2260_v39  ;;  %v11104_v38 = vmul.f32 -1.442695, %v15459_v12 }
 0x24e   : > { %v1697_v9 = vadd.f32 %v20016_v45, %v1498_v20  ;;  %v753_v20 = vld [vmem:[%s20029_s29 + $0x18] sm:$0xff]  ;;  %v834_v45 = vld [vmem:[#allocation3 + $0x18] sm:$0xff] }
 0x24f   : > { %3085 = vrot.lane.b32.xlu0 %v13581_v55, %s14070_s20 }
 0x250   : > { %v1877_v28 = vadd.f32 %v20017_v8, %v1697_v9  ;;  %v11106_v9 = vmul.f32 -1.442695, %v15489_v16  ;;  %v752_v8 = vld [vmem:[%s20029_s29 + $0x10] sm:$0xff] }
 0x252   : > { %v2057_v3 = vadd.f32 %v20021_v10, %v1877_v28  ;;  %v755_v28 = vld [vmem:[%s20029_s29 + $0x28] sm:$0xff] }
 0x254   : > { %v2256_v13 = vadd.f32 %v20022_v63, %v2057_v3  ;;  %v835_v3 = vld [vmem:[#allocation3 + $0x20] sm:$0xff] }
 0x256   : > { %v2455_v42 = vadd.f32 %v20025_v0, %v2256_v13 }
 0x258   : > { %v2635_v17 = vadd.f32 %v15503_v47, %v2455_v42  ;;  %v2639_v47 = vadd.f32 %v2613_v51, %v2459_v25  ;;  %v13585_v15 = vpop.eup %13584  ;;  %v11109_v42 = vmul.f32 -1.442695, %v15552_v59 }
 0x259   : > { %2868 = vrot.lane.b32.xlu0 %v13585_v15, %s14070_s20  ;;  %v13587_v56 = vpop.eup %13586 }
 0x25a   : > { %v15578_v41 = vadd.f32 %v15455_v5, %v2635_v17  ;;  %v15587_v58 = vadd.f32 %v15455_v5, %v2639_v47  ;;  %v13589_v26 = vpop.eup %13588  ;;  %v750_v5 = vld [vmem:[%s20029_s29] sm:$0xff] }
 0x25b   : > { %3093 = vrot.lane.b32.xlu1 %v13589_v26, %s14070_s20 }
 0x25c   : > { %20027 = vst [vmem:[#allocation14_spill] sm:$0xff] %v15578_v41  ;;  %13590 = vtanh.f32 %v15578_v41  ;;  %20028 = vst [vmem:[#allocation15_spill] sm:$0xff] %v15587_v58 }
 0x25d   : > { %13592 = vtanh.f32 %v15525_v61  ;;  %2864 = vrot.lane.b32.xlu0 %v13587_v56, %s14070_s20 }
 0x25e   : > { %13594 = vtanh.f32 %v15531_v37 }
 0x25f   : > { %13596 = vtanh.f32 %v15587_v58 }
 0x260   : > { %13598 = vpow2.f32 %v11104_v38 }
 0x261   : > { %13600 = vpow2.f32 %v11105_v27 }
 0x262   : > { %13602 = vpow2.f32 %v11106_v9 }
 0x263   : > { %13604 = vpow2.f32 %v11107_v18 }
 0x269   : > { %v13591_v7 = vpop.eup %13590 }
 0x26a   : > { %v13593_v54 = vpop.eup %13592  ;;  %3087 = vrot.lane.b32.xlu1 %v13591_v7, %s14070_s20 }
 0x26b   : > { %3089 = vrot.lane.b32.xlu0 %v13593_v54, %s14070_s20  ;;  %v13595_v51 = vpop.eup %13594 }
 0x26c   : > { %v13597_v11 = vpop.eup %13596 }
 0x26d   : > { %v13599_v55 = vpop.eup %13598 }
 0x26e   : > { %2866 = vrot.lane.b32.xlu1 %v13595_v51, %s14070_s20  ;;  %v2699_v31 = vadd.f32 1.0, %v13599_v55  ;;  %v13601_v4 = vpop.eup %13600  ;;  %v11111_v55 = vmul.f32 -1.442695, %v15531_v37 }
 0x26f   : > { %2935 = vperm.xlu0 %13074, %v750_v5   ;;  %v2700_v10 = vadd.f32 1.0, %v13601_v4  ;;  %v13603_v63 = vpop.eup %13602 }
 0x270   : > { %13606 = vrcp.f32 %v2699_v31  ;;  %v2701_v13 = vadd.f32 1.0, %v13603_v63  ;;  %v13605_v62 = vpop.eup %13604 }
 0x271   : > { %13608 = vrcp.f32 %v2700_v10  ;;  %v2702_v0 = vadd.f32 1.0, %v13605_v62 }
 0x272   : > { %3091 = vrot.lane.b32.xlu1 %v13597_v11, %s14070_s20  ;;  %13610 = vrcp.f32 %v2701_v13 }
 0x273   : > { %2807 = vrot.lane.b32.xlu0 %v831_v32, %s14071_s0  ;;  %13612 = vrcp.f32 %v2702_v0 }
 0x274   : > { %13614 = vpow2.f32 %v11109_v42 }
 0x276   : > { %2940 = vperm.xlu1 %13075, %v751_v36  }
 0x277   : > { %2823 = vrot.lane.b32.xlu0 %v839_v19, %s14071_s0 }
 0x27a   : > { %2975 = vperm.xlu1 %13075, %v758_v53   ;;  %v11112_v53 = vmul.f32 -1.442695, %v15540_v2 }
 0x27b   : > { %2950 = vperm.xlu0 %13074, %v753_v20   ;;  %v11108_v20 = vmul.f32 -1.442695, %v15536_v52 }
 0x27d   : > { %v13607_v22 = vpop.eup %13606 }
 0x27e   : > { %2809 = vrot.lane.b32.xlu1 %v832_v21, %s14071_s0  ;;  %v13609_v34 = vpop.eup %13608 }
 0x27f   : > { %2813 = vrot.lane.b32.xlu0 %v834_v45, %s14071_s0  ;;  %v13611_v56 = vpop.eup %13610 }
 0x280   : > { %v13613_v51 = vpop.eup %13612 }
 0x281   : > { %v13615_v38 = vpop.eup %13614 }
 0x282   : > { %2945 = vperm.xlu1 %13075, %v752_v8   ;;  %v2704_v36 = vadd.f32 1.0, %v13615_v38 }
 0x283   : > { %2960 = vperm.xlu0 %13074, %v755_v28   ;;  %v11110_v28 = vmul.f32 -1.442695, %v15514_v49 }
 0x284   : > { %13616 = vrcp.f32 %v2704_v36 }
 0x285   : > { %13618 = vpow2.f32 %v11112_v53 }
 0x286   : > { %2811 = vrot.lane.b32.xlu1 %v833_v50, %s14071_s0  ;;  %13620 = vpow2.f32 %v11108_v20 }
 0x287   : > { %2817 = vrot.lane.b32.xlu0 %v836_v40, %s14071_s0  ;;  %13622 = vpow2.f32 %v11110_v28 }
 0x288   : > { %13624 = vpow2.f32 %v11111_v55  ;;  %v2989_v55 = vadd.f32 1.0, %v15494_v46 }
 0x28a   : > { %2955 = vperm.xlu1 %13075, %v754_v14  }
 0x28e   : > { %2815 = vrot.lane.b32.xlu1 %v835_v3, %s14071_s0 }
 0x291   : > { %v13617_v21 = vpop.eup %13616 }
 0x292   : > { %v13619_v8 = vpop.eup %13618 }
 0x293   : > { %v2707_v18 = vadd.f32 1.0, %v13619_v8  ;;  %v13621_v50 = vpop.eup %13620 }
 0x294   : > { %v2703_v40 = vadd.f32 1.0, %v13621_v50  ;;  %v13623_v4 = vpop.eup %13622 }
 0x295   : > { %13626 = vrcp.f32 %v2707_v18  ;;  %v13625_v10 = vpop.eup %13624  ;;  %v2705_v62 = vadd.f32 1.0, %v13623_v4 }
 0x296   : > { %13628 = vrcp.f32 %v2703_v40 }
 0x297   : > { %13630 = vrcp.f32 %v2705_v62 }
 0x2a2   : > { %v13627_v3 = vpop.eup %13626 }
 0x2ab   : > { %v2853_v60 = vpop.permute.xlu0 %2852 }
 0x2ac   : > { %v2879_v23 = vmul.f32 %v13607_v22, %v2853_v60  ;;  %v13629_v60 = vpop.eup %13628 }
 0x2ad   : > { %v3078_v17 = vpop.permute.xlu1 %3077  ;;  %v13631_v36 = vpop.eup %13630 }
 0x2ae   : > { %2897 = vrot.lane.b32.xlu1 %v2879_v23, %s14071_s0  ;;  %v3104_v35 = vmul.f32 %v13607_v22, %v3078_v17  ;;  %v2706_v22 = vadd.f32 1.0, %v13625_v10 }
 0x2b0   : > { %3122 = vrot.lane.b32.xlu0 %v3104_v35, %s14071_s0  ;;  %13632 = vrcp.f32 %v2706_v22 }
 0x2b1   : > { %v2855_v39 = vpop.permute.xlu1 %2854  ;;  %v3080_v47 = vpop.permute.xlu0 %3079 }
 0x2b2   : > { %v2880_v25 = vmul.f32 %v13609_v34, %v2855_v39  ;;  %v3105_v15 = vmul.f32 %v13609_v34, %v3080_v47  ;;  %v757_v47 = vld [vmem:[%s20029_s29 + $0x38] sm:$0xff] }
 0x2b4   : > { %2899 = vrot.lane.b32.xlu0 %v2880_v25, %s14071_s0  ;;  %3124 = vrot.lane.b32.xlu1 %v3105_v15, %s14071_s0  ;;  %v2987_v25 = vadd.f32 1.0, %v15467_v1  ;;  %v756_v15 = vld [vmem:[%s20029_s29 + $0x30] sm:$0xff] }
 0x2b5   : > { %v2857_v26 = vpop.permute.xlu0 %2856 }
 0x2b6   : > { %v2881_v7 = vmul.f32 %v13611_v56, %v2857_v26  ;;  %v11122_v26 = vmul.f32 -1.442695, %v2987_v25 }
 0x2b7   : > { %v2859_v32 = vpop.permute.xlu1 %2858 }
 0x2b8   : > { %2901 = vrot.lane.b32.xlu1 %v2881_v7, %s14071_s0  ;;  %v2882_v11 = vmul.f32 %v13613_v51, %v2859_v32  ;;  %13634 = vpow2.f32 %v11122_v26 }
 0x2b9   : > { %v3082_v54 = vpop.permute.xlu0 %3081 }
 0x2ba   : > { %v3106_v5 = vmul.f32 %v13611_v56, %v3082_v54  ;;  %2903 = vrot.lane.b32.xlu0 %v2882_v11, %s14071_s0  ;;  %v2726_v56 = vadd.f32 1.0, %v15459_v12  ;;  %v838_v54 = vld [vmem:[#allocation3 + $0x38] sm:$0xff]  ;;  %v2727_v11 = vadd.f32 1.0, %v15475_v6  ;;  %v2728_v6 = vadd.f32 1.0, %v15489_v16 }
 0x2bb   : > { %v3084_v19 = vpop.permute.xlu1 %3083  ;;  %v2990_v16 = vadd.f32 1.0, %v15509_v30 }
 0x2bc   : > { %3126 = vrot.lane.b32.xlu1 %v3106_v5, %s14071_s0  ;;  %v3107_v27 = vmul.f32 %v13613_v51, %v3084_v19  ;;  %v837_v5 = vld [vmem:[#allocation3 + $0x30] sm:$0xff]  ;;  %v2988_v51 = vadd.f32 1.0, %v15479_v48  ;;  %v11113_v38 = vmul.f32 -1.442695, %v2726_v56  ;;  %v11115_v18 = vmul.f32 -1.442695, %v2728_v6 }
 0x2bd   : > { %v2861_v31 = vpop.permute.xlu0 %2860  ;;  %v13633_v19 = vpop.eup %13632 }
 0x2be   : > { %3128 = vrot.lane.b32.xlu0 %v3107_v27, %s14071_s0  ;;  %v2883_v0 = vmul.f32 %v13629_v60, %v2861_v31  ;;  %v11123_v12 = vmul.f32 -1.442695, %v2988_v51  ;;  %13636 = vpow2.f32 %v11113_v38  ;;  %v11124_v31 = vmul.f32 -1.442695, %v2989_v55 }
 0x2bf   : > { %v2863_v45 = vpop.permute.xlu1 %2862 }
 0x2c0   : > { %v2884_v9 = vmul.f32 %v13617_v21, %v2863_v45  ;;  %13638 = vpow2.f32 %v11123_v12 }
 0x2c1   : > { %v3086_v14 = vpop.permute.xlu0 %3085 }
 0x2c2   : > { %2907 = vrot.lane.b32.xlu0 %v2884_v9, %s14071_s0  ;;  %v3108_v35 = vmul.f32 %v13629_v60, %v3086_v14 }
 0x2c5   : > { %v13635_v14 = vpop.eup %13634 }
 0x2cb   : > { %v2869_v63 = vpop.permute.xlu0 %2868  ;;  %v13637_v10 = vpop.eup %13636 }
 0x2cc   : > { %v2887_v13 = vmul.f32 %v13627_v3, %v2869_v63  ;;  %v3023_v63 = vadd.f32 1.0, %v13635_v14  ;;  %v2762_v60 = vadd.f32 1.0, %v13637_v10 }
 0x2cd   : > { %v3094_v23 = vpop.permute.xlu1 %3093  ;;  %v13639_v22 = vpop.eup %13638 }
 0x2ce   : > { %2913 = vrot.lane.b32.xlu1 %v2887_v13, %s14071_s0  ;;  %v3112_v42 = vmul.f32 %v13627_v3, %v3094_v23  ;;  %v11125_v13 = vmul.f32 -1.442695, %v2990_v16 }
 0x2cf   : > { %v2865_v39 = vpop.permute.xlu0 %2864 }
 0x2d0   : > { %3138 = vrot.lane.b32.xlu0 %v3112_v42, %s14071_s0  ;;  %v2885_v27 = vmul.f32 %v13631_v36, %v2865_v39 }
 0x2d2   : > { %2905 = vrot.lane.b32.xlu1 %v2883_v0, %s14071_s0  ;;  %v3024_v0 = vadd.f32 1.0, %v13639_v22 }
 0x2d6   : > { %3130 = vrot.lane.b32.xlu1 %v3108_v35, %s14071_s0 }
 0x2da   : > { %2965 = vperm.xlu1 %13075, %v756_v15  }
 0x2dc   : > { %v3088_v17 = vpop.permute.xlu1 %3087 }
 0x2dd   : > { %v3109_v34 = vmul.f32 %v13617_v21, %v3088_v17  ;;  %v3090_v32 = vpop.permute.xlu0 %3089  ;;  %v11114_v21 = vmul.f32 -1.442695, %v2727_v11 }
 0x2de   : > { %2819 = vrot.lane.b32.xlu1 %v837_v5, %s14071_s0  ;;  %v3110_v9 = vmul.f32 %v13631_v36, %v3090_v32 }
 0x2df   : > { %3132 = vrot.lane.b32.xlu0 %v3109_v34, %s14071_s0  ;;  %13640 = vpow2.f32 %v11114_v21 }
 0x2e0   : > { %v2867_v7 = vpop.permute.xlu1 %2866  ;;  %13642 = vpow2.f32 %v11115_v18 }
 0x2e1   : > { %v2886_v53 = vmul.f32 %v13633_v19, %v2867_v7  ;;  %13644 = vpow2.f32 %v11124_v31  ;;  %v2731_v7 = vadd.f32 1.0, %v15552_v59  ;;  %v14013_v31 = vld [vmem:[#allocation4 + $0x8] sm:$0xff] }
 0x2e2   : > { %2909 = vrot.lane.b32.xlu1 %v2885_v27, %s14071_s0  ;;  %13646 = vrcp.f32 %v3023_v63 }
 0x2e3   : > { %2970 = vperm.xlu0 %13074, %v757_v47   ;;  %13648 = vpow2.f32 %v11125_v13  ;;  %v11118_v11 = vmul.f32 -1.442695, %v2731_v7 }
 0x2e4   : > { %v3092_v45 = vpop.permute.xlu1 %3091  ;;  %13650 = vrcp.f32 %v2762_v60  ;;  %v13282_v60 = vld [vmem:[%s19859_s6 + $0x38] sm:$0xff]  }
 0x2e5   : > { %v3111_v8 = vmul.f32 %v13633_v19, %v3092_v45  ;;  %13652 = vrcp.f32 %v3024_v0  ;;  %v14012_v19 = vld [vmem:[#allocation4] sm:$0xff]  ;;  %v19887_v0 = vmov 0.0  }
 0x2e6   : > { %3134 = vrot.lane.b32.xlu1 %v3110_v9, %s14071_s0  ;;  %12171 = vmatprep.subr.bf16.mxu1 %v19887_v0 }
 0x2e7   : > { %2821 = vrot.lane.b32.xlu0 %v838_v54, %s14071_s0  ;;  %12172 = vmatpush3.bf16.msra.mxu1 %v13282_v60 }
 0x2e8   : > { %12199 = vmatprep.subr.bf16.mxu0 %v19887_v0  ;;  %12173 = vmatprep.subr.bf16.mxu1 %v19887_v0 }
 0x2e9   : > { %12179 = vmatprep.mubr.msk.bf16.mxu1 %vm14074_vm14, %v19887_v0  ;;  %12207 = vmatprep.mubr.msk.bf16.mxu0 %vm14074_vm14, %v19887_v0 }
 0x2ea   : > { %v15660_v20 = vpop.permute.xlu0 %2935 }
 0x2eb   : > { %20030 = vst [vmem:[#allocation18_spill] sm:$0xff] %v15660_v20  ;;  %2911 = vrot.lane.b32.xlu0 %v2886_v53, %s14071_s0 }
 0x2ec   : > { %v13641_v23 = vpop.eup %13640 }
 0x2ed   : > { %v2763_v35 = vadd.f32 1.0, %v13641_v23  ;;  %v13643_v34 = vpop.eup %13642 }
 0x2ee   : > { %v2808_v28 = vpop.permute.xlu0 %2807  ;;  %v13645_v25 = vpop.eup %13644  ;;  %v2764_v15 = vadd.f32 1.0, %v13643_v34 }
 0x2ef   : > { %3136 = vrot.lane.b32.xlu0 %v3111_v8, %s14071_s0  ;;  %13654 = vrcp.f32 %v2763_v35  ;;  %v3025_v26 = vadd.f32 1.0, %v13645_v25  ;;  %v13647_v54 = vpop.eup %13646 }
 0x2f0   : > { %13656 = vrcp.f32 %v2764_v15  ;;  %v13649_v32 = vpop.eup %13648  ;;  %v3059_v12 = vmul.f32 %v14012_v19, %v13647_v54  ;;  %v2734_v19 = vadd.f32 1.0, %v15540_v2  ;;  %v2991_v2 = vadd.f32 1.0, %v15546_v24 }
 0x2f1   : > { %v15668_v50 = vpop.permute.xlu1 %2940  ;;  %13658 = vrcp.f32 %v3025_v26  ;;  %v13651_v38 = vpop.eup %13650  ;;  %v3026_v27 = vadd.f32 1.0, %v13649_v32  ;;  %v14014_v26 = vld [vmem:[#allocation4 + $0x10] sm:$0xff] }
 0x2f2   : > { %20031 = vst [vmem:[#allocation19_spill] sm:$0xff] %v15668_v50  ;;  %v15670_v40 = vpop.permute.xlu0 %2823  ;;  %v2834_v36 = vmul.f32 %v13651_v38, %v2808_v28  ;;  %v13653_v45 = vpop.eup %13652  ;;  %13660 = vpow2.f32 %v11118_v11 }
 0x2f3   : > { %13662 = vrcp.f32 %v3026_v27  ;;  %v3060_v14 = vmul.f32 %v14013_v31, %v13653_v45 }
 0x2f5   : > { %v15673_v4 = vpop.permute.xlu1 %2975 }
 0x2f6   : > { %20032 = vst [vmem:[#allocation22_spill] sm:$0xff] %v15673_v4  ;;  %v15675_v3 = vpop.permute.xlu0 %2950 }
 0x2f7   : > { %20033 = vst [vmem:[#allocation16_spill] sm:$0xff] %v15675_v3 }
 0x2f9   : > { %v2810_v62 = vpop.permute.xlu1 %2809 }
 0x2fa   : > { %v15677_v42 = vpop.permute.xlu0 %2813 }
 0x2fc   : > { %v13655_v59 = vpop.eup %13654 }
 0x2fd   : > { %v15679_v17 = vpop.permute.xlu1 %2945  ;;  %v2835_v8 = vmul.f32 %v13655_v59, %v2810_v62  ;;  %v13657_v22 = vpop.eup %13656  ;;  %v11121_v59 = vmul.f32 -1.442695, %v2734_v19 }
 0x2fe   : > { %20034 = vst [vmem:[#allocation17_spill] sm:$0xff] %v15679_v17  ;;  %v15681_v47 = vpop.permute.xlu0 %2960  ;;  %v13659_v35 = vpop.eup %13658 }
 0x2ff   : > { %20035 = vst [vmem:[#allocation20_spill] sm:$0xff] %v15681_v47  ;;  %v3061_v7 = vmul.f32 %v14014_v26, %v13659_v35  ;;  %v13661_v54 = vpop.eup %13660 }
 0x300   : > { %v2767_v27 = vadd.f32 1.0, %v13661_v54 }
 0x301   : > { %v2812_v39 = vpop.permute.xlu1 %2811 }
 0x302   : > { %v15686_v5 = vpop.permute.xlu0 %2817  ;;  %v2836_v23 = vmul.f32 %v13657_v22, %v2812_v39  ;;  %13664 = vrcp.f32 %v2767_v27  ;;  %v13285_v22 = vld [vmem:[%s19859_s6 + $0x28] sm:$0xff]   ;;  %v2733_v27 = vadd.f32 1.0, %v15531_v37 }
 0x303   : > { %13666 = vpow2.f32 %v11121_v59 }
 0x304   : > { %v11120_v59 = vmul.f32 -1.442695, %v2733_v27 }
 0x305   : > { %v15683_v56 = vpop.permute.xlu1 %2955 }
 0x306   : > { %20036 = vst [vmem:[#allocation23_spill] sm:$0xff] %v15683_v56 }
 0x309   : > { %v15688_v51 = vpop.permute.xlu1 %2815 }
 0x320   : > { %v2898_v53 = vpop.permute.xlu1 %2897 }
 0x321   : > { %v2924_v6 = vadd.f32 %v2898_v53, %v2834_v36  ;;  %v13663_v36 = vpop.eup %13662  ;;  %v2995_v53 = vadd.f32 1.0, %v15549_v43 }
 0x322   : > { %v3123_v21 = vpop.permute.xlu0 %3122  ;;  %v13665_v60 = vpop.eup %13664 }
 0x323   : > { %v3149_v9 = vadd.f32 %v3123_v21, %v3059_v12  ;;  %v2978_v55 = vmul.f32 %v15660_v20, %v2924_v6  ;;  %v14015_v21 = vld [vmem:[#allocation4 + $0x18] sm:$0xff]  ;;  %v13283_v6 = vld [vmem:[%s19859_s6 + $0x30] sm:$0xff]   ;;  %v11130_v31 = vmul.f32 -1.442695, %v2995_v53 }
 0x324   : > { %v3062_v45 = vmul.f32 %v14015_v21, %v13663_v36  ;;  %12174 = vmatpush3.bf16.msra.mxu1 %v13283_v6  ;;  %v2732_v36 = vadd.f32 1.0, %v15514_v49  ;;  %v2994_v6 = vadd.f32 1.0, %v15587_v58 }
 0x325   : > { %v3158_v18 = vmul.f32 %v3149_v9, %v15660_v20  ;;  %3176 = vrot.lane.b32.xlu1 %v2978_v55, %s14072_s27  ;;  %v2729_v9 = vadd.f32 1.0, %v15499_v33  ;;  %12175 = vmatprep.subr.bf16.mxu1 %v19887_v0  ;;  %13668 = vpow2.f32 %v11130_v31 }
 0x326   : > { %v2900_v28 = vpop.permute.xlu0 %2899  ;;  %v3125_v16 = vpop.permute.xlu1 %3124  ;;  %v11129_v49 = vmul.f32 -1.442695, %v2994_v6 }
 0x327   : > { %4888 = vst.msk [vmem:[#allocation4] sm:$0xff] %vm3239_vm13, %v3158_v18  ;;  %v2925_v10 = vadd.f32 %v2900_v28, %v2835_v8  ;;  %v3150_v63 = vadd.f32 %v3125_v16, %v3060_v14  ;;  %v11116_v28 = vmul.f32 -1.442695, %v2729_v9  ;;  %v11126_v16 = vmul.f32 -1.442695, %v2991_v2  ;;  %v13287_v2 = vld [vmem:[%s19859_s6 + $0x8] sm:$0xff]  }
 0x328   : > { %12176 = vmatpush3.bf16.msra.mxu1 %v13285_v22 }
 0x329   : > { %v2979_v13 = vmul.f32 %v15668_v50, %v2925_v10  ;;  %v3159_v62 = vmul.f32 %v3150_v63, %v15668_v50  ;;  %v2730_v10 = vadd.f32 1.0, %v15536_v52  ;;  %13670 = vpow2.f32 %v11116_v28  ;;  %v13286_v52 = vld [vmem:[%s19859_s6 + $0x10] sm:$0xff]   ;;  %12177 = vmatprep.subr.bf16.mxu1 %v19887_v0  ;;  %v13289_v28 = vld [vmem:[%s19859_s6] sm:$0xff]  }
 0x32a   : > { %v2902_v34 = vpop.permute.xlu1 %2901  ;;  %13672 = vpow2.f32 %v11126_v16 }
 0x32b   : > { %3178 = vrot.lane.b32.xlu0 %v2979_v13, %s14072_s27  ;;  %4889 = vst.msk [vmem:[#allocation4 + $0x8] sm:$0xff] %vm3239_vm13, %v3159_v62  ;;  %v2926_v25 = vadd.f32 %v2902_v34, %v2836_v23  ;;  %v13076_v15 = vpack.i.bf16 %v3159_v62, %v3158_v18  ;;  %v2992_v18 = vadd.f32 1.0, %v15578_v41  ;;  %v13284_v13 = vld [vmem:[%s19859_s6 + $0x18] sm:$0xff]   ;;  %v11117_v62 = vmul.f32 -1.442695, %v2730_v10  ;;  %v13667_v34 = vpop.eup %13666 }
 0x32c   : > { %v15706_v11 = vpop.permute.xlu0 %2903  ;;  %12200 = vmatpush3.bf16.msra.mxu0 %v13284_v13  ;;  %v2839_v23 = vmul.f32 %v13665_v60, %v15686_v5  ;;  %v2993_v5 = vadd.f32 1.0, %v15525_v61  ;;  %v14016_v13 = vld [vmem:[#allocation4 + $0x40] sm:$0xff] }
 0x32d   : > { %v2980_v32 = vmul.f32 %v15679_v17, %v2926_v25  ;;  %v11127_v63 = vmul.f32 -1.442695, %v2992_v18  ;;  %12201 = vmatprep.subr.bf16.mxu0 %v19887_v0 }
 0x32e   : > { %v3127_v39 = vpop.permute.xlu1 %3126  ;;  %v11128_v9 = vmul.f32 -1.442695, %v2993_v5 }
 0x32f   : > { %13077 = vrot.lane.b32.xlu0 %v13076_v15, %s14071_s0  ;;  %v3151_v38 = vadd.f32 %v3127_v39, %v3061_v7  ;;  %13674 = vpow2.f32 %v11127_v63  ;;  %v2770_v7 = vadd.f32 1.0, %v13667_v34 }
 0x330   : > { %v3129_v8 = vpop.permute.xlu0 %3128  ;;  %13676 = vpow2.f32 %v11117_v62  ;;  %12202 = vmatpush3.bf16.msra.mxu0 %v13286_v52 }
 0x331   : > { %v3160_v12 = vmul.f32 %v3151_v38, %v15679_v17  ;;  %v3152_v55 = vadd.f32 %v3129_v8, %v3062_v45  ;;  %12203 = vmatprep.subr.bf16.mxu0 %v19887_v0  ;;  %13678 = vrcp.f32 %v2770_v7  ;;  %v11119_v45 = vmul.f32 -1.442695, %v2732_v36  ;;  %v14017_v7 = vld [vmem:[#allocation4 + $0x28] sm:$0xff] }
 0x332   : > { %v13669_v15 = vpop.eup %13668 }
 0x333   : > { %3180 = vrot.lane.b32.xlu0 %v2980_v32, %s14072_s27  ;;  %4890 = vst.msk [vmem:[#allocation4 + $0x10] sm:$0xff] %vm3239_vm13, %v3160_v12  ;;  %v3161_v14 = vmul.f32 %v3152_v55, %v15675_v3  ;;  %v3031_v32 = vadd.f32 1.0, %v13669_v15 }
 0x334   : > { %v2908_v35 = vpop.permute.xlu0 %2907  ;;  %12204 = vmatpush3.bf16.msra.mxu0 %v13287_v2 }
 0x335   : > { %4891 = vst.msk [vmem:[#allocation4 + $0x18] sm:$0xff] %vm3239_vm13, %v3161_v14  ;;  %v13081_v33 = vpack.i.bf16 %v3161_v14, %v3160_v12  ;;  %v2929_v25 = vadd.f32 %v2908_v35, %v2839_v23  ;;  %13680 = vrcp.f32 %v3031_v32  ;;  %12205 = vmatprep.subr.bf16.mxu0 %v19887_v0  ;;  %v13288_v14 = vld [vmem:[%s19859_s6 + $0x20] sm:$0xff]  }
 0x336   : > { %v13671_v39 = vpop.eup %13670  ;;  %12178 = vmatpush3.bf16.msra.mxu1 %v13288_v14 }
 0x337   : > { %13082 = vrot.lane.b32.xlu0 %v13081_v33, %s14071_s0  ;;  %v2983_v26 = vmul.f32 %v15681_v47, %v2929_v25  ;;  %v13673_v54 = vpop.eup %13672  ;;  %v2765_v19 = vadd.f32 1.0, %v13671_v39  ;;  %12227 = vmatprep.subr.bf16.mxu1 %v19887_v0 }
 0x338   : > { %v3027_v12 = vadd.f32 1.0, %v13673_v54  ;;  %12206 = vmatpush3.bf16.msra.mxu0 %v13289_v28  ;;  %v14018_v54 = vld [vmem:[#allocation4 + $0x20] sm:$0xff] }
 0x339   : > { %13682 = vrcp.f32 %v2765_v19  ;;  %12255 = vmatprep.subr.bf16.mxu0 %v19887_v0 }
 0x33a   : > { %13684 = vrcp.f32 %v3027_v12 }
 0x33b   : > { %3186 = vrot.lane.b32.xlu0 %v2983_v26, %s14072_s27 }
 0x33c   : > { %v13675_v38 = vpop.eup %13674 }
 0x33d   : > { %v3028_v53 = vadd.f32 1.0, %v13675_v38  ;;  %v13677_v21 = vpop.eup %13676 }
 0x33e   : > { %v2766_v8 = vadd.f32 1.0, %v13677_v21  ;;  %v13679_v37 = vpop.eup %13678 }
 0x33f   : > { %13686 = vrcp.f32 %v3028_v53  ;;  %v2842_v55 = vmul.f32 %v13679_v37, %v15670_v40 }
 0x340   : > { %13688 = vpow2.f32 %v11119_v45  ;;  %v2914_v31 = vpop.permute.xlu1 %2913 }
 0x341   : > { %13690 = vpow2.f32 %v11128_v9  ;;  %v2932_v16 = vadd.f32 %v2914_v31, %v2842_v55 }
 0x342   : > { %13692 = vpow2.f32 %v11120_v59  ;;  %v13681_v18 = vpop.eup %13680  ;;  %v3139_v62 = vpop.permute.xlu0 %3138 }
 0x343   : > { %13694 = vrcp.f32 %v2766_v8  ;;  %v2986_v63 = vmul.f32 %v15673_v4, %v2932_v16  ;;  %v3067_v22 = vmul.f32 %v14016_v13, %v13681_v18 }
 0x344   : > { %13696 = vpow2.f32 %v11129_v49  ;;  %v2906_v52 = vpop.permute.xlu1 %2905 }
 0x345   : > { %v3157_v35 = vadd.f32 %v3139_v62, %v3067_v22  ;;  %3192 = vrot.lane.b32.xlu1 %v2986_v63, %s14072_s27 }
 0x346   : > { %v13683_v33 = vpop.eup %13682 }
 0x347   : > { %v13685_v10 = vpop.eup %13684  ;;  %v2837_v23 = vmul.f32 %v13683_v33, %v15677_v42  ;;  %v3166_v26 = vmul.f32 %v3157_v35, %v15673_v4  ;;  %v14020_v35 = vld [vmem:[#allocation4 + $0x30] sm:$0xff] }
 0x348   : > { %v3063_v32 = vmul.f32 %v14018_v54, %v13685_v10  ;;  %v3131_v19 = vpop.permute.xlu1 %3130 }
 0x349   : > { %v2927_v15 = vadd.f32 %v15706_v11, %v2837_v23  ;;  %4896 = vst.msk [vmem:[#allocation4 + $0x40] sm:$0xff] %vm3239_vm13, %v3166_v26  ;;  %3228 = vrot.lane.b32.xlu1 %v3166_v26, %s14071_s0 }
 0x34a   : > { %v3153_v53 = vadd.f32 %v3131_v19, %v3063_v32 }
 0x34b   : > { %v2981_v45 = vmul.f32 %v15675_v3, %v2927_v15 }
 0x34c   : > { %v13687_v40 = vpop.eup %13686  ;;  %v3162_v59 = vmul.f32 %v3153_v53, %v15683_v56 }
 0x34d   : > { %v13689_v60 = vpop.eup %13688  ;;  %v3064_v39 = vmul.f32 %v14017_v7, %v13687_v40  ;;  %3182 = vrot.lane.b32.xlu1 %v2981_v45, %s14072_s27 }
 0x34e   : > { %v13691_v34 = vpop.eup %13690  ;;  %v2768_v12 = vadd.f32 1.0, %v13689_v60  ;;  %4892 = vst.msk [vmem:[#allocation4 + $0x20] sm:$0xff] %vm3239_vm13, %v3162_v59  ;;  %v14019_v60 = vld [vmem:[#allocation4 + $0x38] sm:$0xff] }
 0x34f   : > { %v13693_v25 = vpop.eup %13692  ;;  %v3029_v11 = vadd.f32 1.0, %v13691_v34 }
 0x350   : > { %v13695_v38 = vpop.eup %13694  ;;  %v2769_v21 = vadd.f32 1.0, %v13693_v25  ;;  %13698 = vrcp.f32 %v2768_v12 }
 0x351   : > { %v3133_v36 = vpop.permute.xlu0 %3132  ;;  %v13697_v5 = vpop.eup %13696  ;;  %v2838_v42 = vmul.f32 %v13695_v38, %v15688_v51 }
 0x352   : > { %v3154_v27 = vadd.f32 %v3133_v36, %v3064_v39  ;;  %v3030_v8 = vadd.f32 1.0, %v13697_v5  ;;  %13700 = vrcp.f32 %v2769_v21 }
 0x353   : > { %v2928_v6 = vadd.f32 %v2906_v52, %v2838_v42  ;;  %13702 = vrcp.f32 %v3029_v11 }
 0x354   : > { %v3163_v9 = vmul.f32 %v3154_v27, %v15681_v47  ;;  %13704 = vrcp.f32 %v3030_v8 }
 0x355   : > { %v2982_v51 = vmul.f32 %v15683_v56, %v2928_v6  ;;  %v15778_v37 = vpop.permute.xlu1 %2965 }
 0x356   : > { %4893 = vst.msk [vmem:[#allocation4 + $0x28] sm:$0xff] %vm3239_vm13, %v3163_v9  ;;  %v13086_v49 = vpack.i.bf16 %v3163_v9, %v3162_v59  ;;  %20038 = vst [vmem:[#allocation21_spill] sm:$0xff] %v15778_v37 }
 0x357   : > { %3184 = vrot.lane.b32.xlu1 %v2982_v51, %s14072_s27 }
 0x359   : > { %v2820_v18 = vpop.permute.xlu1 %2819 }
 0x35b   : > { %13087 = vrot.lane.b32.xlu1 %v13086_v49, %s14071_s0 }
 0x35d   : > { %v13699_v31 = vpop.eup %13698  ;;  %v2910_v13 = vpop.permute.xlu1 %2909 }
 0x35e   : > { %v15776_v2 = vpop.permute.xlu0 %2970  ;;  %v2840_v33 = vmul.f32 %v13699_v31, %v2820_v18 }
 0x35f   : > { %20037 = vst [vmem:[#allocation26_spill] sm:$0xff] %v15776_v2  ;;  %v13701_v14 = vpop.eup %13700 }
 0x360   : > { %v13703_v28 = vpop.eup %13702  ;;  %v2930_v40 = vadd.f32 %v2910_v13, %v2840_v33 }
 0x361   : > { %v13705_v10 = vpop.eup %13704  ;;  %v3065_v34 = vmul.f32 %v14020_v35, %v13703_v28  ;;  %v3135_v15 = vpop.permute.xlu1 %3134 }
 0x362   : > { %v2822_v55 = vpop.permute.xlu0 %2821  ;;  %v2984_v52 = vmul.f32 %v15778_v37, %v2930_v40  ;;  %v3066_v23 = vmul.f32 %v14019_v60, %v13705_v10 }
 0x363   : > { %v2841_v16 = vmul.f32 %v13701_v14, %v2822_v55  ;;  %v3155_v7 = vadd.f32 %v3135_v15, %v3065_v34 }
 0x364   : > { %3188 = vrot.lane.b32.xlu0 %v2984_v52, %s14072_s27 }
 0x365   : > { %v3164_v54 = vmul.f32 %v3155_v7, %v15778_v37 }
 0x366   : > { %v2912_v63 = vpop.permute.xlu0 %2911 }
 0x367   : > { %v2931_v22 = vadd.f32 %v2912_v63, %v2841_v16  ;;  %4894 = vst.msk [vmem:[#allocation4 + $0x30] sm:$0xff] %vm3239_vm13, %v3164_v54 }
 0x369   : > { %v2985_v62 = vmul.f32 %v15776_v2, %v2931_v22 }
 0x36a   : > { %v3137_v25 = vpop.permute.xlu0 %3136 }
 0x36b   : > { %v3156_v26 = vadd.f32 %v3137_v25, %v3066_v23  ;;  %3190 = vrot.lane.b32.xlu1 %v2985_v62, %s14072_s27 }
 0x36d   : > { %v3165_v39 = vmul.f32 %v3156_v26, %v15776_v2 }
 0x36f   : > { %4895 = vst.msk [vmem:[#allocation4 + $0x38] sm:$0xff] %vm3239_vm13, %v3165_v39  ;;  %v13091_v32 = vpack.i.bf16 %v3165_v39, %v3164_v54 }
 0x371   : > { %13092 = vrot.lane.b32.xlu0 %v13091_v32, %s14071_s0 }
 0x397   : > { %v3177_v38 = vpop.permute.xlu1 %3176 }
 0x398   : > { %4879 = vst.msk [vmem:[#allocation3] sm:$0xff] %vm3239_vm13, %v3177_v38 }
 0x39d   : > { %v3179_v36 = vpop.permute.xlu0 %3178 }
 0x39e   : > { %4880 = vst.msk [vmem:[#allocation3 + $0x8] sm:$0xff] %vm3239_vm13, %v3179_v36 }
 0x3a1   : > { %v13078_v19 = vpop.permute.xlu0 %13077 }
 0x3a2   : > { %v13080_v5 = vunpack.i.h.bf16 %v13078_v19  ;;  %v13079_v12 = vunpack.i.l.bf16 %v13078_v19 }
 0x3a4   : > { %v15793_v42 = vsel %vm3239_vm13, %v3179_v36, %v13080_v5  ;;  %v15796_v27 = vsel %vm3239_vm13, %v3177_v38, %v13079_v12 }
 0x3a5   : > { %v3181_v53 = vpop.permute.xlu0 %3180  ;;  %v4108_v11 = vrot.slane %v15793_v42, 5  ;;  %v4260_v21 = vrot.slane %v15793_v42, 6  ;;  %v15803_v45 = vpack.c.bf16 %v15793_v42, %v15796_v27  ;;  %v4107_v6 = vrot.slane %v15796_v27, 5 }
 0x3a6   : > { %4881 = vst.msk [vmem:[#allocation3 + $0x10] sm:$0xff] %vm3239_vm13, %v3181_v53  ;;  %v4259_v9 = vrot.slane %v15796_v27, 6  ;;  %v3250_v55 = vrot.slane %v15793_v42, 1  ;;  %v3249_v18 = vrot.slane %v15796_v27, 1  ;;  %v3688_v31 = vrot.slane %v15793_v42, 7 }
 0x3a7   : > { %v15811_v59 = vsel %vm2073_vm10, %v4107_v6, %v4108_v11  ;;  %v19882_v14 = vrot.slane %v15796_v27, 7  ;;  %v3281_v7 = vrot.slane %v15793_v42, 2  ;;  %v3280_v39 = vrot.slane %v15796_v27, 2 }
 0x3a8   : > { %v15817_v8 = vsel %vm2272_vm11, %v4259_v9, %v4260_v21  ;;  %v15840_v40 = vsel %vm952_vm8, %v3249_v18, %v3250_v55 }
 0x3a9   : > { %v13083_v51 = vpop.permute.xlu0 %13082  ;;  %v15850_v52 = vsel %vm1514_vm9, %v19882_v14, %v3688_v31  ;;  %v3296_v12 = vsel %vm985_vm6, %v3280_v39, %v3281_v7 }
 0x3aa   : > { %v13084_v49 = vunpack.i.l.bf16 %v13083_v51  ;;  %v13085_v19 = vunpack.i.h.bf16 %v13083_v51 }
 0x3ac   : > { %v15824_v28 = vsel %vm3239_vm13, %v3181_v53, %v13084_v49 }
 0x3ad   : > { %v4109_v16 = vrot.slane %v15824_v28, 5  ;;  %v4261_v33 = vrot.slane %v15824_v28, 6  ;;  %v3251_v10 = vrot.slane %v15824_v28, 1  ;;  %v3689_v63 = vrot.slane %v15824_v28, 7  ;;  %v15866_v15 = vpop.permute.xlu0 %3186 }
 0x3ae   : > { %4884 = vst.msk [vmem:[#allocation3 + $0x28] sm:$0xff] %vm3239_vm13, %v15866_v15  ;;  %v3282_v44 = vrot.slane %v15824_v28, 2 }
 0x3af   : > { %v15832_v13 = vsel %vm2073_vm10, %v4108_v11, %v4109_v16  ;;  %v15836_v22 = vsel %vm2272_vm11, %v4260_v21, %v4261_v33  ;;  %v15844_v62 = vsel %vm952_vm8, %v3250_v55, %v3251_v10  ;;  %v15858_v23 = vsel %vm1514_vm9, %v3688_v31, %v3689_v63  ;;  %v13290_v55 = vld [vmem:[%s19859_s6 + $0x58] sm:$0xff]  }
 0x3b0   : > { %v13293_v31 = vld [vmem:[%s19859_s6 + $0x78] sm:$0xff]  }
 0x3b7   : > { %v3193_v26 = vpop.permute.xlu1 %3192 }
 0x3b8   : > { %4887 = vst.msk [vmem:[#allocation3 + $0x40] sm:$0xff] %vm3239_vm13, %v3193_v26 }
 0x3bb   : > { %v3229_v54 = vpop.permute.xlu1 %3228 }
 0x3bc   : > { %v15874_v32 = vsel %vm3239_vm13, %v3193_v26, %v3229_v54 }
 0x3bd   : > { %v19889_v38 = vrot.slane %v15874_v32, 1  ;;  %v19883_v36 = vrot.slane %v15874_v32, 2  ;;  %v19884_v26 = vrot.slane %v15874_v32, 6  ;;  %v3695_v4 = vrot.slane %v15874_v32, 7 }
 0x3bf   : > { %v3183_v5 = vpop.permute.xlu1 %3182  ;;  %v3297_v53 = vsel %vm985_vm6, %v19883_v36, %v3280_v39  ;;  %v15888_v11 = vsel %vm952_vm8, %v19889_v38, %v3249_v18  ;;  %v19885_v18 = vrot.slane %v15874_v32, 5 }
 0x3c0   : > { %v15891_v21 = vsel %vm3239_vm13, %v3183_v5, %v13085_v19  ;;  %4882 = vst.msk [vmem:[#allocation3 + $0x18] sm:$0xff] %vm3239_vm13, %v3183_v5  ;;  %v3298_v51 = vpack.c.bf16 %v3296_v12, %v3297_v53  ;;  %v3267_v49 = vpack.c.bf16 %v15840_v40, %v15888_v11 }
 0x3c1   : > { %v3283_v39 = vrot.slane %v15891_v21, 2  ;;  %v4110_v54 = vrot.slane %v15891_v21, 5  ;;  %v4262_v19 = vrot.slane %v15891_v21, 6  ;;  %v3252_v5 = vrot.slane %v15891_v21, 1 }
 0x3c2   : > { %12180 = vmatmul.mubr.msk.bf16.vlgmr.msra.gmra.mxu1 %vm3336_vm15, %v3298_v51  ;;  %12208 = vmatmul.mubr.msk.bf16.vlgmr.msra.gmra.mxu0 %vm3336_vm15, %v3267_v49  ;;  %v15912_v12 = vpack.c.bf16 %v15891_v21, %v15824_v28  ;;  %v13291_v51 = vld [vmem:[%s19859_s6 + $0x50] sm:$0xff]  }
 0x3c3   : > { %12183 = vmatprep.mubr.msk.bf16.mxu1 %vm14074_vm14, %v19887_v0  ;;  %12211 = vmatprep.mubr.msk.bf16.mxu0 %vm14074_vm14, %v19887_v0  ;;  %v13294_v49 = vld [vmem:[%s19859_s6 + $0x70] sm:$0xff]   ;;  %v3294_v57 = vsel %vm985_vm6, %v3282_v44, %v3283_v39  ;;  %v15930_v34 = vsel %vm952_vm8, %v3251_v10, %v3252_v5  ;;  %v15952_v10 = vsel %vm2073_vm10, %v19885_v18, %v4107_v6  ;;  %v13292_v6 = vld [vmem:[%s19859_s6 + $0x48] sm:$0xff]  }
 0x3c4   : > { %12228 = vmatpush3.bf16.msra.mxu1 %v13290_v55  ;;  %12256 = vmatpush3.bf16.msra.mxu0 %v13293_v31  ;;  %v15938_v55 = vsel %vm2073_vm10, %v4109_v16, %v4110_v54  ;;  %v15944_v31 = vsel %vm2272_vm11, %v4261_v33, %v4262_v19  ;;  %v15960_v16 = vsel %vm2272_vm11, %v19884_v26, %v4259_v9  ;;  %v13296_v9 = vld [vmem:[%s19859_s6 + $0x68] sm:$0xff]  }
 0x3c5   : > { %12229 = vmatprep.subr.bf16.mxu1 %v19887_v0  ;;  %12257 = vmatprep.subr.bf16.mxu0 %v19887_v0  ;;  %v3295_v33 = vsel %vm985_vm6, %v3281_v7, %v3282_v44  ;;  %v3268_v36 = vpack.c.bf16 %v15930_v34, %v15844_v62  ;;  %v3690_v44 = vrot.slane %v15891_v21, 7 }
 0x3c6   : > { %v3299_v14 = vpack.c.bf16 %v3294_v57, %v3295_v33 }
 0x3c8   : > { %12230 = vmatpush3.bf16.msra.mxu1 %v13291_v51  ;;  %12258 = vmatpush3.bf16.msra.mxu0 %v13294_v49 }
 0x3c9   : > { %v3185_v53 = vpop.permute.xlu1 %3184  ;;  %12231 = vmatprep.subr.bf16.mxu1 %v19887_v0  ;;  %12259 = vmatprep.subr.bf16.mxu0 %v19887_v0 }
 0x3ca   : > { %4883 = vst.msk [vmem:[#allocation3 + $0x20] sm:$0xff] %vm3239_vm13, %v3185_v53  ;;  %12184 = vmatmul.mubr.msk.bf16.gmra.mxu1 %vm3336_vm15, %v3299_v14  ;;  %12212 = vmatmul.mubr.msk.bf16.gmra.mxu0 %vm3336_vm15, %v3268_v36  ;;  %v13295_v14 = vld [vmem:[%s19859_s6 + $0x40] sm:$0xff]  }
 0x3cb   : > { %12187 = vmatprep.mubr.msk.bf16.mxu1 %vm14074_vm14, %v19887_v0  ;;  %12215 = vmatprep.mubr.msk.bf16.mxu0 %vm14074_vm14, %v19887_v0 }
 0x3cc   : > { %12232 = vmatpush3.bf16.msra.mxu1 %v13292_v6  ;;  %12260 = vmatpush3.bf16.msra.mxu0 %v13296_v9 }
 0x3cd   : > { %v13088_v25 = vpop.permute.xlu1 %13087  ;;  %12233 = vmatprep.subr.bf16.mxu1 %v19887_v0  ;;  %12261 = vmatprep.subr.bf16.mxu0 %v19887_v0 }
 0x3ce   : > { %v13090_v35 = vunpack.i.h.bf16 %v13088_v25  ;;  %v13089_v60 = vunpack.i.l.bf16 %v13088_v25 }
 0x3d0   : > { %v15976_v57 = vsel %vm3239_vm13, %v3185_v53, %v13089_v60  ;;  %v15980_v25 = vsel %vm3239_vm13, %v15866_v15, %v13090_v35  ;;  %v13297_v35 = vld [vmem:[%s19859_s6 + $0x60] sm:$0xff]   ;;  %12234 = vmatpush3.bf16.msra.mxu1 %v13295_v14 }
 0x3d1   : > { %v3284_v7 = vrot.slane %v15976_v57, 2  ;;  %v3285_v51 = vrot.slane %v15980_v25, 2  ;;  %v3253_v60 = vrot.slane %v15976_v57, 1  ;;  %v3254_v53 = vrot.slane %v15980_v25, 1  ;;  %12262 = vmatpush3.bf16.msra.mxu0 %v13297_v35  ;;  %12283 = vmatprep.subr.bf16.mxu1 %v19887_v0 }
 0x3d2   : > { %v19886_v15 = vrot.slane %v15976_v57, 7  ;;  %v4111_v26 = vrot.slane %v15976_v57, 5  ;;  %12311 = vmatprep.subr.bf16.mxu0 %v19887_v0  ;;  %v4264_v18 = vrot.slane %v15980_v25, 6  ;;  %v3692_v56 = vrot.slane %v15980_v25, 7 }
 0x3d3   : > { %v3292_v36 = vsel %vm985_vm6, %v3284_v7, %v3285_v51  ;;  %v3293_v49 = vsel %vm985_vm6, %v3283_v39, %v3284_v7  ;;  %v16005_v33 = vsel %vm952_vm8, %v3253_v60, %v3254_v53  ;;  %v16009_v6 = vsel %vm952_vm8, %v3252_v5, %v3253_v60 }
 0x3d4   : > { %v16019_v39 = vsel %vm1514_vm9, %v3689_v63, %v3690_v44  ;;  %v16025_v7 = vsel %vm1514_vm9, %v3690_v44, %v19886_v15  ;;  %v16029_v5 = vpack.c.bf16 %v15980_v25, %v15976_v57  ;;  %v3300_v60 = vpack.c.bf16 %v3292_v36, %v3293_v49 }
 0x3d5   : > { %v3269_v9 = vpack.c.bf16 %v16005_v33, %v16009_v6  ;;  %v4263_v63 = vrot.slane %v15976_v57, 6  ;;  %v4112_v44 = vrot.slane %v15980_v25, 5  ;;  %v16047_v14 = vsel %vm2073_vm10, %v4110_v54, %v4111_v26 }
 0x3d6   : > { %12188 = vmatmul.mubr.msk.bf16.gmra.mxu1 %vm3336_vm15, %v3300_v60  ;;  %v3189_v36 = vpop.permute.xlu0 %3188 }
 0x3d7   : > { %12216 = vmatmul.mubr.msk.bf16.gmra.mxu0 %vm3336_vm15, %v3269_v9  ;;  %v16053_v35 = vsel %vm2272_vm11, %v4262_v19, %v4263_v63  ;;  %12191 = vmatprep.mubr.msk.bf16.mxu1 %vm14074_vm14, %v19887_v0  ;;  %v16065_v54 = vsel %vm2073_vm10, %v4111_v26, %v4112_v44  ;;  %v16069_v19 = vsel %vm2272_vm11, %v4263_v63, %v4264_v18 }
 0x3d8   : > { %12219 = vmatprep.mubr.msk.bf16.mxu0 %vm14074_vm14, %v19887_v0  ;;  %4885 = vst.msk [vmem:[#allocation3 + $0x30] sm:$0xff] %vm3239_vm13, %v3189_v36 }
 0x3dd   : > { %v3191_v60 = vpop.permute.xlu1 %3190 }
 0x3de   : > { %4886 = vst.msk [vmem:[#allocation3 + $0x38] sm:$0xff] %vm3239_vm13, %v3191_v60 }
 0x3e3   : > { %v13093_v15 = vpop.permute.xlu0 %13092 }
 0x3e4   : > { %v13095_v0 = vunpack.i.h.bf16 %v13093_v15  ;;  %v13094_v49 = vunpack.i.l.bf16 %v13093_v15 }
 0x3e6   : > { %v16074_v38 = vsel %vm3239_vm13, %v3191_v60, %v13095_v0  ;;  %v16077_v9 = vsel %vm3239_vm13, %v3189_v36, %v13094_v49 }
 0x3e7   : > { %v3286_v26 = vrot.slane %v16077_v9, 2  ;;  %v3287_v37 = vrot.slane %v16074_v38, 2  ;;  %v3255_v63 = vrot.slane %v16077_v9, 1  ;;  %v3256_v2 = vrot.slane %v16074_v38, 1 }
 0x3e8   : > { %v3693_v47 = vrot.slane %v16077_v9, 7  ;;  %v3694_v3 = vrot.slane %v16074_v38, 7  ;;  %v4266_v41 = vrot.slane %v16074_v38, 6 }
 0x3e9   : > { %v3290_v15 = vsel %vm985_vm6, %v3286_v26, %v3287_v37  ;;  %v3291_v0 = vsel %vm985_vm6, %v3285_v51, %v3286_v26  ;;  %v16091_v36 = vsel %vm952_vm8, %v3255_v63, %v3256_v2  ;;  %v16095_v49 = vsel %vm952_vm8, %v3254_v53, %v3255_v63 }
 0x3ea   : > { %v3301_v60 = vpack.c.bf16 %v3290_v15, %v3291_v0  ;;  %v3270_v17 = vpack.c.bf16 %v16091_v36, %v16095_v49  ;;  %v20039_v51 = vrot.slane %v15874_v32, 1  ;;  %v4113_v53 = vrot.slane %v16077_v9, 5 }
 0x3eb   : > { %v20040_v63 = vmov 0.0   ;;  %v20041_v15 = vrot.slane %v15874_v32, 2  ;;  %v16131_v50 = vsel %vm1514_vm9, %v3693_v47, %v3694_v3  ;;  %v16135_v58 = vsel %vm1514_vm9, %v3694_v3, %v3695_v4 }
 0x3ec   : > { %12192 = vmatmul.mubr.msk.bf16.gmra.mxu1 %vm3336_vm15, %v3301_v60  ;;  %12220 = vmatmul.mubr.msk.bf16.gmra.mxu0 %vm3336_vm15, %v3270_v17  ;;  %v16107_v26 = vsel %vm952_vm8, %v3256_v2, %v20039_v51  ;;  %v20042_v17 = vrot.slane %v15976_v57, 7  ;;  %v16126_v2 = vsel %vm1514_vm9, %v3692_v56, %v3693_v47  ;;  %v4265_v51 = vrot.slane %v16077_v9, 6 }
 0x3ed   : > { %12195 = vmatprep.mubr.msk.bf16.mxu1 %vm14074_vm14, %v20040_v63  ;;  %12223 = vmatprep.mubr.msk.bf16.mxu0 %vm14074_vm14, %v20040_v63  ;;  %v3289_v0 = vsel %vm985_vm6, %v3287_v37, %v20041_v15  ;;  %v16141_v15 = vpack.c.bf16 %v16074_v38, %v16077_v9  ;;  %v4114_v3 = vrot.slane %v16074_v38, 5  ;;  %v3271_v61 = vpack.c.bf16 %v16107_v26, %v16107_v26 }
 0x3ee   : > { %v16122_v60 = vsel %vm1514_vm9, %v20042_v17, %v3692_v56  ;;  %v16147_v17 = vsel %vm2073_vm10, %v4112_v44, %v4113_v53  ;;  %v16151_v47 = vsel %vm2272_vm11, %v4264_v18, %v4265_v51  ;;  %v3302_v30 = vpack.c.bf16 %v3289_v0, %v3289_v0 }
 0x3ef   : > { %v20043_v44 = vrot.slane %v15874_v32, 5  ;;  %v16169_v20 = vsel %vm2073_vm10, %v4113_v53, %v4114_v3  ;;  %v20044_v0 = vrot.slane %v15874_v32, 6  ;;  %v3543_v53 = vrot.slane %v15874_v32, 3 }
 0x3f0   : > { %v3536_v37 = vrot.slane %v15793_v42, 3  ;;  %v3535_v56 = vrot.slane %v15796_v27, 3  ;;  %v13298_v42 = vld [vmem:[%s19859_s6 + $0x98] sm:$0xff]  }
 0x3f1   : > { %v16165_v18 = vsel %vm2073_vm10, %v4114_v3, %v20043_v44  ;;  %v16181_v24 = vsel %vm2272_vm11, %v4266_v41, %v20044_v0  ;;  %v16185_v44 = vsel %vm2272_vm11, %v4265_v51, %v4266_v41  ;;  %v20045_v41 = vrot.slane %v15796_v27, 7 }
 0x3f2   : > { %v3538_v3 = vrot.slane %v15891_v21, 3 }
 0x3f3   : > { %v16202_v51 = vsel %vm1514_vm9, %v3695_v4, %v20045_v41  ;;  %v13301_v4 = vld [vmem:[%s19859_s6 + $0xb8] sm:$0xff]   ;;  %v13299_v41 = vld [vmem:[%s19859_s6 + $0x90] sm:$0xff]  }
 0x3f4   : > { %12196 = vmatmul.mubr.msk.bf16.gmra.mxu1 %vm3336_vm15, %v3302_v30  ;;  %12224 = vmatmul.mubr.msk.bf16.gmra.mxu0 %vm3336_vm15, %v3271_v61  ;;  %v3552_v30 = vsel %vm1315_vm12, %v3543_v53, %v3535_v56  ;;  %v3551_v61 = vsel %vm1315_vm12, %v3535_v56, %v3536_v37  ;;  %v3705_v0 = vpack.c.bf16 %v15850_v52, %v16202_v51  ;;  %v3537_v56 = vrot.slane %v15824_v28, 3 }
 0x3f5   : > { %12235 = vmatprep.mubr.msk.bf16.mxu1 %vm14074_vm14, %v20040_v63  ;;  %12263 = vmatprep.mubr.msk.bf16.mxu0 %vm14074_vm14, %v20040_v63  ;;  %v3553_v27 = vpack.c.bf16 %v3551_v61, %v3552_v30  ;;  %v13302_v30 = vld [vmem:[%s19859_s6 + $0xb0] sm:$0xff]  }
 0x3f6   : > { %v3549_v21 = vsel %vm1315_vm12, %v3537_v56, %v3538_v3  ;;  %v3550_v28 = vsel %vm1315_vm12, %v3536_v37, %v3537_v56  ;;  %v13304_v37 = vld [vmem:[%s19859_s6 + $0xa8] sm:$0xff]  }
 0x3f7   : > { %v3554_v61 = vpack.c.bf16 %v3549_v21, %v3550_v28  ;;  %v3541_v28 = vrot.slane %v16077_v9, 3 }
 0x3fc   : > { %12236 = vmatmul.mubr.msk.bf16.vlgmr.msra.gmra.mxu1 %vm3336_vm15, %v3553_v27  ;;  %12264 = vmatmul.mubr.msk.bf16.vlgmr.msra.gmra.mxu0 %vm3336_vm15, %v3705_v0  ;;  %v13300_v0 = vld [vmem:[%s19859_s6 + $0x88] sm:$0xff]   ;;  %v3539_v27 = vrot.slane %v15976_v57, 3  ;;  %v13303_v57 = vld [vmem:[%s19859_s6 + $0x80] sm:$0xff]  }
 0x3fd   : > { %12284 = vmatpush3.bf16.msra.mxu1 %v13298_v42  ;;  %12239 = vmatprep.mubr.msk.bf16.mxu1 %vm14074_vm14, %v20040_v63  ;;  %v3706_v42 = vpack.c.bf16 %v16019_v39, %v15858_v23 }
 0x3fe   : > { %12267 = vmatprep.mubr.msk.bf16.mxu0 %vm14074_vm14, %v20040_v63  ;;  %12285 = vmatprep.subr.bf16.mxu1 %v20040_v63  ;;  %v3548_v56 = vsel %vm1315_vm12, %v3538_v3, %v3539_v27 }
 0x3ff   : > { %12312 = vmatpush3.bf16.msra.mxu0 %v13301_v4  ;;  %v3540_v4 = vrot.slane %v15980_v25, 3 }
 0x400   : > { %12313 = vmatprep.subr.bf16.mxu0 %v20040_v63 }
 0x401   : > { %12286 = vmatpush3.bf16.msra.mxu1 %v13299_v41  ;;  %v3547_v25 = vsel %vm1315_vm12, %v3539_v27, %v3540_v4  ;;  %v13305_v41 = vld [vmem:[%s19859_s6 + $0xa0] sm:$0xff]  }
 0x402   : > { %12287 = vmatprep.subr.bf16.mxu1 %v20040_v63  ;;  %v3555_v21 = vpack.c.bf16 %v3547_v25, %v3548_v56  ;;  %v13307_v25 = vld [vmem:[%s19859_s6 + $0xd0] sm:$0xff]   ;;  %v13312_v56 = vld [vmem:[%s19859_s6 + $0xe8] sm:$0xff]  }
 0x403   : > { %12314 = vmatpush3.bf16.msra.mxu0 %v13302_v30  ;;  %v3707_v30 = vpack.c.bf16 %v16122_v60, %v16025_v7 }
 0x404   : > { %12240 = vmatmul.mubr.msk.bf16.gmra.mxu1 %vm3336_vm15, %v3554_v61  ;;  %12268 = vmatmul.mubr.msk.bf16.gmra.mxu0 %vm3336_vm15, %v3706_v42  ;;  %v3542_v61 = vrot.slane %v16074_v38, 3  ;;  %v3546_v38 = vsel %vm1315_vm12, %v3540_v4, %v3541_v28  ;;  %v3708_v42 = vpack.c.bf16 %v16131_v50, %v16126_v2  ;;  %v3709_v4 = vpack.c.bf16 %v16135_v58, %v16135_v58 }
 0x405   : > { %12243 = vmatprep.mubr.msk.bf16.mxu1 %vm14074_vm14, %v20040_v63  ;;  %12271 = vmatprep.mubr.msk.bf16.mxu0 %vm14074_vm14, %v20040_v63 }
 0x406   : > { %12288 = vmatpush3.bf16.msra.mxu1 %v13300_v0  ;;  %12315 = vmatprep.subr.bf16.mxu0 %v20040_v63  ;;  %v3545_v9 = vsel %vm1315_vm12, %v3541_v28, %v3542_v61  ;;  %v3544_v0 = vsel %vm1315_vm12, %v3542_v61, %v3543_v53  ;;  %v13309_v53 = vld [vmem:[%s19859_s6 + $0xf8] sm:$0xff]   ;;  %v13315_v28 = vld [vmem:[%s19859_s6 + $0x110] sm:$0xff]   ;;  %v20053_v61 = vpack.c.bf16 %v16053_v35, %v15944_v31 }
 0x407   : > { %12289 = vmatprep.subr.bf16.mxu1 %v20040_v63  ;;  %12316 = vmatpush3.bf16.msra.mxu0 %v13304_v37  ;;  %v3556_v3 = vpack.c.bf16 %v3545_v9, %v3546_v38  ;;  %v3557_v27 = vpack.c.bf16 %v3544_v0, %v3544_v0  ;;  %v13306_v37 = vld [vmem:[%s19859_s6 + $0xd8] sm:$0xff]   ;;  %v13319_v9 = vld [vmem:[%s19859_s6 + $0x100] sm:$0xff]   ;;  %v20054_v31 = vpack.c.bf16 %v16147_v17, %v16065_v54 }
 0x408   : > { %12317 = vmatprep.subr.bf16.mxu0 %v20040_v63  ;;  %v20056_v35 = vpack.c.bf16 %v16165_v18, %v16169_v20  ;;  %v20057_v54 = vpack.c.bf16 %v16181_v24, %v16185_v44  ;;  %v4281_v17 = vpack.c.bf16 %v15960_v16, %v15960_v16  ;;  %v20058_v24 = vpack.c.bf16 %v15858_v23, %v15850_v52 }
 0x409   : > { %v20059_v20 = vpack.c.bf16 %v16025_v7, %v16019_v39 }
 0x40a   : > { %12290 = vmatpush3.bf16.msra.mxu1 %v13303_v57  ;;  %v20046_v57 = vpack.c.bf16 %v15844_v62, %v15840_v40  ;;  %v13310_v40 = vld [vmem:[%s19859_s6 + $0xf0] sm:$0xff]   ;;  %v13308_v62 = vld [vmem:[%s19859_s6 + $0xc8] sm:$0xff]  }
 0x40b   : > { %12318 = vmatpush3.bf16.msra.mxu0 %v13305_v41  ;;  %12339 = vmatprep.subr.bf16.mxu1 %v20040_v63  ;;  %v20047_v41 = vpack.c.bf16 %v16009_v6, %v15930_v34  ;;  %v13313_v34 = vld [vmem:[%s19859_s6 + $0xe0] sm:$0xff]   ;;  %v20048_v6 = vpack.c.bf16 %v16095_v49, %v16005_v33  ;;  %v16378_v33 = vpack.c.bf16 %v15874_v32, %v15874_v32  ;;  %v13317_v32 = vld [vmem:[%s19861_s8 + $0x18] sm:$0xff]  }
 0x40c   : > { %12244 = vmatmul.mubr.msk.bf16.gmra.mxu1 %vm3336_vm15, %v3555_v21  ;;  %12272 = vmatmul.mubr.msk.bf16.gmra.mxu0 %vm3336_vm15, %v3707_v30  ;;  %v13311_v21 = vld [vmem:[%s19859_s6 + $0xc0] sm:$0xff]   ;;  %v20049_v30 = vpack.c.bf16 %v16107_v26, %v16091_v36  ;;  %v3977_v49 = vpack.c.bf16 %v15888_v11, %v15888_v11  ;;  %v13314_v36 = vld [vmem:[%s19859_s6 + $0x118] sm:$0xff]   ;;  %v20050_v11 = vpack.c.bf16 %v15832_v13, %v15811_v59  ;;  %v13318_v59 = vld [vmem:[%s19861_s8 + $0x10] sm:$0xff]  }
 0x40d   : > { %12247 = vmatprep.mubr.msk.bf16.mxu1 %vm14074_vm14, %v20040_v63  ;;  %12275 = vmatprep.mubr.msk.bf16.mxu0 %vm14074_vm14, %v20040_v63  ;;  %v20051_v26 = vpack.c.bf16 %v15836_v22, %v15817_v8  ;;  %v13316_v8 = vld [vmem:[%s19859_s6 + $0x108] sm:$0xff]   ;;  %v20052_v22 = vpack.c.bf16 %v16047_v14, %v15938_v55  ;;  %v13321_v55 = vld [vmem:[%s19861_s8] sm:$0xff]   ;;  %v20055_v14 = vpack.c.bf16 %v16151_v47, %v16069_v19 }
 0x40e   : > { %12367 = vmatprep.subr.bf16.mxu0 %v20040_v63  ;;  %v13320_v13 = vld [vmem:[%s19861_s8 + $0x8] sm:$0xff]   ;;  %v4129_v19 = vpack.c.bf16 %v15952_v10, %v15952_v10  ;;  %v20061_v10 = vpack.c.bf16 %v16135_v58, %v16131_v50  ;;  %v4415_v58 = vpack.c.bf16 %v16202_v51, %v16202_v51 }
 0x414   : > { %12248 = vmatmul.mubr.msk.bf16.gmra.mxu1 %vm3336_vm15, %v3556_v3  ;;  %12276 = vmatmul.mubr.msk.bf16.gmra.mxu0 %vm3336_vm15, %v3708_v42 }
 0x415   : > { %12251 = vmatprep.mubr.msk.bf16.mxu1 %vm14074_vm14, %v20040_v63  ;;  %12279 = vmatprep.mubr.msk.bf16.mxu0 %vm14074_vm14, %v20040_v63 }
 0x41c   : > { %12252 = vmatmul.mubr.msk.bf16.gmra.mxu1 %vm3336_vm15, %v3557_v27  ;;  %12280 = vmatmul.mubr.msk.bf16.gmra.mxu0 %vm3336_vm15, %v3709_v4 }
 0x41d   : > { %12291 = vmatprep.mubr.msk.bf16.mxu1 %vm14074_vm14, %v20040_v63  ;;  %12319 = vmatprep.mubr.msk.bf16.mxu0 %vm14074_vm14, %v20040_v63 }
 0x424   : > { %12292 = vmatmul.mubr.msk.bf16.vlgmr.msra.gmra.mxu1 %vm3336_vm15, %v15803_v45  ;;  %12320 = vmatmul.mubr.msk.bf16.vlgmr.msra.gmra.mxu0 %vm3336_vm15, %v20046_v57 }
 0x425   : > { %12340 = vmatpush3.bf16.msra.mxu1 %v13306_v37  ;;  %12295 = vmatprep.mubr.msk.bf16.mxu1 %vm14074_vm14, %v20040_v63 }
 0x426   : > { %12323 = vmatprep.mubr.msk.bf16.mxu0 %vm14074_vm14, %v20040_v63  ;;  %12341 = vmatprep.subr.bf16.mxu1 %v20040_v63 }
 0x427   : > { %12368 = vmatpush3.bf16.msra.mxu0 %v13309_v53 }
 0x428   : > { %12369 = vmatprep.subr.bf16.mxu0 %v20040_v63 }
 0x429   : > { %12342 = vmatpush3.bf16.msra.mxu1 %v13307_v25 }
 0x42a   : > { %12343 = vmatprep.subr.bf16.mxu1 %v20040_v63 }
 0x42b   : > { %12370 = vmatpush3.bf16.msra.mxu0 %v13310_v40 }
 0x42c   : > { %12296 = vmatmul.mubr.msk.bf16.gmra.mxu1 %vm3336_vm15, %v15912_v12  ;;  %12324 = vmatmul.mubr.msk.bf16.gmra.mxu0 %vm3336_vm15, %v20047_v41 }
 0x42d   : > { %12299 = vmatprep.mubr.msk.bf16.mxu1 %vm14074_vm14, %v20040_v63  ;;  %12327 = vmatprep.mubr.msk.bf16.mxu0 %vm14074_vm14, %v20040_v63 }
 0x42e   : > { %12344 = vmatpush3.bf16.msra.mxu1 %v13308_v62  ;;  %12371 = vmatprep.subr.bf16.mxu0 %v20040_v63 }
 0x42f   : > { %12345 = vmatprep.subr.bf16.mxu1 %v20040_v63  ;;  %12372 = vmatpush3.bf16.msra.mxu0 %v13312_v56 }
 0x430   : > { %12373 = vmatprep.subr.bf16.mxu0 %v20040_v63 }
 0x432   : > { %12346 = vmatpush3.bf16.msra.mxu1 %v13311_v21 }
 0x433   : > { %12374 = vmatpush3.bf16.msra.mxu0 %v13313_v34  ;;  %12395 = vmatprep.subr.bf16.mxu1 %v20040_v63 }
 0x434   : > { %12300 = vmatmul.mubr.msk.bf16.gmra.mxu1 %vm3336_vm15, %v16029_v5  ;;  %12328 = vmatmul.mubr.msk.bf16.gmra.mxu0 %vm3336_vm15, %v20048_v6 }
 0x435   : > { %12303 = vmatprep.mubr.msk.bf16.mxu1 %vm14074_vm14, %v20040_v63  ;;  %12331 = vmatprep.mubr.msk.bf16.mxu0 %vm14074_vm14, %v20040_v63 }
 0x436   : > { %12423 = vmatprep.subr.bf16.mxu0 %v20040_v63 }
 0x43c   : > { %12304 = vmatmul.mubr.msk.bf16.gmra.mxu1 %vm3336_vm15, %v16141_v15  ;;  %12332 = vmatmul.mubr.msk.bf16.gmra.mxu0 %vm3336_vm15, %v20049_v30 }
 0x43d   : > { %12307 = vmatprep.mubr.msk.bf16.mxu1 %vm14074_vm14, %v20040_v63  ;;  %12335 = vmatprep.mubr.msk.bf16.mxu0 %vm14074_vm14, %v20040_v63 }
 0x444   : > { %12308 = vmatmul.mubr.msk.bf16.gmra.mxu1 %vm3336_vm15, %v16378_v33  ;;  %12336 = vmatmul.mubr.msk.bf16.gmra.mxu0 %vm3336_vm15, %v3977_v49 }
 0x445   : > { %12347 = vmatprep.mubr.msk.bf16.mxu1 %vm14074_vm14, %v20040_v63  ;;  %12375 = vmatprep.mubr.msk.bf16.mxu0 %vm14074_vm14, %v20040_v63 }
 0x44c   : > { %12348 = vmatmul.mubr.msk.bf16.vlgmr.msra.gmra.mxu1 %vm3336_vm15, %v20050_v11  ;;  %12376 = vmatmul.mubr.msk.bf16.vlgmr.msra.gmra.mxu0 %vm3336_vm15, %v20051_v26 }
 0x44d   : > { %12396 = vmatpush3.bf16.msra.mxu1 %v13314_v36  ;;  %12351 = vmatprep.mubr.msk.bf16.mxu1 %vm14074_vm14, %v20040_v63 }
 0x44e   : > { %12379 = vmatprep.mubr.msk.bf16.mxu0 %vm14074_vm14, %v20040_v63  ;;  %12397 = vmatprep.subr.bf16.mxu1 %v20040_v63 }
 0x44f   : > { %12424 = vmatpush3.bf16.msra.mxu0 %v13317_v32 }
 0x450   : > { %12425 = vmatprep.subr.bf16.mxu0 %v20040_v63 }
 0x451   : > { %12398 = vmatpush3.bf16.msra.mxu1 %v13315_v28 }
 0x452   : > { %12399 = vmatprep.subr.bf16.mxu1 %v20040_v63 }
 0x453   : > { %12426 = vmatpush3.bf16.msra.mxu0 %v13318_v59 }
 0x454   : > { %12352 = vmatmul.mubr.msk.bf16.gmra.mxu1 %vm3336_vm15, %v20052_v22  ;;  %12380 = vmatmul.mubr.msk.bf16.gmra.mxu0 %vm3336_vm15, %v20053_v61 }
 0x455   : > { %12355 = vmatprep.mubr.msk.bf16.mxu1 %vm14074_vm14, %v20040_v63  ;;  %12383 = vmatprep.mubr.msk.bf16.mxu0 %vm14074_vm14, %v20040_v63 }
 0x456   : > { %12400 = vmatpush3.bf16.msra.mxu1 %v13316_v8  ;;  %12427 = vmatprep.subr.bf16.mxu0 %v20040_v63 }
 0x457   : > { %12401 = vmatprep.subr.bf16.mxu1 %v20040_v63  ;;  %12428 = vmatpush3.bf16.msra.mxu0 %v13320_v13 }
 0x458   : > { %12429 = vmatprep.subr.bf16.mxu0 %v20040_v63 }
 0x45a   : > { %12402 = vmatpush3.bf16.msra.mxu1 %v13319_v9 }
 0x45b   : > { %12430 = vmatpush3.bf16.msra.mxu0 %v13321_v55  ;;  %12451 = vmatprep.subr.bf16.mxu1 %v20040_v63 }
 0x45c   : > { %12356 = vmatmul.mubr.msk.bf16.gmra.mxu1 %vm3336_vm15, %v20054_v31  ;;  %12384 = vmatmul.mubr.msk.bf16.gmra.mxu0 %vm3336_vm15, %v20055_v14 }
 0x45d   : > { %12359 = vmatprep.mubr.msk.bf16.mxu1 %vm14074_vm14, %v20040_v63  ;;  %12387 = vmatprep.mubr.msk.bf16.mxu0 %vm14074_vm14, %v20040_v63 }
 0x45e   : > { %12479 = vmatprep.subr.bf16.mxu0 %v20040_v63 }
 0x464   : > { %12360 = vmatmul.mubr.msk.bf16.gmra.mxu1 %vm3336_vm15, %v20056_v35  ;;  %12388 = vmatmul.mubr.msk.bf16.gmra.mxu0 %vm3336_vm15, %v20057_v54 }
 0x465   : > { %12363 = vmatprep.mubr.msk.bf16.mxu1 %vm14074_vm14, %v20040_v63  ;;  %12391 = vmatprep.mubr.msk.bf16.mxu0 %vm14074_vm14, %v20040_v63 }
 0x46c   : > { %12364 = vmatmul.mubr.msk.bf16.gmra.mxu1 %vm3336_vm15, %v4129_v19  ;;  %12392 = vmatmul.mubr.msk.bf16.gmra.mxu0 %vm3336_vm15, %v4281_v17 }
 0x46d   : > { %12403 = vmatprep.mubr.msk.bf16.mxu1 %vm14074_vm14, %v20040_v63  ;;  %12431 = vmatprep.mubr.msk.bf16.mxu0 %vm14074_vm14, %v20040_v63 }
 0x474   : > { %12404 = vmatmul.mubr.msk.bf16.vlgmr.msra.gmra.mxu1 %vm3336_vm15, %v20058_v24  ;;  %12432 = vmatmul.mubr.msk.bf16.vlgmr.msra.gmra.mxu0 %vm3336_vm15, %v15803_v45  ;;  %v20060_v45 = vpack.c.bf16 %v16126_v2, %v16122_v60 }
 0x475   : > { %12407 = vmatprep.mubr.msk.bf16.mxu1 %vm14074_vm14, %v20040_v63  ;;  %12435 = vmatprep.mubr.msk.bf16.mxu0 %vm14074_vm14, %v20040_v63 }
 0x47c   : > { %12408 = vmatmul.mubr.msk.bf16.gmra.mxu1 %vm3336_vm15, %v20059_v20  ;;  %12436 = vmatmul.mubr.msk.bf16.gmra.mxu0 %vm3336_vm15, %v15912_v12 }
 0x47d   : > { %12411 = vmatprep.mubr.msk.bf16.mxu1 %vm14074_vm14, %v20040_v63  ;;  %12439 = vmatprep.mubr.msk.bf16.mxu0 %vm14074_vm14, %v20040_v63 }
 0x482   : > { %v3386_v52 = vpop.f32.mrf.mxu1  ;;  %v3497_v23 = vpop.f32.mrf.mxu0 }
 0x483   : > { %v3498_v12 = vadd.f32 %v3497_v23, %v3386_v52 }
 0x484   : > { %12412 = vmatmul.mubr.msk.bf16.gmra.mxu1 %vm3336_vm15, %v20060_v45  ;;  %12440 = vmatmul.mubr.msk.bf16.gmra.mxu0 %vm3336_vm15, %v16029_v5  ;;  %v12181_v16 = vpop.f32.mrf.mxu1  ;;  %v12209_v39 = vpop.f32.mrf.mxu0 }
 0x485   : > { %12415 = vmatprep.mubr.msk.bf16.mxu1 %vm14074_vm14, %v20040_v63  ;;  %12443 = vmatprep.mubr.msk.bf16.mxu0 %vm14074_vm14, %v20040_v63 }
 0x486   : > { %v3389_v7 = vpop.f32.mrf.mxu1  ;;  %v3500_v5 = vpop.f32.mrf.mxu0 }
 0x487   : > { %v3501_v60 = vadd.f32 %v3500_v5, %v3389_v7 }
 0x488   : > { %v12182_v2 = vpop.f32.mrf.mxu1  ;;  %v12210_v47 = vpop.f32.mrf.mxu0 }
 0x48a   : > { %v3394_v50 = vpop.f32.mrf.mxu1  ;;  %v3505_v18 = vpop.f32.mrf.mxu0 }
 0x48b   : > { %v3506_v44 = vadd.f32 %v3505_v18, %v3394_v50 }
 0x48c   : > { %12416 = vmatmul.mubr.msk.bf16.gmra.mxu1 %vm3336_vm15, %v20061_v10  ;;  %12444 = vmatmul.mubr.msk.bf16.gmra.mxu0 %vm3336_vm15, %v16141_v15  ;;  %v12185_v15 = vpop.f32.mrf.mxu1  ;;  %v12213_v38 = vpop.f32.mrf.mxu0 }
 0x48d   : > { %12419 = vmatprep.mubr.msk.bf16.mxu1 %vm14074_vm14, %v20040_v63  ;;  %12447 = vmatprep.mubr.msk.bf16.mxu0 %vm14074_vm14, %v20040_v63 }
 0x48e   : > { %v3397_v3 = vpop.f32.mrf.mxu1  ;;  %v3508_v42 = vpop.f32.mrf.mxu0 }
 0x48f   : > { %v3509_v0 = vadd.f32 %v3508_v42, %v3397_v3 }
 0x490   : > { %v12186_v51 = vpop.f32.mrf.mxu1  ;;  %v12214_v27 = vpop.f32.mrf.mxu0 }
 0x494   : > { %12420 = vmatmul.mubr.msk.bf16.gmra.mxu1 %vm3336_vm15, %v4415_v58  ;;  %12448 = vmatmul.mubr.msk.bf16.gmra.mxu0 %vm3336_vm15, %v16378_v33 }
 0x495   : > { %12459 = vmatprep.mubr.msk.bf16.mxu1 %vm14074_vm14, %v20040_v63  ;;  %12487 = vmatprep.mubr.msk.bf16.mxu0 %vm14074_vm14, %v20040_v63 }
 0x496   : > { %v3402_v4 = vpop.f32.mrf.mxu1 }
 0x497   : > { %v3513_v37 = vpop.f32.mrf.mxu0 }
 0x498   : > { %v3514_v53 = vadd.f32 %v3513_v37, %v3402_v4  ;;  %v12189_v57 = vpop.f32.mrf.mxu1 }
 0x499   : > { %v12217_v25 = vpop.f32.mrf.mxu0 }
 0x49a   : > { %v3405_v40 = vpop.f32.mrf.mxu1 }
 0x49b   : > { %v3516_v62 = vpop.f32.mrf.mxu0 }
 0x49c   : > { %v3517_v56 = vadd.f32 %v3516_v62, %v3405_v40  ;;  %v12190_v41 = vpop.f32.mrf.mxu1 }
 0x49d   : > { %v12218_v21 = vpop.f32.mrf.mxu0 }
 0x4ac   : > { %v3410_v34 = vpop.f32.mrf.mxu1  ;;  %v3521_v6 = vpop.f32.mrf.mxu0 }
 0x4ad   : > { %v3522_v30 = vadd.f32 %v3521_v6, %v3410_v34 }
 0x4ae   : > { %v12193_v33 = vpop.f32.mrf.mxu1  ;;  %v12221_v49 = vpop.f32.mrf.mxu0 }
 0x4b0   : > { %v3413_v36 = vpop.f32.mrf.mxu1  ;;  %v3524_v32 = vpop.f32.mrf.mxu0 }
 0x4b1   : > { %v3525_v11 = vadd.f32 %v3524_v32, %v3413_v36 }
 0x4b2   : > { %v12194_v26 = vpop.f32.mrf.mxu1  ;;  %v12222_v28 = vpop.f32.mrf.mxu0 }
 0x4b4   : > { %v3418_v59 = vpop.f32.mrf.mxu1  ;;  %v3529_v8 = vpop.f32.mrf.mxu0 }
 0x4b5   : > { %v3530_v13 = vadd.f32 %v3529_v8, %v3418_v59 }
 0x4b6   : > { %v12197_v22 = vpop.f32.mrf.mxu1  ;;  %v12225_v61 = vpop.f32.mrf.mxu0 }
 0x4b8   : > { %v3421_v9 = vpop.f32.mrf.mxu1  ;;  %v3532_v55 = vpop.f32.mrf.mxu0 }
 0x4ba   : > { %v12198_v31 = vpop.f32.mrf.mxu1  ;;  %v12226_v14 = vpop.f32.mrf.mxu0 }
 0x4bc   : > { %v3640_v35 = vpop.f32.mrf.mxu1  ;;  %v3792_v54 = vpop.f32.mrf.mxu0 }
 0x4bd   : > { %v3678_v19 = vadd.f32 %v3640_v35, %v3498_v12 }
 0x4be   : > { %v12237_v17 = vpop.f32.mrf.mxu1  ;;  %v12265_v24 = vpop.f32.mrf.mxu0 }
 0x4bf   : > { %v3830_v20 = vadd.f32 %v3792_v54, %v3678_v19 }
 0x4c0   : > { %v3643_v45 = vpop.f32.mrf.mxu1  ;;  %v3795_v52 = vpop.f32.mrf.mxu0 }
 0x4c1   : > { %v3679_v23 = vadd.f32 %v3643_v45, %v3501_v60 }
 0x4c2   : > { %v12238_v10 = vpop.f32.mrf.mxu1  ;;  %v12266_v16 = vpop.f32.mrf.mxu0 }
 0x4c3   : > { %v3831_v39 = vadd.f32 %v3795_v52, %v3679_v23 }
 0x4c4   : > { %v3648_v7 = vpop.f32.mrf.mxu1  ;;  %v3800_v5 = vpop.f32.mrf.mxu0 }
 0x4c5   : > { %v3680_v2 = vadd.f32 %v3648_v7, %v3506_v44 }
 0x4c6   : > { %v12241_v47 = vpop.f32.mrf.mxu1  ;;  %v12269_v58 = vpop.f32.mrf.mxu0 }
 0x4c7   : > { %v3832_v50 = vadd.f32 %v3800_v5, %v3680_v2 }
 0x4c8   : > { %v3651_v18 = vpop.f32.mrf.mxu1  ;;  %v3803_v15 = vpop.f32.mrf.mxu0 }
 0x4c9   : > { %v3681_v38 = vadd.f32 %v3651_v18, %v3509_v0 }
 0x4ca   : > { %v12242_v3 = vpop.f32.mrf.mxu1  ;;  %v12270_v12 = vpop.f32.mrf.mxu0 }
 0x4cb   : > { %v3833_v42 = vadd.f32 %v3803_v15, %v3681_v38 }
 0x4cc   : > { %v3656_v51 = vpop.f32.mrf.mxu1  ;;  %v3808_v27 = vpop.f32.mrf.mxu0 }
 0x4cd   : > { %v3682_v4 = vadd.f32 %v3656_v51, %v3514_v53 }
 0x4ce   : > { %v12245_v37 = vpop.f32.mrf.mxu1  ;;  %v12273_v60 = vpop.f32.mrf.mxu0 }
 0x4cf   : > { %v3834_v57 = vadd.f32 %v3808_v27, %v3682_v4 }
 0x4d0   : > { %v3659_v25 = vpop.f32.mrf.mxu1  ;;  %v3811_v40 = vpop.f32.mrf.mxu0 }
 0x4d1   : > { %v3683_v62 = vadd.f32 %v3659_v25, %v3517_v56 }
 0x4d2   : > { %v12246_v41 = vpop.f32.mrf.mxu1  ;;  %v12274_v44 = vpop.f32.mrf.mxu0 }
 0x4d3   : > { %v3835_v21 = vadd.f32 %v3811_v40, %v3683_v62 }
 0x4d4   : > { %v3664_v34 = vpop.f32.mrf.mxu1  ;;  %v3816_v6 = vpop.f32.mrf.mxu0 }
 0x4d5   : > { %v3684_v33 = vadd.f32 %v3664_v34, %v3522_v30 }
 0x4d6   : > { %v12249_v49 = vpop.f32.mrf.mxu1  ;;  %v12277_v0 = vpop.f32.mrf.mxu0 }
 0x4d7   : > { %v3836_v36 = vadd.f32 %v3816_v6, %v3684_v33 }
 0x4d8   : > { %v3667_v32 = vpop.f32.mrf.mxu1  ;;  %v3819_v26 = vpop.f32.mrf.mxu0 }
 0x4d9   : > { %v3685_v28 = vadd.f32 %v3667_v32, %v3525_v11 }
 0x4da   : > { %v12250_v59 = vpop.f32.mrf.mxu1  ;;  %v12278_v53 = vpop.f32.mrf.mxu0 }
 0x4db   : > { %v3837_v8 = vadd.f32 %v3819_v26, %v3685_v28 }
 0x4dc   : > { %v3672_v22 = vpop.f32.mrf.mxu1  ;;  %v3824_v61 = vpop.f32.mrf.mxu0 }
 0x4dd   : > { %v3686_v9 = vadd.f32 %v3672_v22, %v3530_v13 }
 0x4de   : > { %v12253_v55 = vpop.f32.mrf.mxu1  ;;  %v12281_v56 = vpop.f32.mrf.mxu0 }
 0x4df   : > { %v3838_v31 = vadd.f32 %v3824_v61, %v3686_v9 }
 0x4e0   : > { %v3675_v14 = vpop.f32.mrf.mxu1  ;;  %v3827_v35 = vpop.f32.mrf.mxu0 }
 0x4e2   : > { %v12254_v54 = vpop.f32.mrf.mxu1  ;;  %v12282_v19 = vpop.f32.mrf.mxu0 }
 0x4e4   : > { %v3926_v30 = vpop.f32.mrf.mxu1  ;;  %v4060_v17 = vpop.f32.mrf.mxu0 }
 0x4e5   : > { %v3964_v24 = vadd.f32 %v3926_v30, %v3830_v20 }
 0x4e6   : > { %v12293_v45 = vpop.f32.mrf.mxu1  ;;  %v12321_v52 = vpop.f32.mrf.mxu0 }
 0x4e7   : > { %v16528_v23 = vadd.f32 %v4060_v17, %v3964_v24 }
 0x4e8   : > { %v3929_v11 = vpop.f32.mrf.mxu1  ;;  %v4063_v10 = vpop.f32.mrf.mxu0 }
 0x4e9   : > { %v3965_v16 = vadd.f32 %v3929_v11, %v3831_v39 }
 0x4ea   : > { %v12294_v7 = vpop.f32.mrf.mxu1  ;;  %v12322_v5 = vpop.f32.mrf.mxu0 }
 0x4eb   : > { %v16530_v13 = vadd.f32 %v4063_v10, %v3965_v16 }
 0x4ec   : > { %v3934_v2 = vpop.f32.mrf.mxu1  ;;  %v4068_v47 = vpop.f32.mrf.mxu0 }
 0x4ed   : > { %v3966_v58 = vadd.f32 %v3934_v2, %v3832_v50 }
 0x4ee   : > { %v12297_v18 = vpop.f32.mrf.mxu1  ;;  %v12325_v15 = vpop.f32.mrf.mxu0 }
 0x4ef   : > { %v16532_v38 = vadd.f32 %v4068_v47, %v3966_v58 }
 0x4f0   : > { %v3937_v3 = vpop.f32.mrf.mxu1  ;;  %v4071_v20 = vpop.f32.mrf.mxu0 }
 0x4f1   : > { %v3967_v12 = vadd.f32 %v3937_v3, %v3833_v42 }
 0x4f2   : > { %v12298_v51 = vpop.f32.mrf.mxu1  ;;  %v12326_v27 = vpop.f32.mrf.mxu0 }
 0x4f3   : > { %v16534_v4 = vadd.f32 %v4071_v20, %v3967_v12 }
 0x4f4   : > { %v3942_v37 = vpop.f32.mrf.mxu1  ;;  %v4076_v39 = vpop.f32.mrf.mxu0 }
 0x4f5   : > { %v3968_v60 = vadd.f32 %v3942_v37, %v3834_v57 }
 0x4f6   : > { %v12301_v25 = vpop.f32.mrf.mxu1  ;;  %v12329_v40 = vpop.f32.mrf.mxu0 }
 0x4f7   : > { %v16536_v62 = vadd.f32 %v4076_v39, %v3968_v60 }
 0x4f8   : > { %v3945_v41 = vpop.f32.mrf.mxu1  ;;  %v4079_v50 = vpop.f32.mrf.mxu0 }
 0x4f9   : > { %v3969_v44 = vadd.f32 %v3945_v41, %v3835_v21 }
 0x4fa   : > { %v12302_v34 = vpop.f32.mrf.mxu1  ;;  %v12330_v6 = vpop.f32.mrf.mxu0 }
 0x4fb   : > { %v16538_v33 = vadd.f32 %v4079_v50, %v3969_v44 }
 0x4fc   : > { %v3950_v49 = vpop.f32.mrf.mxu1  ;;  %v4084_v42 = vpop.f32.mrf.mxu0 }
 0x4fd   : > { %v3970_v0 = vadd.f32 %v3950_v49, %v3836_v36 }
 0x4fe   : > { %v12305_v32 = vpop.f32.mrf.mxu1  ;;  %v12333_v26 = vpop.f32.mrf.mxu0 }
 0x4ff   : > { %v16540_v28 = vadd.f32 %v4084_v42, %v3970_v0 }
 0x500   : > { %v3953_v59 = vpop.f32.mrf.mxu1  ;;  %v4087_v57 = vpop.f32.mrf.mxu0 }
 0x501   : > { %v3971_v53 = vadd.f32 %v3953_v59, %v3837_v8 }
 0x502   : > { %v12306_v22 = vpop.f32.mrf.mxu1  ;;  %v12334_v61 = vpop.f32.mrf.mxu0 }
 0x503   : > { %v16542_v9 = vadd.f32 %v4087_v57, %v3971_v53 }
 0x504   : > { %v3958_v55 = vpop.f32.mrf.mxu1  ;;  %v4092_v21 = vpop.f32.mrf.mxu0 }
 0x505   : > { %v3972_v56 = vadd.f32 %v3958_v55, %v3838_v31 }
 0x506   : > { %v12309_v14 = vpop.f32.mrf.mxu1  ;;  %v12337_v35 = vpop.f32.mrf.mxu0 }
 0x507   : > { %v16544_v54 = vadd.f32 %v4092_v21, %v3972_v56  ;;  %v16569_v35 = vld [vmem:[%s19860_s7] ss:$0 sm:$0xff] }
 0x508   : > { %v3961_v19 = vpop.f32.mrf.mxu1  ;;  %v4095_v36 = vpop.f32.mrf.mxu0 }
 0x50a   : > { %v12310_v30 = vpop.f32.mrf.mxu1  ;;  %v12338_v17 = vpop.f32.mrf.mxu0 }
 0x50c   : > { %v4212_v24 = vpop.f32.mrf.mxu1  ;;  %v4364_v45 = vpop.f32.mrf.mxu0 }
 0x50d   : > { %v4250_v57 = vadd.f32 %v4212_v24, %v16528_v23 }
 0x50e   : > { %v12349_v52 = vpop.f32.mrf.mxu1  ;;  %v12377_v11 = vpop.f32.mrf.mxu0 }
 0x50f   : > { %v4402_v21 = vadd.f32 %v4364_v45, %v4250_v57 }
 0x510   : > { %v4215_v8 = vpop.f32.mrf.mxu1  ;;  %v4367_v10 = vpop.f32.mrf.mxu0 }
 0x511   : > { %v4251_v56 = vadd.f32 %v4215_v8, %v16530_v13 }
 0x512   : > { %v12350_v16 = vpop.f32.mrf.mxu1  ;;  %v12378_v7 = vpop.f32.mrf.mxu0 }
 0x513   : > { %v4403_v52 = vadd.f32 %v4367_v10, %v4251_v56 }
 0x514   : > { %v4220_v5 = vpop.f32.mrf.mxu1  ;;  %v4372_v2 = vpop.f32.mrf.mxu0 }
 0x515   : > { %v4252_v23 = vadd.f32 %v4220_v5, %v16532_v38 }
 0x516   : > { %v12353_v47 = vpop.f32.mrf.mxu1  ;;  %v12381_v31 = vpop.f32.mrf.mxu0 }
 0x517   : > { %v4404_v7 = vadd.f32 %v4372_v2, %v4252_v23 }
 0x518   : > { %v16546_v58 = vpop.f32.mrf.mxu1  ;;  %v16548_v18 = vpop.f32.mrf.mxu0 }
 0x519   : > { %v4253_v23 = vadd.f32 %v16546_v58, %v16534_v4 }
 0x51a   : > { %v12354_v15 = vpop.f32.mrf.mxu1  ;;  %v12382_v3 = vpop.f32.mrf.mxu0 }
 0x51c   : > { %v4228_v20 = vpop.f32.mrf.mxu1  ;;  %v4380_v12 = vpop.f32.mrf.mxu0 }
 0x51d   : > { %v4254_v5 = vadd.f32 %v4228_v20, %v16536_v62 }
 0x51e   : > { %v12357_v51 = vpop.f32.mrf.mxu1  ;;  %v12385_v27 = vpop.f32.mrf.mxu0 }
 0x51f   : > { %v16583_v27 = vld [vmem:[%s19862_s9] ss:$0 sm:$0xff] }
 0x520   : > { %v16550_v37 = vpop.f32.mrf.mxu1  ;;  %v16552_v39 = vpop.f32.mrf.mxu0 }
 0x522   : > { %v12358_v60 = vpop.f32.mrf.mxu1  ;;  %v12386_v25 = vpop.f32.mrf.mxu0 }
 0x524   : > { %v4236_v40 = vpop.f32.mrf.mxu1  ;;  %v16554_v41 = vpop.f32.mrf.mxu0 }
 0x525   : > { %v4256_v57 = vadd.f32 %v4236_v40, %v16540_v28 }
 0x526   : > { %v12361_v50 = vpop.f32.mrf.mxu1  ;;  %v12389_v44 = vpop.f32.mrf.mxu0 }
 0x527   : > { %v4406_v44 = vadd.f32 %v4380_v12, %v4254_v5  ;;  %v4408_v12 = vadd.f32 %v16554_v41, %v4256_v57 }
 0x528   : > { %v16556_v34 = vpop.f32.mrf.mxu1  ;;  %v16558_v6 = vpop.f32.mrf.mxu0 }
 0x52a   : > { %v12362_v49 = vpop.f32.mrf.mxu1  ;;  %v12390_v42 = vpop.f32.mrf.mxu0 }
 0x52c   : > { %v16560_v0 = vpop.f32.mrf.mxu1  ;;  %v16562_v32 = vpop.f32.mrf.mxu0 }
 0x52e   : > { %v12365_v26 = vpop.f32.mrf.mxu1  ;;  %v12393_v59 = vpop.f32.mrf.mxu0 }
 0x530   : > { %v4247_v53 = vpop.f32.mrf.mxu1  ;;  %v4399_v22 = vpop.f32.mrf.mxu0 }
 0x532   : > { %v12366_v61 = vpop.f32.mrf.mxu1  ;;  %v12394_v55 = vpop.f32.mrf.mxu0 }
 0x534   : > { %v4498_v14 = vpop.f32.mrf.mxu1  ;;  %v4733_v19 = vpop.f32.mrf.mxu0 }
 0x535   : > { %v4536_v36 = vadd.f32 %v4498_v14, %v4402_v21  ;;  %v4734_v49 = vadd.f32 %v16583_v27, %v4733_v19 }
 0x536   : > { %v12405_v30 = vpop.f32.mrf.mxu1  ;;  %v12433_v17 = vpop.f32.mrf.mxu0 }
 0x537   : > { %v4552_v24 = vadd.f32 %v16569_v35, %v4536_v36  ;;  %13706 = vtanh.f32 %v4734_v49  ;;  %v4258_v17 = vadd.f32 %v16560_v0, %v16544_v54  ;;  %v4255_v54 = vadd.f32 %v16550_v37, %v16538_v33 }
 0x538   : > { %v4501_v11 = vpop.f32.mrf.mxu1  ;;  %v4736_v16 = vpop.f32.mrf.mxu0  ;;  %v4257_v33 = vadd.f32 %v16556_v34, %v16542_v9 }
 0x539   : > { %v4537_v45 = vadd.f32 %v4501_v11, %v4403_v52  ;;  %4570 = vrot.lane.b32.xlu1 %v4552_v24, %s14070_s20  ;;  %v4410_v41 = vadd.f32 %v16562_v32, %v4258_v17  ;;  %v4737_v4 = vadd.f32 %v16583_v27, %v4736_v16  ;;  %v4407_v5 = vadd.f32 %v16552_v39, %v4255_v54 }
 0x53a   : > { %v12406_v13 = vpop.f32.mrf.mxu1  ;;  %v12434_v8 = vpop.f32.mrf.mxu0 }
 0x53b   : > { %v4553_v47 = vadd.f32 %v16569_v35, %v4537_v45 }
 0x53c   : > { %v4506_v31 = vpop.f32.mrf.mxu1  ;;  %v16575_v15 = vpop.f32.mrf.mxu0 }
 0x53d   : > { %v4538_v3 = vadd.f32 %v4506_v31, %v4404_v7  ;;  %4572 = vrot.lane.b32.xlu0 %v4553_v47, %s14070_s20  ;;  %v4405_v7 = vadd.f32 %v16548_v18, %v4253_v23  ;;  %v4742_v37 = vadd.f32 %v16583_v27, %v16575_v15 }
 0x53e   : > { %v12409_v10 = vpop.f32.mrf.mxu1  ;;  %v12437_v38 = vpop.f32.mrf.mxu0 }
 0x53f   : > { %v4554_v51 = vadd.f32 %v16569_v35, %v4538_v3 }
 0x540   : > { %v4509_v2 = vpop.f32.mrf.mxu1  ;;  %v4744_v60 = vpop.f32.mrf.mxu0 }
 0x541   : > { %4574 = vrot.lane.b32.xlu0 %v4554_v51, %s14070_s20  ;;  %v4539_v3 = vadd.f32 %v4509_v2, %v4405_v7  ;;  %v4745_v32 = vadd.f32 %v16583_v27, %v4744_v60 }
 0x542   : > { %v12410_v25 = vpop.f32.mrf.mxu1  ;;  %v12438_v50 = vpop.f32.mrf.mxu0 }
 0x543   : > { %v4555_v2 = vadd.f32 %v16569_v35, %v4539_v3  ;;  %v4409_v50 = vadd.f32 %v16558_v6, %v4257_v33 }
 0x544   : > { %v4514_v42 = vpop.f32.mrf.mxu1  ;;  %v4749_v26 = vpop.f32.mrf.mxu0 }
 0x545   : > { %v4540_v59 = vadd.f32 %v4514_v42, %v4406_v44  ;;  %v13707_v45 = vpop.eup %13706  ;;  %v4750_v9 = vadd.f32 %v16583_v27, %v4749_v26 }
 0x546   : > { %v12413_v62 = vpop.f32.mrf.mxu1  ;;  %v12441_v20 = vpop.f32.mrf.mxu0 }
 0x547   : > { %v4556_v53 = vadd.f32 %v16569_v35, %v4540_v59  ;;  %v4897_v20 = vld [vmem:[#allocation8] sm:$0xff] }
 0x548   : > { %v4517_v22 = vpop.f32.mrf.mxu1  ;;  %v4752_v61 = vpop.f32.mrf.mxu0 }
 0x549   : > { %4578 = vrot.lane.b32.xlu0 %v4556_v53, %s14070_s20  ;;  %v4541_v60 = vadd.f32 %v4517_v22, %v4407_v5  ;;  %v4753_v25 = vadd.f32 %v16583_v27, %v4752_v61  ;;  %v4898_v53 = vld [vmem:[#allocation8 + $0x8] sm:$0xff]  ;;  %v4905_v22 = vld [vmem:[#allocation8 + $0x40] sm:$0xff] }
 0x54a   : > { %v12414_v55 = vpop.f32.mrf.mxu1  ;;  %v12442_v21 = vpop.f32.mrf.mxu0  ;;  %v13322_v61 = vld [vmem:[%s19869_s16 + $0x38] sm:$0xff]  }
 0x54b   : > { %v4557_v39 = vadd.f32 %v16569_v35, %v4541_v60  ;;  %12452 = vmatpush3.bf16.msra.mxu1 %v13322_v61 }
 0x54c   : > { %v4522_v56 = vpop.f32.mrf.mxu1  ;;  %v4757_v14 = vpop.f32.mrf.mxu0  ;;  %12453 = vmatprep.subr.bf16.mxu1 %v20040_v63 }
 0x54d   : > { %v4542_v19 = vadd.f32 %v4522_v56, %v4408_v12  ;;  %v4758_v44 = vadd.f32 %v16583_v27, %v4757_v14 }
 0x54e   : > { %v12417_v36 = vpop.f32.mrf.mxu1  ;;  %v12445_v30 = vpop.f32.mrf.mxu0 }
 0x54f   : > { %v4558_v28 = vadd.f32 %v16569_v35, %v4542_v19 }
 0x550   : > { %v4525_v40 = vpop.f32.mrf.mxu1  ;;  %v4760_v52 = vpop.f32.mrf.mxu0 }
 0x551   : > { %4582 = vrot.lane.b32.xlu0 %v4558_v28, %s14070_s20  ;;  %v4543_v34 = vadd.f32 %v4525_v40, %v4409_v50  ;;  %v4761_v15 = vadd.f32 %v16583_v27, %v4760_v52  ;;  %v13327_v50 = vld [vmem:[%s19869_s16 + $0x20] sm:$0xff]  }
 0x552   : > { %v12418_v24 = vpop.f32.mrf.mxu1  ;;  %v12446_v11 = vpop.f32.mrf.mxu0 }
 0x553   : > { %v4559_v49 = vadd.f32 %v16569_v35, %v4543_v34 }
 0x554   : > { %v4530_v13 = vpop.f32.mrf.mxu1  ;;  %v4765_v8 = vpop.f32.mrf.mxu0 }
 0x555   : > { %v4544_v0 = vadd.f32 %v4530_v13, %v4410_v41  ;;  %v4766_v47 = vadd.f32 %v16583_v27, %v4765_v8  ;;  %4789 = vrot.lane.b32.xlu0 %v13707_v45, %s14070_s20  ;;  %v20062_v8 = vld [vmem:[#allocation30_spill] sm:$0xff] }
 0x556   : > { %v12421_v58 = vpop.f32.mrf.mxu1  ;;  %v12449_v31 = vpop.f32.mrf.mxu0 }
 0x557   : > { %v4560_v10 = vadd.f32 %v16569_v35, %v4544_v0  ;;  %13708 = vtanh.f32 %v4766_v47  ;;  %v20063_v47 = vld [vmem:[#allocation18_spill] sm:$0xff]  ;;  %v20064_v58 = vld [vmem:[#allocation28_spill] sm:$0xff] }
 0x558   : > { %v4533_v38 = vpop.f32.mrf.mxu1  ;;  %v4768_v18 = vpop.f32.mrf.mxu0  ;;  %13710 = vtanh.f32 %v4737_v4 }
 0x559   : > { %4586 = vrot.lane.b32.xlu1 %v4560_v10, %s14070_s20  ;;  %13712 = vtanh.f32 %v4745_v32  ;;  %v20066_v18 = vld [vmem:[#allocation29_spill] sm:$0xff] }
 0x55a   : > { %v12422_v16 = vpop.f32.mrf.mxu1  ;;  %v12450_v51 = vpop.f32.mrf.mxu0  ;;  %13714 = vtanh.f32 %v4742_v37 }
 0x55b   : > { %13716 = vtanh.f32 %v4753_v25  ;;  %v13324_v16 = vld [vmem:[%s19869_s16 + $0x28] sm:$0xff]   ;;  %v13325_v51 = vld [vmem:[%s19869_s16 + $0x18] sm:$0xff]   ;;  %v13326_v25 = vld [vmem:[%s19869_s16 + $0x10] sm:$0xff]  }
 0x55c   : > { %13718 = vtanh.f32 %v4750_v9  ;;  %12480 = vmatpush3.bf16.msra.mxu0 %v13325_v51 }
 0x55d   : > { %4576 = vrot.lane.b32.xlu1 %v4555_v2, %s14070_s20  ;;  %13720 = vtanh.f32 %v4761_v15  ;;  %v20067_v2 = vld [vmem:[#allocation15_spill] sm:$0xff]  ;;  %12481 = vmatprep.subr.bf16.mxu0 %v20040_v63 }
 0x55e   : > { %13722 = vtanh.f32 %v4758_v44 }
 0x560   : > { %12482 = vmatpush3.bf16.msra.mxu0 %v13326_v25 }
 0x561   : > { %4580 = vrot.lane.b32.xlu1 %v4557_v39, %s14070_s20  ;;  %12483 = vmatprep.subr.bf16.mxu0 %v20040_v63 }
 0x564   : > { %v13709_v6 = vpop.eup %13708 }
 0x565   : > { %4584 = vrot.lane.b32.xlu1 %v4559_v49, %s14070_s20  ;;  %4805 = vrot.lane.b32.xlu0 %v13709_v6, %s14070_s20  ;;  %v13711_v42 = vpop.eup %13710 }
 0x566   : > { %v13713_v26 = vpop.eup %13712 }
 0x567   : > { %v13715_v59 = vpop.eup %13714 }
 0x568   : > { %v13717_v62 = vpop.eup %13716 }
 0x569   : > { %4791 = vrot.lane.b32.xlu1 %v13711_v42, %s14070_s20  ;;  %4795 = vrot.lane.b32.xlu0 %v13713_v26, %s14070_s20  ;;  %v13719_v35 = vpop.eup %13718  ;;  %v13328_v42 = vld [vmem:[%s19869_s16 + $0x8] sm:$0xff]  }
 0x56a   : > { %v13721_v27 = vpop.eup %13720  ;;  %12484 = vmatpush3.bf16.msra.mxu0 %v13328_v42 }
 0x56b   : > { %v13723_v57 = vpop.eup %13722  ;;  %12485 = vmatprep.subr.bf16.mxu0 %v20040_v63 }
 0x56d   : > { %4793 = vrot.lane.b32.xlu1 %v13715_v59, %s14070_s20  ;;  %4799 = vrot.lane.b32.xlu0 %v13717_v62, %s14070_s20  ;;  %v20068_v62 = vld [vmem:[#allocation19_spill] sm:$0xff] }
 0x571   : > { %4797 = vrot.lane.b32.xlu1 %v13719_v35, %s14070_s20  ;;  %4803 = vrot.lane.b32.xlu0 %v13721_v27, %s14070_s20 }
 0x575   : > { %4801 = vrot.lane.b32.xlu1 %v13723_v57, %s14070_s20  ;;  %4915 = vrot.lane.b32.xlu0 %v4897_v20, %s14071_s0 }
 0x579   : > { %4917 = vrot.lane.b32.xlu1 %v4898_v53, %s14071_s0  ;;  %4931 = vrot.lane.b32.xlu0 %v4905_v22, %s14071_s0 }
 0x5ab   : > { %v4571_v55 = vpop.permute.xlu1 %4570 }
 0x5ac   : > { %v4597_v21 = vadd.f32 %v4571_v55, %v15467_v1  ;;  %v13323_v1 = vld [vmem:[%s19869_s16 + $0x30] sm:$0xff]  }
 0x5ad   : > { %12454 = vmatpush3.bf16.msra.mxu1 %v13323_v1 }
 0x5ae   : > { %v11277_v12 = vmul.f32 -1.442695, %v4597_v21  ;;  %12455 = vmatprep.subr.bf16.mxu1 %v20040_v63  ;;  %v13329_v21 = vld [vmem:[%s19869_s16] sm:$0xff]  }
 0x5af   : > { %v4573_v56 = vpop.permute.xlu0 %4572  ;;  %12486 = vmatpush3.bf16.msra.mxu0 %v13329_v21 }
 0x5b0   : > { %13724 = vpow2.f32 %v11277_v12  ;;  %v4598_v14 = vadd.f32 %v4573_v56, %v15479_v48  ;;  %12535 = vmatprep.subr.bf16.mxu0 %v20040_v63 }
 0x5b1   : > { %12456 = vmatpush3.bf16.msra.mxu1 %v13324_v16  ;;  %v4902_v16 = vld [vmem:[#allocation8 + $0x28] sm:$0xff] }
 0x5b2   : > { %v11278_v19 = vmul.f32 -1.442695, %v4598_v14  ;;  %12457 = vmatprep.subr.bf16.mxu1 %v20040_v63 }
 0x5b3   : > { %v4575_v17 = vpop.permute.xlu0 %4574 }
 0x5b4   : > { %13726 = vpow2.f32 %v11278_v19  ;;  %v4599_v40 = vadd.f32 %v4575_v17, %v15494_v46 }
 0x5b5   : > { %12458 = vmatpush3.bf16.msra.mxu1 %v13327_v50  ;;  %v20075_v50 = vld [vmem:[#allocation21_spill] sm:$0xff] }
 0x5b6   : > { %v11279_v24 = vmul.f32 -1.442695, %v4599_v40  ;;  %12507 = vmatprep.subr.bf16.mxu1 %v20040_v63  ;;  %v20069_v40 = vld [vmem:[#allocation22_spill] sm:$0xff] }
 0x5bb   : > { %v4579_v28 = vpop.permute.xlu0 %4578 }
 0x5bc   : > { %v4601_v46 = vadd.f32 %v4579_v28, %v20062_v8 }
 0x5bd   : > { %v13725_v36 = vpop.eup %13724 }
 0x5be   : > { %v4633_v30 = vadd.f32 1.0, %v13725_v36  ;;  %v11281_v3 = vmul.f32 -1.442695, %v4601_v46 }
 0x5c0   : > { %13728 = vrcp.f32 %v4633_v30 }
 0x5c1   : > { %v13727_v52 = vpop.eup %13726  ;;  %13730 = vpow2.f32 %v11279_v24 }
 0x5c2   : > { %v4634_v11 = vadd.f32 1.0, %v13727_v52 }
 0x5c3   : > { %v4583_v23 = vpop.permute.xlu0 %4582 }
 0x5c4   : > { %13732 = vrcp.f32 %v4634_v11  ;;  %v4603_v5 = vadd.f32 %v4583_v23, %v20066_v18 }
 0x5c6   : > { %v11283_v39 = vmul.f32 -1.442695, %v4603_v5 }
 0x5c7   : > { %v4790_v13 = vpop.permute.xlu0 %4789 }
 0x5cb   : > { %v4587_v48 = vpop.permute.xlu1 %4586 }
 0x5cc   : > { %v4605_v41 = vadd.f32 %v4587_v48, %v15549_v43  ;;  %v20065_v43 = vld [vmem:[#allocation14_spill] sm:$0xff]  ;;  %v20070_v48 = vld [vmem:[#allocation16_spill] sm:$0xff] }
 0x5cd   : > { %v13729_v45 = vpop.eup %13728 }
 0x5ce   : > { %v4816_v7 = vmul.f32 %v13729_v45, %v4790_v13  ;;  %v11285_v54 = vmul.f32 -1.442695, %v4605_v41  ;;  %v13731_v9 = vpop.eup %13730  ;;  %v20071_v45 = vld [vmem:[#allocation17_spill] sm:$0xff] }
 0x5cf   : > { %v4577_v0 = vpop.permute.xlu1 %4576  ;;  %v4635_v26 = vadd.f32 1.0, %v13731_v9 }
 0x5d0   : > { %v4825_v4 = vmul.f32 %v4816_v7, %v20063_v47  ;;  %13734 = vpow2.f32 %v11285_v54  ;;  %v4600_v31 = vadd.f32 %v4577_v0, %v20064_v58  ;;  %v4899_v0 = vld [vmem:[#allocation8 + $0x10] sm:$0xff] }
 0x5d1   : > { %v13733_v15 = vpop.eup %13732 }
 0x5d2   : > { %v11280_v32 = vmul.f32 -1.442695, %v4600_v31  ;;  %4843 = vrot.lane.b32.xlu1 %v4825_v4, %s14070_s20  ;;  %v4900_v4 = vld [vmem:[#allocation8 + $0x18] sm:$0xff] }
 0x5d3   : > { %v4581_v10 = vpop.permute.xlu1 %4580 }
 0x5d4   : > { %13736 = vpow2.f32 %v11280_v32  ;;  %v4602_v38 = vadd.f32 %v4581_v10, %v20065_v43  ;;  %v20073_v10 = vld [vmem:[#allocation23_spill] sm:$0xff] }
 0x5d5   : > { %13738 = vpow2.f32 %v11281_v3  ;;  %v20072_v3 = vld [vmem:[#allocation20_spill] sm:$0xff] }
 0x5d6   : > { %v11282_v33 = vmul.f32 -1.442695, %v4602_v38 }
 0x5d7   : > { %v4585_v37 = vpop.permute.xlu1 %4584  ;;  %v4806_v56 = vpop.permute.xlu0 %4805 }
 0x5d8   : > { %13740 = vpow2.f32 %v11282_v33  ;;  %v4604_v60 = vadd.f32 %v4585_v37, %v20067_v2  ;;  %v4901_v37 = vld [vmem:[#allocation8 + $0x20] sm:$0xff] }
 0x5da   : > { %v11284_v34 = vmul.f32 -1.442695, %v4604_v60  ;;  %v20074_v60 = vld [vmem:[#allocation26_spill] sm:$0xff] }
 0x5db   : > { %v4792_v44 = vpop.permute.xlu1 %4791  ;;  %v4796_v24 = vpop.permute.xlu0 %4795 }
 0x5dc   : > { %13742 = vpow2.f32 %v11284_v34  ;;  %v4817_v49 = vmul.f32 %v13733_v15, %v4792_v44  ;;  %v4904_v34 = vld [vmem:[#allocation8 + $0x38] sm:$0xff] }
 0x5dd   : > { %v13735_v6 = vpop.eup %13734  ;;  %13744 = vpow2.f32 %v11283_v39  ;;  %v4903_v39 = vld [vmem:[#allocation8 + $0x30] sm:$0xff] }
 0x5de   : > { %v4641_v59 = vadd.f32 1.0, %v13735_v6  ;;  %v4826_v35 = vmul.f32 %v4817_v49, %v20068_v62 }
 0x5df   : > { %v4794_v36 = vpop.permute.xlu1 %4793  ;;  %v4800_v54 = vpop.permute.xlu0 %4799 }
 0x5e0   : > { %13746 = vrcp.f32 %v4641_v59  ;;  %4845 = vrot.lane.b32.xlu0 %v4826_v35, %s14070_s20 }
 0x5e1   : > { %v13737_v27 = vpop.eup %13736  ;;  %13748 = vrcp.f32 %v4635_v26 }
 0x5e2   : > { %v4636_v20 = vadd.f32 1.0, %v13737_v27  ;;  %v13739_v57 = vpop.eup %13738 }
 0x5e3   : > { %v4637_v22 = vadd.f32 1.0, %v13739_v57  ;;  %v4798_v46 = vpop.permute.xlu1 %4797  ;;  %v4804_v33 = vpop.permute.xlu0 %4803 }
 0x5e4   : > { %13750 = vrcp.f32 %v4636_v20 }
 0x5e5   : > { %v13741_v53 = vpop.eup %13740 }
 0x5e6   : > { %v4638_v61 = vadd.f32 1.0, %v13741_v53 }
 0x5e7   : > { %v4802_v18 = vpop.permute.xlu1 %4801  ;;  %v16702_v49 = vpop.permute.xlu0 %4915 }
 0x5e8   : > { %13752 = vrcp.f32 %v4638_v61 }
 0x5e9   : > { %v13743_v55 = vpop.eup %13742  ;;  %13754 = vrcp.f32 %v4637_v22 }
 0x5ea   : > { %v13745_v12 = vpop.eup %13744  ;;  %v4640_v14 = vadd.f32 1.0, %v13743_v55 }
 0x5eb   : > { %v4639_v30 = vadd.f32 1.0, %v13745_v12  ;;  %v16699_v15 = vpop.permute.xlu1 %4917  ;;  %v16704_v6 = vpop.permute.xlu0 %4931 }
 0x5ec   : > { %13756 = vrcp.f32 %v4640_v14  ;;  %20076 = vst [vmem:[#allocation24_spill] sm:$0xff] %v16704_v6 }
 0x5ed   : > { %v13747_v19 = vpop.eup %13746  ;;  %13758 = vrcp.f32 %v4639_v30 }
 0x5ee   : > { %v4824_v17 = vmul.f32 %v13747_v19, %v4806_v56  ;;  %v13749_v28 = vpop.eup %13748 }
 0x5ef   : > { %v4818_v23 = vmul.f32 %v13749_v28, %v4794_v36 }
 0x5f0   : > { %v4833_v52 = vmul.f32 %v4824_v17, %v20069_v40 }
 0x5f1   : > { %v13751_v1 = vpop.eup %13750  ;;  %v4827_v13 = vmul.f32 %v4818_v23, %v20071_v45 }
 0x5f2   : > { %v4819_v11 = vmul.f32 %v13751_v1, %v4796_v24  ;;  %4859 = vrot.lane.b32.xlu1 %v4833_v52, %s14070_s20 }
 0x5f4   : > { %v4828_v41 = vmul.f32 %v4819_v11, %v20070_v48 }
 0x5f5   : > { %v13753_v8 = vpop.eup %13752 }
 0x5f6   : > { %4847 = vrot.lane.b32.xlu1 %v4827_v13, %s14070_s20  ;;  %4849 = vrot.lane.b32.xlu0 %v4828_v41, %s14070_s20  ;;  %v13755_v7 = vpop.eup %13754  ;;  %v4821_v58 = vmul.f32 %v13753_v8, %v4800_v54  ;;  %v13330_v13 = vld [vmem:[%s19869_s16 + $0x58] sm:$0xff]  }
 0x5f7   : > { %v4820_v31 = vmul.f32 %v13755_v7, %v4798_v46  ;;  %v13333_v7 = vld [vmem:[%s19869_s16 + $0x78] sm:$0xff]  }
 0x5f8   : > { %v4830_v32 = vmul.f32 %v4821_v58, %v20072_v3 }
 0x5f9   : > { %v4829_v43 = vmul.f32 %v4820_v31, %v20073_v10  ;;  %v13757_v38 = vpop.eup %13756  ;;  %v13331_v31 = vld [vmem:[%s19869_s16 + $0x50] sm:$0xff]  }
 0x5fa   : > { %4919 = vrot.lane.b32.xlu1 %v4899_v0, %s14071_s0  ;;  %4921 = vrot.lane.b32.xlu0 %v4900_v4, %s14071_s0  ;;  %v13759_v5 = vpop.eup %13758  ;;  %v4823_v51 = vmul.f32 %v13757_v38, %v4804_v33 }
 0x5fb   : > { %v4822_v2 = vmul.f32 %v13759_v5, %v4802_v18  ;;  %v13334_v5 = vld [vmem:[%s19869_s16 + $0x70] sm:$0xff]  }
 0x5fc   : > { %v4832_v25 = vmul.f32 %v4823_v51, %v20074_v60 }
 0x5fd   : > { %v4831_v9 = vmul.f32 %v4822_v2, %v20075_v50 }
 0x5fe   : > { %4851 = vrot.lane.b32.xlu1 %v4829_v43, %s14070_s20  ;;  %4853 = vrot.lane.b32.xlu0 %v4830_v32, %s14070_s20 }
 0x602   : > { %4923 = vrot.lane.b32.xlu1 %v4901_v37, %s14071_s0  ;;  %4925 = vrot.lane.b32.xlu0 %v4902_v16, %s14071_s0 }
 0x606   : > { %4855 = vrot.lane.b32.xlu1 %v4831_v9, %s14070_s20  ;;  %4857 = vrot.lane.b32.xlu0 %v4832_v25, %s14070_s20 }
 0x60a   : > { %4927 = vrot.lane.b32.xlu1 %v4903_v39, %s14071_s0  ;;  %4929 = vrot.lane.b32.xlu0 %v4904_v34, %s14071_s0 }
 0x644   : > { %v4844_v44 = vpop.permute.xlu1 %4843 }
 0x645   : > { %4870 = vst.msk [vmem:[#allocation2] sm:$0xff] %vm3239_vm13, %v4844_v44  ;;  %v16708_v42 = vsel %vm3239_vm13, %v4844_v44, %v16702_v49 }
 0x646   : > { %v5808_v35 = vrot.slane %v16708_v42, 5  ;;  %v5960_v27 = vrot.slane %v16708_v42, 6  ;;  %v4951_v14 = vrot.slane %v16708_v42, 1  ;;  %v4982_v19 = vrot.slane %v16708_v42, 2 }
 0x652   : > { %v4846_v26 = vpop.permute.xlu0 %4845 }
 0x653   : > { %4871 = vst.msk [vmem:[#allocation2 + $0x8] sm:$0xff] %vm3239_vm13, %v4846_v26  ;;  %v16713_v59 = vsel %vm3239_vm13, %v4846_v26, %v16699_v15  ;;  %v13332_v26 = vld [vmem:[%s19869_s16 + $0x48] sm:$0xff]  }
 0x654   : > { %v5809_v57 = vrot.slane %v16713_v59, 5  ;;  %v5961_v53 = vrot.slane %v16713_v59, 6  ;;  %v4952_v55 = vrot.slane %v16713_v59, 1  ;;  %v4983_v21 = vrot.slane %v16713_v59, 2 }
 0x656   : > { %v16723_v22 = vsel %vm2073_vm10, %v5808_v35, %v5809_v57  ;;  %v16727_v61 = vsel %vm2272_vm11, %v5960_v27, %v5961_v53  ;;  %v16746_v52 = vsel %vm952_vm8, %v4951_v14, %v4952_v55  ;;  %v4998_v23 = vsel %vm985_vm6, %v4982_v19, %v4983_v21 }
 0x664   : > { %v4860_v12 = vpop.permute.xlu1 %4859 }
 0x665   : > { %4878 = vst.msk [vmem:[#allocation2 + $0x40] sm:$0xff] %vm3239_vm13, %v4860_v12  ;;  %v16734_v56 = vsel %vm3239_vm13, %v4860_v12, %v16704_v6 }
 0x666   : > { %v19919_v36 = vrot.slane %v16734_v56, 1  ;;  %v19920_v30 = vrot.slane %v16734_v56, 2  ;;  %v19915_v17 = vrot.slane %v16734_v56, 5  ;;  %v19914_v28 = vrot.slane %v16734_v56, 6 }
 0x667   : > { %v20082_v3 = vrot.slane %v16734_v56, 2  ;;  %v20083_v48 = vrot.slane %v16734_v56, 1  ;;  %v20088_v6 = vrot.slane %v16734_v56, 5  ;;  %v19926_v50 = vrot.slane %v16734_v56, 3 }
 0x668   : > { %v16754_v1 = vsel %vm952_vm8, %v19919_v36, %v4951_v14  ;;  %v4999_v24 = vsel %vm985_vm6, %v19920_v30, %v4982_v19  ;;  %v4848_v11 = vpop.permute.xlu1 %4847  ;;  %v4850_v41 = vpop.permute.xlu0 %4849  ;;  %v16774_v54 = vsel %vm2073_vm10, %v19915_v17, %v5808_v35  ;;  %v16780_v0 = vsel %vm2272_vm11, %v19914_v28, %v5960_v27  ;;  %v13336_v14 = vld [vmem:[%s19869_s16 + $0x68] sm:$0xff]  }
 0x669   : > { %v4969_v8 = vpack.c.bf16 %v16746_v52, %v16754_v1  ;;  %v5000_v46 = vpack.c.bf16 %v4998_v23, %v4999_v24  ;;  %4872 = vst.msk [vmem:[#allocation2 + $0x10] sm:$0xff] %vm3239_vm13, %v4848_v11  ;;  %4873 = vst.msk [vmem:[#allocation2 + $0x18] sm:$0xff] %vm3239_vm13, %v4850_v41  ;;  %v5389_v19 = vrot.slane %v16713_v59, 7 }
 0x66b   : > { %12460 = vmatmul.mubr.msk.bf16.vlgmr.msra.gmra.mxu1 %vm3336_vm15, %v5000_v46  ;;  %12488 = vmatmul.mubr.msk.bf16.vlgmr.msra.gmra.mxu0 %vm3336_vm15, %v4969_v8  ;;  %v13335_v8 = vld [vmem:[%s19869_s16 + $0x40] sm:$0xff]   ;;  %v19913_v46 = vrot.slane %v16708_v42, 7 }
 0x66c   : > { %12508 = vmatpush3.bf16.msra.mxu1 %v13330_v13  ;;  %v16784_v4 = vpop.permute.xlu1 %4919  ;;  %v16786_v58 = vpop.permute.xlu0 %4921  ;;  %12463 = vmatprep.mubr.msk.bf16.mxu1 %vm14074_vm14, %v20040_v63 }
 0x66d   : > { %20077 = vst [vmem:[#allocation27_spill] sm:$0xff] %v16786_v58  ;;  %v16795_v32 = vsel %vm3239_vm13, %v4848_v11, %v16784_v4  ;;  %v16799_v43 = vsel %vm3239_vm13, %v4850_v41, %v16786_v58  ;;  %12491 = vmatprep.mubr.msk.bf16.mxu0 %vm14074_vm14, %v20040_v63  ;;  %12509 = vmatprep.subr.bf16.mxu1 %v20040_v63 }
 0x66e   : > { %v4953_v38 = vrot.slane %v16795_v32, 1  ;;  %v4984_v18 = vrot.slane %v16795_v32, 2  ;;  %12536 = vmatpush3.bf16.msra.mxu0 %v13333_v7  ;;  %v19918_v33 = vrot.slane %v16795_v32, 5  ;;  %v19917_v37 = vrot.slane %v16795_v32, 6 }
 0x66f   : > { %v4954_v16 = vrot.slane %v16799_v43, 1  ;;  %v4985_v51 = vrot.slane %v16799_v43, 2  ;;  %12537 = vmatprep.subr.bf16.mxu0 %v20040_v63  ;;  %v5391_v20 = vrot.slane %v16799_v43, 7  ;;  %v5239_v10 = vrot.slane %v16799_v43, 3 }
 0x670   : > { %v4852_v2 = vpop.permute.xlu1 %4851  ;;  %v4854_v25 = vpop.permute.xlu0 %4853  ;;  %12510 = vmatpush3.bf16.msra.mxu1 %v13331_v31  ;;  %v16818_v9 = vsel %vm2073_vm10, %v5809_v57, %v19918_v33  ;;  %v16824_v39 = vsel %vm2272_vm11, %v5961_v53, %v19917_v37  ;;  %v4997_v44 = vsel %vm985_vm6, %v4983_v21, %v4984_v18  ;;  %v5390_v21 = vrot.slane %v16795_v32, 7 }
 0x671   : > { %4874 = vst.msk [vmem:[#allocation2 + $0x20] sm:$0xff] %vm3239_vm13, %v4852_v2  ;;  %4875 = vst.msk [vmem:[#allocation2 + $0x28] sm:$0xff] %vm3239_vm13, %v4854_v25  ;;  %v4996_v34 = vsel %vm985_vm6, %v4984_v18, %v4985_v51  ;;  %12511 = vmatprep.subr.bf16.mxu1 %v20040_v63  ;;  %v16842_v53 = vsel %vm952_vm8, %v4953_v38, %v4954_v16  ;;  %v16849_v12 = vsel %vm952_vm8, %v4952_v55, %v4953_v38 }
 0x672   : > { %v5001_v57 = vpack.c.bf16 %v4996_v34, %v4997_v44  ;;  %12538 = vmatpush3.bf16.msra.mxu0 %v13334_v5  ;;  %v4970_v23 = vpack.c.bf16 %v16842_v53, %v16849_v12  ;;  %v13337_v5 = vld [vmem:[%s19869_s16 + $0x60] sm:$0xff]   ;;  %v16971_v37 = vsel %vm1514_vm9, %v5390_v21, %v5391_v20 }
 0x673   : > { %12539 = vmatprep.subr.bf16.mxu0 %v20040_v63 }
 0x674   : > { %12464 = vmatmul.mubr.msk.bf16.gmra.mxu1 %vm3336_vm15, %v5001_v57  ;;  %v16861_v11 = vpop.permute.xlu1 %4923  ;;  %v16863_v55 = vpop.permute.xlu0 %4925  ;;  %12492 = vmatmul.mubr.msk.bf16.gmra.mxu0 %vm3336_vm15, %v4970_v23 }
 0x675   : > { %20078 = vst [vmem:[#allocation25_spill] sm:$0xff] %v16861_v11  ;;  %20079 = vst [vmem:[#allocation30_spill] sm:$0xff] %v16863_v55  ;;  %v16867_v41 = vsel %vm3239_vm13, %v4852_v2, %v16861_v11  ;;  %v16871_v13 = vsel %vm3239_vm13, %v4854_v25, %v16863_v55  ;;  %12467 = vmatprep.mubr.msk.bf16.mxu1 %vm14074_vm14, %v20040_v63  ;;  %12512 = vmatpush3.bf16.msra.mxu1 %v13332_v26 }
 0x676   : > { %v4955_v7 = vrot.slane %v16867_v41, 1  ;;  %v4986_v31 = vrot.slane %v16867_v41, 2  ;;  %12513 = vmatprep.subr.bf16.mxu1 %v20040_v63  ;;  %v4956_v38 = vrot.slane %v16871_v13, 1  ;;  %v4987_v18 = vrot.slane %v16871_v13, 2  ;;  %12495 = vmatprep.mubr.msk.bf16.mxu0 %vm14074_vm14, %v20040_v63 }
 0x677   : > { %12540 = vmatpush3.bf16.msra.mxu0 %v13336_v14  ;;  %v16894_v2 = vsel %vm1514_vm9, %v5389_v19, %v5390_v21  ;;  %v16900_v25 = vsel %vm1514_vm9, %v19913_v46, %v5389_v19  ;;  %v19916_v34 = vrot.slane %v16867_v41, 5  ;;  %v5964_v17 = vrot.slane %v16867_v41, 6 }
 0x678   : > { %v4856_v44 = vpop.permute.xlu1 %4855  ;;  %v4858_v26 = vpop.permute.xlu0 %4857  ;;  %12541 = vmatprep.subr.bf16.mxu0 %v20040_v63  ;;  %v4994_v57 = vsel %vm985_vm6, %v4986_v31, %v4987_v18  ;;  %v4995_v14 = vsel %vm985_vm6, %v4985_v51, %v4986_v31  ;;  %v16912_v19 = vsel %vm952_vm8, %v4955_v7, %v4956_v38  ;;  %v16916_v23 = vsel %vm952_vm8, %v4954_v16, %v4955_v7 }
 0x679   : > { %4876 = vst.msk [vmem:[#allocation2 + $0x30] sm:$0xff] %vm3239_vm13, %v4856_v44  ;;  %4877 = vst.msk [vmem:[#allocation2 + $0x38] sm:$0xff] %vm3239_vm13, %v4858_v26  ;;  %12514 = vmatpush3.bf16.msra.mxu1 %v13335_v8  ;;  %v5002_v27 = vpack.c.bf16 %v4994_v57, %v4995_v14  ;;  %v4971_v35 = vpack.c.bf16 %v16912_v19, %v16916_v23  ;;  %v5811_v51 = vrot.slane %v16799_v43, 5  ;;  %v5392_v31 = vrot.slane %v16867_v41, 7 }
 0x67a   : > { %12563 = vmatprep.subr.bf16.mxu1 %v20040_v63  ;;  %v5813_v60 = vrot.slane %v16871_v13, 5  ;;  %v5241_v45 = vrot.slane %v16871_v13, 3 }
 0x67b   : > { %12542 = vmatpush3.bf16.msra.mxu0 %v13337_v5  ;;  %v16951_v14 = vsel %vm2073_vm10, %v5811_v51, %v19916_v34 }
 0x67c   : > { %12468 = vmatmul.mubr.msk.bf16.gmra.mxu1 %vm3336_vm15, %v5002_v27  ;;  %v16928_v16 = vpop.permute.xlu1 %4927  ;;  %v16930_v8 = vpop.permute.xlu0 %4929  ;;  %12591 = vmatprep.subr.bf16.mxu0 %v20040_v63  ;;  %v5393_v27 = vrot.slane %v16871_v13, 7 }
 0x67d   : > { %20080 = vst [vmem:[#allocation28_spill] sm:$0xff] %v16928_v16  ;;  %20081 = vst [vmem:[#allocation14_spill] sm:$0xff] %v16930_v8  ;;  %v16937_v57 = vsel %vm3239_vm13, %v4856_v44, %v16928_v16  ;;  %v16941_v5 = vsel %vm3239_vm13, %v4858_v26, %v16930_v8  ;;  %12471 = vmatprep.mubr.msk.bf16.mxu1 %vm14074_vm14, %v20040_v63  ;;  %v5963_v44 = vrot.slane %v16799_v43, 6  ;;  %12496 = vmatmul.mubr.msk.bf16.gmra.mxu0 %vm3336_vm15, %v4971_v35 }
 0x67e   : > { %v4957_v26 = vrot.slane %v16937_v57, 1  ;;  %v4988_v7 = vrot.slane %v16937_v57, 2  ;;  %v4958_v46 = vrot.slane %v16941_v5, 1  ;;  %v4989_v28 = vrot.slane %v16941_v5, 2  ;;  %12499 = vmatprep.mubr.msk.bf16.mxu0 %vm14074_vm14, %v20040_v63 }
 0x67f   : > { %v5394_v34 = vrot.slane %v16937_v57, 7  ;;  %v5395_v35 = vrot.slane %v16941_v5, 7 }
 0x680   : > { %v4992_v33 = vsel %vm985_vm6, %v4988_v7, %v4989_v28  ;;  %v4993_v24 = vsel %vm985_vm6, %v4987_v18, %v4988_v7  ;;  %v16979_v36 = vsel %vm952_vm8, %v4957_v26, %v4958_v46  ;;  %v16983_v30 = vsel %vm952_vm8, %v4956_v38, %v4957_v26 }
 0x681   : > { %v5003_v8 = vpack.c.bf16 %v4992_v33, %v4993_v24  ;;  %v4972_v21 = vpack.c.bf16 %v16979_v36, %v16983_v30  ;;  %v4991_v55 = vsel %vm985_vm6, %v4989_v28, %v20082_v3  ;;  %v5965_v18 = vrot.slane %v16871_v13, 6 }
 0x682   : > { %v5814_v7 = vrot.slane %v16937_v57, 5  ;;  %v16998_v38 = vsel %vm952_vm8, %v4958_v46, %v20083_v48  ;;  %v17002_v33 = vsel %vm1514_vm9, %v5392_v31, %v5393_v27  ;;  %v5966_v24 = vrot.slane %v16937_v57, 6 }
 0x683   : > { %v5815_v26 = vrot.slane %v16941_v5, 5  ;;  %v5967_v3 = vrot.slane %v16941_v5, 6  ;;  %v17010_v28 = vsel %vm1514_vm9, %v5391_v20, %v5392_v31  ;;  %v5004_v48 = vpack.c.bf16 %v4991_v55, %v4991_v55 }
 0x684   : > { %12472 = vmatmul.mubr.msk.bf16.gmra.mxu1 %vm3336_vm15, %v5003_v8  ;;  %v17016_v46 = vsel %vm1514_vm9, %v5394_v34, %v5395_v35  ;;  %v17020_v58 = vsel %vm1514_vm9, %v5393_v27, %v5394_v34  ;;  %v20084_v20 = vrot.slane %v16734_v56, 7  ;;  %v20085_v34 = vrot.slane %v16795_v32, 5 }
 0x685   : > { %12475 = vmatprep.mubr.msk.bf16.mxu1 %vm14074_vm14, %v20040_v63  ;;  %12500 = vmatmul.mubr.msk.bf16.gmra.mxu0 %vm3336_vm15, %v4972_v21  ;;  %v20087_v55 = vrot.slane %v16867_v41, 5  ;;  %v17069_v40 = vsel %vm2272_vm11, %v5965_v18, %v5966_v24 }
 0x686   : > { %v17029_v31 = vsel %vm1514_vm9, %v5395_v35, %v20084_v20  ;;  %v17039_v27 = vsel %vm2073_vm10, %v20085_v34, %v5811_v51  ;;  %12503 = vmatprep.mubr.msk.bf16.mxu0 %vm14074_vm14, %v20040_v63  ;;  %v17047_v35 = vsel %vm2272_vm11, %v5963_v44, %v5964_v17  ;;  %v20086_v20 = vrot.slane %v16795_v32, 6 }
 0x687   : > { %v17057_v51 = vsel %vm2073_vm10, %v5813_v60, %v5814_v7  ;;  %v17065_v21 = vsel %vm2073_vm10, %v20087_v55, %v5813_v60  ;;  %v17083_v60 = vsel %vm2073_vm10, %v5815_v26, %v20088_v6  ;;  %v17087_v55 = vsel %vm2073_vm10, %v5814_v7, %v5815_v26 }
 0x688   : > { %v17053_v8 = vsel %vm2272_vm11, %v20086_v20, %v5963_v44  ;;  %v17073_v44 = vsel %vm2272_vm11, %v5964_v17, %v5965_v18  ;;  %v20089_v18 = vrot.slane %v16734_v56, 6  ;;  %v17099_v34 = vsel %vm2272_vm11, %v5966_v24, %v5967_v3 }
 0x689   : > { %v4973_v24 = vpack.c.bf16 %v16998_v38, %v16998_v38  ;;  %v20090_v17 = vrot.slane %v16708_v42, 7  ;;  %v20091_v6 = vrot.slane %v16734_v56, 7 }
 0x68a   : > { %v17095_v20 = vsel %vm2272_vm11, %v5967_v3, %v20089_v18  ;;  %v5236_v3 = vrot.slane %v16708_v42, 3  ;;  %v5237_v18 = vrot.slane %v16713_v59, 3 }
 0x68b   : > { %v17132_v7 = vsel %vm1514_vm9, %v20091_v6, %v20090_v17  ;;  %v13339_v17 = vld [vmem:[%s19869_s16 + $0x90] sm:$0xff]  }
 0x68c   : > { %12476 = vmatmul.mubr.msk.bf16.gmra.mxu1 %vm3336_vm15, %v5004_v48  ;;  %v5253_v26 = vsel %vm1315_vm12, %v19926_v50, %v5236_v3  ;;  %v5252_v48 = vsel %vm1315_vm12, %v5236_v3, %v5237_v18  ;;  %v5238_v50 = vrot.slane %v16795_v32, 3  ;;  %v13341_v3 = vld [vmem:[%s19869_s16 + $0xb8] sm:$0xff]   ;;  %v5406_v11 = vpack.c.bf16 %v16900_v25, %v17132_v7 }
 0x68d   : > { %12515 = vmatprep.mubr.msk.bf16.mxu1 %vm14074_vm14, %v20040_v63  ;;  %12504 = vmatmul.mubr.msk.bf16.gmra.mxu0 %vm3336_vm15, %v4973_v24  ;;  %v13338_v24 = vld [vmem:[%s19869_s16 + $0x98] sm:$0xff]   ;;  %v5254_v16 = vpack.c.bf16 %v5252_v48, %v5253_v26  ;;  %v13342_v26 = vld [vmem:[%s19869_s16 + $0xb0] sm:$0xff]  }
 0x68e   : > { %12543 = vmatprep.mubr.msk.bf16.mxu0 %vm14074_vm14, %v20040_v63  ;;  %v5250_v6 = vsel %vm1315_vm12, %v5238_v50, %v5239_v10 }
 0x694   : > { %12516 = vmatmul.mubr.msk.bf16.vlgmr.msra.gmra.mxu1 %vm3336_vm15, %v5254_v16  ;;  %v5251_v16 = vsel %vm1315_vm12, %v5237_v18, %v5238_v50  ;;  %v13344_v50 = vld [vmem:[%s19869_s16 + $0xa8] sm:$0xff]   ;;  %v5407_v18 = vpack.c.bf16 %v16971_v37, %v16894_v2 }
 0x695   : > { %12564 = vmatpush3.bf16.msra.mxu1 %v13338_v24  ;;  %12519 = vmatprep.mubr.msk.bf16.mxu1 %vm14074_vm14, %v20040_v63  ;;  %v5255_v48 = vpack.c.bf16 %v5250_v6, %v5251_v16  ;;  %v5240_v24 = vrot.slane %v16867_v41, 3  ;;  %v13345_v16 = vld [vmem:[%s19869_s16 + $0xa0] sm:$0xff]  }
 0x696   : > { %12544 = vmatmul.mubr.msk.bf16.vlgmr.msra.gmra.mxu0 %vm3336_vm15, %v5406_v11  ;;  %12565 = vmatprep.subr.bf16.mxu1 %v20040_v63  ;;  %v13340_v11 = vld [vmem:[%s19869_s16 + $0x88] sm:$0xff]  }
 0x697   : > { %12547 = vmatprep.mubr.msk.bf16.mxu0 %vm14074_vm14, %v20040_v63  ;;  %12592 = vmatpush3.bf16.msra.mxu0 %v13341_v3  ;;  %v13343_v3 = vld [vmem:[%s19869_s16 + $0x80] sm:$0xff]   ;;  %v5249_v6 = vsel %vm1315_vm12, %v5239_v10, %v5240_v24  ;;  %v5408_v10 = vpack.c.bf16 %v17002_v33, %v17010_v28 }
 0x698   : > { %12593 = vmatprep.subr.bf16.mxu0 %v20040_v63 }
 0x699   : > { %12566 = vmatpush3.bf16.msra.mxu1 %v13339_v17  ;;  %v5248_v17 = vsel %vm1315_vm12, %v5240_v24, %v5241_v45 }
 0x69a   : > { %12567 = vmatprep.subr.bf16.mxu1 %v20040_v63 }
 0x69b   : > { %12594 = vmatpush3.bf16.msra.mxu0 %v13342_v26  ;;  %v5256_v26 = vpack.c.bf16 %v5248_v17, %v5249_v6  ;;  %v20092_v17 = vrot.slane %v16734_v56, 3 }
 0x69c   : > { %12520 = vmatmul.mubr.msk.bf16.gmra.mxu1 %vm3336_vm15, %v5255_v48  ;;  %12595 = vmatprep.subr.bf16.mxu0 %v20040_v63  ;;  %v5243_v48 = vrot.slane %v16941_v5, 3 }
 0x69d   : > { %12523 = vmatprep.mubr.msk.bf16.mxu1 %vm14074_vm14, %v20040_v63  ;;  %12568 = vmatpush3.bf16.msra.mxu1 %v13340_v11  ;;  %v5242_v11 = vrot.slane %v16937_v57, 3 }
 0x69e   : > { %12548 = vmatmul.mubr.msk.bf16.gmra.mxu0 %vm3336_vm15, %v5407_v18  ;;  %12569 = vmatprep.subr.bf16.mxu1 %v20040_v63  ;;  %v5245_v6 = vsel %vm1315_vm12, %v5243_v48, %v20092_v17 }
 0x69f   : > { %12551 = vmatprep.mubr.msk.bf16.mxu0 %vm14074_vm14, %v20040_v63  ;;  %12596 = vmatpush3.bf16.msra.mxu0 %v13344_v50  ;;  %v5246_v24 = vsel %vm1315_vm12, %v5242_v11, %v5243_v48  ;;  %v5247_v50 = vsel %vm1315_vm12, %v5241_v45, %v5242_v11  ;;  %v5258_v45 = vpack.c.bf16 %v5245_v6, %v5245_v6  ;;  %v13349_v11 = vld [vmem:[%s19869_s16 + $0xf8] sm:$0xff]  }
 0x6a0   : > { %12597 = vmatprep.subr.bf16.mxu0 %v20040_v63  ;;  %v5257_v18 = vpack.c.bf16 %v5246_v24, %v5247_v50  ;;  %v20093_v48 = vpack.c.bf16 %v16713_v59, %v16708_v42  ;;  %v20094_v24 = vpack.c.bf16 %v16849_v12, %v16746_v52  ;;  %v13350_v42 = vld [vmem:[%s19869_s16 + $0xf0] sm:$0xff]   ;;  %v13348_v59 = vld [vmem:[%s19869_s16 + $0xc8] sm:$0xff]   ;;  %v20095_v12 = vpack.c.bf16 %v16799_v43, %v16795_v32  ;;  %v13351_v50 = vld [vmem:[%s19869_s16 + $0xc0] sm:$0xff]  }
 0x6a1   : > { %12570 = vmatpush3.bf16.msra.mxu1 %v13343_v3  ;;  %v5409_v3 = vpack.c.bf16 %v17016_v46, %v17020_v58  ;;  %v13352_v52 = vld [vmem:[%s19869_s16 + $0xe8] sm:$0xff]   ;;  %v13353_v32 = vld [vmem:[%s19869_s16 + $0xe0] sm:$0xff]   ;;  %v20097_v43 = vpack.c.bf16 %v16871_v13, %v16867_v41  ;;  %v20100_v41 = vpack.c.bf16 %v16998_v38, %v16979_v36  ;;  %v5678_v13 = vpack.c.bf16 %v16754_v1, %v16754_v1  ;;  %v13354_v36 = vld [vmem:[%s19869_s16 + $0x118] sm:$0xff]  }
 0x6a2   : > { %12619 = vmatprep.subr.bf16.mxu1 %v20040_v63  ;;  %v13355_v1 = vld [vmem:[%s19869_s16 + $0x110] sm:$0xff]   ;;  %v20108_v38 = vpack.c.bf16 %v17095_v20, %v17099_v34 }
 0x6a3   : > { %12598 = vmatpush3.bf16.msra.mxu0 %v13345_v16  ;;  %v5410_v16 = vpack.c.bf16 %v17029_v31, %v17029_v31 }
 0x6a4   : > { %12524 = vmatmul.mubr.msk.bf16.gmra.mxu1 %vm3336_vm15, %v5256_v26  ;;  %12647 = vmatprep.subr.bf16.mxu0 %v20040_v63  ;;  %v13346_v26 = vld [vmem:[%s19869_s16 + $0xd8] sm:$0xff]  }
 0x6a5   : > { %12527 = vmatprep.mubr.msk.bf16.mxu1 %vm14074_vm14, %v20040_v63 }
 0x6a6   : > { %12552 = vmatmul.mubr.msk.bf16.gmra.mxu0 %vm3336_vm15, %v5408_v10  ;;  %v13347_v10 = vld [vmem:[%s19869_s16 + $0xd0] sm:$0xff]  }
 0x6a7   : > { %12555 = vmatprep.mubr.msk.bf16.mxu0 %vm14074_vm14, %v20040_v63 }
 0x6ac   : > { %12528 = vmatmul.mubr.msk.bf16.gmra.mxu1 %vm3336_vm15, %v5257_v18  ;;  %v20096_v18 = vpack.c.bf16 %v16916_v23, %v16842_v53  ;;  %v20098_v53 = vpack.c.bf16 %v16983_v30, %v16912_v19  ;;  %v20099_v23 = vpack.c.bf16 %v16941_v5, %v16937_v57  ;;  %v5544_v30 = vpack.c.bf16 %v16734_v56, %v16734_v56 }
 0x6ad   : > { %12531 = vmatprep.mubr.msk.bf16.mxu1 %vm14074_vm14, %v20040_v63  ;;  %v20101_v56 = vpack.c.bf16 %v16818_v9, %v16723_v22  ;;  %v20102_v19 = vpack.c.bf16 %v16824_v39, %v16727_v61  ;;  %v13356_v22 = vld [vmem:[%s19869_s16 + $0x108] sm:$0xff]   ;;  %v20103_v9 = vpack.c.bf16 %v16951_v14, %v17039_v27  ;;  %v13357_v61 = vld [vmem:[%s19869_s16 + $0x100] sm:$0xff]   ;;  %v20104_v39 = vpack.c.bf16 %v17047_v35, %v17053_v8 }
 0x6ae   : > { %12556 = vmatmul.mubr.msk.bf16.gmra.mxu0 %vm3336_vm15, %v5409_v3  ;;  %v20105_v57 = vpack.c.bf16 %v17057_v51, %v17065_v21  ;;  %v20106_v5 = vpack.c.bf16 %v17069_v40, %v17073_v44  ;;  %v20107_v14 = vpack.c.bf16 %v17083_v60, %v17087_v55  ;;  %v5830_v40 = vpack.c.bf16 %v16774_v54, %v16774_v54 }
 0x6af   : > { %12559 = vmatprep.mubr.msk.bf16.mxu0 %vm14074_vm14, %v20040_v63  ;;  %v5982_v8 = vpack.c.bf16 %v16780_v0, %v16780_v0  ;;  %v20109_v27 = vmov 0   ;;  %v20110_v21 = vpack.c.bf16 %v16894_v2, %v16900_v25  ;;  %v20111_v54 = vpack.c.bf16 %v17010_v28, %v16971_v37 }
 0x6b0   : > { %v20112_v0 = vpack.c.bf16 %v17020_v58, %v17002_v33  ;;  %v20113_v2 = vpack.c.bf16 %v17029_v31, %v17016_v46  ;;  %v6116_v37 = vpack.c.bf16 %v17132_v7, %v17132_v7 }
 0x6b4   : > { %12532 = vmatmul.mubr.msk.bf16.gmra.mxu1 %vm3336_vm15, %v5258_v45 }
 0x6b5   : > { %12571 = vmatprep.mubr.msk.bf16.mxu1 %vm14074_vm14, %v20040_v63 }
 0x6b6   : > { %12560 = vmatmul.mubr.msk.bf16.gmra.mxu0 %vm3336_vm15, %v5410_v16 }
 0x6b7   : > { %12599 = vmatprep.mubr.msk.bf16.mxu0 %vm14074_vm14, %v20040_v63 }
 0x6bc   : > { %12572 = vmatmul.mubr.msk.bf16.vlgmr.msra.gmra.mxu1 %vm3336_vm15, %v20093_v48 }
 0x6bd   : > { %12620 = vmatpush3.bf16.msra.mxu1 %v13346_v26  ;;  %12575 = vmatprep.mubr.msk.bf16.mxu1 %vm14074_vm14, %v20040_v63 }
 0x6be   : > { %12600 = vmatmul.mubr.msk.bf16.vlgmr.msra.gmra.mxu0 %vm3336_vm15, %v20094_v24  ;;  %12621 = vmatprep.subr.bf16.mxu1 %v20040_v63 }
 0x6bf   : > { %12603 = vmatprep.mubr.msk.bf16.mxu0 %vm14074_vm14, %v20040_v63  ;;  %12648 = vmatpush3.bf16.msra.mxu0 %v13349_v11 }
 0x6c0   : > { %12649 = vmatprep.subr.bf16.mxu0 %v20040_v63 }
 0x6c1   : > { %12622 = vmatpush3.bf16.msra.mxu1 %v13347_v10 }
 0x6c2   : > { %12623 = vmatprep.subr.bf16.mxu1 %v20040_v63 }
 0x6c3   : > { %12650 = vmatpush3.bf16.msra.mxu0 %v13350_v42 }
 0x6c4   : > { %12576 = vmatmul.mubr.msk.bf16.gmra.mxu1 %vm3336_vm15, %v20095_v12  ;;  %12651 = vmatprep.subr.bf16.mxu0 %v20040_v63 }
 0x6c5   : > { %12579 = vmatprep.mubr.msk.bf16.mxu1 %vm14074_vm14, %v20040_v63  ;;  %12624 = vmatpush3.bf16.msra.mxu1 %v13348_v59 }
 0x6c6   : > { %12604 = vmatmul.mubr.msk.bf16.gmra.mxu0 %vm3336_vm15, %v20096_v18  ;;  %12625 = vmatprep.subr.bf16.mxu1 %v20040_v63 }
 0x6c7   : > { %12607 = vmatprep.mubr.msk.bf16.mxu0 %vm14074_vm14, %v20040_v63  ;;  %12652 = vmatpush3.bf16.msra.mxu0 %v13352_v52 }
 0x6c8   : > { %12653 = vmatprep.subr.bf16.mxu0 %v20040_v63 }
 0x6c9   : > { %12626 = vmatpush3.bf16.msra.mxu1 %v13351_v50 }
 0x6ca   : > { %12675 = vmatprep.subr.bf16.mxu1 %v20040_v63 }
 0x6cb   : > { %12654 = vmatpush3.bf16.msra.mxu0 %v13353_v32 }
 0x6cc   : > { %12580 = vmatmul.mubr.msk.bf16.gmra.mxu1 %vm3336_vm15, %v20097_v43 }
 0x6cd   : > { %12583 = vmatprep.mubr.msk.bf16.mxu1 %vm14074_vm14, %v20040_v63 }
 0x6ce   : > { %12608 = vmatmul.mubr.msk.bf16.gmra.mxu0 %vm3336_vm15, %v20098_v53 }
 0x6cf   : > { %12611 = vmatprep.mubr.msk.bf16.mxu0 %vm14074_vm14, %v20040_v63 }
 0x6d4   : > { %12584 = vmatmul.mubr.msk.bf16.gmra.mxu1 %vm3336_vm15, %v20099_v23 }
 0x6d5   : > { %12587 = vmatprep.mubr.msk.bf16.mxu1 %vm14074_vm14, %v20040_v63 }
 0x6d6   : > { %12612 = vmatmul.mubr.msk.bf16.gmra.mxu0 %vm3336_vm15, %v20100_v41 }
 0x6d7   : > { %12615 = vmatprep.mubr.msk.bf16.mxu0 %vm14074_vm14, %v20040_v63 }
 0x6dc   : > { %12588 = vmatmul.mubr.msk.bf16.gmra.mxu1 %vm3336_vm15, %v5544_v30 }
 0x6dd   : > { %12627 = vmatprep.mubr.msk.bf16.mxu1 %vm14074_vm14, %v20040_v63 }
 0x6de   : > { %12616 = vmatmul.mubr.msk.bf16.gmra.mxu0 %vm3336_vm15, %v5678_v13 }
 0x6df   : > { %12655 = vmatprep.mubr.msk.bf16.mxu0 %vm14074_vm14, %v20040_v63 }
 0x6e4   : > { %12628 = vmatmul.mubr.msk.bf16.vlgmr.msra.gmra.mxu1 %vm3336_vm15, %v20101_v56 }
 0x6e5   : > { %12676 = vmatpush3.bf16.msra.mxu1 %v13354_v36  ;;  %12631 = vmatprep.mubr.msk.bf16.mxu1 %vm14074_vm14, %v20040_v63 }
 0x6e6   : > { %12656 = vmatmul.mubr.msk.bf16.vlgmr.msra.gmra.mxu0 %vm3336_vm15, %v20102_v19  ;;  %12677 = vmatprep.subr.bf16.mxu1 %v20040_v63 }
 0x6e7   : > { %12659 = vmatprep.mubr.msk.bf16.mxu0 %vm14074_vm14, %v20040_v63 }
 0x6e9   : > { %12678 = vmatpush3.bf16.msra.mxu1 %v13355_v1 }
 0x6ea   : > { %12679 = vmatprep.subr.bf16.mxu1 %v20040_v63 }
 0x6ec   : > { %12632 = vmatmul.mubr.msk.bf16.gmra.mxu1 %vm3336_vm15, %v20103_v9 }
 0x6ed   : > { %12635 = vmatprep.mubr.msk.bf16.mxu1 %vm14074_vm14, %v20040_v63  ;;  %12680 = vmatpush3.bf16.msra.mxu1 %v13356_v22 }
 0x6ee   : > { %12660 = vmatmul.mubr.msk.bf16.gmra.mxu0 %vm3336_vm15, %v20104_v39  ;;  %12681 = vmatprep.subr.bf16.mxu1 %v20040_v63 }
 0x6ef   : > { %12663 = vmatprep.mubr.msk.bf16.mxu0 %vm14074_vm14, %v20040_v63 }
 0x6f1   : > { %12682 = vmatpush3.bf16.msra.mxu1 %v13357_v61 }
 0x6f4   : > { %12636 = vmatmul.mubr.msk.bf16.gmra.mxu1 %vm3336_vm15, %v20105_v57 }
 0x6f5   : > { %12639 = vmatprep.mubr.msk.bf16.mxu1 %vm14074_vm14, %v20040_v63 }
 0x6f6   : > { %12664 = vmatmul.mubr.msk.bf16.gmra.mxu0 %vm3336_vm15, %v20106_v5 }
 0x6f7   : > { %12667 = vmatprep.mubr.msk.bf16.mxu0 %vm14074_vm14, %v20040_v63 }
 0x6fc   : > { %12640 = vmatmul.mubr.msk.bf16.gmra.mxu1 %vm3336_vm15, %v20107_v14 }
 0x6fd   : > { %12643 = vmatprep.mubr.msk.bf16.mxu1 %vm14074_vm14, %v20040_v63 }
 0x6fe   : > { %12668 = vmatmul.mubr.msk.bf16.gmra.mxu0 %vm3336_vm15, %v20108_v38 }
 0x6ff   : > { %12671 = vmatprep.mubr.msk.bf16.mxu0 %vm14074_vm14, %v20040_v63 }
 0x704   : > { %12644 = vmatmul.mubr.msk.bf16.gmra.mxu1 %vm3336_vm15, %v5830_v40 }
 0x705   : > { %12683 = vmatprep.mubr.msk.bf16.mxu1 %vm14074_vm14, %v20040_v63 }
 0x706   : > { %12672 = vmatmul.mubr.msk.bf16.gmra.mxu0 %vm3336_vm15, %v5982_v8 }
 0x707   : > { %6747 = vmatprep.mubr.bf16.mxu0 %v20109_v27 }
 0x70c   : > { %12684 = vmatmul.mubr.msk.bf16.vlgmr.msra.gmra.mxu1 %vm3336_vm15, %v20110_v21 }
 0x70d   : > { %12687 = vmatprep.mubr.msk.bf16.mxu1 %vm14074_vm14, %v20040_v63 }
 0x714   : > { %12688 = vmatmul.mubr.msk.bf16.gmra.mxu1 %vm3336_vm15, %v20111_v54 }
 0x715   : > { %12691 = vmatprep.mubr.msk.bf16.mxu1 %vm14074_vm14, %v20040_v63 }
 0x71c   : > { %12692 = vmatmul.mubr.msk.bf16.gmra.mxu1 %vm3336_vm15, %v20112_v0 }
 0x71d   : > { %12695 = vmatprep.mubr.msk.bf16.mxu1 %vm14074_vm14, %v20040_v63 }
 0x724   : > { %12696 = vmatmul.mubr.msk.bf16.gmra.mxu1 %vm3336_vm15, %v20113_v2 }
 0x725   : > { %12699 = vmatprep.mubr.msk.bf16.mxu1 %vm14074_vm14, %v20040_v63 }
 0x72b   : > { %v5087_v25 = vpop.f32.mrf.mxu1  ;;  %v5198_v28 = vpop.f32.mrf.mxu0 }
 0x72c   : > { %v5199_v35 = vadd.f32 %v5198_v28, %v5087_v25  ;;  %12700 = vmatmul.mubr.msk.bf16.gmra.mxu1 %vm3336_vm15, %v6116_v37 }
 0x72d   : > { %v12461_v58 = vpop.f32.mrf.mxu1  ;;  %v12489_v33 = vpop.f32.mrf.mxu0  ;;  %6903 = vmatprep.mubr.bf16.mxu1 %v20109_v27 }
 0x72f   : > { %v5090_v51 = vpop.f32.mrf.mxu1  ;;  %v5201_v34 = vpop.f32.mrf.mxu0 }
 0x730   : > { %v5202_v46 = vadd.f32 %v5201_v34, %v5090_v51 }
 0x731   : > { %v12462_v31 = vpop.f32.mrf.mxu1  ;;  %v12490_v44 = vpop.f32.mrf.mxu0 }
 0x734   : > { %v5095_v20 = vpop.f32.mrf.mxu1  ;;  %v5206_v60 = vpop.f32.mrf.mxu0 }
 0x735   : > { %v5207_v3 = vadd.f32 %v5206_v60, %v5095_v20 }
 0x736   : > { %v12465_v55 = vpop.f32.mrf.mxu1  ;;  %v12493_v17 = vpop.f32.mrf.mxu0 }
 0x738   : > { %v5098_v7 = vpop.f32.mrf.mxu1  ;;  %v5209_v6 = vpop.f32.mrf.mxu0 }
 0x739   : > { %v5210_v16 = vadd.f32 %v5209_v6, %v5098_v7 }
 0x73a   : > { %v12466_v45 = vpop.f32.mrf.mxu1  ;;  %v12494_v26 = vpop.f32.mrf.mxu0 }
 0x73c   : > { %v5103_v11 = vpop.f32.mrf.mxu1 }
 0x73d   : > { %v5214_v48 = vpop.f32.mrf.mxu0 }
 0x73e   : > { %v12469_v10 = vpop.f32.mrf.mxu1  ;;  %v5215_v24 = vadd.f32 %v5214_v48, %v5103_v11 }
 0x73f   : > { %v12497_v42 = vpop.f32.mrf.mxu0 }
 0x740   : > { %v5106_v59 = vpop.f32.mrf.mxu1 }
 0x741   : > { %v5217_v52 = vpop.f32.mrf.mxu0 }
 0x742   : > { %v12470_v12 = vpop.f32.mrf.mxu1  ;;  %v5218_v50 = vadd.f32 %v5217_v52, %v5106_v59 }
 0x743   : > { %v12498_v18 = vpop.f32.mrf.mxu0 }
 0x744   : > { %v5111_v32 = vpop.f32.mrf.mxu1 }
 0x745   : > { %v5222_v43 = vpop.f32.mrf.mxu0 }
 0x746   : > { %v12473_v53 = vpop.f32.mrf.mxu1  ;;  %v5223_v23 = vadd.f32 %v5222_v43, %v5111_v32 }
 0x747   : > { %v12501_v41 = vpop.f32.mrf.mxu0 }
 0x748   : > { %v5114_v30 = vpop.f32.mrf.mxu1 }
 0x749   : > { %v5225_v13 = vpop.f32.mrf.mxu0 }
 0x74a   : > { %v12474_v36 = vpop.f32.mrf.mxu1  ;;  %v5226_v56 = vadd.f32 %v5225_v13, %v5114_v30 }
 0x74b   : > { %v12502_v1 = vpop.f32.mrf.mxu0 }
 0x74c   : > { %v5119_v19 = vpop.f32.mrf.mxu1 }
 0x74d   : > { %v5230_v22 = vpop.f32.mrf.mxu0 }
 0x74e   : > { %v12477_v9 = vpop.f32.mrf.mxu1  ;;  %v5231_v61 = vadd.f32 %v5230_v22, %v5119_v19 }
 0x74f   : > { %v12505_v39 = vpop.f32.mrf.mxu0 }
 0x750   : > { %v5122_v57 = vpop.f32.mrf.mxu1 }
 0x751   : > { %v5233_v5 = vpop.f32.mrf.mxu0 }
 0x752   : > { %v12478_v14 = vpop.f32.mrf.mxu1 }
 0x753   : > { %v12506_v38 = vpop.f32.mrf.mxu0 }
 0x754   : > { %v5341_v40 = vpop.f32.mrf.mxu1 }
 0x755   : > { %v5379_v8 = vadd.f32 %v5341_v40, %v5199_v35 }
 0x756   : > { %v5493_v21 = vpop.f32.mrf.mxu0  ;;  %v12517_v54 = vpop.f32.mrf.mxu1 }
 0x757   : > { %v5531_v0 = vadd.f32 %v5493_v21, %v5379_v8 }
 0x758   : > { %v12545_v2 = vpop.f32.mrf.mxu0  ;;  %v5344_v37 = vpop.f32.mrf.mxu1 }
 0x759   : > { %v5380_v25 = vadd.f32 %v5344_v37, %v5202_v46 }
 0x75a   : > { %v5496_v28 = vpop.f32.mrf.mxu0  ;;  %v12518_v58 = vpop.f32.mrf.mxu1 }
 0x75b   : > { %v5532_v33 = vadd.f32 %v5496_v28, %v5380_v25 }
 0x75c   : > { %v12546_v51 = vpop.f32.mrf.mxu0  ;;  %v5349_v34 = vpop.f32.mrf.mxu1 }
 0x75d   : > { %v5381_v31 = vadd.f32 %v5349_v34, %v5207_v3 }
 0x75e   : > { %v5501_v44 = vpop.f32.mrf.mxu0  ;;  %v12521_v20 = vpop.f32.mrf.mxu1 }
 0x75f   : > { %v5533_v60 = vadd.f32 %v5501_v44, %v5381_v31 }
 0x760   : > { %v12549_v55 = vpop.f32.mrf.mxu0  ;;  %v5352_v17 = vpop.f32.mrf.mxu1 }
 0x761   : > { %v5382_v7 = vadd.f32 %v5352_v17, %v5210_v16 }
 0x762   : > { %v5504_v6 = vpop.f32.mrf.mxu0  ;;  %v12522_v35 = vpop.f32.mrf.mxu1 }
 0x763   : > { %v5534_v45 = vadd.f32 %v5504_v6, %v5382_v7 }
 0x764   : > { %v12550_v26 = vpop.f32.mrf.mxu0  ;;  %v5357_v11 = vpop.f32.mrf.mxu1 }
 0x765   : > { %v5383_v48 = vadd.f32 %v5357_v11, %v5215_v24 }
 0x766   : > { %v5509_v10 = vpop.f32.mrf.mxu0  ;;  %v12525_v46 = vpop.f32.mrf.mxu1 }
 0x767   : > { %v5535_v42 = vadd.f32 %v5509_v10, %v5383_v48 }
 0x768   : > { %v12553_v59 = vpop.f32.mrf.mxu0  ;;  %v5360_v52 = vpop.f32.mrf.mxu1 }
 0x769   : > { %v5384_v12 = vadd.f32 %v5360_v52, %v5218_v50 }
 0x76a   : > { %v5512_v18 = vpop.f32.mrf.mxu0  ;;  %v12526_v3 = vpop.f32.mrf.mxu1 }
 0x76b   : > { %v5536_v32 = vadd.f32 %v5512_v18, %v5384_v12 }
 0x76c   : > { %v12554_v43 = vpop.f32.mrf.mxu0  ;;  %v5365_v53 = vpop.f32.mrf.mxu1 }
 0x76d   : > { %v5385_v41 = vadd.f32 %v5365_v53, %v5223_v23 }
 0x76e   : > { %v5517_v30 = vpop.f32.mrf.mxu0  ;;  %v12529_v16 = vpop.f32.mrf.mxu1 }
 0x76f   : > { %v5537_v13 = vadd.f32 %v5517_v30, %v5385_v41 }
 0x770   : > { %v12557_v36 = vpop.f32.mrf.mxu0  ;;  %v5368_v1 = vpop.f32.mrf.mxu1 }
 0x771   : > { %v5386_v19 = vadd.f32 %v5368_v1, %v5226_v56 }
 0x772   : > { %v5520_v22 = vpop.f32.mrf.mxu0  ;;  %v12530_v24 = vpop.f32.mrf.mxu1 }
 0x773   : > { %v5538_v9 = vadd.f32 %v5520_v22, %v5386_v19 }
 0x774   : > { %v12558_v39 = vpop.f32.mrf.mxu0  ;;  %v5373_v57 = vpop.f32.mrf.mxu1 }
 0x775   : > { %v5387_v5 = vadd.f32 %v5373_v57, %v5231_v61 }
 0x776   : > { %v5525_v14 = vpop.f32.mrf.mxu0  ;;  %v12533_v50 = vpop.f32.mrf.mxu1 }
 0x777   : > { %v5539_v38 = vadd.f32 %v5525_v14, %v5387_v5 }
 0x778   : > { %v12561_v40 = vpop.f32.mrf.mxu0  ;;  %v5376_v8 = vpop.f32.mrf.mxu1 }
 0x77a   : > { %v5528_v21 = vpop.f32.mrf.mxu0  ;;  %v12534_v54 = vpop.f32.mrf.mxu1 }
 0x77c   : > { %v12562_v23 = vpop.f32.mrf.mxu0  ;;  %v5627_v2 = vpop.f32.mrf.mxu1 }
 0x77d   : > { %v5665_v37 = vadd.f32 %v5627_v2, %v5531_v0 }
 0x77e   : > { %v5761_v25 = vpop.f32.mrf.mxu0  ;;  %v12573_v28 = vpop.f32.mrf.mxu1 }
 0x77f   : > { %v17417_v58 = vadd.f32 %v5761_v25, %v5665_v37 }
 0x780   : > { %v12601_v56 = vpop.f32.mrf.mxu0  ;;  %v5630_v51 = vpop.f32.mrf.mxu1 }
 0x781   : > { %v5666_v34 = vadd.f32 %v5630_v51, %v5532_v33 }
 0x782   : > { %v5764_v31 = vpop.f32.mrf.mxu0  ;;  %v12574_v44 = vpop.f32.mrf.mxu1 }
 0x783   : > { %v17419_v61 = vadd.f32 %v5764_v31, %v5666_v34 }
 0x784   : > { %v12602_v20 = vpop.f32.mrf.mxu0  ;;  %v5635_v55 = vpop.f32.mrf.mxu1 }
 0x785   : > { %v5667_v17 = vadd.f32 %v5635_v55, %v5533_v60 }
 0x786   : > { %v5769_v7 = vpop.f32.mrf.mxu0  ;;  %v12577_v6 = vpop.f32.mrf.mxu1 }
 0x787   : > { %v17421_v35 = vadd.f32 %v5769_v7, %v5667_v17 }
 0x788   : > { %v12605_v26 = vpop.f32.mrf.mxu0  ;;  %v5638_v0 = vpop.f32.mrf.mxu1 }
 0x789   : > { %v5668_v11 = vadd.f32 %v5638_v0, %v5534_v45 }
 0x78a   : > { %v5772_v48 = vpop.f32.mrf.mxu0  ;;  %v12578_v10 = vpop.f32.mrf.mxu1 }
 0x78b   : > { %v17423_v46 = vadd.f32 %v5772_v48, %v5668_v11 }
 0x78c   : > { %v12606_v59 = vpop.f32.mrf.mxu0  ;;  %v5643_v33 = vpop.f32.mrf.mxu1 }
 0x78d   : > { %v5669_v52 = vadd.f32 %v5643_v33, %v5535_v42 }
 0x78e   : > { %v5777_v12 = vpop.f32.mrf.mxu0  ;;  %v12581_v18 = vpop.f32.mrf.mxu1 }
 0x78f   : > { %v17425_v3 = vadd.f32 %v5777_v12, %v5669_v52 }
 0x790   : > { %v12609_v43 = vpop.f32.mrf.mxu0  ;;  %v5646_v60 = vpop.f32.mrf.mxu1 }
 0x791   : > { %v5670_v53 = vadd.f32 %v5646_v60, %v5536_v32 }
 0x792   : > { %v5780_v41 = vpop.f32.mrf.mxu0  ;;  %v12582_v30 = vpop.f32.mrf.mxu1 }
 0x793   : > { %v17427_v16 = vadd.f32 %v5780_v41, %v5670_v53 }
 0x794   : > { %v12610_v36 = vpop.f32.mrf.mxu0  ;;  %v5651_v45 = vpop.f32.mrf.mxu1 }
 0x795   : > { %v5671_v1 = vadd.f32 %v5651_v45, %v5537_v13 }
 0x796   : > { %v5785_v19 = vpop.f32.mrf.mxu0  ;;  %v12585_v22 = vpop.f32.mrf.mxu1 }
 0x797   : > { %v17429_v24 = vadd.f32 %v5785_v19, %v5671_v1 }
 0x798   : > { %v12613_v39 = vpop.f32.mrf.mxu0  ;;  %v5654_v42 = vpop.f32.mrf.mxu1 }
 0x799   : > { %v5672_v57 = vadd.f32 %v5654_v42, %v5538_v9 }
 0x79a   : > { %v5788_v5 = vpop.f32.mrf.mxu0  ;;  %v12586_v14 = vpop.f32.mrf.mxu1 }
 0x79b   : > { %v17431_v50 = vadd.f32 %v5788_v5, %v5672_v57 }
 0x79c   : > { %v12614_v40 = vpop.f32.mrf.mxu0  ;;  %v5659_v32 = vpop.f32.mrf.mxu1 }
 0x79d   : > { %v5673_v8 = vadd.f32 %v5659_v32, %v5539_v38 }
 0x79e   : > { %v5793_v21 = vpop.f32.mrf.mxu0  ;;  %v12589_v54 = vpop.f32.mrf.mxu1 }
 0x79f   : > { %v17433_v23 = vadd.f32 %v5793_v21, %v5673_v8 }
 0x7a0   : > { %v12617_v2 = vpop.f32.mrf.mxu0  ;;  %v5662_v13 = vpop.f32.mrf.mxu1 }
 0x7a2   : > { %v5796_v37 = vpop.f32.mrf.mxu0  ;;  %v12590_v25 = vpop.f32.mrf.mxu1 }
 0x7a3   : > { %v17452_v37 = vld [vmem:[%s19870_s17] ss:$0 sm:$0xff] }
 0x7a4   : > { %v12618_v28 = vpop.f32.mrf.mxu0  ;;  %v5913_v56 = vpop.f32.mrf.mxu1 }
 0x7a5   : > { %v5951_v5 = vadd.f32 %v5913_v56, %v17417_v58 }
 0x7a6   : > { %v6065_v51 = vpop.f32.mrf.mxu0  ;;  %v12629_v34 = vpop.f32.mrf.mxu1 }
 0x7a7   : > { %v6103_v21 = vadd.f32 %v6065_v51, %v5951_v5 }
 0x7a8   : > { %v12657_v9 = vpop.f32.mrf.mxu0  ;;  %v5916_v31 = vpop.f32.mrf.mxu1 }
 0x7a9   : > { %v5952_v54 = vadd.f32 %v5916_v31, %v17419_v61 }
 0x7aa   : > { %v6068_v44 = vpop.f32.mrf.mxu0  ;;  %v12630_v20 = vpop.f32.mrf.mxu1 }
 0x7ab   : > { %v6104_v34 = vadd.f32 %v6068_v44, %v5952_v54 }
 0x7ac   : > { %v12658_v55 = vpop.f32.mrf.mxu0  ;;  %v5921_v17 = vpop.f32.mrf.mxu1 }
 0x7ad   : > { %v5953_v9 = vadd.f32 %v5921_v17, %v17421_v35 }
 0x7ae   : > { %v6073_v7 = vpop.f32.mrf.mxu0  ;;  %v12633_v38 = vpop.f32.mrf.mxu1 }
 0x7af   : > { %v6105_v31 = vadd.f32 %v6073_v7, %v5953_v9  ;;  %v6459_v9 = vld [vmem:[#allocation5 + $0x40] sm:$0xff] }
 0x7b0   : > { %v12661_v6 = vpop.f32.mrf.mxu0  ;;  %v17435_v26 = vpop.f32.mrf.mxu1 }
 0x7b2   : > { %v17437_v0 = vpop.f32.mrf.mxu0  ;;  %v12634_v11 = vpop.f32.mrf.mxu1 }
 0x7b4   : > { %v12662_v48 = vpop.f32.mrf.mxu0  ;;  %v5929_v10 = vpop.f32.mrf.mxu1 }
 0x7b5   : > { %v5955_v44 = vadd.f32 %v5929_v10, %v17425_v3 }
 0x7b6   : > { %v6081_v59 = vpop.f32.mrf.mxu0  ;;  %v12637_v33 = vpop.f32.mrf.mxu1 }
 0x7b7   : > { %v6107_v48 = vadd.f32 %v6081_v59, %v5955_v44  ;;  %v6469_v44 = vld [vmem:[#allocation7] sm:$0xff] }
 0x7b8   : > { %v12665_v52 = vpop.f32.mrf.mxu0  ;;  %v17439_v12 = vpop.f32.mrf.mxu1 }
 0x7ba   : > { %v17441_v18 = vpop.f32.mrf.mxu0  ;;  %v12638_v43 = vpop.f32.mrf.mxu1 }
 0x7bc   : > { %v12666_v60 = vpop.f32.mrf.mxu0  ;;  %v5937_v53 = vpop.f32.mrf.mxu1 }
 0x7bd   : > { %v5957_v60 = vadd.f32 %v5937_v53, %v17429_v24  ;;  %v5954_v24 = vadd.f32 %v17435_v26, %v17423_v46 }
 0x7be   : > { %v6089_v41 = vpop.f32.mrf.mxu0  ;;  %v12641_v30 = vpop.f32.mrf.mxu1 }
 0x7c0   : > { %v12669_v36 = vpop.f32.mrf.mxu0  ;;  %v17443_v45 = vpop.f32.mrf.mxu1 }
 0x7c2   : > { %v17445_v1 = vpop.f32.mrf.mxu0  ;;  %v12642_v19 = vpop.f32.mrf.mxu1 }
 0x7c3   : > { %v6109_v19 = vadd.f32 %v6089_v41, %v5957_v60 }
 0x7c4   : > { %v12670_v22 = vpop.f32.mrf.mxu0  ;;  %v5945_v39 = vpop.f32.mrf.mxu1 }
 0x7c5   : > { %v5959_v53 = vadd.f32 %v5945_v39, %v17433_v23 }
 0x7c6   : > { %v6097_v42 = vpop.f32.mrf.mxu0  ;;  %v12645_v57 = vpop.f32.mrf.mxu1 }
 0x7c8   : > { %v12673_v14 = vpop.f32.mrf.mxu0  ;;  %v5948_v40 = vpop.f32.mrf.mxu1 }
 0x7ca   : > { %v6100_v32 = vpop.f32.mrf.mxu0  ;;  %v12646_v8 = vpop.f32.mrf.mxu1 }
 0x7cb   : > { %v6106_v32 = vadd.f32 %v17437_v0, %v5954_v24  ;;  %v5956_v8 = vadd.f32 %v17439_v12, %v17427_v16  ;;  %v13358_v24 = vld [vmem:[%s19863_s10 + $0xb0] ss:$8 sps:$4 sm:$0xff]  }
 0x7cc   : > { %v12674_v2 = vpop.f32.mrf.mxu0  ;;  %v6199_v13 = vpop.f32.mrf.mxu1 }
 0x7cd   : > { %v6237_v25 = vadd.f32 %v6199_v13, %v6103_v21  ;;  %v6111_v21 = vadd.f32 %v6097_v42, %v5959_v53  ;;  %v6108_v39 = vadd.f32 %v17441_v18, %v5956_v8  ;;  %v5958_v13 = vadd.f32 %v17443_v45, %v17431_v50  ;;  %v6453_v42 = vld [vmem:[#allocation5 + $0x10] sm:$0xff]  ;;  %v13360_v53 = vld [vmem:[%s19863_s10 + $0xb4] ss:$8 sps:$4 sm:$0xff]  }
 0x7ce   : > { %v12685_v28 = vpop.f32.mrf.mxu1  ;;  %v13101_v45 = vpack.i.bf16 %v6453_v42, %v6459_v9  ;;  %6719 = vmatprep.subr.bf16.mxu0 %v13360_v53 }
 0x7cf   : > { %v17456_v58 = vadd.f32 %v17452_v37, %v6237_v25  ;;  %v6110_v12 = vadd.f32 %v17445_v1, %v5958_v13  ;;  %6720 = vmatpush1.bf16.msra.mxu0 %v13358_v24  ;;  %v20117_v24 = vld [vmem:[#allocation28_spill] sm:$0xff] }
 0x7d0   : > { %v6202_v56 = vpop.f32.mrf.mxu1 }
 0x7d1   : > { %13760 = vtanh.f32 %v17456_v58  ;;  %v6238_v51 = vadd.f32 %v6202_v56, %v6104_v34 }
 0x7d2   : > { %v12686_v61 = vpop.f32.mrf.mxu1 }
 0x7d3   : > { %v17460_v20 = vadd.f32 %v17452_v37, %v6238_v51 }
 0x7d4   : > { %v6207_v55 = vpop.f32.mrf.mxu1 }
 0x7d5   : > { %13762 = vtanh.f32 %v17460_v20  ;;  %v6239_v38 = vadd.f32 %v6207_v55, %v6105_v31  ;;  %v6451_v55 = vld [vmem:[#allocation5] sm:$0xff] }
 0x7d6   : > { %v12689_v6 = vpop.f32.mrf.mxu1 }
 0x7d7   : > { %v17465_v35 = vadd.f32 %v17452_v37, %v6239_v38  ;;  %v6452_v38 = vld [vmem:[#allocation5 + $0x8] sm:$0xff] }
 0x7d8   : > { %v6210_v17 = vpop.f32.mrf.mxu1 }
 0x7d9   : > { %13764 = vtanh.f32 %v17465_v35  ;;  %v6240_v2 = vadd.f32 %v6210_v17, %v6106_v32  ;;  %v6470_v17 = vld [vmem:[#allocation7 + $0x8] sm:$0xff] }
 0x7da   : > { %v12690_v11 = vpop.f32.mrf.mxu1 }
 0x7db   : > { %v6256_v0 = vadd.f32 %v17452_v37, %v6240_v2  ;;  %v13106_v11 = vpack.i.bf16 %v6470_v17, %v6469_v44  ;;  %v13370_v44 = vld [vmem:[%s19863_s10 + $0x80] ss:$8 sps:$4 sm:$0xff]   ;;  %v13372_v17 = vld [vmem:[%s19863_s10 + $0x84] ss:$8 sps:$4 sm:$0xff]  }
 0x7dc   : > { %v6215_v33 = vpop.f32.mrf.mxu1 }
 0x7dd   : > { %v6241_v7 = vadd.f32 %v6215_v33, %v6107_v48  ;;  %v11442_v48 = vmul.f32 -1.442695, %v17456_v58  ;;  %v11443_v33 = vmul.f32 -1.442695, %v17460_v20 }
 0x7de   : > { %v13761_v52 = vpop.eup %13760  ;;  %v12693_v43 = vpop.f32.mrf.mxu1 }
 0x7df   : > { %v17470_v30 = vadd.f32 %v17452_v37, %v6241_v7  ;;  %6334 = vrot.lane.b32.xlu1 %v13761_v52, %s14071_s0  ;;  %v11444_v7 = vmul.f32 -1.442695, %v17465_v35 }
 0x7e0   : > { %v6218_v3 = vpop.f32.mrf.mxu1 }
 0x7e1   : > { %13766 = vtanh.f32 %v17470_v30  ;;  %v6242_v34 = vadd.f32 %v6218_v3, %v6108_v39  ;;  %v11446_v52 = vmul.f32 -1.442695, %v17470_v30 }
 0x7e2   : > { %v13763_v10 = vpop.eup %13762  ;;  %v12694_v36 = vpop.f32.mrf.mxu1 }
 0x7e3   : > { %6336 = vrot.lane.b32.xlu0 %v13763_v10, %s14071_s0  ;;  %v17494_v18 = vadd.f32 %v17452_v37, %v6242_v34 }
 0x7e4   : > { %v6223_v59 = vpop.f32.mrf.mxu1 }
 0x7e5   : > { %v6243_v22 = vadd.f32 %v6223_v59, %v6109_v19  ;;  %v11447_v2 = vmul.f32 -1.442695, %v17494_v18 }
 0x7e6   : > { %v13765_v57 = vpop.eup %13764  ;;  %v12697_v5 = vpop.f32.mrf.mxu1 }
 0x7e7   : > { %v17479_v14 = vadd.f32 %v17452_v37, %v6243_v22  ;;  %6338 = vrot.lane.b32.xlu0 %v13765_v57, %s14071_s0  ;;  %v11445_v57 = vmul.f32 -1.442695, %v6256_v0 }
 0x7e8   : > { %v6226_v40 = vpop.f32.mrf.mxu1 }
 0x7e9   : > { %13768 = vtanh.f32 %v17479_v14  ;;  %v6244_v56 = vadd.f32 %v6226_v40, %v6110_v12  ;;  %v11448_v36 = vmul.f32 -1.442695, %v17479_v14 }
 0x7ea   : > { %v12698_v41 = vpop.f32.mrf.mxu1 }
 0x7eb   : > { %v17499_v51 = vadd.f32 %v17452_v37, %v6244_v56  ;;  %v13364_v56 = vld [vmem:[%s19863_s10 + $0x90] ss:$8 sps:$4 sm:$0xff]  }
 0x7ec   : > { %v6231_v54 = vpop.f32.mrf.mxu1 }
 0x7ed   : > { %v6245_v46 = vadd.f32 %v6231_v54, %v6111_v21 }
 0x7ee   : > { %v13767_v26 = vpop.eup %13766  ;;  %v12701_v23 = vpop.f32.mrf.mxu1 }
 0x7ef   : > { %v6261_v25 = vadd.f32 %v17452_v37, %v6245_v46  ;;  %6342 = vrot.lane.b32.xlu0 %v13767_v26, %s14071_s0  ;;  %v13096_v37 = vpack.i.bf16 %v6452_v38, %v6451_v55  ;;  %v13361_v26 = vld [vmem:[%s19863_s10 + $0xa0] ss:$8 sps:$4 sm:$0xff]   ;;  %v13363_v23 = vld [vmem:[%s19863_s10 + $0xa4] ss:$8 sps:$4 sm:$0xff]   ;;  %v6454_v55 = vld [vmem:[#allocation5 + $0x18] sm:$0xff] }
 0x7f0   : > { %v6234_v28 = vpop.f32.mrf.mxu1  ;;  %6721 = vmatprep.subr.bf16.mxu0 %v13363_v23  ;;  %v6455_v38 = vld [vmem:[#allocation5 + $0x20] sm:$0xff] }
 0x7f1   : > { %13770 = vtanh.f32 %v6261_v25  ;;  %v11450_v59 = vmul.f32 -1.442695, %v6261_v25  ;;  %6722 = vmatpush1.bf16.msra.mxu0 %v13361_v26  ;;  %v6458_v26 = vld [vmem:[#allocation5 + $0x38] sm:$0xff]  ;;  %v20118_v23 = vld [vmem:[#allocation21_spill] sm:$0xff] }
 0x7f2   : > { %v12702_v16 = vpop.f32.mrf.mxu1  ;;  %13772 = vtanh.f32 %v6256_v0 }
 0x7f3   : > { %13774 = vtanh.f32 %v17494_v18 }
 0x7f4   : > { %13776 = vtanh.f32 %v17499_v51 }
 0x7f5   : > { %13778 = vpow2.f32 %v11442_v48  ;;  %v13116_v48 = vpack.i.bf16 %v6455_v38, %v6454_v55  ;;  %v13390_v38 = vld [vmem:[%s19863_s10 + $0x64] ss:$8 sps:$4 sm:$0xff]  }
 0x7f6   : > { %v13769_v50 = vpop.eup %13768  ;;  %13780 = vpow2.f32 %v11443_v33 }
 0x7f7   : > { %6346 = vrot.lane.b32.xlu0 %v13769_v50, %s14071_s0  ;;  %13782 = vpow2.f32 %v11444_v7  ;;  %v13366_v50 = vld [vmem:[%s19863_s10 + $0x94] ss:$8 sps:$4 sm:$0xff]  }
 0x7f8   : > { %13784 = vpow2.f32 %v11446_v52  ;;  %6723 = vmatprep.subr.bf16.mxu0 %v13366_v50  ;;  %v20115_v7 = vld [vmem:[#allocation25_spill] sm:$0xff] }
 0x7f9   : > { %6724 = vmatpush1.bf16.msra.mxu0 %v13364_v56  ;;  %v13385_v50 = vld [vmem:[%s19863_s10 + $0x10] ss:$8 sps:$4 sm:$0xff]  }
 0x7fa   : > { %6725 = vmatprep.subr.bf16.mxu0 %v13372_v17 }
 0x7fb   : > { %13102 = vrot.lane.b32.xlu0 %v13101_v45, %s14071_s0  ;;  %v11449_v45 = vmul.f32 -1.442695, %v17499_v51  ;;  %v13369_v51 = vld [vmem:[%s19863_s10 + $0x54] ss:$8 sps:$4 sm:$0xff]  }
 0x7fc   : > { %6875 = vmatprep.subr.bf16.mxu1 %v13369_v51  ;;  %v20121_v51 = vld [vmem:[#allocation27_spill] sm:$0xff] }
 0x7fd   : > { %6726 = vmatpush1.bf16.msra.mxu0 %v13370_v44 }
 0x7fe   : > { %v13771_v1 = vpop.eup %13770 }
 0x7ff   : > { %6350 = vrot.lane.b32.xlu1 %v13771_v1, %s14071_s0  ;;  %v13773_v61 = vpop.eup %13772 }
 0x800   : > { %v13775_v31 = vpop.eup %13774 }
 0x801   : > { %v13777_v6 = vpop.eup %13776 }
 0x802   : > { %v13779_v43 = vpop.eup %13778 }
 0x803   : > { %6340 = vrot.lane.b32.xlu1 %v13773_v61, %s14071_s0  ;;  %v13781_v60 = vpop.eup %13780  ;;  %v6298_v3 = vadd.f32 1.0, %v13779_v43 }
 0x804   : > { %v6299_v10 = vadd.f32 1.0, %v13781_v60  ;;  %v13783_v19 = vpop.eup %13782 }
 0x805   : > { %13786 = vrcp.f32 %v6298_v3  ;;  %v6300_v58 = vadd.f32 1.0, %v13783_v19  ;;  %v13785_v20 = vpop.eup %13784  ;;  %v13373_v3 = vld [vmem:[%s19863_s10 + $0x40] ss:$8 sps:$4 sm:$0xff]  }
 0x806   : > { %13788 = vrcp.f32 %v6299_v10  ;;  %v6302_v22 = vadd.f32 1.0, %v13785_v20  ;;  %v13375_v10 = vld [vmem:[%s19863_s10 + $0x44] ss:$8 sps:$4 sm:$0xff]  }
 0x807   : > { %6344 = vrot.lane.b32.xlu1 %v13775_v31, %s14071_s0  ;;  %13790 = vpow2.f32 %v11448_v36 }
 0x808   : > { %13792 = vrcp.f32 %v6300_v58  ;;  %v20116_v58 = vld [vmem:[#allocation23_spill] sm:$0xff] }
 0x809   : > { %13794 = vpow2.f32 %v11450_v59 }
 0x80a   : > { %13796 = vrcp.f32 %v6302_v22 }
 0x80b   : > { %6348 = vrot.lane.b32.xlu1 %v13777_v6, %s14071_s0  ;;  %13798 = vpow2.f32 %v11445_v57  ;;  %v6456_v57 = vld [vmem:[#allocation5 + $0x28] sm:$0xff] }
 0x80f   : > { %13097 = vrot.lane.b32.xlu1 %v13096_v37, %s14071_s0  ;;  %v13367_v37 = vld [vmem:[%s19863_s10 + $0x50] ss:$8 sps:$4 sm:$0xff]  }
 0x810   : > { %6876 = vmatpush1.bf16.msra.mxu1 %v13367_v37  ;;  %v13396_v37 = vld [vmem:[%s19863_s10 + $0x114] ss:$8 sps:$4 sm:$0xff]  }
 0x811   : > { %6877 = vmatprep.subr.bf16.mxu1 %v13375_v10  ;;  %v20123_v10 = vld [vmem:[#allocation30_spill] sm:$0xff] }
 0x812   : > { %v13787_v35 = vpop.eup %13786 }
 0x813   : > { %13107 = vrot.lane.b32.xlu1 %v13106_v11, %s14070_s20  ;;  %v13789_v30 = vpop.eup %13788  ;;  %v6370_v5 = vsub.f32 1.0, %v13787_v35 }
 0x814   : > { %v13791_v14 = vpop.eup %13790  ;;  %v6371_v41 = vsub.f32 1.0, %v13789_v30  ;;  %6878 = vmatpush1.bf16.msra.mxu1 %v13373_v3 }
 0x815   : > { %v6304_v32 = vadd.f32 1.0, %v13791_v14  ;;  %v6379_v8 = vmul.f32 %v6370_v5, %v16702_v49  ;;  %v13793_v54 = vpop.eup %13792  ;;  %v13378_v5 = vld [vmem:[%s19863_s10 + $0x34] ss:$8 sps:$4 sm:$0xff]  }
 0x816   : > { %v6380_v39 = vmul.f32 %v6371_v41, %v16699_v15  ;;  %v6372_v28 = vsub.f32 1.0, %v13793_v54  ;;  %v13795_v0 = vpop.eup %13794  ;;  %v13381_v41 = vld [vmem:[%s19863_s10 + $0x74] ss:$8 sps:$4 sm:$0xff]   ;;  %6879 = vmatprep.subr.bf16.mxu1 %v13378_v5 }
 0x817   : > { %13800 = vrcp.f32 %v6304_v32  ;;  %v13797_v12 = vpop.eup %13796  ;;  %v6306_v42 = vadd.f32 1.0, %v13795_v0  ;;  %6727 = vmatprep.subr.bf16.mxu0 %v13381_v41  ;;  %v20124_v5 = vld [vmem:[#allocation20_spill] sm:$0xff] }
 0x818   : > { %13802 = vpow2.f32 %v11447_v2  ;;  %v6381_v15 = vmul.f32 %v6372_v28, %v16784_v4  ;;  %v13799_v61 = vpop.eup %13798  ;;  %v6374_v31 = vsub.f32 1.0, %v13797_v12  ;;  %v20114_v4 = vld [vmem:[#allocation17_spill] sm:$0xff] }
 0x819   : > { %13804 = vrcp.f32 %v6306_v42  ;;  %v6301_v11 = vadd.f32 1.0, %v13799_v61  ;;  %v20120_v61 = vld [vmem:[#allocation22_spill] sm:$0xff] }
 0x81a   : > { %13806 = vpow2.f32 %v11449_v45  ;;  %v6383_v52 = vmul.f32 %v6374_v31, %v20115_v7  ;;  %v13387_v45 = vld [vmem:[%s19863_s10 + $0x14] ss:$8 sps:$4 sm:$0xff]  }
 0x81b   : > { %13808 = vrcp.f32 %v6301_v11 }
 0x824   : > { %v13801_v60 = vpop.eup %13800 }
 0x825   : > { %v13803_v19 = vpop.eup %13802  ;;  %v6376_v59 = vsub.f32 1.0, %v13801_v60 }
 0x826   : > { %v6303_v22 = vadd.f32 1.0, %v13803_v19  ;;  %v13805_v32 = vpop.eup %13804 }
 0x827   : > { %v6385_v53 = vmul.f32 %v6376_v59, %v20117_v24  ;;  %v13807_v2 = vpop.eup %13806 }
 0x828   : > { %13810 = vrcp.f32 %v6303_v22  ;;  %v13809_v28 = vpop.eup %13808 }
 0x835   : > { %v13811_v11 = vpop.eup %13810 }
 0x851   : > { %v6335_v40 = vpop.permute.xlu1 %6334 }
 0x852   : > { %v6361_v21 = vmul.f32 %v13787_v35, %v6335_v40  ;;  %v13379_v40 = vld [vmem:[%s19863_s10 + $0x70] ss:$8 sps:$4 sm:$0xff]  }
 0x853   : > { %6728 = vmatpush1.bf16.msra.mxu0 %v13379_v40 }
 0x854   : > { %v6388_v46 = vadd.f32 %v6379_v8, %v6361_v21  ;;  %v13384_v8 = vld [vmem:[%s19863_s10 + $0x24] ss:$8 sps:$4 sm:$0xff]   ;;  %6729 = vmatprep.subr.bf16.mxu0 %v13390_v38 }
 0x855   : > { %v6337_v13 = vpop.permute.xlu0 %6336 }
 0x856   : > { %v6397_v25 = vmul.f32 %v6388_v46, %v20063_v47  ;;  %v6362_v49 = vmul.f32 %v13789_v30, %v6337_v13  ;;  %v13376_v30 = vld [vmem:[%s19863_s10 + $0x30] ss:$8 sps:$4 sm:$0xff]   ;;  %v6457_v46 = vld [vmem:[#allocation5 + $0x30] sm:$0xff]  ;;  %v6378_v13 = vsub.f32 1.0, %v13805_v32 }
 0x857   : > { %6880 = vmatpush1.bf16.msra.mxu1 %v13376_v30  ;;  %v6474_v30 = vld [vmem:[#allocation7 + $0x28] sm:$0xff] }
 0x858   : > { %v6389_v34 = vadd.f32 %v6380_v39, %v6362_v49  ;;  %6415 = vrot.lane.b32.xlu0 %v6397_v25, %s14072_s27  ;;  %6881 = vmatprep.subr.bf16.mxu1 %v13384_v8  ;;  %v6305_v25 = vadd.f32 1.0, %v13807_v2  ;;  %v13126_v49 = vpack.i.bf16 %v6458_v26, %v6457_v46  ;;  %v20126_v2 = vld [vmem:[#allocation26_spill] sm:$0xff] }
 0x859   : > { %v6339_v16 = vpop.permute.xlu0 %6338 }
 0x85a   : > { %v6398_v9 = vmul.f32 %v6389_v34, %v20068_v62  ;;  %v6363_v18 = vmul.f32 %v13793_v54, %v6339_v16  ;;  %v13382_v54 = vld [vmem:[%s19863_s10 + $0x20] ss:$8 sps:$4 sm:$0xff]   ;;  %v20119_v34 = vld [vmem:[#allocation24_spill] sm:$0xff]  ;;  %13812 = vrcp.f32 %v6305_v25 }
 0x85b   : > { %6882 = vmatpush1.bf16.msra.mxu1 %v13382_v54  ;;  %v6387_v16 = vmul.f32 %v6378_v13, %v20119_v34  ;;  %v6476_v54 = vld [vmem:[#allocation7 + $0x38] sm:$0xff] }
 0x85c   : > { %v6390_v1 = vadd.f32 %v6381_v15, %v6363_v18  ;;  %6417 = vrot.lane.b32.xlu1 %v6398_v9, %s14072_s27  ;;  %v6373_v9 = vsub.f32 1.0, %v13809_v28  ;;  %v6471_v15 = vld [vmem:[#allocation7 + $0x10] sm:$0xff]  ;;  %v6477_v18 = vld [vmem:[#allocation7 + $0x40] sm:$0xff]  ;;  %6883 = vmatprep.subr.bf16.mxu1 %v13387_v45 }
 0x85d   : > { %v13111_v17 = vpack.i.bf16 %v6471_v15, %v6477_v18 }
 0x85e   : > { %v6399_v6 = vmul.f32 %v6390_v1, %v20114_v4  ;;  %v13388_v1 = vld [vmem:[%s19863_s10 + $0x60] ss:$8 sps:$4 sm:$0xff]   ;;  %v6382_v44 = vmul.f32 %v6373_v9, %v20121_v51 }
 0x85f   : > { %6884 = vmatpush1.bf16.msra.mxu1 %v13385_v50  ;;  %6730 = vmatpush1.bf16.msra.mxu0 %v13388_v1 }
 0x860   : > { %6419 = vrot.lane.b32.xlu1 %v6399_v6, %s14072_s27  ;;  %v13393_v6 = vld [vmem:[%s19863_s10 + $0x4] ss:$8 sps:$4 sm:$0xff]   ;;  %7067 = vmatprep.subr.bf16.mxu0 %v13396_v37 }
 0x861   : > { %v6343_v33 = vpop.permute.xlu0 %6342  ;;  %6885 = vmatprep.subr.bf16.mxu1 %v13393_v6 }
 0x862   : > { %v6365_v43 = vmul.f32 %v13797_v12, %v6343_v33 }
 0x864   : > { %v6392_v36 = vadd.f32 %v6383_v52, %v6365_v43  ;;  %13117 = vrot.lane.b32.xlu1 %v13116_v48, %s14071_s0  ;;  %v13391_v48 = vld [vmem:[%s19863_s10] ss:$8 sps:$4 sm:$0xff]   ;;  %v6375_v52 = vsub.f32 1.0, %v13811_v11  ;;  %v20122_v43 = vld [vmem:[#allocation16_spill] sm:$0xff] }
 0x865   : > { %6886 = vmatpush1.bf16.msra.mxu1 %v13391_v48 }
 0x866   : > { %v6401_v20 = vmul.f32 %v6392_v36, %v20116_v58  ;;  %v6384_v36 = vmul.f32 %v6375_v52, %v20123_v10 }
 0x867   : > { %v13813_v19 = vpop.eup %13812 }
 0x868   : > { %6423 = vrot.lane.b32.xlu1 %v6401_v20, %s14072_s27  ;;  %v6472_v20 = vld [vmem:[#allocation7 + $0x18] sm:$0xff] }
 0x869   : > { %v6347_v35 = vpop.permute.xlu0 %6346 }
 0x86a   : > { %v6367_v14 = vmul.f32 %v13801_v60, %v6347_v35  ;;  %v6377_v35 = vsub.f32 1.0, %v13813_v19 }
 0x86c   : > { %v6394_v21 = vadd.f32 %v6385_v53, %v6367_v14  ;;  %6497 = vrot.lane.b32.xlu1 %v6456_v57, %s14071_s0  ;;  %v6473_v57 = vld [vmem:[#allocation7 + $0x20] sm:$0xff] }
 0x86d   : > { %v20125_v14 = vld [vmem:[#allocation14_spill] sm:$0xff]  ;;  %v13121_v41 = vpack.i.bf16 %v6474_v30, %v6473_v57  ;;  %v13103_v13 = vpop.permute.xlu0 %13102 }
 0x86e   : > { %v6403_v39 = vmul.f32 %v6394_v21, %v20118_v23  ;;  %v6386_v40 = vmul.f32 %v6377_v35, %v20125_v14  ;;  %v6475_v21 = vld [vmem:[#allocation7 + $0x30] sm:$0xff]  ;;  %v13105_v48 = vunpack.i.h.bf16 %v13103_v13 }
 0x86f   : > { %v13131_v26 = vpack.i.bf16 %v6476_v54, %v6475_v21  ;;  %v13394_v54 = vld [vmem:[%s19863_s10 + $0x110] ss:$8 sps:$4 sm:$0xff]  }
 0x870   : > { %6427 = vrot.lane.b32.xlu1 %v6403_v39, %s14072_s27 }
 0x871   : > { %v6351_v0 = vpop.permute.xlu1 %6350 }
 0x872   : > { %v6369_v12 = vmul.f32 %v13805_v32, %v6351_v0  ;;  %v13405_v32 = vld [vmem:[%s19863_s10 + $0x174] ss:$8 sps:$4 sm:$0xff]  }
 0x873   : > { %7277 = vmatprep.subr.bf16.mxu1 %v13405_v32 }
 0x874   : > { %v6396_v42 = vadd.f32 %v6387_v16, %v6369_v12  ;;  %13127 = vrot.lane.b32.xlu1 %v13126_v49, %s14071_s0 }
 0x875   : > { %v6341_v56 = vpop.permute.xlu1 %6340 }
 0x876   : > { %v6405_v31 = vmul.f32 %v6396_v42, %v20120_v61  ;;  %v6364_v55 = vmul.f32 %v13809_v28, %v6341_v56 }
 0x878   : > { %6431 = vrot.lane.b32.xlu0 %v6405_v31, %s14072_s27  ;;  %v6391_v33 = vadd.f32 %v6382_v44, %v6364_v55 }
 0x879   : > { %v6345_v7 = vpop.permute.xlu1 %6344 }
 0x87a   : > { %v6400_v60 = vmul.f32 %v6391_v33, %v20122_v43  ;;  %v6366_v3 = vmul.f32 %v13811_v11, %v6345_v7  ;;  %v13104_v33 = vunpack.i.l.bf16 %v13103_v13 }
 0x87c   : > { %13112 = vrot.lane.b32.xlu0 %v13111_v17, %s14070_s20  ;;  %v6393_v59 = vadd.f32 %v6384_v36, %v6366_v3 }
 0x87d   : > { %v6349_v22 = vpop.permute.xlu1 %6348 }
 0x87e   : > { %v6402_v24 = vmul.f32 %v6393_v59, %v20124_v5  ;;  %v6368_v53 = vmul.f32 %v13813_v19, %v6349_v22 }
 0x880   : > { %6421 = vrot.lane.b32.xlu0 %v6400_v60, %s14072_s27  ;;  %v6395_v8 = vadd.f32 %v6386_v40, %v6368_v53 }
 0x881   : > { %v13098_v39 = vpop.permute.xlu1 %13097 }
 0x882   : > { %v6404_v46 = vmul.f32 %v6395_v8, %v20126_v2  ;;  %v13099_v25 = vunpack.i.l.bf16 %v13098_v39  ;;  %v13100_v34 = vunpack.i.h.bf16 %v13098_v39 }
 0x884   : > { %6529 = vrot.lane.b32.xlu0 %v6472_v20, %s14070_s20 }
 0x885   : > { %v13108_v49 = vpop.permute.xlu1 %13107 }
 0x886   : > { %v13109_v28 = vunpack.i.l.bf16 %v13108_v49  ;;  %v13110_v12 = vunpack.i.h.bf16 %v13108_v49 }
 0x888   : > { %6425 = vrot.lane.b32.xlu0 %v6402_v24, %s14072_s27 }
 0x88c   : > { %13122 = vrot.lane.b32.xlu0 %v13121_v41, %s14070_s20 }
 0x890   : > { %6429 = vrot.lane.b32.xlu0 %v6404_v46, %s14072_s27 }
 0x894   : > { %13132 = vrot.lane.b32.xlu0 %v13131_v26, %s14070_s20 }
 0x8ca   : > { %v6416_v0 = vpop.permute.xlu0 %6415 }
 0x8cb   : > { %6442 = vst.msk [vmem:[#allocation8] sm:$0xff] %vm3239_vm13, %v6416_v0  ;;  %v6550_v16 = vsel %vm3239_vm13, %v6416_v0, %v13099_v25  ;;  %v13399_v25 = vld [vmem:[%s19863_s10 + $0x104] ss:$8 sps:$4 sm:$0xff]  }
 0x8cc   : > { %v17631_v42 = vsel %vm3336_vm15, %v6550_v16, %v13109_v28 }
 0x8cd   : > { %v7756_v56 = vrot.slane %v17631_v42, 5  ;;  %v7966_v50 = vrot.slane %v17631_v42, 6  ;;  %v6568_v20 = vrot.slane %v17631_v42, 1  ;;  %v6603_v35 = vrot.slane %v17631_v42, 2 }
 0x8ce   : > { %v6418_v9 = vpop.permute.xlu1 %6417 }
 0x8cf   : > { %6443 = vst.msk [vmem:[#allocation8 + $0x8] sm:$0xff] %vm3239_vm13, %v6418_v9  ;;  %v6551_v15 = vsel %vm3239_vm13, %v6418_v9, %v13100_v34  ;;  %v13403_v34 = vld [vmem:[%s19863_s10 + $0x170] ss:$8 sps:$4 sm:$0xff]   ;;  %v13411_v9 = vld [vmem:[%s19863_s10 + $0x164] ss:$8 sps:$4 sm:$0xff]  }
 0x8d0   : > { %v17636_v18 = vsel %vm3336_vm15, %v6551_v15, %v13110_v12 }
 0x8d1   : > { %v7757_v1 = vrot.slane %v17636_v18, 5  ;;  %v7967_v31 = vrot.slane %v17636_v18, 6  ;;  %v6569_v3 = vrot.slane %v17636_v18, 1  ;;  %v6604_v10 = vrot.slane %v17636_v18, 2 }
 0x8d2   : > { %v6420_v55 = vpop.permute.xlu1 %6419  ;;  %v7163_v15 = vrot.slane %v17636_v18, 7 }
 0x8d3   : > { %6444 = vst.msk [vmem:[#allocation8 + $0x10] sm:$0xff] %vm3239_vm13, %v6420_v55  ;;  %v17649_v38 = vsel %vm2073_vm10, %v7756_v56, %v7757_v1  ;;  %v17655_v6 = vsel %vm2272_vm11, %v7966_v50, %v7967_v31  ;;  %v6552_v36 = vsel %vm3239_vm13, %v6420_v55, %v13105_v48  ;;  %v17690_v41 = vsel %vm952_vm8, %v6568_v20, %v6569_v3  ;;  %v13397_v55 = vld [vmem:[%s19863_s10 + $0x100] ss:$8 sps:$4 sm:$0xff]  }
 0x8d4   : > { %v6619_v32 = vsel %vm985_vm6, %v6603_v35, %v6604_v10  ;;  %v19928_v48 = vrot.slane %v17631_v42, 7 }
 0x8d6   : > { %v17657_v37 = vpop.permute.xlu1 %13117 }
 0x8d7   : > { %v13119_v57 = vunpack.i.l.bf16 %v17657_v37 }
 0x8da   : > { %v17659_v51 = vpop.permute.xlu1 %6423 }
 0x8db   : > { %6446 = vst.msk [vmem:[#allocation8 + $0x20] sm:$0xff] %vm3239_vm13, %v17659_v51 }
 0x8de   : > { %v17663_v44 = vpop.permute.xlu1 %6497 }
 0x8e2   : > { %v17665_v17 = vpop.permute.xlu1 %6427 }
 0x8e3   : > { %6448 = vst.msk [vmem:[#allocation8 + $0x30] sm:$0xff] %vm3239_vm13, %v17665_v17 }
 0x8ea   : > { %v6432_v11 = vpop.permute.xlu0 %6431 }
 0x8eb   : > { %6450 = vst.msk [vmem:[#allocation8 + $0x40] sm:$0xff] %vm3239_vm13, %v6432_v11  ;;  %v6558_v19 = vsel %vm3239_vm13, %v6432_v11, %v13104_v33 }
 0x8ee   : > { %v13113_v7 = vpop.permute.xlu0 %13112 }
 0x8ef   : > { %v13115_v52 = vunpack.i.h.bf16 %v13113_v7  ;;  %v13114_v60 = vunpack.i.l.bf16 %v13113_v7 }
 0x8f1   : > { %v17676_v59 = vsel %vm3336_vm15, %v6552_v36, %v13115_v52  ;;  %v17679_v22 = vsel %vm3336_vm15, %v6558_v19, %v13114_v60  ;;  %v13402_v52 = vld [vmem:[%s19863_s10 + $0xf4] ss:$8 sps:$4 sm:$0xff]  }
 0x8f2   : > { %v6576_v30 = vrot.slane %v17679_v22, 1  ;;  %v6611_v24 = vrot.slane %v17679_v22, 2  ;;  %v6422_v53 = vpop.permute.xlu0 %6421  ;;  %v7758_v14 = vrot.slane %v17676_v59, 5  ;;  %v7968_v40 = vrot.slane %v17676_v59, 6 }
 0x8f3   : > { %6445 = vst.msk [vmem:[#allocation8 + $0x18] sm:$0xff] %vm3239_vm13, %v6422_v53  ;;  %v6553_v49 = vsel %vm3239_vm13, %v6422_v53, %v13119_v57  ;;  %v6570_v0 = vrot.slane %v17676_v59, 1  ;;  %v6605_v12 = vrot.slane %v17676_v59, 2  ;;  %v7164_v11 = vrot.slane %v17676_v59, 7 }
 0x8f4   : > { %v17698_v8 = vsel %vm952_vm8, %v6576_v30, %v6568_v20  ;;  %v6620_v21 = vsel %vm985_vm6, %v6611_v24, %v6603_v35  ;;  %v17711_v46 = vsel %vm2073_vm10, %v7757_v1, %v7758_v14  ;;  %v17717_v26 = vsel %vm2272_vm11, %v7967_v31, %v7968_v40  ;;  %v13409_v35 = vld [vmem:[%s19863_s10 + $0x160] ss:$8 sps:$4 sm:$0xff]  }
 0x8f5   : > { %v6621_v39 = vpack.c.bf16 %v6619_v32, %v6620_v21  ;;  %v6586_v13 = vpack.c.bf16 %v17690_v41, %v17698_v8  ;;  %v17751_v7 = vsel %vm952_vm8, %v6569_v3, %v6570_v0  ;;  %v13120_v57 = vunpack.i.h.bf16 %v17657_v37 }
 0x8f6   : > { %v6530_v28 = vpop.permute.xlu0 %6529  ;;  %v6618_v53 = vsel %vm985_vm6, %v6604_v10, %v6605_v12  ;;  %v17780_v32 = vsel %vm1514_vm9, %v19928_v48, %v7163_v15  ;;  %v17789_v37 = vsel %vm1514_vm9, %v7163_v15, %v7164_v11  ;;  %v19930_v15 = vrot.slane %v17679_v22, 5 }
 0x8f7   : > { %v17730_v16 = vsel %vm3336_vm15, %v6553_v49, %v6530_v28  ;;  %11475 = vmatmul.mubr.msk.bf16.vlgmr.msra.gmra.mxu0 %vm6699_vm0, %v6621_v39  ;;  %11492 = vmatmul.mubr.msk.bf16.vlgmr.msra.gmra.mxu1 %vm6699_vm0, %v6586_v13  ;;  %v13408_v13 = vld [vmem:[%s19863_s10 + $0xe4] ss:$8 sps:$4 sm:$0xff]   ;;  %v13415_v49 = vld [vmem:[%s19863_s10 + $0xd0] ss:$8 sps:$4 sm:$0xff]  }
 0x8f8   : > { %v6571_v1 = vrot.slane %v17730_v16, 1  ;;  %v6606_v31 = vrot.slane %v17730_v16, 2  ;;  %7068 = vmatpush1.bf16.msra.mxu0 %v13394_v54  ;;  %6757 = vmatprep.mubr.bf16.mxu0 %v20109_v27  ;;  %v19932_v33 = vrot.slane %v17730_v16, 5  ;;  %v19931_v60 = vrot.slane %v17730_v16, 6  ;;  %v13400_v54 = vld [vmem:[%s19863_s10 + $0xf0] ss:$8 sps:$4 sm:$0xff]  }
 0x8f9   : > { %7069 = vmatprep.subr.bf16.mxu0 %v13399_v25  ;;  %6913 = vmatprep.mubr.bf16.mxu1 %v20109_v27  ;;  %v7165_v10 = vrot.slane %v17730_v16, 7  ;;  %v6955_v58 = vrot.slane %v17730_v16, 3 }
 0x8fa   : > { %v6426_v36 = vpop.permute.xlu0 %6425  ;;  %v6617_v19 = vsel %vm985_vm6, %v6605_v12, %v6606_v31  ;;  %v17765_v20 = vsel %vm952_vm8, %v6570_v0, %v6571_v1  ;;  %7278 = vmatpush1.bf16.msra.mxu1 %v13403_v34  ;;  %v13414_v34 = vld [vmem:[%s19863_s10 + $0x154] ss:$8 sps:$4 sm:$0xff]   ;;  %v17813_v12 = vsel %vm2073_vm10, %v7758_v14, %v19932_v33  ;;  %v13412_v14 = vld [vmem:[%s19863_s10 + $0x150] ss:$8 sps:$4 sm:$0xff]  }
 0x8fb   : > { %6447 = vst.msk [vmem:[#allocation8 + $0x28] sm:$0xff] %vm3239_vm13, %v6426_v36  ;;  %7279 = vmatprep.subr.bf16.mxu1 %v13411_v9  ;;  %v6622_v21 = vpack.c.bf16 %v6617_v19, %v6618_v53  ;;  %v6587_v39 = vpack.c.bf16 %v17765_v20, %v17751_v7  ;;  %v17821_v9 = vsel %vm2272_vm11, %v7968_v40, %v19931_v60  ;;  %v13128_v53 = vpop.permute.xlu1 %13127 }
 0x8fc   : > { %7070 = vmatpush1.bf16.msra.mxu0 %v13397_v55  ;;  %v19929_v55 = vrot.slane %v17679_v22, 6  ;;  %v6555_v40 = vsel %vm3239_vm13, %v6426_v36, %v17663_v44 }
 0x8fd   : > { %7071 = vmatprep.subr.bf16.mxu0 %v13402_v52  ;;  %v6554_v52 = vsel %vm3239_vm13, %v17659_v51, %v13120_v57  ;;  %v13406_v51 = vld [vmem:[%s19863_s10 + $0xe0] ss:$8 sps:$4 sm:$0xff]   ;;  %v17844_v57 = vsel %vm2073_vm10, %v19930_v15, %v7756_v56  ;;  %v13417_v56 = vld [vmem:[%s19863_s10 + $0xd4] ss:$8 sps:$4 sm:$0xff]  }
 0x8fe   : > { %v13123_v0 = vpop.permute.xlu0 %13122  ;;  %7280 = vmatpush1.bf16.msra.mxu1 %v13409_v35  ;;  %v17852_v44 = vsel %vm2272_vm11, %v19929_v55, %v7966_v50 }
 0x8ff   : > { %v13125_v19 = vunpack.i.h.bf16 %v13123_v0  ;;  %v13124_v35 = vunpack.i.l.bf16 %v13123_v0  ;;  %11476 = vmatmul.mubr.msk.bf16.gmra.mxu0 %vm6699_vm0, %v6622_v21  ;;  %11493 = vmatmul.mubr.msk.bf16.gmra.mxu1 %vm6699_vm0, %v6587_v39 }
 0x900   : > { %7072 = vmatpush1.bf16.msra.mxu0 %v13400_v54  ;;  %6767 = vmatprep.mubr.bf16.mxu0 %v20109_v27  ;;  %v13420_v54 = vld [vmem:[%s19863_s10 + $0x144] ss:$8 sps:$4 sm:$0xff]  }
 0x901   : > { %v17855_v36 = vsel %vm3336_vm15, %v6554_v52, %v13124_v35  ;;  %v17858_v21 = vsel %vm3336_vm15, %v6555_v40, %v13125_v19  ;;  %6923 = vmatprep.mubr.bf16.mxu1 %v20109_v27  ;;  %7073 = vmatprep.subr.bf16.mxu0 %v13408_v13  ;;  %v13130_v35 = vunpack.i.h.bf16 %v13128_v53  ;;  %v13129_v13 = vunpack.i.l.bf16 %v13128_v53 }
 0x902   : > { %v6430_v39 = vpop.permute.xlu0 %6429  ;;  %v6607_v50 = vrot.slane %v17855_v36, 2  ;;  %v6608_v0 = vrot.slane %v17858_v21, 2  ;;  %v6572_v52 = vrot.slane %v17855_v36, 1  ;;  %v6573_v19 = vrot.slane %v17858_v21, 1  ;;  %7281 = vmatprep.subr.bf16.mxu1 %v13414_v34 }
 0x903   : > { %6449 = vst.msk [vmem:[#allocation8 + $0x38] sm:$0xff] %vm3239_vm13, %v6430_v39  ;;  %7282 = vmatpush1.bf16.msra.mxu1 %v13412_v14  ;;  %v6557_v3 = vsel %vm3239_vm13, %v6430_v39, %v13130_v35  ;;  %v13424_v39 = vld [vmem:[%s19863_s10 + $0xc0] ss:$8 sps:$4 sm:$0xff]   ;;  %v7166_v35 = vrot.slane %v17855_v36, 7  ;;  %v6956_v4 = vrot.slane %v17855_v36, 3 }
 0x904   : > { %v6615_v40 = vsel %vm985_vm6, %v6607_v50, %v6608_v0  ;;  %v6616_v25 = vsel %vm985_vm6, %v6606_v31, %v6607_v50  ;;  %v17880_v28 = vsel %vm952_vm8, %v6572_v52, %v6573_v19  ;;  %v17886_v34 = vsel %vm952_vm8, %v6571_v1, %v6572_v52  ;;  %7074 = vmatpush1.bf16.msra.mxu0 %v13406_v51  ;;  %v13418_v31 = vld [vmem:[%s19863_s10 + $0x140] ss:$8 sps:$4 sm:$0xff]   ;;  %v13423_v1 = vld [vmem:[%s19863_s10 + $0x134] ss:$8 sps:$4 sm:$0xff]  }
 0x905   : > { %v6623_v14 = vpack.c.bf16 %v6615_v40, %v6616_v25  ;;  %v6588_v53 = vpack.c.bf16 %v17880_v28, %v17886_v34  ;;  %7075 = vmatprep.subr.bf16.mxu0 %v13417_v56  ;;  %7283 = vmatprep.subr.bf16.mxu1 %v13420_v54  ;;  %v13426_v25 = vld [vmem:[%s19863_s10 + $0xc4] ss:$8 sps:$4 sm:$0xff]   ;;  %v6556_v54 = vsel %vm3239_vm13, %v17665_v17, %v13129_v13  ;;  %v13421_v17 = vld [vmem:[%s19863_s10 + $0x130] ss:$8 sps:$4 sm:$0xff]   ;;  %v7167_v13 = vrot.slane %v17858_v21, 7 }
 0x906   : > { %v13133_v50 = vpop.permute.xlu0 %13132 }
 0x907   : > { %v13135_v52 = vunpack.i.h.bf16 %v13133_v50  ;;  %v13134_v40 = vunpack.i.l.bf16 %v13133_v50  ;;  %11477 = vmatmul.mubr.msk.bf16.gmra.mxu0 %vm6699_vm0, %v6623_v14  ;;  %11494 = vmatmul.mubr.msk.bf16.gmra.mxu1 %vm6699_vm0, %v6588_v53 }
 0x908   : > { %6777 = vmatprep.mubr.bf16.mxu0 %v20109_v27  ;;  %6933 = vmatprep.mubr.bf16.mxu1 %v20109_v27 }
 0x909   : > { %v17915_v51 = vsel %vm3336_vm15, %v6556_v54, %v13134_v40  ;;  %v17918_v50 = vsel %vm3336_vm15, %v6557_v3, %v13135_v52  ;;  %7076 = vmatpush1.bf16.msra.mxu0 %v13415_v49  ;;  %7284 = vmatpush1.bf16.msra.mxu1 %v13418_v31  ;;  %v13429_v31 = vld [vmem:[%s19863_s10 + $0x124] ss:$8 sps:$4 sm:$0xff]   ;;  %v19933_v40 = vrot.slane %v17679_v22, 7 }
 0x90a   : > { %v6609_v14 = vrot.slane %v17915_v51, 2  ;;  %v6610_v53 = vrot.slane %v17918_v50, 2  ;;  %v6574_v3 = vrot.slane %v17915_v51, 1  ;;  %v6575_v49 = vrot.slane %v17918_v50, 1  ;;  %7285 = vmatprep.subr.bf16.mxu1 %v13423_v1  ;;  %7077 = vmatprep.subr.bf16.mxu0 %v13426_v25 }
 0x90b   : > { %v7168_v54 = vrot.slane %v17915_v51, 7  ;;  %v7169_v56 = vrot.slane %v17918_v50, 7  ;;  %v7973_v60 = vrot.slane %v17918_v50, 6  ;;  %v6958_v62 = vrot.slane %v17915_v51, 3 }
 0x90c   : > { %v6613_v45 = vsel %vm985_vm6, %v6609_v14, %v6610_v53  ;;  %v6614_v48 = vsel %vm985_vm6, %v6608_v0, %v6609_v14  ;;  %v17945_v1 = vsel %vm952_vm8, %v6574_v3, %v6575_v49  ;;  %v17949_v25 = vsel %vm952_vm8, %v6573_v19, %v6574_v3  ;;  %v13427_v19 = vld [vmem:[%s19863_s10 + $0x120] ss:$8 sps:$4 sm:$0xff]  }
 0x90d   : > { %v6624_v52 = vpack.c.bf16 %v6613_v45, %v6614_v48  ;;  %v6589_v55 = vpack.c.bf16 %v17945_v1, %v17949_v25  ;;  %v6612_v15 = vsel %vm985_vm6, %v6610_v53, %v6611_v24  ;;  %v17961_v0 = vsel %vm952_vm8, %v6575_v49, %v6576_v30  ;;  %7286 = vmatpush1.bf16.msra.mxu1 %v13421_v17  ;;  %v13432_v45 = vld [vmem:[%s19863_s10 + $0x1d4] ss:$8 sps:$4 sm:$0xff]  }
 0x90e   : > { %7078 = vmatpush1.bf16.msra.mxu0 %v13424_v39  ;;  %7287 = vmatprep.subr.bf16.mxu1 %v13429_v31  ;;  %v17973_v24 = vsel %vm1514_vm9, %v7164_v11, %v7165_v10  ;;  %v17977_v30 = vsel %vm1514_vm9, %v7166_v35, %v7167_v13  ;;  %v17981_v48 = vsel %vm1514_vm9, %v7165_v10, %v7166_v35  ;;  %v13441_v17 = vld [vmem:[%s19863_s10 + $0x234] ss:$8 sps:$4 sm:$0xff]   ;;  %v7760_v39 = vrot.slane %v17855_v36, 5 }
 0x90f   : > { %11478 = vmatmul.mubr.msk.bf16.gmra.mxu0 %vm6699_vm0, %v6624_v52  ;;  %11495 = vmatmul.mubr.msk.bf16.gmra.mxu1 %vm6699_vm0, %v6589_v55  ;;  %v7970_v11 = vrot.slane %v17855_v36, 6  ;;  %v7761_v14 = vrot.slane %v17858_v21, 5  ;;  %v7762_v53 = vrot.slane %v17915_v51, 5  ;;  %v7971_v3 = vrot.slane %v17858_v21, 6 }
 0x910   : > { %6787 = vmatprep.mubr.bf16.mxu0 %v20109_v27  ;;  %6943 = vmatprep.mubr.bf16.mxu1 %v20109_v27  ;;  %v6625_v10 = vpack.c.bf16 %v6612_v15, %v6612_v15  ;;  %v6590_v35 = vpack.c.bf16 %v17961_v0, %v17961_v0  ;;  %v17999_v49 = vsel %vm1514_vm9, %v7168_v54, %v7169_v56  ;;  %v7972_v55 = vrot.slane %v17915_v51, 6 }
 0x911   : > { %7288 = vmatpush1.bf16.msra.mxu1 %v13427_v19  ;;  %7469 = vmatprep.subr.bf16.mxu0 %v13432_v45  ;;  %v18004_v31 = vsel %vm1514_vm9, %v7167_v13, %v7168_v54  ;;  %v7763_v15 = vrot.slane %v17918_v50, 5  ;;  %v18014_v33 = vsel %vm1514_vm9, %v7169_v56, %v19933_v40  ;;  %v20127_v54 = vrot.slane %v17730_v16, 5 }
 0x912   : > { %7661 = vmatprep.subr.bf16.mxu1 %v13441_v17  ;;  %v20128_v52 = vrot.slane %v17730_v16, 6  ;;  %v18036_v19 = vsel %vm2073_vm10, %v7761_v14, %v7762_v53  ;;  %v18040_v13 = vsel %vm2073_vm10, %v7760_v39, %v7761_v14  ;;  %v18048_v40 = vsel %vm2272_vm11, %v7971_v3, %v7972_v55 }
 0x913   : > { %v18024_v45 = vsel %vm2073_vm10, %v20127_v54, %v7760_v39  ;;  %v20129_v39 = vrot.slane %v17679_v22, 5  ;;  %v18064_v17 = vsel %vm2073_vm10, %v7762_v53, %v7763_v15  ;;  %v20130_v54 = vrot.slane %v17679_v22, 6 }
 0x914   : > { %v18032_v56 = vsel %vm2272_vm11, %v20128_v52, %v7970_v11  ;;  %v18052_v52 = vsel %vm2272_vm11, %v7970_v11, %v7971_v3  ;;  %v18076_v3 = vsel %vm2272_vm11, %v7972_v55, %v7973_v60  ;;  %v6952_v11 = vrot.slane %v17631_v42, 3 }
 0x915   : > { %v18060_v14 = vsel %vm2073_vm10, %v7763_v15, %v20129_v39  ;;  %v18070_v23 = vsel %vm2272_vm11, %v7973_v60, %v20130_v54  ;;  %v6953_v60 = vrot.slane %v17636_v18, 3  ;;  %v20131_v55 = vrot.slane %v17679_v22, 3  ;;  %v13430_v15 = vld [vmem:[%s19863_s10 + $0x1d0] ss:$8 sps:$4 sm:$0xff]  }
 0x916   : > { %v20133_v53 = vrot.slane %v17679_v22, 7  ;;  %v7181_v43 = vpack.c.bf16 %v17973_v24, %v17789_v37 }
 0x917   : > { %11479 = vmatmul.mubr.msk.bf16.gmra.mxu0 %vm6699_vm0, %v6625_v10  ;;  %11496 = vmatmul.mubr.msk.bf16.gmra.mxu1 %vm6699_vm0, %v6590_v35  ;;  %v6969_v10 = vsel %vm1315_vm12, %v20131_v55, %v6952_v11  ;;  %v20132_v35 = vrot.slane %v17631_v42, 7  ;;  %v6968_v39 = vsel %vm1315_vm12, %v6952_v11, %v6953_v60  ;;  %v13435_v55 = vld [vmem:[%s19863_s10 + $0x1c4] ss:$8 sps:$4 sm:$0xff]  }
 0x918   : > { %7095 = vmatprep.mubr.bf16.mxu0 %v20109_v27  ;;  %7305 = vmatprep.mubr.bf16.mxu1 %v20109_v27  ;;  %v6970_v2 = vpack.c.bf16 %v6968_v39, %v6969_v10  ;;  %v13447_v11 = vld [vmem:[%s19863_s10 + $0x224] ss:$8 sps:$4 sm:$0xff]   ;;  %v13433_v39 = vld [vmem:[%s19863_s10 + $0x1c0] ss:$8 sps:$4 sm:$0xff]   ;;  %v6954_v10 = vrot.slane %v17676_v59, 3 }
 0x919   : > { %v18102_v54 = vsel %vm1514_vm9, %v20133_v53, %v20132_v35  ;;  %v13439_v53 = vld [vmem:[%s19863_s10 + $0x230] ss:$8 sps:$4 sm:$0xff]  }
 0x91a   : > { %v7180_v5 = vpack.c.bf16 %v17780_v32, %v18102_v54  ;;  %v6967_v35 = vsel %vm1315_vm12, %v6953_v60, %v6954_v10  ;;  %v13450_v60 = vld [vmem:[%s19863_s10 + $0x214] ss:$8 sps:$4 sm:$0xff]  }
 0x91f   : > { %11521 = vmatmul.mubr.msk.bf16.vlgmr.msra.gmra.mxu0 %vm6699_vm0, %v6970_v2  ;;  %11550 = vmatmul.mubr.msk.bf16.vlgmr.msra.gmra.mxu1 %vm6699_vm0, %v7180_v5  ;;  %v13438_v5 = vld [vmem:[%s19863_s10 + $0x1b4] ss:$8 sps:$4 sm:$0xff]   ;;  %v6966_v2 = vsel %vm1315_vm12, %v6954_v10, %v6955_v58  ;;  %v13442_v10 = vld [vmem:[%s19863_s10 + $0x1a0] ss:$8 sps:$4 sm:$0xff]  }
 0x920   : > { %7470 = vmatpush1.bf16.msra.mxu0 %v13430_v15  ;;  %7105 = vmatprep.mubr.bf16.mxu0 %v20109_v27  ;;  %v13445_v15 = vld [vmem:[%s19863_s10 + $0x220] ss:$8 sps:$4 sm:$0xff]   ;;  %v6971_v61 = vpack.c.bf16 %v6966_v2, %v6967_v35  ;;  %v6965_v2 = vsel %vm1315_vm12, %v6955_v58, %v6956_v4  ;;  %v7182_v35 = vpack.c.bf16 %v17977_v30, %v17981_v48  ;;  %v13459_v58 = vld [vmem:[%s19863_s10 + $0x1f4] ss:$8 sps:$4 sm:$0xff]  }
 0x921   : > { %7471 = vmatprep.subr.bf16.mxu0 %v13435_v55  ;;  %7315 = vmatprep.mubr.bf16.mxu1 %v20109_v27  ;;  %v13436_v55 = vld [vmem:[%s19863_s10 + $0x1b0] ss:$8 sps:$4 sm:$0xff]  }
 0x922   : > { %7662 = vmatpush1.bf16.msra.mxu1 %v13439_v53  ;;  %v13444_v53 = vld [vmem:[%s19863_s10 + $0x1a4] ss:$8 sps:$4 sm:$0xff]  }
 0x923   : > { %7663 = vmatprep.subr.bf16.mxu1 %v13447_v11  ;;  %v6957_v11 = vrot.slane %v17858_v21, 3 }
 0x924   : > { %7472 = vmatpush1.bf16.msra.mxu0 %v13433_v39  ;;  %v13448_v39 = vld [vmem:[%s19863_s10 + $0x210] ss:$8 sps:$4 sm:$0xff]  }
 0x925   : > { %7473 = vmatprep.subr.bf16.mxu0 %v13438_v5  ;;  %v13456_v5 = vld [vmem:[%s19863_s10 + $0x204] ss:$8 sps:$4 sm:$0xff]  }
 0x926   : > { %7664 = vmatpush1.bf16.msra.mxu1 %v13445_v15 }
 0x927   : > { %11522 = vmatmul.mubr.msk.bf16.gmra.mxu0 %vm6699_vm0, %v6971_v61  ;;  %11551 = vmatmul.mubr.msk.bf16.gmra.mxu1 %vm6699_vm0, %v7181_v43  ;;  %v13453_v61 = vld [vmem:[%s19863_s10 + $0x194] ss:$8 sps:$4 sm:$0xff]   ;;  %v6964_v43 = vsel %vm1315_vm12, %v6956_v4, %v6957_v11  ;;  %v6959_v4 = vrot.slane %v17918_v50, 3 }
 0x928   : > { %7474 = vmatpush1.bf16.msra.mxu0 %v13436_v55  ;;  %7115 = vmatprep.mubr.bf16.mxu0 %v20109_v27  ;;  %v6972_v15 = vpack.c.bf16 %v6964_v43, %v6965_v2  ;;  %v13451_v55 = vld [vmem:[%s19863_s10 + $0x190] ss:$8 sps:$4 sm:$0xff]   ;;  %v13465_v43 = vld [vmem:[%s19863_s10 + $0x1e4] ss:$8 sps:$4 sm:$0xff]   ;;  %v13468_v2 = vld [vmem:[%s19863_s10 + $0x294] ss:$8 sps:$4 sm:$0xff]  }
 0x929   : > { %7325 = vmatprep.mubr.bf16.mxu1 %v20109_v27  ;;  %7475 = vmatprep.subr.bf16.mxu0 %v13444_v53  ;;  %v13454_v53 = vld [vmem:[%s19863_s10 + $0x200] ss:$8 sps:$4 sm:$0xff]  }
 0x92a   : > { %7665 = vmatprep.subr.bf16.mxu1 %v13450_v60  ;;  %v13462_v60 = vld [vmem:[%s19863_s10 + $0x184] ss:$8 sps:$4 sm:$0xff]  }
 0x92b   : > { %7666 = vmatpush1.bf16.msra.mxu1 %v13448_v39  ;;  %v13457_v39 = vld [vmem:[%s19863_s10 + $0x1f0] ss:$8 sps:$4 sm:$0xff]  }
 0x92c   : > { %7476 = vmatpush1.bf16.msra.mxu0 %v13442_v10  ;;  %7667 = vmatprep.subr.bf16.mxu1 %v13456_v5  ;;  %v13460_v10 = vld [vmem:[%s19863_s10 + $0x180] ss:$8 sps:$4 sm:$0xff]   ;;  %v6962_v5 = vsel %vm1315_vm12, %v6958_v62, %v6959_v4 }
 0x92d   : > { %7477 = vmatprep.subr.bf16.mxu0 %v13453_v61  ;;  %v6963_v61 = vsel %vm1315_vm12, %v6957_v11, %v6958_v62  ;;  %v13463_v62 = vld [vmem:[%s19863_s10 + $0x1e0] ss:$8 sps:$4 sm:$0xff]   ;;  %v13477_v11 = vld [vmem:[%s19863_s10 + $0x2f4] ss:$8 sps:$4 sm:$0xff]  }
 0x92f   : > { %11523 = vmatmul.mubr.msk.bf16.gmra.mxu0 %vm6699_vm0, %v6972_v15  ;;  %11552 = vmatmul.mubr.msk.bf16.gmra.mxu1 %vm6699_vm0, %v7182_v35  ;;  %v6973_v15 = vpack.c.bf16 %v6962_v5, %v6963_v61  ;;  %v7183_v35 = vpack.c.bf16 %v17999_v49, %v18004_v31  ;;  %v20135_v5 = vpack.c.bf16 %v17636_v18, %v17631_v42  ;;  %v13474_v42 = vld [vmem:[%s19863_s10 + $0x274] ss:$8 sps:$4 sm:$0xff]   ;;  %v13481_v18 = vld [vmem:[%s19863_s10 + $0x2e0] ss:$8 sps:$4 sm:$0xff]  }
 0x930   : > { %7125 = vmatprep.mubr.bf16.mxu0 %v20109_v27  ;;  %7335 = vmatprep.mubr.bf16.mxu1 %v20109_v27  ;;  %v20136_v61 = vpack.c.bf16 %v17751_v7, %v17690_v41  ;;  %v13472_v41 = vld [vmem:[%s19863_s10 + $0x270] ss:$8 sps:$4 sm:$0xff]   ;;  %v13480_v7 = vld [vmem:[%s19863_s10 + $0x264] ss:$8 sps:$4 sm:$0xff]  }
 0x931   : > { %7478 = vmatpush1.bf16.msra.mxu0 %v13451_v55  ;;  %7668 = vmatpush1.bf16.msra.mxu1 %v13454_v53  ;;  %v20134_v55 = vrot.slane %v17679_v22, 3 }
 0x932   : > { %7669 = vmatprep.subr.bf16.mxu1 %v13459_v58  ;;  %7479 = vmatprep.subr.bf16.mxu0 %v13462_v60  ;;  %v7184_v60 = vpack.c.bf16 %v18014_v33, %v18014_v33 }
 0x933   : > { %v6961_v53 = vsel %vm1315_vm12, %v6959_v4, %v20134_v55  ;;  %v13471_v4 = vld [vmem:[%s19863_s10 + $0x284] ss:$8 sps:$4 sm:$0xff]   ;;  %v13478_v55 = vld [vmem:[%s19863_s10 + $0x260] ss:$8 sps:$4 sm:$0xff]  }
 0x934   : > { %v6974_v58 = vpack.c.bf16 %v6961_v53, %v6961_v53  ;;  %v13495_v53 = vld [vmem:[%s19863_s10 + $0x2b4] ss:$8 sps:$4 sm:$0xff]  }
 0x935   : > { %7670 = vmatpush1.bf16.msra.mxu1 %v13457_v39  ;;  %7480 = vmatpush1.bf16.msra.mxu0 %v13460_v10  ;;  %v13466_v39 = vld [vmem:[%s19863_s10 + $0x290] ss:$8 sps:$4 sm:$0xff]  }
 0x936   : > { %7671 = vmatprep.subr.bf16.mxu1 %v13465_v43  ;;  %7871 = vmatprep.subr.bf16.mxu0 %v13468_v2  ;;  %v13475_v10 = vld [vmem:[%s19863_s10 + $0x2f0] ss:$8 sps:$4 sm:$0xff]   ;;  %v13483_v43 = vld [vmem:[%s19863_s10 + $0x2e4] ss:$8 sps:$4 sm:$0xff]   ;;  %v13469_v2 = vld [vmem:[%s19863_s10 + $0x280] ss:$8 sps:$4 sm:$0xff]  }
 0x937   : > { %11524 = vmatmul.mubr.msk.bf16.gmra.mxu0 %vm6699_vm0, %v6973_v15  ;;  %11553 = vmatmul.mubr.msk.bf16.gmra.mxu1 %vm6699_vm0, %v7183_v35  ;;  %v13486_v15 = vld [vmem:[%s19863_s10 + $0x2d4] ss:$8 sps:$4 sm:$0xff]   ;;  %v20137_v35 = vpack.c.bf16 %v17730_v16, %v17676_v59  ;;  %v13492_v59 = vld [vmem:[%s19863_s10 + $0x2c4] ss:$8 sps:$4 sm:$0xff]  }
 0x938   : > { %7135 = vmatprep.mubr.bf16.mxu0 %v20109_v27  ;;  %7345 = vmatprep.mubr.bf16.mxu1 %v20109_v27  ;;  %v13489_v16 = vld [vmem:[%s19863_s10 + $0x254] ss:$8 sps:$4 sm:$0xff]  }
 0x939   : > { %7672 = vmatpush1.bf16.msra.mxu1 %v13463_v62  ;;  %v20138_v62 = vpack.c.bf16 %v17886_v34, %v17765_v20  ;;  %v13487_v20 = vld [vmem:[%s19863_s10 + $0x250] ss:$8 sps:$4 sm:$0xff]   ;;  %v13490_v34 = vld [vmem:[%s19863_s10 + $0x2c0] ss:$8 sps:$4 sm:$0xff]  }
 0x93a   : > { %8081 = vmatprep.subr.bf16.mxu1 %v13477_v11  ;;  %v13484_v11 = vld [vmem:[%s19863_s10 + $0x2d0] ss:$8 sps:$4 sm:$0xff]  }
 0x93f   : > { %11525 = vmatmul.mubr.msk.bf16.gmra.mxu0 %vm6699_vm0, %v6974_v58  ;;  %11554 = vmatmul.mubr.msk.bf16.gmra.mxu1 %vm6699_vm0, %v7184_v60  ;;  %v13498_v58 = vld [vmem:[%s19863_s10 + $0x244] ss:$8 sps:$4 sm:$0xff]   ;;  %v20139_v60 = vpack.c.bf16 %v17858_v21, %v17855_v36  ;;  %v13496_v36 = vld [vmem:[%s19863_s10 + $0x240] ss:$8 sps:$4 sm:$0xff]   ;;  %v13504_v21 = vld [vmem:[%s19863_s10 + $0x354] ss:$8 sps:$4 sm:$0xff]  }
 0x940   : > { %7497 = vmatprep.mubr.bf16.mxu0 %v20109_v27  ;;  %7689 = vmatprep.mubr.bf16.mxu1 %v20109_v27 }
 0x947   : > { %11579 = vmatmul.mubr.msk.bf16.vlgmr.msra.gmra.mxu0 %vm6699_vm0, %v20135_v5  ;;  %11608 = vmatmul.mubr.msk.bf16.vlgmr.msra.gmra.mxu1 %vm6699_vm0, %v20136_v61  ;;  %v20142_v5 = vpack.c.bf16 %v17961_v0, %v17945_v1  ;;  %v7376_v61 = vpack.c.bf16 %v17679_v22, %v17679_v22  ;;  %v13507_v1 = vld [vmem:[%s19863_s10 + $0x344] ss:$8 sps:$4 sm:$0xff]   ;;  %v20143_v22 = vpack.c.bf16 %v17711_v46, %v17649_v38  ;;  %v13505_v0 = vld [vmem:[%s19863_s10 + $0x340] ss:$8 sps:$4 sm:$0xff]   ;;  %v13510_v38 = vld [vmem:[%s19863_s10 + $0x334] ss:$8 sps:$4 sm:$0xff]  }
 0x948   : > { %7872 = vmatpush1.bf16.msra.mxu0 %v13466_v39  ;;  %7507 = vmatprep.mubr.bf16.mxu0 %v20109_v27  ;;  %v20140_v39 = vpack.c.bf16 %v17949_v25, %v17880_v28  ;;  %v13501_v28 = vld [vmem:[%s19863_s10 + $0x2a4] ss:$8 sps:$4 sm:$0xff]   ;;  %v13499_v25 = vld [vmem:[%s19863_s10 + $0x2a0] ss:$8 sps:$4 sm:$0xff]  }
 0x949   : > { %7873 = vmatprep.subr.bf16.mxu0 %v13471_v4  ;;  %7699 = vmatprep.mubr.bf16.mxu1 %v20109_v27  ;;  %v13493_v4 = vld [vmem:[%s19863_s10 + $0x2b0] ss:$8 sps:$4 sm:$0xff]   ;;  %v13513_v46 = vld [vmem:[%s19863_s10 + $0x324] ss:$8 sps:$4 sm:$0xff]  }
 0x94a   : > { %8082 = vmatpush1.bf16.msra.mxu1 %v13475_v10  ;;  %v20141_v10 = vpack.c.bf16 %v17918_v50, %v17915_v51  ;;  %v7568_v51 = vpack.c.bf16 %v17698_v8, %v17698_v8  ;;  %v13502_v50 = vld [vmem:[%s19863_s10 + $0x350] ss:$8 sps:$4 sm:$0xff]   ;;  %v20144_v8 = vpack.c.bf16 %v17717_v26, %v17655_v6  ;;  %v20145_v26 = vpack.c.bf16 %v18024_v45, %v17813_v12  ;;  %v13516_v12 = vld [vmem:[%s19863_s10 + $0x314] ss:$8 sps:$4 sm:$0xff]   ;;  %v13519_v45 = vld [vmem:[%s19863_s10 + $0x304] ss:$8 sps:$4 sm:$0xff]  }
 0x94b   : > { %8083 = vmatprep.subr.bf16.mxu1 %v13483_v43  ;;  %v13508_v6 = vld [vmem:[%s19863_s10 + $0x330] ss:$8 sps:$4 sm:$0xff]   ;;  %v20146_v43 = vpack.c.bf16 %v18032_v56, %v17821_v9  ;;  %v20147_v56 = vpack.c.bf16 %v18036_v19, %v18040_v13  ;;  %v20149_v19 = vpack.c.bf16 %v18060_v14, %v18064_v17  ;;  %v7778_v13 = vpack.c.bf16 %v17844_v57, %v17844_v57 }
 0x94c   : > { %7874 = vmatpush1.bf16.msra.mxu0 %v13469_v2  ;;  %v13511_v2 = vld [vmem:[%s19863_s10 + $0x320] ss:$8 sps:$4 sm:$0xff]   ;;  %v13514_v9 = vld [vmem:[%s19863_s10 + $0x310] ss:$8 sps:$4 sm:$0xff]   ;;  %v20152_v57 = vpack.c.bf16 %v17981_v48, %v17973_v24 }
 0x94d   : > { %7875 = vmatprep.subr.bf16.mxu0 %v13474_v42  ;;  %v20148_v42 = vpack.c.bf16 %v18048_v40, %v18052_v52  ;;  %v20150_v40 = vpack.c.bf16 %v18070_v23, %v18076_v3  ;;  %v7988_v52 = vpack.c.bf16 %v17852_v44, %v17852_v44  ;;  %v20151_v23 = vpack.c.bf16 %v17789_v37, %v17780_v32 }
 0x94e   : > { %8084 = vmatpush1.bf16.msra.mxu1 %v13481_v18  ;;  %v13517_v18 = vld [vmem:[%s19863_s10 + $0x300] ss:$8 sps:$4 sm:$0xff]   ;;  %v20153_v44 = vpack.c.bf16 %v18004_v31, %v17977_v30  ;;  %v20154_v32 = vpack.c.bf16 %v18014_v33, %v17999_v49  ;;  %v8180_v37 = vpack.c.bf16 %v18102_v54, %v18102_v54 }
 0x94f   : > { %11580 = vmatmul.mubr.msk.bf16.gmra.mxu0 %vm6699_vm0, %v20137_v35  ;;  %11609 = vmatmul.mubr.msk.bf16.gmra.mxu1 %vm6699_vm0, %v20138_v62 }
 0x950   : > { %7876 = vmatpush1.bf16.msra.mxu0 %v13472_v41  ;;  %7517 = vmatprep.mubr.bf16.mxu0 %v20109_v27 }
 0x951   : > { %7709 = vmatprep.mubr.bf16.mxu1 %v20109_v27  ;;  %7877 = vmatprep.subr.bf16.mxu0 %v13480_v7 }
 0x952   : > { %8085 = vmatprep.subr.bf16.mxu1 %v13486_v15 }
 0x953   : > { %8086 = vmatpush1.bf16.msra.mxu1 %v13484_v11 }
 0x954   : > { %7878 = vmatpush1.bf16.msra.mxu0 %v13478_v55  ;;  %8087 = vmatprep.subr.bf16.mxu1 %v13492_v59 }
 0x955   : > { %7879 = vmatprep.subr.bf16.mxu0 %v13489_v16 }
 0x957   : > { %11581 = vmatmul.mubr.msk.bf16.gmra.mxu0 %vm6699_vm0, %v20139_v60  ;;  %11610 = vmatmul.mubr.msk.bf16.gmra.mxu1 %vm6699_vm0, %v20140_v39 }
 0x958   : > { %7527 = vmatprep.mubr.bf16.mxu0 %v20109_v27  ;;  %7719 = vmatprep.mubr.bf16.mxu1 %v20109_v27 }
 0x959   : > { %7880 = vmatpush1.bf16.msra.mxu0 %v13487_v20  ;;  %8088 = vmatpush1.bf16.msra.mxu1 %v13490_v34 }
 0x95a   : > { %8089 = vmatprep.subr.bf16.mxu1 %v13495_v53  ;;  %7881 = vmatprep.subr.bf16.mxu0 %v13498_v58 }
 0x95d   : > { %8090 = vmatpush1.bf16.msra.mxu1 %v13493_v4  ;;  %7882 = vmatpush1.bf16.msra.mxu0 %v13496_v36 }
 0x95e   : > { %8091 = vmatprep.subr.bf16.mxu1 %v13501_v28  ;;  %8273 = vmatprep.subr.bf16.mxu0 %v13504_v21 }
 0x95f   : > { %11582 = vmatmul.mubr.msk.bf16.gmra.mxu0 %vm6699_vm0, %v20141_v10  ;;  %11611 = vmatmul.mubr.msk.bf16.gmra.mxu1 %vm6699_vm0, %v20142_v5 }
 0x960   : > { %7537 = vmatprep.mubr.bf16.mxu0 %v20109_v27  ;;  %7729 = vmatprep.mubr.bf16.mxu1 %v20109_v27 }
 0x961   : > { %8092 = vmatpush1.bf16.msra.mxu1 %v13499_v25 }
 0x962   : > { %12703 = vmatprep.subr.bf16.mxu1 %v20040_v63 }
 0x967   : > { %11583 = vmatmul.mubr.msk.bf16.gmra.mxu0 %vm6699_vm0, %v7376_v61  ;;  %11612 = vmatmul.mubr.msk.bf16.gmra.mxu1 %vm6699_vm0, %v7568_v51 }
 0x968   : > { %7899 = vmatprep.mubr.bf16.mxu0 %v20109_v27  ;;  %8109 = vmatprep.mubr.bf16.mxu1 %v20109_v27 }
 0x96f   : > { %11637 = vmatmul.mubr.msk.bf16.vlgmr.msra.gmra.mxu0 %vm6699_vm0, %v20143_v22  ;;  %11666 = vmatmul.mubr.msk.bf16.vlgmr.msra.gmra.mxu1 %vm6699_vm0, %v20144_v8 }
 0x970   : > { %8274 = vmatpush1.bf16.msra.mxu0 %v13502_v50  ;;  %7909 = vmatprep.mubr.bf16.mxu0 %v20109_v27 }
 0x971   : > { %8275 = vmatprep.subr.bf16.mxu0 %v13507_v1  ;;  %8119 = vmatprep.mubr.bf16.mxu1 %v20109_v27 }
 0x974   : > { %8276 = vmatpush1.bf16.msra.mxu0 %v13505_v0 }
 0x975   : > { %8277 = vmatprep.subr.bf16.mxu0 %v13510_v38 }
 0x977   : > { %11638 = vmatmul.mubr.msk.bf16.gmra.mxu0 %vm6699_vm0, %v20145_v26  ;;  %11667 = vmatmul.mubr.msk.bf16.gmra.mxu1 %vm6699_vm0, %v20146_v43 }
 0x978   : > { %8278 = vmatpush1.bf16.msra.mxu0 %v13508_v6  ;;  %7919 = vmatprep.mubr.bf16.mxu0 %v20109_v27 }
 0x979   : > { %8129 = vmatprep.mubr.bf16.mxu1 %v20109_v27  ;;  %8279 = vmatprep.subr.bf16.mxu0 %v13513_v46 }
 0x97c   : > { %8280 = vmatpush1.bf16.msra.mxu0 %v13511_v2 }
 0x97d   : > { %8281 = vmatprep.subr.bf16.mxu0 %v13516_v12 }
 0x97f   : > { %11639 = vmatmul.mubr.msk.bf16.gmra.mxu0 %vm6699_vm0, %v20147_v56  ;;  %11668 = vmatmul.mubr.msk.bf16.gmra.mxu1 %vm6699_vm0, %v20148_v42 }
 0x980   : > { %7929 = vmatprep.mubr.bf16.mxu0 %v20109_v27  ;;  %8139 = vmatprep.mubr.bf16.mxu1 %v20109_v27 }
 0x981   : > { %8282 = vmatpush1.bf16.msra.mxu0 %v13514_v9 }
 0x982   : > { %8283 = vmatprep.subr.bf16.mxu0 %v13519_v45 }
 0x985   : > { %8284 = vmatpush1.bf16.msra.mxu0 %v13517_v18 }
 0x986   : > { %12731 = vmatprep.subr.bf16.mxu0 %v20040_v63 }
 0x987   : > { %11640 = vmatmul.mubr.msk.bf16.gmra.mxu0 %vm6699_vm0, %v20149_v19  ;;  %11669 = vmatmul.mubr.msk.bf16.gmra.mxu1 %vm6699_vm0, %v20150_v40 }
 0x988   : > { %7939 = vmatprep.mubr.bf16.mxu0 %v20109_v27  ;;  %8149 = vmatprep.mubr.bf16.mxu1 %v20109_v27 }
 0x98f   : > { %11641 = vmatmul.mubr.msk.bf16.gmra.mxu0 %vm6699_vm0, %v7778_v13  ;;  %11670 = vmatmul.mubr.msk.bf16.gmra.mxu1 %vm6699_vm0, %v7988_v52 }
 0x990   : > { %8301 = vmatprep.mubr.bf16.mxu0 %v20109_v27  ;;  %12711 = vmatprep.mubr.msk.bf16.mxu1 %vm14074_vm14, %v20040_v63 }
 0x997   : > { %11695 = vmatmul.mubr.msk.bf16.vlgmr.msra.gmra.mxu0 %vm6699_vm0, %v20151_v23 }
 0x998   : > { %8311 = vmatprep.mubr.bf16.mxu0 %v20109_v27 }
 0x99f   : > { %11696 = vmatmul.mubr.msk.bf16.gmra.mxu0 %vm6699_vm0, %v20152_v57 }
 0x9a0   : > { %8321 = vmatprep.mubr.bf16.mxu0 %v20109_v27 }
 0x9a7   : > { %11697 = vmatmul.mubr.msk.bf16.gmra.mxu0 %vm6699_vm0, %v20153_v44 }
 0x9a8   : > { %8331 = vmatprep.mubr.bf16.mxu0 %v20109_v27 }
 0x9af   : > { %11698 = vmatmul.mubr.msk.bf16.gmra.mxu0 %vm6699_vm0, %v20154_v32 }
 0x9b0   : > { %8341 = vmatprep.mubr.bf16.mxu0 %v20109_v27 }
 0x9b7   : > { %v6749_v24 = vpop.f32.mrf.mxu0  ;;  %v6905_v48 = vpop.f32.mrf.mxu1  ;;  %11699 = vmatmul.mubr.msk.bf16.gmra.mxu0 %vm6699_vm0, %v8180_v37 }
 0x9b8   : > { %v6906_v17 = vadd.f32 %v6905_v48, %v6749_v24  ;;  %12739 = vmatprep.mubr.msk.bf16.mxu0 %vm14074_vm14, %v20040_v63 }
 0x9b9   : > { %v6751_v30 = vpop.f32.mrf.mxu0  ;;  %v6907_v31 = vpop.f32.mrf.mxu1 }
 0x9ba   : > { %v6908_v14 = vadd.f32 %v6907_v31, %v6751_v30 }
 0x9bb   : > { %v6753_v3 = vpop.f32.mrf.mxu0  ;;  %v6909_v33 = vpop.f32.mrf.mxu1 }
 0x9bc   : > { %v6910_v49 = vadd.f32 %v6909_v33, %v6753_v3 }
 0x9bd   : > { %v18456_v41 = vpop.f32.mrf.mxu0  ;;  %v18458_v27 = vpop.f32.mrf.mxu1 }
 0x9bf   : > { %v6759_v7 = vpop.f32.mrf.mxu0  ;;  %v6915_v54 = vpop.f32.mrf.mxu1 }
 0x9c0   : > { %v6916_v15 = vadd.f32 %v6915_v54, %v6759_v7 }
 0x9c1   : > { %v6761_v35 = vpop.f32.mrf.mxu0  ;;  %v6917_v62 = vpop.f32.mrf.mxu1 }
 0x9c2   : > { %v6918_v11 = vadd.f32 %v6917_v62, %v6761_v35 }
 0x9c3   : > { %v6763_v55 = vpop.f32.mrf.mxu0  ;;  %v6919_v59 = vpop.f32.mrf.mxu1 }
 0x9c4   : > { %v6920_v16 = vadd.f32 %v6919_v59, %v6763_v55 }
 0x9c5   : > { %v18460_v20 = vpop.f32.mrf.mxu0  ;;  %v18462_v34 = vpop.f32.mrf.mxu1 }
 0x9c7   : > { %v6769_v53 = vpop.f32.mrf.mxu0  ;;  %v6925_v58 = vpop.f32.mrf.mxu1 }
 0x9c8   : > { %v6926_v60 = vadd.f32 %v6925_v58, %v6769_v53 }
 0x9c9   : > { %v6771_v39 = vpop.f32.mrf.mxu0  ;;  %v6927_v4 = vpop.f32.mrf.mxu1 }
 0x9ca   : > { %v6928_v36 = vadd.f32 %v6927_v4, %v6771_v39 }
 0x9cb   : > { %v6773_v28 = vpop.f32.mrf.mxu0  ;;  %v6929_v21 = vpop.f32.mrf.mxu1 }
 0x9cc   : > { %v6930_v25 = vadd.f32 %v6929_v21, %v6773_v28 }
 0x9cd   : > { %v18464_v10 = vpop.f32.mrf.mxu0  ;;  %v18466_v5 = vpop.f32.mrf.mxu1 }
 0x9cf   : > { %v6779_v61 = vpop.f32.mrf.mxu0  ;;  %v6935_v51 = vpop.f32.mrf.mxu1 }
 0x9d0   : > { %v18468_v50 = vadd.f32 %v6935_v51, %v6779_v61 }
 0x9d1   : > { %v6781_v1 = vpop.f32.mrf.mxu0  ;;  %v6937_v22 = vpop.f32.mrf.mxu1 }
 0x9d2   : > { %v18470_v8 = vadd.f32 %v6937_v22, %v6781_v1 }
 0x9d3   : > { %v6783_v0 = vpop.f32.mrf.mxu0  ;;  %v6939_v38 = vpop.f32.mrf.mxu1 }
 0x9d4   : > { %v18472_v6 = vadd.f32 %v6939_v38, %v6783_v0 }
 0x9d5   : > { %v18474_v46 = vpop.f32.mrf.mxu0  ;;  %v18476_v26 = vpop.f32.mrf.mxu1 }
 0x9d7   : > { %v6789_v43 = vpop.f32.mrf.mxu0  ;;  %v6945_v2 = vpop.f32.mrf.mxu1 }
 0x9d8   : > { %v18478_v12 = vadd.f32 %v6945_v2, %v6789_v43 }
 0x9d9   : > { %v6791_v9 = vpop.f32.mrf.mxu0  ;;  %v6947_v45 = vpop.f32.mrf.mxu1 }
 0x9da   : > { %v18480_v56 = vadd.f32 %v6947_v45, %v6791_v9 }
 0x9db   : > { %v6793_v42 = vpop.f32.mrf.mxu0  ;;  %v6949_v18 = vpop.f32.mrf.mxu1 }
 0x9dd   : > { %v6794_v19 = vpop.f32.mrf.mxu0  ;;  %v6950_v40 = vpop.f32.mrf.mxu1 }
 0x9df   : > { %v7097_v13 = vpop.f32.mrf.mxu0  ;;  %v7307_v52 = vpop.f32.mrf.mxu1 }
 0x9e0   : > { %v7144_v23 = vadd.f32 %v7097_v13, %v6906_v17 }
 0x9e1   : > { %v7099_v57 = vpop.f32.mrf.mxu0  ;;  %v7309_v44 = vpop.f32.mrf.mxu1 }
 0x9e2   : > { %v18482_v32 = vadd.f32 %v7307_v52, %v7144_v23  ;;  %v7145_v37 = vadd.f32 %v7099_v57, %v6908_v14 }
 0x9e3   : > { %v7101_v24 = vpop.f32.mrf.mxu0  ;;  %v7311_v48 = vpop.f32.mrf.mxu1 }
 0x9e4   : > { %v18484_v30 = vadd.f32 %v7309_v44, %v7145_v37  ;;  %v7146_v31 = vadd.f32 %v7101_v24, %v6910_v49 }
 0x9e5   : > { %v18486_v3 = vpop.f32.mrf.mxu0  ;;  %v18488_v33 = vpop.f32.mrf.mxu1 }
 0x9e6   : > { %v18490_v7 = vadd.f32 %v7311_v48, %v7146_v31 }
 0x9e7   : > { %v7107_v54 = vpop.f32.mrf.mxu0  ;;  %v7317_v35 = vpop.f32.mrf.mxu1 }
 0x9e8   : > { %v7148_v62 = vadd.f32 %v7107_v54, %v6916_v15 }
 0x9e9   : > { %v7109_v17 = vpop.f32.mrf.mxu0  ;;  %v7319_v55 = vpop.f32.mrf.mxu1 }
 0x9ea   : > { %v18492_v59 = vadd.f32 %v7317_v35, %v7148_v62  ;;  %v7149_v53 = vadd.f32 %v7109_v17, %v6918_v11 }
 0x9eb   : > { %v7111_v14 = vpop.f32.mrf.mxu0  ;;  %v7321_v58 = vpop.f32.mrf.mxu1 }
 0x9ec   : > { %v18494_v39 = vadd.f32 %v7319_v55, %v7149_v53  ;;  %v7150_v4 = vadd.f32 %v7111_v14, %v6920_v16 }
 0x9ed   : > { %v18496_v49 = vpop.f32.mrf.mxu0  ;;  %v18498_v28 = vpop.f32.mrf.mxu1 }
 0x9ee   : > { %v18500_v21 = vadd.f32 %v7321_v58, %v7150_v4 }
 0x9ef   : > { %v7117_v61 = vpop.f32.mrf.mxu0  ;;  %v7327_v51 = vpop.f32.mrf.mxu1 }
 0x9f0   : > { %v7152_v1 = vadd.f32 %v7117_v61, %v6926_v60 }
 0x9f1   : > { %v7119_v15 = vpop.f32.mrf.mxu0  ;;  %v7329_v22 = vpop.f32.mrf.mxu1 }
 0x9f2   : > { %v18502_v0 = vadd.f32 %v7327_v51, %v7152_v1  ;;  %v7153_v38 = vadd.f32 %v7119_v15, %v6928_v36 }
 0x9f3   : > { %v7121_v11 = vpop.f32.mrf.mxu0  ;;  %v7331_v43 = vpop.f32.mrf.mxu1 }
 0x9f4   : > { %v18504_v2 = vadd.f32 %v7329_v22, %v7153_v38  ;;  %v7154_v9 = vadd.f32 %v7121_v11, %v6930_v25 }
 0x9f5   : > { %v18506_v16 = vpop.f32.mrf.mxu0  ;;  %v18508_v45 = vpop.f32.mrf.mxu1 }
 0x9f6   : > { %v18510_v42 = vadd.f32 %v7331_v43, %v7154_v9 }
 0x9f7   : > { %v7127_v18 = vpop.f32.mrf.mxu0  ;;  %v7337_v19 = vpop.f32.mrf.mxu1 }
 0x9f8   : > { %v7156_v60 = vadd.f32 %v7127_v18, %v18468_v50 }
 0x9f9   : > { %v7129_v40 = vpop.f32.mrf.mxu0  ;;  %v7339_v13 = vpop.f32.mrf.mxu1 }
 0x9fa   : > { %v18513_v52 = vadd.f32 %v7337_v19, %v7156_v60  ;;  %v7157_v36 = vadd.f32 %v7129_v40, %v18470_v8 }
 0x9fb   : > { %v7131_v23 = vpop.f32.mrf.mxu0  ;;  %v7341_v57 = vpop.f32.mrf.mxu1 }
 0x9fc   : > { %v18516_v44 = vadd.f32 %v7339_v13, %v7157_v36  ;;  %v7158_v25 = vadd.f32 %v7131_v23, %v18472_v6 }
 0x9fd   : > { %v18519_v37 = vpop.f32.mrf.mxu0  ;;  %v18521_v24 = vpop.f32.mrf.mxu1 }
 0x9fe   : > { %v18523_v48 = vadd.f32 %v7341_v57, %v7158_v25 }
 0x9ff   : > { %v7137_v31 = vpop.f32.mrf.mxu0  ;;  %v7347_v50 = vpop.f32.mrf.mxu1 }
 0xa00   : > { %v7160_v54 = vadd.f32 %v7137_v31, %v18478_v12 }
 0xa01   : > { %v7139_v35 = vpop.f32.mrf.mxu0  ;;  %v7349_v62 = vpop.f32.mrf.mxu1 }
 0xa02   : > { %v18526_v17 = vadd.f32 %v7347_v50, %v7160_v54  ;;  %v7161_v8 = vadd.f32 %v7139_v35, %v18480_v56 }
 0xa03   : > { %v7141_v55 = vpop.f32.mrf.mxu0  ;;  %v7351_v53 = vpop.f32.mrf.mxu1 }
 0xa04   : > { %v18529_v14 = vadd.f32 %v7349_v62, %v7161_v8 }
 0xa05   : > { %v7142_v6 = vpop.f32.mrf.mxu0  ;;  %v7352_v58 = vpop.f32.mrf.mxu1 }
 0xa07   : > { %v7499_v4 = vpop.f32.mrf.mxu0  ;;  %v7691_v61 = vpop.f32.mrf.mxu1 }
 0xa08   : > { %v7546_v51 = vadd.f32 %v7499_v4, %v18482_v32 }
 0xa09   : > { %v7501_v1 = vpop.f32.mrf.mxu0  ;;  %v7693_v15 = vpop.f32.mrf.mxu1 }
 0xa0a   : > { %v18532_v22 = vadd.f32 %v7691_v61, %v7546_v51  ;;  %v7547_v12 = vadd.f32 %v7501_v1, %v18484_v30 }
 0xa0b   : > { %v7503_v38 = vpop.f32.mrf.mxu0  ;;  %v7695_v11 = vpop.f32.mrf.mxu1 }
 0xa0c   : > { %v18535_v43 = vadd.f32 %v7693_v15, %v7547_v12  ;;  %v7548_v56 = vadd.f32 %v7503_v38, %v18490_v7 }
 0xa0d   : > { %v18538_v9 = vpop.f32.mrf.mxu0  ;;  %v18540_v18 = vpop.f32.mrf.mxu1 }
 0xa0e   : > { %v18542_v19 = vadd.f32 %v7695_v11, %v7548_v56 }
 0xa0f   : > { %v7509_v60 = vpop.f32.mrf.mxu0  ;;  %v7701_v32 = vpop.f32.mrf.mxu1 }
 0xa10   : > { %v7550_v40 = vadd.f32 %v7509_v60, %v18492_v59 }
 0xa11   : > { %v7511_v13 = vpop.f32.mrf.mxu0  ;;  %v7703_v36 = vpop.f32.mrf.mxu1 }
 0xa12   : > { %v7742_v23 = vadd.f32 %v7701_v32, %v7550_v40  ;;  %v7551_v30 = vadd.f32 %v7511_v13, %v18494_v39 }
 0xa13   : > { %v7513_v57 = vpop.f32.mrf.mxu0  ;;  %v7705_v25 = vpop.f32.mrf.mxu1 }
 0xa14   : > { %v7743_v31 = vadd.f32 %v7703_v36, %v7551_v30  ;;  %v7552_v7 = vadd.f32 %v7513_v57, %v18500_v21 }
 0xa15   : > { %v18547_v50 = vpop.f32.mrf.mxu0  ;;  %v18549_v54 = vpop.f32.mrf.mxu1 }
 0xa16   : > { %v7744_v35 = vadd.f32 %v7705_v25, %v7552_v7 }
 0xa17   : > { %v7519_v62 = vpop.f32.mrf.mxu0  ;;  %v7711_v8 = vpop.f32.mrf.mxu1 }
 0xa18   : > { %v7554_v55 = vadd.f32 %v7519_v62, %v18502_v0 }
 0xa19   : > { %v7521_v59 = vpop.f32.mrf.mxu0  ;;  %v7713_v53 = vpop.f32.mrf.mxu1 }
 0xa1a   : > { %v7746_v6 = vadd.f32 %v7711_v8, %v7554_v55  ;;  %v7555_v58 = vadd.f32 %v7521_v59, %v18504_v2 }
 0xa1b   : > { %v7523_v39 = vpop.f32.mrf.mxu0  ;;  %v7715_v4 = vpop.f32.mrf.mxu1 }
 0xa1c   : > { %v7747_v61 = vadd.f32 %v7713_v53, %v7555_v58  ;;  %v7556_v51 = vadd.f32 %v7523_v39, %v18510_v42 }
 0xa1d   : > { %v18554_v21 = vpop.f32.mrf.mxu0  ;;  %v18556_v1 = vpop.f32.mrf.mxu1 }
 0xa1e   : > { %v7748_v15 = vadd.f32 %v7715_v4, %v7556_v51 }
 0xa1f   : > { %v7529_v12 = vpop.f32.mrf.mxu0  ;;  %v7721_v38 = vpop.f32.mrf.mxu1 }
 0xa20   : > { %v7558_v11 = vadd.f32 %v7529_v12, %v18513_v52 }
 0xa21   : > { %v7531_v0 = vpop.f32.mrf.mxu0  ;;  %v7723_v56 = vpop.f32.mrf.mxu1 }
 0xa22   : > { %v7750_v60 = vadd.f32 %v7721_v38, %v7558_v11  ;;  %v7559_v32 = vadd.f32 %v7531_v0, %v18516_v44 }
 0xa23   : > { %v7533_v2 = vpop.f32.mrf.mxu0  ;;  %v7725_v40 = vpop.f32.mrf.mxu1 }
 0xa24   : > { %v7751_v13 = vadd.f32 %v7723_v56, %v7559_v32  ;;  %v7560_v36 = vadd.f32 %v7533_v2, %v18523_v48 }
 0xa25   : > { %v18561_v42 = vpop.f32.mrf.mxu0  ;;  %v18563_v30 = vpop.f32.mrf.mxu1 }
 0xa26   : > { %20155 = vst [vmem:[#allocation29_spill] sm:$0xff] %v18561_v42  ;;  %20156 = vst [vmem:[#allocation15_spill] sm:$0xff] %v18563_v30  ;;  %v7752_v57 = vadd.f32 %v7725_v40, %v7560_v36 }
 0xa27   : > { %v7539_v25 = vpop.f32.mrf.mxu0  ;;  %v7731_v7 = vpop.f32.mrf.mxu1 }
 0xa28   : > { %v7562_v62 = vadd.f32 %v7539_v25, %v18526_v17 }
 0xa29   : > { %v7541_v52 = vpop.f32.mrf.mxu0  ;;  %v7733_v8 = vpop.f32.mrf.mxu1 }
 0xa2a   : > { %v7754_v55 = vadd.f32 %v7731_v7, %v7562_v62  ;;  %v7563_v59 = vadd.f32 %v7541_v52, %v18529_v14 }
 0xa2b   : > { %v7543_v44 = vpop.f32.mrf.mxu0  ;;  %v7735_v53 = vpop.f32.mrf.mxu1 }
 0xa2c   : > { %v18567_v58 = vadd.f32 %v7733_v8, %v7563_v59 }
 0xa2d   : > { %v7544_v39 = vpop.f32.mrf.mxu0  ;;  %v7736_v48 = vpop.f32.mrf.mxu1 }
 0xa2f   : > { %v7901_v4 = vpop.f32.mrf.mxu0  ;;  %v18569_v51 = vpop.f32.mrf.mxu1 }
 0xa31   : > { %v18571_v12 = vpop.f32.mrf.mxu0  ;;  %v18573_v38 = vpop.f32.mrf.mxu1 }
 0xa33   : > { %v18575_v11 = vpop.f32.mrf.mxu0  ;;  %v18577_v17 = vpop.f32.mrf.mxu1 }
 0xa35   : > { %v18579_v0 = vpop.f32.mrf.mxu0  ;;  %v18581_v14 = vpop.f32.mrf.mxu1 }
 0xa37   : > { %v7911_v56 = vpop.f32.mrf.mxu0  ;;  %v8121_v32 = vpop.f32.mrf.mxu1 }
 0xa38   : > { %v7952_v2 = vadd.f32 %v7911_v56, %v7742_v23 }
 0xa39   : > { %v7913_v40 = vpop.f32.mrf.mxu0  ;;  %v8123_v36 = vpop.f32.mrf.mxu1 }
 0xa3a   : > { %v18583_v25 = vadd.f32 %v8121_v32, %v7952_v2  ;;  %v7953_v7 = vadd.f32 %v7913_v40, %v7743_v31 }
 0xa3b   : > { %v7915_v62 = vpop.f32.mrf.mxu0  ;;  %v8125_v52 = vpop.f32.mrf.mxu1 }
 0xa3c   : > { %v18585_v8 = vadd.f32 %v8123_v36, %v7953_v7  ;;  %v7954_v59 = vadd.f32 %v7915_v62, %v7744_v35 }
 0xa3d   : > { %v18587_v44 = vpop.f32.mrf.mxu0  ;;  %v18589_v53 = vpop.f32.mrf.mxu1 }
 0xa3e   : > { %v18591_v39 = vadd.f32 %v8125_v52, %v7954_v59 }
 0xa3f   : > { %v7921_v48 = vpop.f32.mrf.mxu0  ;;  %v8131_v63 = vpop.f32.mrf.mxu1 }
 0xa40   : > { %v7956_v47 = vadd.f32 %v7921_v48, %v7746_v6 }
 0xa41   : > { %v7923_v23 = vpop.f32.mrf.mxu0  ;;  %v8133_v56 = vpop.f32.mrf.mxu1 }
 0xa42   : > { %v18593_v30 = vadd.f32 %v8131_v63, %v7956_v47  ;;  %v7957_v32 = vadd.f32 %v7923_v23, %v7747_v61  ;;  %v6912_v63 = vadd.f32 %v18458_v27, %v18456_v41 }
 0xa43   : > { %v7925_v31 = vpop.f32.mrf.mxu0  ;;  %v8135_v2 = vpop.f32.mrf.mxu1 }
 0xa44   : > { %v18595_v40 = vadd.f32 %v8133_v56, %v7957_v32  ;;  %v7958_v36 = vadd.f32 %v7925_v31, %v7748_v15  ;;  %v7147_v15 = vadd.f32 %v18486_v3, %v6912_v63  ;;  %v7948_v3 = vadd.f32 %v7901_v4, %v18532_v22 }
 0xa45   : > { %v18597_v35 = vpop.f32.mrf.mxu0  ;;  %v18599_v7 = vpop.f32.mrf.mxu1  ;;  %v20158_v4 = vsub.s32 0, %v14462_v29 }
 0xa46   : > { %20157 = vst [vmem:[#allocation25_spill] sm:$0xff] %v18599_v7  ;;  %v18601_v62 = vadd.f32 %v8135_v2, %v7958_v36  ;;  %v7357_v41 = vadd.f32 %v18488_v33, %v7147_v15  ;;  %v7949_v33 = vadd.f32 %v18571_v12, %v18535_v43  ;;  %v8158_v22 = vadd.f32 %v18569_v51, %v7948_v3 }
 0xa47   : > { %v7931_v52 = vpop.f32.mrf.mxu0  ;;  %v8141_v59 = vpop.f32.mrf.mxu1 }
 0xa48   : > { %v7960_v42 = vadd.f32 %v7931_v52, %v7750_v60 }
 0xa49   : > { %v7933_v6 = vpop.f32.mrf.mxu0  ;;  %v8143_v48 = vpop.f32.mrf.mxu1 }
 0xa4a   : > { %v18605_v47 = vadd.f32 %v8141_v59, %v7960_v42  ;;  %v7961_v61 = vadd.f32 %v7933_v6, %v7751_v13  ;;  %v7549_v59 = vadd.f32 %v18538_v9, %v7357_v41 }
 0xa4b   : > { %v7935_v23 = vpop.f32.mrf.mxu0  ;;  %v8145_v56 = vpop.f32.mrf.mxu1 }
 0xa4c   : > { %v18608_v32 = vadd.f32 %v8143_v48, %v7961_v61  ;;  %v7962_v31 = vadd.f32 %v7935_v23, %v7752_v57  ;;  %v8368_v61 = vld [vmem:[%s19864_s11] sm:$0x3]  ;;  %v7741_v9 = vadd.f32 %v18540_v18, %v7549_v59 }
 0xa4d   : > { %v18610_v2 = vpop.f32.mrf.mxu0  ;;  %v18612_v36 = vpop.f32.mrf.mxu1 }
 0xa4e   : > { %v18614_v60 = vadd.f32 %v8145_v56, %v7962_v31  ;;  %v8159_v31 = vadd.f32 %v18573_v38, %v7949_v33  ;;  %v7951_v43 = vadd.f32 %v18579_v0, %v7741_v9 }
 0xa4f   : > { %v7941_v52 = vpop.f32.mrf.mxu0  ;;  %v8151_v7 = vpop.f32.mrf.mxu1 }
 0xa50   : > { %v7964_v27 = vadd.f32 %v7941_v52, %v7754_v55  ;;  %v20159_v52 = vsub.s32 1, %v14462_v29  ;;  %v13547_v29 = vld [vmem:[%s19865_s12 + $0xf8] sm:$0xff]  }
 0xa51   : > { %v7943_v42 = vpop.f32.mrf.mxu0  ;;  %v8153_v13 = vpop.f32.mrf.mxu1 }
 0xa52   : > { %v18619_v6 = vadd.f32 %v8151_v7, %v7964_v27  ;;  %v7965_v57 = vadd.f32 %v7943_v42, %v18567_v58  ;;  %v18633_v58 = vrot.slane %v8368_v61, %v20158_v4  ;;  %v7950_v7 = vadd.f32 %v18575_v11, %v18542_v19 }
 0xa53   : > { %v7945_v48 = vpop.f32.mrf.mxu0  ;;  %v8155_v63 = vpop.f32.mrf.mxu1  ;;  %v18641_v41 = vrot.slane %v8368_v61, %v20159_v52  ;;  %v8161_v19 = vadd.f32 %v18581_v14, %v7951_v43 }
 0xa54   : > { %v18627_v55 = vadd.f32 %v8153_v13, %v7965_v57  ;;  %v8160_v42 = vadd.f32 %v18577_v17, %v7950_v7 }
 0xa55   : > { %v7946_v23 = vpop.f32.mrf.mxu0  ;;  %v8156_v56 = vpop.f32.mrf.mxu1 }
 0xa57   : > { %v8303_v15 = vpop.f32.mrf.mxu0 }
 0xa58   : > { %v8350_v12 = vadd.f32 %v8303_v15, %v8158_v22 }
 0xa59   : > { %v8305_v18 = vpop.f32.mrf.mxu0 }
 0xa5a   : > { %v18644_v51 = vadd.f32 %v18633_v58, %v8350_v12  ;;  %v8351_v27 = vadd.f32 %v8305_v18, %v8159_v31 }
 0xa5b   : > { %v8307_v13 = vpop.f32.mrf.mxu0 }
 0xa5c   : > { %13814 = vtanh.f32 %v18644_v51  ;;  %v18650_v38 = vadd.f32 %v18641_v41, %v8351_v27  ;;  %v8352_v11 = vadd.f32 %v8307_v13, %v8160_v42 }
 0xa5d   : > { %v8309_v0 = vpop.f32.mrf.mxu0 }
 0xa5e   : > { %v8353_v59 = vadd.f32 %v8309_v0, %v8161_v19  ;;  %13816 = vtanh.f32 %v18650_v38  ;;  %v18654_v3 = vadd.f32 %v18633_v58, %v8352_v11 }
 0xa5f   : > { %v8313_v57 = vpop.f32.mrf.mxu0 }
 0xa60   : > { %v18657_v48 = vadd.f32 %v18641_v41, %v8353_v59  ;;  %v8354_v17 = vadd.f32 %v8313_v57, %v18583_v25  ;;  %13818 = vtanh.f32 %v18654_v3 }
 0xa61   : > { %v8315_v14 = vpop.f32.mrf.mxu0 }
 0xa62   : > { %v18661_v63 = vadd.f32 %v18633_v58, %v8354_v17  ;;  %v8355_v61 = vadd.f32 %v8315_v14, %v18585_v8  ;;  %13820 = vtanh.f32 %v18657_v48 }
 0xa63   : > { %v8317_v33 = vpop.f32.mrf.mxu0 }
 0xa64   : > { %v18667_v23 = vadd.f32 %v18641_v41, %v8355_v61  ;;  %v8356_v56 = vadd.f32 %v8317_v33, %v18591_v39 }
 0xa65   : > { %v8319_v9 = vpop.f32.mrf.mxu0 }
 0xa66   : > { %v18671_v22 = vadd.f32 %v18633_v58, %v8356_v56 }
 0xa67   : > { %v8323_v25 = vpop.f32.mrf.mxu0 }
 0xa68   : > { %v8358_v4 = vadd.f32 %v8323_v25, %v18593_v30 }
 0xa69   : > { %v13815_v7 = vpop.eup %13814  ;;  %v8325_v15 = vpop.f32.mrf.mxu0 }
 0xa6a   : > { %v18675_v8 = vadd.f32 %v18633_v58, %v8358_v4  ;;  %v8359_v31 = vadd.f32 %v8325_v15, %v18595_v40  ;;  %8578 = vrot.lane.b32.xlu1 %v13815_v7, %s14070_s20 }
 0xa6b   : > { %v8327_v43 = vpop.f32.mrf.mxu0  ;;  %v13817_v12 = vpop.eup %13816 }
 0xa6c   : > { %v18680_v39 = vadd.f32 %v18641_v41, %v8359_v31  ;;  %v8360_v52 = vadd.f32 %v8327_v43, %v18601_v62  ;;  %8758 = vrot.lane.b32.xlu0 %v13817_v12, %s14070_s20 }
 0xa6d   : > { %v8329_v18 = vpop.f32.mrf.mxu0  ;;  %v13819_v42 = vpop.eup %13818 }
 0xa6e   : > { %20160 = vst [vmem:[#allocation28_spill] sm:$0xff] %v18680_v39  ;;  %v18685_v30 = vadd.f32 %v18633_v58, %v8360_v52 }
 0xa6f   : > { %v8333_v27 = vpop.f32.mrf.mxu0  ;;  %v13821_v40 = vpop.eup %13820 }
 0xa70   : > { %v8362_v13 = vadd.f32 %v8333_v27, %v18605_v47  ;;  %8580 = vrot.lane.b32.xlu0 %v13819_v42, %s14070_s20  ;;  %8760 = vrot.lane.b32.xlu1 %v13821_v40, %s14070_s20 }
 0xa71   : > { %v8335_v19 = vpop.f32.mrf.mxu0 }
 0xa72   : > { %v18690_v11 = vadd.f32 %v18633_v58, %v8362_v13  ;;  %v8363_v62 = vadd.f32 %v8335_v19, %v18608_v32 }
 0xa73   : > { %v8337_v0 = vpop.f32.mrf.mxu0 }
 0xa74   : > { %v18695_v57 = vadd.f32 %v18641_v41, %v8363_v62  ;;  %v8364_v17 = vadd.f32 %v8337_v0, %v18614_v60  ;;  %v6922_v60 = vadd.f32 %v18462_v34, %v18460_v20  ;;  %v6942_v20 = vadd.f32 %v18476_v26, %v18474_v46  ;;  %v20164_v26 = vld [vmem:[#allocation29_spill] sm:$0xff] }
 0xa75   : > { %v8339_v59 = vpop.f32.mrf.mxu0  ;;  %v11700_v0 = vmul.f32 -1.442695, %v18644_v51 }
 0xa76   : > { %20161 = vst [vmem:[#allocation24_spill] sm:$0xff] %v18695_v57  ;;  %v18699_v47 = vadd.f32 %v18633_v58, %v8364_v17  ;;  %v7151_v15 = vadd.f32 %v18496_v49, %v6922_v60  ;;  %v6468_v60 = vld [vmem:[#allocation6 + $0x40] sm:$0xff] }
 0xa77   : > { %v8343_v14 = vpop.f32.mrf.mxu0 }
 0xa78   : > { %v8366_v61 = vadd.f32 %v8343_v14, %v18619_v6  ;;  %v7361_v31 = vadd.f32 %v18498_v28, %v7151_v15  ;;  %v6932_v6 = vadd.f32 %v18466_v5, %v18464_v10  ;;  %v7159_v10 = vadd.f32 %v18519_v37, %v6942_v20  ;;  %v20165_v37 = vld [vmem:[#allocation25_spill] sm:$0xff] }
 0xa79   : > { %v8345_v33 = vpop.f32.mrf.mxu0 }
 0xa7a   : > { %v18703_v25 = vadd.f32 %v18633_v58, %v8366_v61  ;;  %v8367_v32 = vadd.f32 %v8345_v33, %v18627_v55  ;;  %v7553_v43 = vadd.f32 %v18547_v50, %v7361_v31  ;;  %v7155_v58 = vadd.f32 %v18506_v16, %v6932_v6  ;;  %v6462_v31 = vld [vmem:[#allocation6 + $0x10] sm:$0xff]  ;;  %v6463_v6 = vld [vmem:[#allocation6 + $0x18] sm:$0xff] }
 0xa7b   : > { %v8347_v56 = vpop.f32.mrf.mxu0  ;;  %v7369_v16 = vadd.f32 %v18521_v24, %v7159_v10 }
 0xa7c   : > { %v18707_v7 = vadd.f32 %v18641_v41, %v8367_v32  ;;  %v7745_v55 = vadd.f32 %v18549_v54, %v7553_v43  ;;  %v7365_v12 = vadd.f32 %v18508_v45, %v7155_v58  ;;  %13822 = vtanh.f32 %v18703_v25  ;;  %v6460_v56 = vld [vmem:[#allocation6] sm:$0xff] }
 0xa7d   : > { %v8348_v4 = vpop.f32.mrf.mxu0  ;;  %13824 = vtanh.f32 %v18661_v63  ;;  %v7561_v45 = vadd.f32 %v20164_v26, %v7369_v16  ;;  %v11702_v26 = vmul.f32 -1.442695, %v18661_v63 }
 0xa7e   : > { %20162 = vst [vmem:[#allocation27_spill] sm:$0xff] %v18707_v7  ;;  %v7955_v52 = vadd.f32 %v18587_v44, %v7745_v55  ;;  %v7557_v27 = vadd.f32 %v18554_v21, %v7365_v12  ;;  %13826 = vtanh.f32 %v18707_v7  ;;  %v20166_v21 = vld [vmem:[#allocation15_spill] sm:$0xff] }
 0xa7f   : > { %13828 = vtanh.f32 %v18667_v23  ;;  %v6461_v4 = vld [vmem:[#allocation6 + $0x8] sm:$0xff] }
 0xa80   : > { %v8165_v34 = vadd.f32 %v18589_v53, %v7955_v52  ;;  %v7749_v5 = vadd.f32 %v18556_v1, %v7557_v27  ;;  %13830 = vtanh.f32 %v18671_v22  ;;  %v7753_v1 = vadd.f32 %v20166_v21, %v7561_v45 }
 0xa81   : > { %v11703_v45 = vmul.f32 -1.442695, %v18671_v22 }
 0xa82   : > { %v8357_v49 = vadd.f32 %v8319_v9, %v8165_v34  ;;  %v7959_v28 = vadd.f32 %v18597_v35, %v7749_v5  ;;  %v7963_v24 = vadd.f32 %v18610_v2, %v7753_v1  ;;  %v11705_v1 = vmul.f32 -1.442695, %v18685_v30 }
 0xa84   : > { %v18733_v46 = vadd.f32 %v18641_v41, %v8357_v49  ;;  %v8169_v50 = vadd.f32 %v20165_v37, %v7959_v28  ;;  %v11708_v37 = vmul.f32 -1.442695, %v18703_v25 }
 0xa86   : > { %20163 = vst [vmem:[#allocation30_spill] sm:$0xff] %v18733_v46  ;;  %13832 = vtanh.f32 %v18733_v46  ;;  %v8361_v54 = vadd.f32 %v8329_v18, %v8169_v50  ;;  %v8173_v18 = vadd.f32 %v18612_v36, %v7963_v24  ;;  %v8460_v24 = vadd.f32 1.0, %v18703_v25 }
 0xa87   : > { %13834 = vtanh.f32 %v18675_v8 }
 0xa88   : > { %13836 = vtanh.f32 %v18680_v39  ;;  %v18745_v53 = vadd.f32 %v18641_v41, %v8361_v54  ;;  %v8365_v42 = vadd.f32 %v8339_v59, %v8173_v18  ;;  %v11704_v54 = vmul.f32 -1.442695, %v18675_v8 }
 0xa89   : > { %v13823_v44 = vpop.eup %13822  ;;  %13838 = vtanh.f32 %v18685_v30  ;;  %v8454_v18 = vadd.f32 1.0, %v18661_v63 }
 0xa8a   : > { %8594 = vrot.lane.b32.xlu1 %v13823_v44, %s14070_s20  ;;  %20167 = vst [vmem:[#allocation14_spill] sm:$0xff] %v18745_v53  ;;  %v13825_v35 = vpop.eup %13824  ;;  %13840 = vtanh.f32 %v18745_v53  ;;  %v18758_v36 = vadd.f32 %v18641_v41, %v8365_v42  ;;  %v11701_v41 = vmul.f32 -1.442695, %v18654_v3  ;;  %v8455_v42 = vadd.f32 1.0, %v18671_v22 }
 0xa8b   : > { %v13827_v9 = vpop.eup %13826  ;;  %13842 = vtanh.f32 %v18690_v11 }
 0xa8c   : > { %8774 = vrot.lane.b32.xlu0 %v13827_v9, %s14070_s20  ;;  %v13829_v2 = vpop.eup %13828  ;;  %13844 = vtanh.f32 %v18695_v57  ;;  %20168 = vst [vmem:[#allocation29_spill] sm:$0xff] %v18758_v36 }
 0xa8d   : > { %v13831_v13 = vpop.eup %13830  ;;  %13846 = vtanh.f32 %v18699_v47 }
 0xa8e   : > { %8582 = vrot.lane.b32.xlu1 %v13825_v35, %s14070_s20  ;;  %13848 = vtanh.f32 %v18758_v36 }
 0xa8f   : > { %13850 = vpow2.f32 %v11700_v0  ;;  %v11707_v0 = vmul.f32 -1.442695, %v18699_v47 }
 0xa90   : > { %8584 = vrot.lane.b32.xlu0 %v13831_v13, %s14070_s20  ;;  %13852 = vpow2.f32 %v11701_v41  ;;  %v11717_v13 = vmul.f32 -1.442695, %v8460_v24 }
 0xa92   : > { %8762 = vrot.lane.b32.xlu1 %v13829_v2, %s14070_s20  ;;  %v11706_v2 = vmul.f32 -1.442695, %v18690_v11 }
 0xa93   : > { %v13833_v40 = vpop.eup %13832 }
 0xa94   : > { %v13835_v19 = vpop.eup %13834  ;;  %8764 = vrot.lane.b32.xlu0 %v13833_v40, %s14070_s20 }
 0xa95   : > { %v13837_v62 = vpop.eup %13836 }
 0xa96   : > { %8586 = vrot.lane.b32.xlu1 %v13835_v19, %s14070_s20  ;;  %v13839_v59 = vpop.eup %13838  ;;  %v11711_v19 = vmul.f32 -1.442695, %v8454_v18 }
 0xa97   : > { %v13841_v17 = vpop.eup %13840 }
 0xa98   : > { %8588 = vrot.lane.b32.xlu0 %v13839_v59, %s14070_s20  ;;  %v13843_v14 = vpop.eup %13842 }
 0xa99   : > { %v13845_v61 = vpop.eup %13844 }
 0xa9a   : > { %8766 = vrot.lane.b32.xlu1 %v13837_v62, %s14070_s20  ;;  %v13847_v33 = vpop.eup %13846  ;;  %v11712_v62 = vmul.f32 -1.442695, %v8455_v42 }
 0xa9b   : > { %v13849_v32 = vpop.eup %13848 }
 0xa9c   : > { %8768 = vrot.lane.b32.xlu0 %v13841_v17, %s14070_s20  ;;  %v13851_v15 = vpop.eup %13850 }
 0xa9d   : > { %v8425_v43 = vadd.f32 1.0, %v13851_v15  ;;  %v13853_v58 = vpop.eup %13852 }
 0xa9e   : > { %8590 = vrot.lane.b32.xlu1 %v13843_v14, %s14070_s20  ;;  %v8426_v55 = vadd.f32 1.0, %v13853_v58 }
 0xa9f   : > { %13854 = vrcp.f32 %v8425_v43 }
 0xaa0   : > { %8592 = vrot.lane.b32.xlu0 %v13847_v33, %s14070_s20  ;;  %13856 = vrcp.f32 %v8426_v55  ;;  %v8668_v55 = vadd.f32 1.0, %v18650_v38 }
 0xaa1   : > { %13858 = vpow2.f32 %v11702_v26 }
 0xaa2   : > { %8770 = vrot.lane.b32.xlu1 %v13845_v61, %s14070_s20  ;;  %13860 = vpow2.f32 %v11703_v45 }
 0xaa3   : > { %13862 = vpow2.f32 %v11708_v37  ;;  %v6464_v37 = vld [vmem:[#allocation6 + $0x20] sm:$0xff] }
 0xaa4   : > { %8772 = vrot.lane.b32.xlu0 %v13849_v32, %s14070_s20  ;;  %13864 = vpow2.f32 %v11704_v54 }
 0xaa6   : > { %8533 = vrot.lane.b32.xlu1 %v6460_v56, %s14071_s0 }
 0xaa8   : > { %8535 = vrot.lane.b32.xlu0 %v6461_v4, %s14071_s0 }
 0xaaa   : > { %8549 = vrot.lane.b32.xlu1 %v6468_v60, %s14071_s0  ;;  %v8452_v60 = vadd.f32 1.0, %v18644_v51 }
 0xaac   : > { %8537 = vrot.lane.b32.xlu0 %v6462_v31, %s14071_s0  ;;  %v13855_v12 = vpop.eup %13854 }
 0xaad   : > { %v13857_v10 = vpop.eup %13856 }
 0xaae   : > { %8539 = vrot.lane.b32.xlu1 %v6463_v6, %s14071_s0  ;;  %v13859_v50 = vpop.eup %13858 }
 0xaaf   : > { %v8427_v21 = vadd.f32 1.0, %v13859_v50  ;;  %v13861_v44 = vpop.eup %13860  ;;  %v8669_v50 = vadd.f32 1.0, %v18657_v48 }
 0xab0   : > { %v8428_v35 = vadd.f32 1.0, %v13861_v44  ;;  %v13863_v9 = vpop.eup %13862 }
 0xab1   : > { %13866 = vrcp.f32 %v8427_v21  ;;  %v8433_v40 = vadd.f32 1.0, %v13863_v9  ;;  %v13865_v25 = vpop.eup %13864  ;;  %v11719_v42 = vmul.f32 -1.442695, %v8669_v50 }
 0xab2   : > { %13868 = vpow2.f32 %v11705_v1  ;;  %v8429_v63 = vadd.f32 1.0, %v13865_v25  ;;  %v8453_v1 = vadd.f32 1.0, %v18654_v3 }
 0xab3   : > { %13870 = vrcp.f32 %v8428_v35 }
 0xab4   : > { %13872 = vpow2.f32 %v11706_v2  ;;  %v6465_v2 = vld [vmem:[#allocation6 + $0x28] sm:$0xff] }
 0xab5   : > { %13874 = vpow2.f32 %v11717_v13 }
 0xab6   : > { %13876 = vrcp.f32 %v8433_v40  ;;  %v11710_v40 = vmul.f32 -1.442695, %v8453_v1 }
 0xab7   : > { %13878 = vpow2.f32 %v11711_v19 }
 0xab8   : > { %13880 = vpow2.f32 %v11712_v62 }
 0xab9   : > { %13882 = vpow2.f32 %v11707_v0 }
 0xaba   : > { %13884 = vrcp.f32 %v8429_v63  ;;  %v6466_v63 = vld [vmem:[#allocation6 + $0x30] sm:$0xff] }
 0xabe   : > { %v13867_v17 = vpop.eup %13866 }
 0xabf   : > { %v13869_v14 = vpop.eup %13868 }
 0xac0   : > { %v8430_v33 = vadd.f32 1.0, %v13869_v14  ;;  %v13871_v56 = vpop.eup %13870 }
 0xac1   : > { %v13873_v6 = vpop.eup %13872 }
 0xac2   : > { %v13875_v43 = vpop.eup %13874  ;;  %13886 = vrcp.f32 %v8430_v33 }
 0xac3   : > { %v13877_v58 = vpop.eup %13876 }
 0xadc   : > { %v8579_v52 = vpop.permute.xlu1 %8578 }
 0xadd   : > { %v8605_v27 = vmul.f32 %v13855_v12, %v8579_v52 }
 0xade   : > { %v8759_v20 = vpop.permute.xlu0 %8758 }
 0xadf   : > { %8623 = vrot.lane.b32.xlu0 %v8605_v27, %s14071_s0  ;;  %v8785_v34 = vmul.f32 %v13855_v12, %v8759_v20  ;;  %v11709_v27 = vmul.f32 -1.442695, %v8452_v60 }
 0xae1   : > { %8803 = vrot.lane.b32.xlu1 %v8785_v34, %s14071_s0  ;;  %13888 = vpow2.f32 %v11709_v27 }
 0xae2   : > { %v8581_v5 = vpop.permute.xlu0 %8580  ;;  %v8761_v28 = vpop.permute.xlu1 %8760 }
 0xae3   : > { %v8606_v49 = vmul.f32 %v13857_v10, %v8581_v5  ;;  %v8786_v16 = vmul.f32 %v13857_v10, %v8761_v28  ;;  %v13879_v10 = vpop.eup %13878  ;;  %v8431_v5 = vadd.f32 1.0, %v13873_v6 }
 0xae4   : > { %v13881_v51 = vpop.eup %13880  ;;  %v8490_v54 = vadd.f32 1.0, %v13879_v10 }
 0xae5   : > { %8625 = vrot.lane.b32.xlu1 %v8606_v49, %s14071_s0  ;;  %8805 = vrot.lane.b32.xlu0 %v8786_v16, %s14071_s0  ;;  %v8496_v49 = vadd.f32 1.0, %v13875_v43  ;;  %v13883_v28 = vpop.eup %13882  ;;  %v11718_v16 = vmul.f32 -1.442695, %v8668_v55  ;;  %v8491_v44 = vadd.f32 1.0, %v13881_v51  ;;  %13890 = vrcp.f32 %v8431_v5 }
 0xae6   : > { %v8432_v24 = vadd.f32 1.0, %v13883_v28  ;;  %v13885_v35 = vpop.eup %13884 }
 0xae7   : > { %13892 = vrcp.f32 %v8496_v49  ;;  %v13887_v3 = vpop.eup %13886 }
 0xae8   : > { %13894 = vpow2.f32 %v11718_v16 }
 0xae9   : > { %13896 = vrcp.f32 %v8490_v54 }
 0xaea   : > { %13898 = vrcp.f32 %v8491_v44  ;;  %v20169_v44 = vld [vmem:[#allocation18_spill] sm:$0xff] }
 0xaeb   : > { %13900 = vrcp.f32 %v8432_v24 }
 0xaec   : > { %13902 = vpow2.f32 %v11719_v42 }
 0xaed   : > { %13904 = vpow2.f32 %v11710_v40 }
 0xafc   : > { %v8595_v59 = vpop.permute.xlu1 %8594 }
 0xafd   : > { %v8613_v20 = vmul.f32 %v13877_v58, %v8595_v59 }
 0xafe   : > { %v8775_v41 = vpop.permute.xlu0 %8774 }
 0xaff   : > { %v8793_v21 = vmul.f32 %v13877_v58, %v8775_v41  ;;  %v13889_v41 = vpop.eup %13888 }
 0xb00   : > { %v8583_v22 = vpop.permute.xlu1 %8582  ;;  %v8488_v43 = vadd.f32 1.0, %v13889_v41  ;;  %v13521_v41 = vld [vmem:[%s19865_s12 + $0x30] sm:$0xff]  }
 0xb01   : > { %v8607_v61 = vmul.f32 %v13867_v17, %v8583_v22  ;;  %v13891_v22 = vpop.eup %13890 }
 0xb02   : > { %v8585_v32 = vpop.permute.xlu0 %8584  ;;  %13906 = vrcp.f32 %v8488_v43  ;;  %v8456_v43 = vadd.f32 1.0, %v18675_v8  ;;  %v8674_v8 = vadd.f32 1.0, %v18695_v57 }
 0xb03   : > { %8627 = vrot.lane.b32.xlu0 %v8607_v61, %s14071_s0  ;;  %v8608_v15 = vmul.f32 %v13871_v56, %v8585_v32  ;;  %v13893_v61 = vpop.eup %13892  ;;  %v6467_v32 = vld [vmem:[#allocation6 + $0x38] sm:$0xff] }
 0xb04   : > { %v8763_v4 = vpop.permute.xlu1 %8762 }
 0xb05   : > { %v8787_v31 = vmul.f32 %v13867_v17, %v8763_v4  ;;  %8629 = vrot.lane.b32.xlu1 %v8608_v15, %s14071_s0  ;;  %v13895_v4 = vpop.eup %13894 }
 0xb06   : > { %v8765_v12 = vpop.permute.xlu0 %8764  ;;  %v8704_v55 = vadd.f32 1.0, %v13895_v4 }
 0xb07   : > { %8807 = vrot.lane.b32.xlu0 %v8787_v31, %s14071_s0  ;;  %v8788_v34 = vmul.f32 %v13871_v56, %v8765_v12  ;;  %v13897_v31 = vpop.eup %13896 }
 0xb08   : > { %v8587_v52 = vpop.permute.xlu1 %8586  ;;  %v13899_v6 = vpop.eup %13898  ;;  %13908 = vrcp.f32 %v8704_v55 }
 0xb09   : > { %8809 = vrot.lane.b32.xlu1 %v8788_v34, %s14071_s0  ;;  %v8609_v13 = vmul.f32 %v13885_v35, %v8587_v52  ;;  %v13901_v58 = vpop.eup %13900 }
 0xb0a   : > { %v8589_v26 = vpop.permute.xlu0 %8588  ;;  %v13903_v5 = vpop.eup %13902 }
 0xb0b   : > { %8639 = vrot.lane.b32.xlu0 %v8613_v20, %s14071_s0  ;;  %v8610_v0 = vmul.f32 %v13887_v3, %v8589_v26  ;;  %v13905_v51 = vpop.eup %13904  ;;  %v8705_v49 = vadd.f32 1.0, %v13903_v5 }
 0xb0c   : > { %v8767_v45 = vpop.permute.xlu1 %8766  ;;  %v8489_v16 = vadd.f32 1.0, %v13905_v51 }
 0xb0d   : > { %8819 = vrot.lane.b32.xlu1 %v8793_v21, %s14071_s0  ;;  %v8789_v25 = vmul.f32 %v13885_v35, %v8767_v45  ;;  %13910 = vrcp.f32 %v8705_v49  ;;  %v14021_v21 = vld [vmem:[#allocation7] sm:$0xff] }
 0xb0e   : > { %v8769_v9 = vpop.permute.xlu0 %8768  ;;  %13912 = vrcp.f32 %v8489_v16 }
 0xb0f   : > { %8541 = vrot.lane.b32.xlu0 %v6464_v37, %s14071_s0  ;;  %v8790_v14 = vmul.f32 %v13887_v3, %v8769_v9  ;;  %v13907_v26 = vpop.eup %13906  ;;  %v14022_v3 = vld [vmem:[#allocation7 + $0x8] sm:$0xff] }
 0xb10   : > { %v8591_v18 = vpop.permute.xlu1 %8590 }
 0xb11   : > { %8543 = vrot.lane.b32.xlu1 %v6465_v2, %s14071_s0  ;;  %v8611_v60 = vmul.f32 %v13891_v22, %v8591_v18 }
 0xb12   : > { %v8593_v19 = vpop.permute.xlu0 %8592 }
 0xb13   : > { %8631 = vrot.lane.b32.xlu0 %v8609_v13, %s14071_s0  ;;  %v8612_v27 = vmul.f32 %v13901_v58, %v8593_v19 }
 0xb14   : > { %v8771_v62 = vpop.permute.xlu1 %8770 }
 0xb15   : > { %8633 = vrot.lane.b32.xlu1 %v8610_v0, %s14071_s0  ;;  %v8791_v20 = vmul.f32 %v13891_v22, %v8771_v62  ;;  %v13909_v45 = vpop.eup %13908 }
 0xb16   : > { %v8773_v59 = vpop.permute.xlu0 %8772  ;;  %v8740_v1 = vmul.f32 %v14021_v21, %v13909_v45  ;;  %v8459_v45 = vadd.f32 1.0, %v18699_v47  ;;  %v13522_v21 = vld [vmem:[%s19865_s12 + $0x28] sm:$0xff]   ;;  %v13524_v47 = vld [vmem:[%s19865_s12 + $0x10] sm:$0xff]  }
 0xb17   : > { %8811 = vrot.lane.b32.xlu0 %v8789_v25, %s14071_s0  ;;  %v8792_v28 = vmul.f32 %v13901_v58, %v8773_v59  ;;  %v20170_v59 = vld [vmem:[#allocation19_spill] sm:$0xff]  ;;  %v8457_v58 = vadd.f32 1.0, %v18685_v30 }
 0xb18   : > { %v8534_v17 = vpop.permute.xlu1 %8533 }
 0xb19   : > { %8813 = vrot.lane.b32.xlu1 %v8790_v14, %s14071_s0  ;;  %v8560_v37 = vmul.f32 %v13907_v26, %v8534_v17  ;;  %v13520_v14 = vld [vmem:[%s19865_s12 + $0x38] sm:$0xff]  }
 0xb1a   : > { %v8536_v33 = vpop.permute.xlu0 %8535  ;;  %v13911_v9 = vpop.eup %13910  ;;  %12704 = vmatpush3.bf16.msra.mxu1 %v13520_v14 }
 0xb1b   : > { %8545 = vrot.lane.b32.xlu0 %v6466_v63, %s14071_s0  ;;  %v13913_v2 = vpop.eup %13912  ;;  %v8741_v19 = vmul.f32 %v14022_v3, %v13911_v9 }
 0xb1c   : > { %v8550_v56 = vpop.permute.xlu1 %8549  ;;  %v8561_v42 = vmul.f32 %v13913_v2, %v8536_v33  ;;  %v8670_v33 = vadd.f32 1.0, %v18667_v23 }
 0xb1d   : > { %v18808_v15 = vmul.f32 %v13893_v61, %v8550_v56  ;;  %8547 = vrot.lane.b32.xlu1 %v6467_v32, %s14071_s0  ;;  %v20171_v61 = vmov 0.0   ;;  %v8671_v32 = vadd.f32 1.0, %v18733_v46 }
 0xb1e   : > { %v8538_v12 = vpop.permute.xlu0 %8537  ;;  %12705 = vmatprep.subr.bf16.mxu1 %v20171_v61  ;;  %v11720_v56 = vmul.f32 -1.442695, %v8670_v33 }
 0xb1f   : > { %8635 = vrot.lane.b32.xlu0 %v8611_v60, %s14071_s0  ;;  %v18812_v34 = vmul.f32 %v13897_v31, %v8538_v12  ;;  %12706 = vmatpush3.bf16.msra.mxu1 %v13521_v41  ;;  %v11721_v4 = vmul.f32 -1.442695, %v8671_v32  ;;  %v8676_v60 = vadd.f32 1.0, %v18707_v7  ;;  %v13526_v41 = vld [vmem:[%s19865_s12 + $0x8] sm:$0xff]  }
 0xb20   : > { %v8540_v52 = vpop.permute.xlu1 %8539  ;;  %12707 = vmatprep.subr.bf16.mxu1 %v20171_v61  ;;  %13914 = vpow2.f32 %v11720_v56 }
 0xb21   : > { %v18814_v10 = vmul.f32 %v13899_v6, %v8540_v52  ;;  %8637 = vrot.lane.b32.xlu1 %v8612_v27, %s14071_s0  ;;  %13916 = vpow2.f32 %v11721_v4  ;;  %v11726_v31 = vmul.f32 -1.442695, %v8676_v60  ;;  %v8672_v6 = vadd.f32 1.0, %v18680_v39 }
 0xb22   : > { %v11713_v52 = vmul.f32 -1.442695, %v8456_v43  ;;  %v8673_v27 = vadd.f32 1.0, %v18745_v53  ;;  %v13525_v43 = vld [vmem:[%s19865_s12 + $0x20] sm:$0xff]  }
 0xb23   : > { %8815 = vrot.lane.b32.xlu0 %v8791_v20, %s14071_s0  ;;  %13918 = vpow2.f32 %v11726_v31  ;;  %v11722_v55 = vmul.f32 -1.442695, %v8672_v6  ;;  %v11714_v20 = vmul.f32 -1.442695, %v8457_v58  ;;  %12708 = vmatpush3.bf16.msra.mxu1 %v13522_v21  ;;  %v14024_v31 = vld [vmem:[#allocation7 + $0x18] sm:$0xff] }
 0xb24   : > { %v11723_v51 = vmul.f32 -1.442695, %v8673_v27  ;;  %12709 = vmatprep.subr.bf16.mxu1 %v20171_v61  ;;  %v13527_v58 = vld [vmem:[%s19865_s12] sm:$0xff]  }
 0xb25   : > { %8817 = vrot.lane.b32.xlu1 %v8792_v28, %s14071_s0  ;;  %13920 = vpow2.f32 %v11722_v55  ;;  %v8458_v28 = vadd.f32 1.0, %v18690_v11  ;;  %v13523_v11 = vld [vmem:[%s19865_s12 + $0x18] sm:$0xff]  }
 0xb26   : > { %13922 = vpow2.f32 %v11713_v52  ;;  %12732 = vmatpush3.bf16.msra.mxu0 %v13523_v11 }
 0xb27   : > { %13924 = vpow2.f32 %v11714_v20  ;;  %v11715_v26 = vmul.f32 -1.442695, %v8458_v28  ;;  %12733 = vmatprep.subr.bf16.mxu0 %v20171_v61  ;;  %12710 = vmatpush3.bf16.msra.mxu1 %v13525_v43  ;;  %v20173_v28 = vld [vmem:[#allocation16_spill] sm:$0xff] }
 0xb28   : > { %12759 = vmatprep.subr.bf16.mxu1 %v20171_v61 }
 0xb2a   : > { %12734 = vmatpush3.bf16.msra.mxu0 %v13524_v47 }
 0xb2b   : > { %12735 = vmatprep.subr.bf16.mxu0 %v20171_v61 }
 0xb2d   : > { %v13915_v12 = vpop.eup %13914 }
 0xb2e   : > { %v8706_v5 = vadd.f32 1.0, %v13915_v12  ;;  %v13917_v49 = vpop.eup %13916  ;;  %12736 = vmatpush3.bf16.msra.mxu0 %v13526_v41 }
 0xb2f   : > { %v8707_v16 = vadd.f32 1.0, %v13917_v49  ;;  %12737 = vmatprep.subr.bf16.mxu0 %v20171_v61 }
 0xb30   : > { %13926 = vrcp.f32 %v8706_v5  ;;  %v13919_v30 = vpop.eup %13918 }
 0xb31   : > { %13928 = vpow2.f32 %v11723_v51 }
 0xb32   : > { %13930 = vrcp.f32 %v8707_v16  ;;  %12738 = vmatpush3.bf16.msra.mxu0 %v13527_v58  ;;  %v20174_v16 = vld [vmem:[#allocation22_spill] sm:$0xff] }
 0xb33   : > { %13932 = vpow2.f32 %v11715_v26  ;;  %12787 = vmatprep.subr.bf16.mxu0 %v20171_v61  ;;  %v14025_v26 = vld [vmem:[#allocation7 + $0x40] sm:$0xff] }
 0xb51   : > { %v8624_v50 = vpop.permute.xlu0 %8623 }
 0xb52   : > { %v8650_v54 = vadd.f32 %v8624_v50, %v8560_v37  ;;  %v11724_v37 = vmul.f32 -1.442695, %v8674_v8  ;;  %v8675_v50 = vadd.f32 1.0, %v18758_v36 }
 0xb53   : > { %v8804_v35 = vpop.permute.xlu1 %8803 }
 0xb54   : > { %v8659_v24 = vmul.f32 %v8650_v54, %v20169_v44  ;;  %v8830_v18 = vadd.f32 %v8804_v35, %v8740_v1  ;;  %v8712_v54 = vadd.f32 1.0, %v13919_v30  ;;  %v11716_v1 = vmul.f32 -1.442695, %v8459_v45 }
 0xb55   : > { %13934 = vpow2.f32 %v11724_v37  ;;  %v11725_v35 = vmul.f32 -1.442695, %v8675_v50 }
 0xb56   : > { %8857 = vrot.lane.b32.xlu0 %v8659_v24, %s14072_s27  ;;  %v8839_v13 = vmul.f32 %v8830_v18, %v20169_v44  ;;  %v13921_v24 = vpop.eup %13920  ;;  %13936 = vrcp.f32 %v8712_v54 }
 0xb57   : > { %v8626_v40 = vpop.permute.xlu1 %8625  ;;  %v8806_v0 = vpop.permute.xlu0 %8805  ;;  %13938 = vpow2.f32 %v11716_v1  ;;  %v8708_v2 = vadd.f32 1.0, %v13921_v24 }
 0xb58   : > { %10567 = vst.msk [vmem:[#allocation7] sm:$0xff] %vm3239_vm13, %v8839_v13  ;;  %v8651_v62 = vadd.f32 %v8626_v40, %v8561_v42  ;;  %v8831_v25 = vadd.f32 %v8806_v0, %v8741_v19  ;;  %v13923_v9 = vpop.eup %13922  ;;  %13940 = vpow2.f32 %v11725_v35 }
 0xb59   : > { %v13925_v18 = vpop.eup %13924  ;;  %13942 = vrcp.f32 %v8708_v2 }
 0xb5a   : > { %v8660_v17 = vmul.f32 %v8651_v62, %v20170_v59  ;;  %v8840_v63 = vmul.f32 %v8831_v25, %v20170_v59  ;;  %v13927_v42 = vpop.eup %13926  ;;  %v8493_v19 = vadd.f32 1.0, %v13925_v18  ;;  %v20172_v25 = vld [vmem:[#allocation17_spill] sm:$0xff] }
 0xb5b   : > { %v13929_v40 = vpop.eup %13928 }
 0xb5c   : > { %8859 = vrot.lane.b32.xlu1 %v8660_v17, %s14072_s27  ;;  %10568 = vst.msk [vmem:[#allocation7 + $0x8] sm:$0xff] %vm3239_vm13, %v8840_v63  ;;  %v13136_v22 = vpack.i.bf16 %v8840_v63, %v8839_v13  ;;  %v8492_v13 = vadd.f32 1.0, %v13923_v9  ;;  %v8709_v0 = vadd.f32 1.0, %v13929_v40  ;;  %v14023_v63 = vld [vmem:[#allocation7 + $0x10] sm:$0xff]  ;;  %v14026_v40 = vld [vmem:[#allocation7 + $0x20] sm:$0xff] }
 0xb5d   : > { %v8742_v14 = vmul.f32 %v14023_v63, %v13927_v42 }
 0xb5e   : > { %13944 = vrcp.f32 %v8492_v13 }
 0xb5f   : > { %13946 = vrcp.f32 %v8493_v19 }
 0xb60   : > { %13137 = vrot.lane.b32.xlu1 %v13136_v22, %s14071_s0  ;;  %v13931_v22 = vpop.eup %13930  ;;  %13948 = vrcp.f32 %v8709_v0 }
 0xb61   : > { %v8743_v6 = vmul.f32 %v14024_v31, %v13931_v22  ;;  %v20175_v22 = vld [vmem:[#allocation23_spill] sm:$0xff] }
 0xb75   : > { %v8628_v3 = vpop.permute.xlu0 %8627 }
 0xb76   : > { %v8652_v62 = vadd.f32 %v8628_v3, %v18812_v34  ;;  %v13933_v34 = vpop.eup %13932 }
 0xb77   : > { %v8630_v33 = vpop.permute.xlu1 %8629  ;;  %v13935_v4 = vpop.eup %13934  ;;  %v8494_v27 = vadd.f32 1.0, %v13933_v34 }
 0xb78   : > { %v8661_v17 = vmul.f32 %v8652_v62, %v20172_v25  ;;  %v13937_v55 = vpop.eup %13936  ;;  %v8710_v49 = vadd.f32 1.0, %v13935_v4  ;;  %v8653_v24 = vadd.f32 %v8630_v33, %v18814_v10  ;;  %v14027_v4 = vld [vmem:[#allocation7 + $0x28] sm:$0xff] }
 0xb79   : > { %v8808_v56 = vpop.permute.xlu0 %8807  ;;  %v13939_v51 = vpop.eup %13938  ;;  %v8748_v45 = vmul.f32 %v14025_v26, %v13937_v55  ;;  %13950 = vrcp.f32 %v8494_v27 }
 0xb7a   : > { %v8832_v32 = vadd.f32 %v8808_v56, %v8742_v14  ;;  %8861 = vrot.lane.b32.xlu1 %v8661_v17, %s14072_s27  ;;  %v13941_v37 = vpop.eup %13940  ;;  %v8495_v21 = vadd.f32 1.0, %v13939_v51  ;;  %13952 = vrcp.f32 %v8710_v49  ;;  %v8662_v19 = vmul.f32 %v8653_v24, %v20173_v28  ;;  %v20176_v56 = vld [vmem:[#allocation20_spill] sm:$0xff] }
 0xb7b   : > { %v8810_v12 = vpop.permute.xlu1 %8809  ;;  %v13943_v1 = vpop.eup %13942  ;;  %v8711_v47 = vadd.f32 1.0, %v13941_v37 }
 0xb7c   : > { %v8841_v60 = vmul.f32 %v8832_v32, %v20172_v25  ;;  %v8833_v20 = vadd.f32 %v8810_v12, %v8743_v6  ;;  %v13945_v9 = vpop.eup %13944  ;;  %13954 = vrcp.f32 %v8495_v21  ;;  %v8744_v3 = vmul.f32 %v14026_v40, %v13943_v1  ;;  %v20178_v1 = vld [vmem:[#allocation26_spill] sm:$0xff] }
 0xb7d   : > { %v8640_v52 = vpop.permute.xlu0 %8639  ;;  %v13947_v13 = vpop.eup %13946  ;;  %13956 = vrcp.f32 %v8711_v47 }
 0xb7e   : > { %10569 = vst.msk [vmem:[#allocation7 + $0x10] sm:$0xff] %vm3239_vm13, %v8841_v60  ;;  %v8658_v5 = vadd.f32 %v8640_v52, %v18808_v15  ;;  %v8842_v8 = vmul.f32 %v8833_v20, %v20173_v28  ;;  %v13949_v0 = vpop.eup %13948 }
 0xb7f   : > { %v8820_v50 = vpop.permute.xlu1 %8819 }
 0xb80   : > { %v8667_v30 = vmul.f32 %v8658_v5, %v20174_v16  ;;  %10570 = vst.msk [vmem:[#allocation7 + $0x18] sm:$0xff] %vm3239_vm13, %v8842_v8  ;;  %v13141_v15 = vpack.i.bf16 %v8842_v8, %v8841_v60  ;;  %v8838_v11 = vadd.f32 %v8820_v50, %v8748_v45  ;;  %v8745_v60 = vmul.f32 %v14027_v4, %v13949_v0  ;;  %v14028_v45 = vld [vmem:[#allocation7 + $0x30] sm:$0xff] }
 0xb81   : > { %v8542_v54 = vpop.permute.xlu0 %8541 }
 0xb82   : > { %8873 = vrot.lane.b32.xlu0 %v8667_v30, %s14072_s27  ;;  %v8847_v35 = vmul.f32 %v8838_v11, %v20174_v16  ;;  %13142 = vrot.lane.b32.xlu1 %v13141_v15, %s14071_s0  ;;  %v8564_v42 = vmul.f32 %v13945_v9, %v8542_v54  ;;  %v20177_v30 = vld [vmem:[#allocation21_spill] sm:$0xff] }
 0xb83   : > { %v8544_v18 = vpop.permute.xlu1 %8543 }
 0xb84   : > { %10575 = vst.msk [vmem:[#allocation7 + $0x40] sm:$0xff] %vm3239_vm13, %v8847_v35  ;;  %v8565_v10 = vmul.f32 %v13947_v13, %v8544_v18 }
 0xb85   : > { %v8632_v2 = vpop.permute.xlu0 %8631 }
 0xb86   : > { %8909 = vrot.lane.b32.xlu0 %v8847_v35, %s14071_s0  ;;  %v8654_v62 = vadd.f32 %v8632_v2, %v8564_v42  ;;  %v13951_v58 = vpop.eup %13950  ;;  %v14029_v35 = vld [vmem:[#allocation7 + $0x38] sm:$0xff] }
 0xb87   : > { %v8634_v17 = vpop.permute.xlu1 %8633  ;;  %v13953_v52 = vpop.eup %13952 }
 0xb88   : > { %v8655_v14 = vadd.f32 %v8634_v17, %v8565_v10  ;;  %v8663_v33 = vmul.f32 %v8654_v62, %v20175_v22  ;;  %v8746_v37 = vmul.f32 %v14028_v45, %v13953_v52 }
 0xb89   : > { %v8812_v63 = vpop.permute.xlu0 %8811  ;;  %v13955_v49 = vpop.eup %13954 }
 0xb8a   : > { %v8834_v41 = vadd.f32 %v8812_v63, %v8744_v3  ;;  %8863 = vrot.lane.b32.xlu0 %v8662_v19, %s14072_s27  ;;  %v8664_v32 = vmul.f32 %v8655_v14, %v20176_v56  ;;  %v13957_v50 = vpop.eup %13956 }
 0xb8b   : > { %v8814_v31 = vpop.permute.xlu1 %8813  ;;  %v8747_v9 = vmul.f32 %v14029_v35, %v13957_v50 }
 0xb8c   : > { %v8843_v34 = vmul.f32 %v8834_v41, %v20175_v22  ;;  %v8835_v43 = vadd.f32 %v8814_v31, %v8745_v60  ;;  %8867 = vrot.lane.b32.xlu1 %v8664_v32, %s14072_s27 }
 0xb8d   : > { %v8546_v6 = vpop.permute.xlu0 %8545 }
 0xb8e   : > { %10571 = vst.msk [vmem:[#allocation7 + $0x20] sm:$0xff] %vm3239_vm13, %v8843_v34  ;;  %8865 = vrot.lane.b32.xlu0 %v8663_v33, %s14072_s27  ;;  %v8844_v55 = vmul.f32 %v8835_v43, %v20176_v56  ;;  %v8566_v12 = vmul.f32 %v13951_v58, %v8546_v6 }
 0xb8f   : > { %v8548_v27 = vpop.permute.xlu1 %8547 }
 0xb90   : > { %10572 = vst.msk [vmem:[#allocation7 + $0x28] sm:$0xff] %vm3239_vm13, %v8844_v55  ;;  %v13146_v5 = vpack.i.bf16 %v8844_v55, %v8843_v34  ;;  %v8567_v8 = vmul.f32 %v13955_v49, %v8548_v27 }
 0xb91   : > { %v8636_v20 = vpop.permute.xlu0 %8635 }
 0xb92   : > { %v8656_v51 = vadd.f32 %v8636_v20, %v8566_v12  ;;  %13147 = vrot.lane.b32.xlu0 %v13146_v5, %s14071_s0 }
 0xb93   : > { %v8638_v54 = vpop.permute.xlu1 %8637 }
 0xb94   : > { %v8665_v26 = vmul.f32 %v8656_v51, %v20177_v30  ;;  %v8657_v15 = vadd.f32 %v8638_v54, %v8567_v8 }
 0xb95   : > { %v8816_v21 = vpop.permute.xlu0 %8815 }
 0xb96   : > { %v8836_v11 = vadd.f32 %v8816_v21, %v8746_v37  ;;  %8869 = vrot.lane.b32.xlu1 %v8665_v26, %s14072_s27  ;;  %v8666_v47 = vmul.f32 %v8657_v15, %v20178_v1 }
 0xb97   : > { %v8818_v18 = vpop.permute.xlu1 %8817 }
 0xb98   : > { %v8845_v24 = vmul.f32 %v8836_v11, %v20177_v30  ;;  %v8837_v2 = vadd.f32 %v8818_v18, %v8747_v9  ;;  %8871 = vrot.lane.b32.xlu0 %v8666_v47, %s14072_s27 }
 0xb9a   : > { %10573 = vst.msk [vmem:[#allocation7 + $0x30] sm:$0xff] %vm3239_vm13, %v8845_v24  ;;  %v8846_v42 = vmul.f32 %v8837_v2, %v20178_v1  ;;  %v13531_v2 = vld [vmem:[%s19865_s12 + $0x78] sm:$0xff]  }
 0xb9c   : > { %10574 = vst.msk [vmem:[#allocation7 + $0x38] sm:$0xff] %vm3239_vm13, %v8846_v42  ;;  %v13151_v13 = vpack.i.bf16 %v8846_v42, %v8845_v24  ;;  %v13528_v24 = vld [vmem:[%s19865_s12 + $0x58] sm:$0xff]  }
 0xb9e   : > { %13152 = vrot.lane.b32.xlu1 %v13151_v13, %s14071_s0 }
 0xbc8   : > { %v8858_v40 = vpop.permute.xlu0 %8857 }
 0xbc9   : > { %10558 = vst.msk [vmem:[#allocation6] sm:$0xff] %vm3239_vm13, %v8858_v40 }
 0xbce   : > { %v8860_v3 = vpop.permute.xlu1 %8859 }
 0xbcf   : > { %10559 = vst.msk [vmem:[#allocation6 + $0x8] sm:$0xff] %vm3239_vm13, %v8860_v3 }
 0xbd2   : > { %v13138_v19 = vpop.permute.xlu1 %13137 }
 0xbd3   : > { %v13140_v10 = vunpack.i.h.bf16 %v13138_v19  ;;  %v13139_v62 = vunpack.i.l.bf16 %v13138_v19 }
 0xbd5   : > { %v18909_v0 = vsel %vm3239_vm13, %v8860_v3, %v13140_v10  ;;  %v18912_v17 = vsel %vm3239_vm13, %v8858_v40, %v13139_v62 }
 0xbd6   : > { %v9787_v63 = vrot.slane %v18909_v0, 5  ;;  %v9939_v14 = vrot.slane %v18909_v0, 6  ;;  %v18918_v41 = vpack.c.bf16 %v18909_v0, %v18912_v17  ;;  %v9786_v33 = vrot.slane %v18912_v17, 5 }
 0xbd7   : > { %v9938_v32 = vrot.slane %v18912_v17, 6  ;;  %v8930_v6 = vrot.slane %v18909_v0, 1  ;;  %v8961_v58 = vrot.slane %v18909_v0, 2  ;;  %v8929_v55 = vrot.slane %v18912_v17, 1 }
 0xbd8   : > { %v18926_v34 = vsel %vm2073_vm10, %v9786_v33, %v9787_v63  ;;  %v8960_v12 = vrot.slane %v18912_v17, 2  ;;  %v9367_v3 = vrot.slane %v18909_v0, 7  ;;  %v19937_v19 = vrot.slane %v18912_v17, 7 }
 0xbd9   : > { %v18932_v4 = vsel %vm2272_vm11, %v9938_v32, %v9939_v14  ;;  %v18952_v37 = vsel %vm952_vm8, %v8929_v55, %v8930_v6 }
 0xbda   : > { %v8976_v50 = vsel %vm985_vm6, %v8960_v12, %v8961_v58 }
 0xbec   : > { %v8862_v60 = vpop.permute.xlu1 %8861 }
 0xbed   : > { %10560 = vst.msk [vmem:[#allocation6 + $0x10] sm:$0xff] %vm3239_vm13, %v8862_v60 }
 0xbf4   : > { %v8874_v31 = vpop.permute.xlu0 %8873  ;;  %v13143_v43 = vpop.permute.xlu1 %13142 }
 0xbf5   : > { %10566 = vst.msk [vmem:[#allocation6 + $0x40] sm:$0xff] %vm3239_vm13, %v8874_v31  ;;  %v13144_v52 = vunpack.i.l.bf16 %v13143_v43  ;;  %v13145_v45 = vunpack.i.h.bf16 %v13143_v43 }
 0xbf7   : > { %v18941_v20 = vsel %vm3239_vm13, %v8862_v60, %v13144_v52  ;;  %v13529_v60 = vld [vmem:[%s19865_s12 + $0x50] sm:$0xff]  }
 0xbf8   : > { %v8910_v27 = vpop.permute.xlu0 %8909  ;;  %v9788_v51 = vrot.slane %v18941_v20, 5  ;;  %v9940_v49 = vrot.slane %v18941_v20, 6  ;;  %v8962_v40 = vrot.slane %v18941_v20, 2 }
 0xbf9   : > { %v18944_v5 = vsel %vm3239_vm13, %v8874_v31, %v8910_v27 }
 0xbfa   : > { %v19941_v8 = vrot.slane %v18944_v5, 1  ;;  %v19940_v26 = vrot.slane %v18944_v5, 2  ;;  %v18960_v54 = vsel %vm2073_vm10, %v9787_v63, %v9788_v51  ;;  %v18966_v21 = vsel %vm2272_vm11, %v9939_v14, %v9940_v49 }
 0xbfb   : > { %v19939_v10 = vrot.slane %v18944_v5, 5  ;;  %v8931_v14 = vrot.slane %v18941_v20, 1  ;;  %v19938_v31 = vrot.slane %v18944_v5, 6  ;;  %v9374_v44 = vrot.slane %v18944_v5, 7 }
 0xbfc   : > { %v18972_v15 = vsel %vm952_vm8, %v19941_v8, %v8929_v55  ;;  %v8977_v11 = vsel %vm985_vm6, %v19940_v26, %v8960_v12  ;;  %v8864_v47 = vpop.permute.xlu0 %8863  ;;  %v9368_v55 = vrot.slane %v18941_v20, 7 }
 0xbfd   : > { %v8947_v35 = vpack.c.bf16 %v18952_v37, %v18972_v15  ;;  %v8978_v9 = vpack.c.bf16 %v8976_v50, %v8977_v11  ;;  %10561 = vst.msk [vmem:[#allocation6 + $0x18] sm:$0xff] %vm3239_vm13, %v8864_v47  ;;  %v18985_v18 = vsel %vm3239_vm13, %v8864_v47, %v13145_v45  ;;  %v19029_v50 = vsel %vm952_vm8, %v8930_v6, %v8931_v14  ;;  %v13532_v11 = vld [vmem:[%s19865_s12 + $0x70] sm:$0xff]  }
 0xbfe   : > { %v8932_v42 = vrot.slane %v18985_v18, 1  ;;  %v8963_v13 = vrot.slane %v18985_v18, 2  ;;  %v8868_v62 = vpop.permute.xlu1 %8867  ;;  %v19017_v12 = vpack.c.bf16 %v18985_v18, %v18941_v20  ;;  %v9789_v52 = vrot.slane %v18985_v18, 5 }
 0xbff   : > { %12712 = vmatmul.mubr.msk.bf16.vlgmr.msra.gmra.mxu1 %vm3336_vm15, %v8978_v9  ;;  %12740 = vmatmul.mubr.msk.bf16.vlgmr.msra.gmra.mxu0 %vm3336_vm15, %v8947_v35  ;;  %10563 = vst.msk [vmem:[#allocation6 + $0x28] sm:$0xff] %vm3239_vm13, %v8868_v62  ;;  %v9941_v27 = vrot.slane %v18985_v18, 6  ;;  %v8975_v47 = vsel %vm985_vm6, %v8961_v58, %v8962_v40  ;;  %v19043_v35 = vsel %vm1514_vm9, %v19937_v19, %v9367_v3  ;;  %v9217_v46 = vrot.slane %v18985_v18, 3 }
 0xc00   : > { %v8866_v63 = vpop.permute.xlu0 %8865  ;;  %12760 = vmatpush3.bf16.msra.mxu1 %v13528_v24  ;;  %12715 = vmatprep.mubr.msk.bf16.mxu1 %vm14074_vm14, %v20171_v61  ;;  %v8974_v43 = vsel %vm985_vm6, %v8962_v40, %v8963_v13  ;;  %v19025_v45 = vsel %vm952_vm8, %v8931_v14, %v8932_v42  ;;  %v19049_v9 = vsel %vm1514_vm9, %v9367_v3, %v9368_v55 }
 0xc01   : > { %10562 = vst.msk [vmem:[#allocation6 + $0x20] sm:$0xff] %vm3239_vm13, %v8866_v63  ;;  %12743 = vmatprep.mubr.msk.bf16.mxu0 %vm14074_vm14, %v20171_v61  ;;  %12761 = vmatprep.subr.bf16.mxu1 %v20171_v61  ;;  %v8979_v6 = vpack.c.bf16 %v8974_v43, %v8975_v47  ;;  %v8948_v58 = vpack.c.bf16 %v19025_v45, %v19029_v50  ;;  %v13534_v43 = vld [vmem:[%s19865_s12 + $0x68] sm:$0xff]  }
 0xc02   : > { %12788 = vmatpush3.bf16.msra.mxu0 %v13531_v2  ;;  %v13530_v2 = vld [vmem:[%s19865_s12 + $0x48] sm:$0xff]   ;;  %v19072_v47 = vsel %vm2073_vm10, %v9788_v51, %v9789_v52  ;;  %v19080_v40 = vsel %vm2272_vm11, %v9940_v49, %v9941_v27  ;;  %v19096_v51 = vsel %vm2272_vm11, %v19938_v31, %v9938_v32  ;;  %v13533_v32 = vld [vmem:[%s19865_s12 + $0x40] sm:$0xff]  }
 0xc03   : > { %12789 = vmatprep.subr.bf16.mxu0 %v20171_v61 }
 0xc04   : > { %12762 = vmatpush3.bf16.msra.mxu1 %v13529_v60  ;;  %v13148_v3 = vpop.permute.xlu0 %13147 }
 0xc05   : > { %12763 = vmatprep.subr.bf16.mxu1 %v20171_v61  ;;  %v13150_v60 = vunpack.i.h.bf16 %v13148_v3  ;;  %v13149_v14 = vunpack.i.l.bf16 %v13148_v3 }
 0xc06   : > { %12790 = vmatpush3.bf16.msra.mxu0 %v13532_v11  ;;  %v19088_v11 = vsel %vm2073_vm10, %v19939_v10, %v9786_v33 }
 0xc07   : > { %12716 = vmatmul.mubr.msk.bf16.gmra.mxu1 %vm3336_vm15, %v8979_v6  ;;  %12744 = vmatmul.mubr.msk.bf16.gmra.mxu0 %vm3336_vm15, %v8948_v58  ;;  %v19105_v33 = vsel %vm3239_vm13, %v8868_v62, %v13150_v60  ;;  %v19108_v24 = vsel %vm3239_vm13, %v8866_v63, %v13149_v14  ;;  %v13535_v63 = vld [vmem:[%s19865_s12 + $0x60] sm:$0xff]  }
 0xc08   : > { %v8870_v49 = vpop.permute.xlu1 %8869  ;;  %12719 = vmatprep.mubr.msk.bf16.mxu1 %vm14074_vm14, %v20171_v61  ;;  %12747 = vmatprep.mubr.msk.bf16.mxu0 %vm14074_vm14, %v20171_v61  ;;  %v8964_v6 = vrot.slane %v19108_v24, 2  ;;  %v8965_v58 = vrot.slane %v19105_v33, 2  ;;  %v8933_v3 = vrot.slane %v19108_v24, 1  ;;  %v8934_v62 = vrot.slane %v19105_v33, 1 }
 0xc09   : > { %10564 = vst.msk [vmem:[#allocation6 + $0x30] sm:$0xff] %vm3239_vm13, %v8870_v49  ;;  %12764 = vmatpush3.bf16.msra.mxu1 %v13530_v2  ;;  %12791 = vmatprep.subr.bf16.mxu0 %v20171_v61  ;;  %v9369_v2 = vrot.slane %v18985_v18, 7  ;;  %v9370_v14 = vrot.slane %v19108_v24, 7  ;;  %v9371_v28 = vrot.slane %v19105_v33, 7 }
 0xc0a   : > { %12765 = vmatprep.subr.bf16.mxu1 %v20171_v61  ;;  %12792 = vmatpush3.bf16.msra.mxu0 %v13534_v43  ;;  %v8872_v60 = vpop.permute.xlu0 %8871  ;;  %v8972_v19 = vsel %vm985_vm6, %v8964_v6, %v8965_v58  ;;  %v8973_v31 = vsel %vm985_vm6, %v8963_v13, %v8964_v6  ;;  %v19134_v43 = vsel %vm952_vm8, %v8933_v3, %v8934_v62  ;;  %v9790_v6 = vrot.slane %v19108_v24, 5 }
 0xc0b   : > { %12793 = vmatprep.subr.bf16.mxu0 %v20171_v61  ;;  %v19140_v10 = vsel %vm952_vm8, %v8932_v42, %v8933_v3  ;;  %10565 = vst.msk [vmem:[#allocation6 + $0x38] sm:$0xff] %vm3239_vm13, %v8872_v60  ;;  %v8980_v26 = vpack.c.bf16 %v8972_v19, %v8973_v31  ;;  %v19148_v13 = vsel %vm1514_vm9, %v9369_v2, %v9370_v14 }
 0xc0c   : > { %v8949_v8 = vpack.c.bf16 %v19134_v43, %v19140_v10  ;;  %v19157_v42 = vsel %vm1514_vm9, %v9368_v55, %v9369_v2  ;;  %v19163_v31 = vpack.c.bf16 %v19105_v33, %v19108_v24  ;;  %v9943_v55 = vrot.slane %v19105_v33, 6 }
 0xc0d   : > { %12766 = vmatpush3.bf16.msra.mxu1 %v13533_v32  ;;  %v9942_v32 = vrot.slane %v19108_v24, 6 }
 0xc0e   : > { %12794 = vmatpush3.bf16.msra.mxu0 %v13535_v63  ;;  %12815 = vmatprep.subr.bf16.mxu1 %v20171_v61 }
 0xc0f   : > { %12720 = vmatmul.mubr.msk.bf16.gmra.mxu1 %vm3336_vm15, %v8980_v26  ;;  %12748 = vmatmul.mubr.msk.bf16.gmra.mxu0 %vm3336_vm15, %v8949_v8  ;;  %v19174_v8 = vsel %vm2073_vm10, %v9789_v52, %v9790_v6  ;;  %v9791_v26 = vrot.slane %v19105_v33, 5  ;;  %v19187_v2 = vsel %vm2272_vm11, %v9941_v27, %v9942_v32  ;;  %v19197_v3 = vsel %vm2272_vm11, %v9942_v32, %v9943_v55 }
 0xc10   : > { %12723 = vmatprep.mubr.msk.bf16.mxu1 %vm14074_vm14, %v20171_v61  ;;  %12751 = vmatprep.mubr.msk.bf16.mxu0 %vm14074_vm14, %v20171_v61  ;;  %v13153_v52 = vpop.permute.xlu1 %13152 }
 0xc11   : > { %12843 = vmatprep.subr.bf16.mxu0 %v20171_v61  ;;  %v19193_v16 = vsel %vm2073_vm10, %v9790_v6, %v9791_v26  ;;  %v13155_v1 = vunpack.i.h.bf16 %v13153_v52  ;;  %v13154_v63 = vunpack.i.l.bf16 %v13153_v52 }
 0xc13   : > { %v19200_v30 = vsel %vm3239_vm13, %v8870_v49, %v13154_v63  ;;  %v19203_v27 = vsel %vm3239_vm13, %v8872_v60, %v13155_v1 }
 0xc14   : > { %v8966_v56 = vrot.slane %v19200_v30, 2  ;;  %v8967_v19 = vrot.slane %v19203_v27, 2  ;;  %v8935_v22 = vrot.slane %v19200_v30, 1  ;;  %v8936_v6 = vrot.slane %v19203_v27, 1 }
 0xc15   : > { %v9372_v32 = vrot.slane %v19200_v30, 7  ;;  %v9373_v59 = vrot.slane %v19203_v27, 7  ;;  %v9945_v36 = vrot.slane %v19203_v27, 6 }
 0xc16   : > { %v8970_v52 = vsel %vm985_vm6, %v8966_v56, %v8967_v19  ;;  %v8971_v49 = vsel %vm985_vm6, %v8965_v58, %v8966_v56  ;;  %v19217_v1 = vsel %vm952_vm8, %v8935_v22, %v8936_v6  ;;  %v19221_v60 = vsel %vm952_vm8, %v8934_v62, %v8935_v22 }
 0xc17   : > { %v8981_v63 = vpack.c.bf16 %v8970_v52, %v8971_v49  ;;  %v8950_v25 = vpack.c.bf16 %v19217_v1, %v19221_v60  ;;  %v20179_v56 = vrot.slane %v18944_v5, 1  ;;  %v9792_v22 = vrot.slane %v19200_v30, 5 }
 0xc18   : > { %v20180_v62 = vrot.slane %v18944_v5, 2  ;;  %v9944_v49 = vrot.slane %v19200_v30, 6 }
 0xc19   : > { %12724 = vmatmul.mubr.msk.bf16.gmra.mxu1 %vm3336_vm15, %v8981_v63  ;;  %12752 = vmatmul.mubr.msk.bf16.gmra.mxu0 %vm3336_vm15, %v8950_v25  ;;  %v19233_v58 = vsel %vm952_vm8, %v8936_v6, %v20179_v56  ;;  %v19246_v25 = vsel %vm1514_vm9, %v9370_v14, %v9371_v28  ;;  %v19250_v6 = vsel %vm1514_vm9, %v9371_v28, %v9372_v32  ;;  %v9214_v28 = vrot.slane %v18912_v17, 3 }
 0xc1a   : > { %12727 = vmatprep.mubr.msk.bf16.mxu1 %vm14074_vm14, %v20171_v61  ;;  %12755 = vmatprep.mubr.msk.bf16.mxu0 %vm14074_vm14, %v20171_v61  ;;  %v8969_v52 = vsel %vm985_vm6, %v8967_v19, %v20180_v62  ;;  %v19255_v63 = vsel %vm1514_vm9, %v9372_v32, %v9373_v59  ;;  %v19259_v56 = vsel %vm1514_vm9, %v9373_v59, %v9374_v44  ;;  %v9793_v59 = vrot.slane %v19203_v27, 5 }
 0xc1b   : > { %v19265_v14 = vpack.c.bf16 %v19203_v27, %v19200_v30  ;;  %v19271_v62 = vsel %vm2073_vm10, %v9791_v26, %v9792_v22  ;;  %v19275_v32 = vsel %vm2272_vm11, %v9943_v55, %v9944_v49  ;;  %v8982_v57 = vpack.c.bf16 %v8969_v52, %v8969_v52 }
 0xc1c   : > { %v20181_v26 = vrot.slane %v18944_v5, 5  ;;  %v19293_v53 = vsel %vm2073_vm10, %v9792_v22, %v9793_v59  ;;  %v8951_v7 = vpack.c.bf16 %v19233_v58, %v19233_v58  ;;  %v20182_v52 = vrot.slane %v18944_v5, 6 }
 0xc1d   : > { %v9222_v22 = vrot.slane %v18944_v5, 3  ;;  %v9215_v19 = vrot.slane %v18909_v0, 3  ;;  %v13536_v0 = vld [vmem:[%s19865_s12 + $0x98] sm:$0xff]  }
 0xc1e   : > { %v19289_v55 = vsel %vm2073_vm10, %v9793_v59, %v20181_v26  ;;  %v19305_v39 = vsel %vm2272_vm11, %v9945_v36, %v20182_v52  ;;  %v19309_v26 = vsel %vm2272_vm11, %v9944_v49, %v9945_v36  ;;  %v20183_v49 = vrot.slane %v18912_v17, 7  ;;  %v13539_v17 = vld [vmem:[%s19865_s12 + $0xb8] sm:$0xff]  }
 0xc1f   : > { %v9231_v36 = vsel %vm1315_vm12, %v9222_v22, %v9214_v28 }
 0xc21   : > { %12728 = vmatmul.mubr.msk.bf16.gmra.mxu1 %vm3336_vm15, %v8982_v57  ;;  %12756 = vmatmul.mubr.msk.bf16.gmra.mxu0 %vm3336_vm15, %v8951_v7  ;;  %v19330_v57 = vsel %vm1514_vm9, %v9374_v44, %v20183_v49  ;;  %v9230_v7 = vsel %vm1315_vm12, %v9214_v28, %v9215_v19  ;;  %v9216_v44 = vrot.slane %v18941_v20, 3  ;;  %v13537_v28 = vld [vmem:[%s19865_s12 + $0x90] sm:$0xff]   ;;  %v9385_v49 = vpack.c.bf16 %v19157_v42, %v19049_v9 }
 0xc22   : > { %12767 = vmatprep.mubr.msk.bf16.mxu1 %vm14074_vm14, %v20171_v61  ;;  %12795 = vmatprep.mubr.msk.bf16.mxu0 %vm14074_vm14, %v20171_v61  ;;  %v9232_v52 = vpack.c.bf16 %v9230_v7, %v9231_v36  ;;  %v9384_v59 = vpack.c.bf16 %v19043_v35, %v19330_v57  ;;  %v13538_v7 = vld [vmem:[%s19865_s12 + $0x88] sm:$0xff]  }
 0xc23   : > { %v9228_v18 = vsel %vm1315_vm12, %v9216_v44, %v9217_v46  ;;  %v9229_v20 = vsel %vm1315_vm12, %v9215_v19, %v9216_v44  ;;  %v13542_v19 = vld [vmem:[%s19865_s12 + $0xa8] sm:$0xff]   ;;  %v13543_v44 = vld [vmem:[%s19865_s12 + $0xa0] sm:$0xff]  }
 0xc24   : > { %v9233_v36 = vpack.c.bf16 %v9228_v18, %v9229_v20  ;;  %v9386_v18 = vpack.c.bf16 %v19246_v25, %v19148_v13  ;;  %v9221_v20 = vrot.slane %v19203_v27, 3 }
 0xc29   : > { %12768 = vmatmul.mubr.msk.bf16.vlgmr.msra.gmra.mxu1 %vm3336_vm15, %v9232_v52  ;;  %12796 = vmatmul.mubr.msk.bf16.vlgmr.msra.gmra.mxu0 %vm3336_vm15, %v9384_v59  ;;  %v13540_v59 = vld [vmem:[%s19865_s12 + $0xb0] sm:$0xff]   ;;  %v9219_v52 = vrot.slane %v19105_v33, 3 }
 0xc2a   : > { %12816 = vmatpush3.bf16.msra.mxu1 %v13536_v0  ;;  %12771 = vmatprep.mubr.msk.bf16.mxu1 %vm14074_vm14, %v20171_v61  ;;  %v9218_v0 = vrot.slane %v19108_v24, 3  ;;  %v13541_v24 = vld [vmem:[%s19865_s12 + $0x80] sm:$0xff]  }
 0xc2b   : > { %12799 = vmatprep.mubr.msk.bf16.mxu0 %vm14074_vm14, %v20171_v61  ;;  %12817 = vmatprep.subr.bf16.mxu1 %v20171_v61 }
 0xc2c   : > { %12844 = vmatpush3.bf16.msra.mxu0 %v13539_v17  ;;  %v9226_v33 = vsel %vm1315_vm12, %v9218_v0, %v9219_v52  ;;  %v9227_v17 = vsel %vm1315_vm12, %v9217_v46, %v9218_v0  ;;  %v9388_v0 = vpack.c.bf16 %v19259_v56, %v19259_v56 }
 0xc2d   : > { %12845 = vmatprep.subr.bf16.mxu0 %v20171_v61 }
 0xc2e   : > { %12818 = vmatpush3.bf16.msra.mxu1 %v13537_v28  ;;  %v9234_v28 = vpack.c.bf16 %v9226_v33, %v9227_v17  ;;  %v20185_v33 = vpack.c.bf16 %v19140_v10, %v19025_v45  ;;  %v13549_v17 = vld [vmem:[%s19865_s12 + $0xc0] sm:$0xff]   ;;  %v20186_v45 = vpack.c.bf16 %v19221_v60, %v19134_v43  ;;  %v19502_v43 = vpack.c.bf16 %v18944_v5, %v18944_v5  ;;  %v13555_v5 = vld [vmem:[%s19867_s14 + $0x18] sm:$0xff]  }
 0xc2f   : > { %12819 = vmatprep.subr.bf16.mxu1 %v20171_v61  ;;  %v13551_v10 = vld [vmem:[%s19865_s12 + $0xe0] sm:$0xff]   ;;  %v9656_v60 = vpack.c.bf16 %v18972_v15, %v18972_v15  ;;  %v20188_v15 = vpack.c.bf16 %v18960_v54, %v18926_v34  ;;  %v13556_v34 = vld [vmem:[%s19867_s14 + $0x10] sm:$0xff]   ;;  %v13558_v54 = vld [vmem:[%s19867_s14 + $0x8] sm:$0xff]  }
 0xc30   : > { %12846 = vmatpush3.bf16.msra.mxu0 %v13540_v59  ;;  %v9220_v59 = vrot.slane %v19200_v30, 3 }
 0xc31   : > { %12772 = vmatmul.mubr.msk.bf16.gmra.mxu1 %vm3336_vm15, %v9233_v36  ;;  %12800 = vmatmul.mubr.msk.bf16.gmra.mxu0 %vm3336_vm15, %v9385_v49  ;;  %v9387_v36 = vpack.c.bf16 %v19255_v63, %v19250_v6  ;;  %v9223_v49 = vsel %vm1315_vm12, %v9221_v20, %v9222_v22  ;;  %v20184_v22 = vpack.c.bf16 %v19029_v50, %v18952_v37  ;;  %v13548_v37 = vld [vmem:[%s19865_s12 + $0xf0] sm:$0xff]   ;;  %v13546_v50 = vld [vmem:[%s19865_s12 + $0xc8] sm:$0xff]  }
 0xc32   : > { %12775 = vmatprep.mubr.msk.bf16.mxu1 %vm14074_vm14, %v20171_v61  ;;  %12803 = vmatprep.mubr.msk.bf16.mxu0 %vm14074_vm14, %v20171_v61  ;;  %v9224_v46 = vsel %vm1315_vm12, %v9220_v59, %v9221_v20  ;;  %v9225_v30 = vsel %vm1315_vm12, %v9219_v52, %v9220_v59  ;;  %v13544_v52 = vld [vmem:[%s19865_s12 + $0xd8] sm:$0xff]   ;;  %v13557_v59 = vld [vmem:[%s19865_s12 + $0x100] sm:$0xff]  }
 0xc33   : > { %12820 = vmatpush3.bf16.msra.mxu1 %v13538_v7  ;;  %12847 = vmatprep.subr.bf16.mxu0 %v20171_v61  ;;  %v9235_v27 = vpack.c.bf16 %v9224_v46, %v9225_v30  ;;  %v9236_v7 = vpack.c.bf16 %v9223_v49, %v9223_v49 }
 0xc34   : > { %12821 = vmatprep.subr.bf16.mxu1 %v20171_v61  ;;  %12848 = vmatpush3.bf16.msra.mxu0 %v13542_v19  ;;  %v13545_v19 = vld [vmem:[%s19865_s12 + $0xd0] sm:$0xff]  }
 0xc35   : > { %12849 = vmatprep.subr.bf16.mxu0 %v20171_v61 }
 0xc37   : > { %12822 = vmatpush3.bf16.msra.mxu1 %v13541_v24  ;;  %v13550_v24 = vld [vmem:[%s19865_s12 + $0xe8] sm:$0xff]  }
 0xc38   : > { %12850 = vmatpush3.bf16.msra.mxu0 %v13543_v44  ;;  %12871 = vmatprep.subr.bf16.mxu1 %v20171_v61  ;;  %v20187_v44 = vpack.c.bf16 %v19233_v58, %v19217_v1  ;;  %v13552_v1 = vld [vmem:[%s19865_s12 + $0x118] sm:$0xff]   ;;  %v20189_v58 = vpack.c.bf16 %v18966_v21, %v18932_v4  ;;  %v13554_v4 = vld [vmem:[%s19865_s12 + $0x108] sm:$0xff]   ;;  %v20190_v21 = vpack.c.bf16 %v19174_v8, %v19072_v47 }
 0xc39   : > { %12776 = vmatmul.mubr.msk.bf16.gmra.mxu1 %vm3336_vm15, %v9234_v28  ;;  %12804 = vmatmul.mubr.msk.bf16.gmra.mxu0 %vm3336_vm15, %v9386_v18  ;;  %v13553_v28 = vld [vmem:[%s19865_s12 + $0x110] sm:$0xff]   ;;  %v20191_v18 = vpack.c.bf16 %v19187_v2, %v19080_v40  ;;  %v13559_v40 = vld [vmem:[%s19867_s14] sm:$0xff]   ;;  %v20192_v47 = vpack.c.bf16 %v19271_v62, %v19193_v16  ;;  %v20193_v8 = vpack.c.bf16 %v19275_v32, %v19197_v3 }
 0xc3a   : > { %12779 = vmatprep.mubr.msk.bf16.mxu1 %vm14074_vm14, %v20171_v61  ;;  %12807 = vmatprep.mubr.msk.bf16.mxu0 %vm14074_vm14, %v20171_v61  ;;  %v20194_v2 = vpack.c.bf16 %v19289_v55, %v19293_v53  ;;  %v20195_v16 = vpack.c.bf16 %v19305_v39, %v19309_v26  ;;  %v9808_v3 = vpack.c.bf16 %v19088_v11, %v19088_v11 }
 0xc3b   : > { %12899 = vmatprep.subr.bf16.mxu0 %v20171_v61  ;;  %v9960_v62 = vpack.c.bf16 %v19096_v51, %v19096_v51  ;;  %v20196_v39 = vpack.c.bf16 %v19049_v9, %v19043_v35  ;;  %v20197_v53 = vpack.c.bf16 %v19148_v13, %v19157_v42  ;;  %v10094_v42 = vpack.c.bf16 %v19330_v57, %v19330_v57 }
 0xc41   : > { %12780 = vmatmul.mubr.msk.bf16.gmra.mxu1 %vm3336_vm15, %v9235_v27  ;;  %12808 = vmatmul.mubr.msk.bf16.gmra.mxu0 %vm3336_vm15, %v9387_v36 }
 0xc42   : > { %12783 = vmatprep.mubr.msk.bf16.mxu1 %vm14074_vm14, %v20171_v61  ;;  %12811 = vmatprep.mubr.msk.bf16.mxu0 %vm14074_vm14, %v20171_v61 }
 0xc49   : > { %12784 = vmatmul.mubr.msk.bf16.gmra.mxu1 %vm3336_vm15, %v9236_v7  ;;  %12812 = vmatmul.mubr.msk.bf16.gmra.mxu0 %vm3336_vm15, %v9388_v0 }
 0xc4a   : > { %12823 = vmatprep.mubr.msk.bf16.mxu1 %vm14074_vm14, %v20171_v61  ;;  %12851 = vmatprep.mubr.msk.bf16.mxu0 %vm14074_vm14, %v20171_v61 }
 0xc51   : > { %12824 = vmatmul.mubr.msk.bf16.vlgmr.msra.gmra.mxu1 %vm3336_vm15, %v18918_v41  ;;  %12852 = vmatmul.mubr.msk.bf16.vlgmr.msra.gmra.mxu0 %vm3336_vm15, %v20184_v22 }
 0xc52   : > { %12872 = vmatpush3.bf16.msra.mxu1 %v13544_v52  ;;  %12827 = vmatprep.mubr.msk.bf16.mxu1 %vm14074_vm14, %v20171_v61 }
 0xc53   : > { %12855 = vmatprep.mubr.msk.bf16.mxu0 %vm14074_vm14, %v20171_v61  ;;  %12873 = vmatprep.subr.bf16.mxu1 %v20171_v61 }
 0xc54   : > { %12900 = vmatpush3.bf16.msra.mxu0 %v13547_v29 }
 0xc55   : > { %12901 = vmatprep.subr.bf16.mxu0 %v20171_v61 }
 0xc56   : > { %12874 = vmatpush3.bf16.msra.mxu1 %v13545_v19 }
 0xc57   : > { %12875 = vmatprep.subr.bf16.mxu1 %v20171_v61 }
 0xc58   : > { %12902 = vmatpush3.bf16.msra.mxu0 %v13548_v37 }
 0xc59   : > { %12828 = vmatmul.mubr.msk.bf16.gmra.mxu1 %vm3336_vm15, %v19017_v12  ;;  %12856 = vmatmul.mubr.msk.bf16.gmra.mxu0 %vm3336_vm15, %v20185_v33 }
 0xc5a   : > { %12831 = vmatprep.mubr.msk.bf16.mxu1 %vm14074_vm14, %v20171_v61  ;;  %12859 = vmatprep.mubr.msk.bf16.mxu0 %vm14074_vm14, %v20171_v61 }
 0xc5b   : > { %12876 = vmatpush3.bf16.msra.mxu1 %v13546_v50  ;;  %12903 = vmatprep.subr.bf16.mxu0 %v20171_v61 }
 0xc5c   : > { %12877 = vmatprep.subr.bf16.mxu1 %v20171_v61  ;;  %12904 = vmatpush3.bf16.msra.mxu0 %v13550_v24 }
 0xc5d   : > { %12905 = vmatprep.subr.bf16.mxu0 %v20171_v61 }
 0xc5f   : > { %12878 = vmatpush3.bf16.msra.mxu1 %v13549_v17 }
 0xc60   : > { %12906 = vmatpush3.bf16.msra.mxu0 %v13551_v10  ;;  %12927 = vmatprep.subr.bf16.mxu1 %v20171_v61 }
 0xc61   : > { %12832 = vmatmul.mubr.msk.bf16.gmra.mxu1 %vm3336_vm15, %v19163_v31  ;;  %12860 = vmatmul.mubr.msk.bf16.gmra.mxu0 %vm3336_vm15, %v20186_v45 }
 0xc62   : > { %12835 = vmatprep.mubr.msk.bf16.mxu1 %vm14074_vm14, %v20171_v61  ;;  %12863 = vmatprep.mubr.msk.bf16.mxu0 %vm14074_vm14, %v20171_v61 }
 0xc63   : > { %12955 = vmatprep.subr.bf16.mxu0 %v20171_v61 }
 0xc69   : > { %12836 = vmatmul.mubr.msk.bf16.gmra.mxu1 %vm3336_vm15, %v19265_v14  ;;  %12864 = vmatmul.mubr.msk.bf16.gmra.mxu0 %vm3336_vm15, %v20187_v44 }
 0xc6a   : > { %12839 = vmatprep.mubr.msk.bf16.mxu1 %vm14074_vm14, %v20171_v61  ;;  %12867 = vmatprep.mubr.msk.bf16.mxu0 %vm14074_vm14, %v20171_v61 }
 0xc71   : > { %12840 = vmatmul.mubr.msk.bf16.gmra.mxu1 %vm3336_vm15, %v19502_v43  ;;  %12868 = vmatmul.mubr.msk.bf16.gmra.mxu0 %vm3336_vm15, %v9656_v60 }
 0xc72   : > { %12879 = vmatprep.mubr.msk.bf16.mxu1 %vm14074_vm14, %v20171_v61  ;;  %12907 = vmatprep.mubr.msk.bf16.mxu0 %vm14074_vm14, %v20171_v61 }
 0xc79   : > { %12880 = vmatmul.mubr.msk.bf16.vlgmr.msra.gmra.mxu1 %vm3336_vm15, %v20188_v15  ;;  %12908 = vmatmul.mubr.msk.bf16.vlgmr.msra.gmra.mxu0 %vm3336_vm15, %v20189_v58 }
 0xc7a   : > { %12928 = vmatpush3.bf16.msra.mxu1 %v13552_v1  ;;  %12883 = vmatprep.mubr.msk.bf16.mxu1 %vm14074_vm14, %v20171_v61 }
 0xc7b   : > { %12911 = vmatprep.mubr.msk.bf16.mxu0 %vm14074_vm14, %v20171_v61  ;;  %12929 = vmatprep.subr.bf16.mxu1 %v20171_v61 }
 0xc7c   : > { %12956 = vmatpush3.bf16.msra.mxu0 %v13555_v5 }
 0xc7d   : > { %12957 = vmatprep.subr.bf16.mxu0 %v20171_v61 }
 0xc7e   : > { %12930 = vmatpush3.bf16.msra.mxu1 %v13553_v28 }
 0xc7f   : > { %12931 = vmatprep.subr.bf16.mxu1 %v20171_v61 }
 0xc80   : > { %12958 = vmatpush3.bf16.msra.mxu0 %v13556_v34 }
 0xc81   : > { %12884 = vmatmul.mubr.msk.bf16.gmra.mxu1 %vm3336_vm15, %v20190_v21  ;;  %12912 = vmatmul.mubr.msk.bf16.gmra.mxu0 %vm3336_vm15, %v20191_v18 }
 0xc82   : > { %12887 = vmatprep.mubr.msk.bf16.mxu1 %vm14074_vm14, %v20171_v61  ;;  %12915 = vmatprep.mubr.msk.bf16.mxu0 %vm14074_vm14, %v20171_v61 }
 0xc83   : > { %12932 = vmatpush3.bf16.msra.mxu1 %v13554_v4  ;;  %12959 = vmatprep.subr.bf16.mxu0 %v20171_v61 }
 0xc84   : > { %12933 = vmatprep.subr.bf16.mxu1 %v20171_v61  ;;  %12960 = vmatpush3.bf16.msra.mxu0 %v13558_v54 }
 0xc85   : > { %12961 = vmatprep.subr.bf16.mxu0 %v20171_v61 }
 0xc87   : > { %12934 = vmatpush3.bf16.msra.mxu1 %v13557_v59 }
 0xc88   : > { %12962 = vmatpush3.bf16.msra.mxu0 %v13559_v40  ;;  %12983 = vmatprep.subr.bf16.mxu1 %v20171_v61 }
 0xc89   : > { %12888 = vmatmul.mubr.msk.bf16.gmra.mxu1 %vm3336_vm15, %v20192_v47  ;;  %12916 = vmatmul.mubr.msk.bf16.gmra.mxu0 %vm3336_vm15, %v20193_v8 }
 0xc8a   : > { %12891 = vmatprep.mubr.msk.bf16.mxu1 %vm14074_vm14, %v20171_v61  ;;  %12919 = vmatprep.mubr.msk.bf16.mxu0 %vm14074_vm14, %v20171_v61 }
 0xc91   : > { %12892 = vmatmul.mubr.msk.bf16.gmra.mxu1 %vm3336_vm15, %v20194_v2  ;;  %12920 = vmatmul.mubr.msk.bf16.gmra.mxu0 %vm3336_vm15, %v20195_v16 }
 0xc92   : > { %12895 = vmatprep.mubr.msk.bf16.mxu1 %vm14074_vm14, %v20171_v61  ;;  %12923 = vmatprep.mubr.msk.bf16.mxu0 %vm14074_vm14, %v20171_v61 }
 0xc99   : > { %12896 = vmatmul.mubr.msk.bf16.gmra.mxu1 %vm3336_vm15, %v9808_v3  ;;  %12924 = vmatmul.mubr.msk.bf16.gmra.mxu0 %vm3336_vm15, %v9960_v62 }
 0xc9a   : > { %12935 = vmatprep.mubr.msk.bf16.mxu1 %vm14074_vm14, %v20171_v61  ;;  %12963 = vmatprep.mubr.msk.bf16.mxu0 %vm14074_vm14, %v20171_v61 }
 0xca1   : > { %12936 = vmatmul.mubr.msk.bf16.vlgmr.msra.gmra.mxu1 %vm3336_vm15, %v20196_v39  ;;  %12964 = vmatmul.mubr.msk.bf16.vlgmr.msra.gmra.mxu0 %vm3336_vm15, %v18918_v41  ;;  %v20198_v41 = vpack.c.bf16 %v19250_v6, %v19246_v25 }
 0xca2   : > { %12939 = vmatprep.mubr.msk.bf16.mxu1 %vm14074_vm14, %v20171_v61  ;;  %12967 = vmatprep.mubr.msk.bf16.mxu0 %vm14074_vm14, %v20171_v61 }
 0xca9   : > { %12940 = vmatmul.mubr.msk.bf16.gmra.mxu1 %vm3336_vm15, %v20197_v53  ;;  %12968 = vmatmul.mubr.msk.bf16.gmra.mxu0 %vm3336_vm15, %v19017_v12  ;;  %v20199_v12 = vpack.c.bf16 %v19259_v56, %v19255_v63 }
 0xcaa   : > { %12943 = vmatprep.mubr.msk.bf16.mxu1 %vm14074_vm14, %v20171_v61  ;;  %12971 = vmatprep.mubr.msk.bf16.mxu0 %vm14074_vm14, %v20171_v61 }
 0xcb1   : > { %12944 = vmatmul.mubr.msk.bf16.gmra.mxu1 %vm3336_vm15, %v20198_v41  ;;  %12972 = vmatmul.mubr.msk.bf16.gmra.mxu0 %vm3336_vm15, %v19163_v31 }
 0xcb2   : > { %12947 = vmatprep.mubr.msk.bf16.mxu1 %vm14074_vm14, %v20171_v61  ;;  %12975 = vmatprep.mubr.msk.bf16.mxu0 %vm14074_vm14, %v20171_v61 }
 0xcb9   : > { %12948 = vmatmul.mubr.msk.bf16.gmra.mxu1 %vm3336_vm15, %v20199_v12  ;;  %12976 = vmatmul.mubr.msk.bf16.gmra.mxu0 %vm3336_vm15, %v19265_v14 }
 0xcba   : > { %12951 = vmatprep.mubr.msk.bf16.mxu1 %vm14074_vm14, %v20171_v61  ;;  %12979 = vmatprep.mubr.msk.bf16.mxu0 %vm14074_vm14, %v20171_v61 }
 0xcbf   : > { %v9065_v35 = vpop.f32.mrf.mxu1  ;;  %v9176_v9 = vpop.f32.mrf.mxu0 }
 0xcc0   : > { %v9177_v11 = vadd.f32 %v9176_v9, %v9065_v35 }
 0xcc1   : > { %v12713_v51 = vpop.f32.mrf.mxu1  ;;  %v12741_v13 = vpop.f32.mrf.mxu0  ;;  %12952 = vmatmul.mubr.msk.bf16.gmra.mxu1 %vm3336_vm15, %v10094_v42  ;;  %12980 = vmatmul.mubr.msk.bf16.gmra.mxu0 %vm3336_vm15, %v19502_v43 }
 0xcc2   : > { %12987 = vmatprep.mubr.msk.bf16.mxu1 %vm14074_vm14, %v20171_v61 }
 0xcc3   : > { %v9068_v31 = vpop.f32.mrf.mxu1  ;;  %v9179_v25 = vpop.f32.mrf.mxu0 }
 0xcc4   : > { %v9180_v6 = vadd.f32 %v9179_v25, %v9068_v31 }
 0xcc5   : > { %v12714_v63 = vpop.f32.mrf.mxu1  ;;  %v12742_v56 = vpop.f32.mrf.mxu0 }
 0xcc7   : > { %v9073_v14 = vpop.f32.mrf.mxu1  ;;  %v9184_v32 = vpop.f32.mrf.mxu0 }
 0xcc8   : > { %v9185_v55 = vadd.f32 %v9184_v32, %v9073_v14 }
 0xcc9   : > { %v12717_v26 = vpop.f32.mrf.mxu1  ;;  %v12745_v20 = vpop.f32.mrf.mxu0 }
 0xccb   : > { %v9076_v46 = vpop.f32.mrf.mxu1  ;;  %v9187_v57 = vpop.f32.mrf.mxu0 }
 0xccc   : > { %v9188_v30 = vadd.f32 %v9187_v57, %v9076_v46 }
 0xccd   : > { %v12718_v27 = vpop.f32.mrf.mxu1  ;;  %v12746_v36 = vpop.f32.mrf.mxu0 }
 0xccf   : > { %v9081_v49 = vpop.f32.mrf.mxu1  ;;  %v9192_v7 = vpop.f32.mrf.mxu0 }
 0xcd0   : > { %v9193_v0 = vadd.f32 %v9192_v7, %v9081_v49 }
 0xcd1   : > { %v12721_v52 = vpop.f32.mrf.mxu1  ;;  %v12749_v29 = vpop.f32.mrf.mxu0 }
 0xcd3   : > { %v9084_v22 = vpop.f32.mrf.mxu1  ;;  %v9195_v19 = vpop.f32.mrf.mxu0 }
 0xcd4   : > { %v9196_v37 = vadd.f32 %v9195_v19, %v9084_v22 }
 0xcd5   : > { %v12722_v50 = vpop.f32.mrf.mxu1  ;;  %v12750_v24 = vpop.f32.mrf.mxu0 }
 0xcd9   : > { %v9089_v33 = vpop.f32.mrf.mxu1  ;;  %v9200_v17 = vpop.f32.mrf.mxu0 }
 0xcda   : > { %v9201_v10 = vadd.f32 %v9200_v17, %v9089_v33 }
 0xcdb   : > { %v12725_v45 = vpop.f32.mrf.mxu1  ;;  %v12753_v44 = vpop.f32.mrf.mxu0 }
 0xcdd   : > { %v9092_v43 = vpop.f32.mrf.mxu1  ;;  %v9203_v60 = vpop.f32.mrf.mxu0 }
 0xcde   : > { %v9204_v1 = vadd.f32 %v9203_v60, %v9092_v43 }
 0xcdf   : > { %v12726_v5 = vpop.f32.mrf.mxu1  ;;  %v12754_v15 = vpop.f32.mrf.mxu0 }
 0xce1   : > { %v9097_v58 = vpop.f32.mrf.mxu1  ;;  %v9208_v28 = vpop.f32.mrf.mxu0 }
 0xce2   : > { %v9209_v34 = vadd.f32 %v9208_v28, %v9097_v58 }
 0xce3   : > { %v12729_v4 = vpop.f32.mrf.mxu1  ;;  %v12757_v54 = vpop.f32.mrf.mxu0 }
 0xce5   : > { %v9100_v21 = vpop.f32.mrf.mxu1  ;;  %v9211_v18 = vpop.f32.mrf.mxu0 }
 0xce7   : > { %v12730_v59 = vpop.f32.mrf.mxu1  ;;  %v12758_v40 = vpop.f32.mrf.mxu0 }
 0xce9   : > { %v9319_v47 = vpop.f32.mrf.mxu1  ;;  %v9471_v8 = vpop.f32.mrf.mxu0 }
 0xcea   : > { %v9357_v2 = vadd.f32 %v9319_v47, %v9177_v11 }
 0xceb   : > { %v12769_v16 = vpop.f32.mrf.mxu1  ;;  %v12797_v3 = vpop.f32.mrf.mxu0 }
 0xcec   : > { %v9509_v62 = vadd.f32 %v9471_v8, %v9357_v2 }
 0xced   : > { %v9322_v39 = vpop.f32.mrf.mxu1  ;;  %v9474_v53 = vpop.f32.mrf.mxu0 }
 0xcee   : > { %v9358_v41 = vadd.f32 %v9322_v39, %v9180_v6 }
 0xcef   : > { %v12770_v12 = vpop.f32.mrf.mxu1  ;;  %v12798_v35 = vpop.f32.mrf.mxu0 }
 0xcf0   : > { %v9510_v9 = vadd.f32 %v9474_v53, %v9358_v41 }
 0xcf1   : > { %v9327_v51 = vpop.f32.mrf.mxu1  ;;  %v9479_v13 = vpop.f32.mrf.mxu0 }
 0xcf2   : > { %v9359_v42 = vadd.f32 %v9327_v51, %v9185_v55 }
 0xcf3   : > { %v12773_v31 = vpop.f32.mrf.mxu1  ;;  %v12801_v25 = vpop.f32.mrf.mxu0 }
 0xcf4   : > { %v9511_v63 = vadd.f32 %v9479_v13, %v9359_v42 }
 0xcf5   : > { %v9330_v56 = vpop.f32.mrf.mxu1  ;;  %v9482_v14 = vpop.f32.mrf.mxu0 }
 0xcf6   : > { %v9360_v32 = vadd.f32 %v9330_v56, %v9188_v30 }
 0xcf7   : > { %v12774_v26 = vpop.f32.mrf.mxu1  ;;  %v12802_v11 = vpop.f32.mrf.mxu0 }
 0xcf8   : > { %v9512_v20 = vadd.f32 %v9482_v14, %v9360_v32 }
 0xcf9   : > { %v9335_v46 = vpop.f32.mrf.mxu1  ;;  %v9487_v57 = vpop.f32.mrf.mxu0 }
 0xcfa   : > { %v9361_v27 = vadd.f32 %v9335_v46, %v9193_v0 }
 0xcfb   : > { %v12777_v36 = vpop.f32.mrf.mxu1  ;;  %v12805_v6 = vpop.f32.mrf.mxu0 }
 0xcfc   : > { %v9513_v49 = vadd.f32 %v9487_v57, %v9361_v27 }
 0xcfd   : > { %v9338_v7 = vpop.f32.mrf.mxu1  ;;  %v9490_v52 = vpop.f32.mrf.mxu0 }
 0xcfe   : > { %v9362_v29 = vadd.f32 %v9338_v7, %v9196_v37 }
 0xcff   : > { %v12778_v22 = vpop.f32.mrf.mxu1  ;;  %v12806_v55 = vpop.f32.mrf.mxu0 }
 0xd00   : > { %v9514_v19 = vadd.f32 %v9490_v52, %v9362_v29 }
 0xd01   : > { %v9343_v50 = vpop.f32.mrf.mxu1  ;;  %v9495_v24 = vpop.f32.mrf.mxu0 }
 0xd02   : > { %v9363_v33 = vadd.f32 %v9343_v50, %v9201_v10 }
 0xd03   : > { %v12781_v17 = vpop.f32.mrf.mxu1  ;;  %v12809_v30 = vpop.f32.mrf.mxu0 }
 0xd04   : > { %v9515_v45 = vadd.f32 %v9495_v24, %v9363_v33 }
 0xd05   : > { %v9346_v44 = vpop.f32.mrf.mxu1  ;;  %v9498_v43 = vpop.f32.mrf.mxu0 }
 0xd06   : > { %v9364_v60 = vadd.f32 %v9346_v44, %v9204_v1 }
 0xd07   : > { %v12782_v5 = vpop.f32.mrf.mxu1  ;;  %v12810_v0 = vpop.f32.mrf.mxu0 }
 0xd08   : > { %v9516_v15 = vadd.f32 %v9498_v43, %v9364_v60 }
 0xd09   : > { %v9351_v58 = vpop.f32.mrf.mxu1  ;;  %v9503_v28 = vpop.f32.mrf.mxu0 }
 0xd0a   : > { %v9365_v4 = vadd.f32 %v9351_v58, %v9209_v34 }
 0xd0b   : > { %v12785_v54 = vpop.f32.mrf.mxu1  ;;  %v12813_v37 = vpop.f32.mrf.mxu0 }
 0xd0c   : > { %v9517_v21 = vadd.f32 %v9503_v28, %v9365_v4 }
 0xd0d   : > { %v9354_v18 = vpop.f32.mrf.mxu1  ;;  %v9506_v59 = vpop.f32.mrf.mxu0 }
 0xd0f   : > { %v12786_v40 = vpop.f32.mrf.mxu1  ;;  %v12814_v47 = vpop.f32.mrf.mxu0 }
 0xd11   : > { %v9605_v10 = vpop.f32.mrf.mxu1  ;;  %v9739_v8 = vpop.f32.mrf.mxu0 }
 0xd12   : > { %v9643_v2 = vadd.f32 %v9605_v10, %v9509_v62 }
 0xd13   : > { %v12825_v16 = vpop.f32.mrf.mxu1  ;;  %v12853_v3 = vpop.f32.mrf.mxu0 }
 0xd14   : > { %v19649_v39 = vadd.f32 %v9739_v8, %v9643_v2 }
 0xd15   : > { %v9608_v1 = vpop.f32.mrf.mxu1  ;;  %v9742_v53 = vpop.f32.mrf.mxu0 }
 0xd16   : > { %v9644_v41 = vadd.f32 %v9608_v1, %v9510_v9 }
 0xd17   : > { %v12826_v12 = vpop.f32.mrf.mxu1  ;;  %v12854_v35 = vpop.f32.mrf.mxu0 }
 0xd18   : > { %v19651_v34 = vadd.f32 %v9742_v53, %v9644_v41 }
 0xd19   : > { %v9613_v51 = vpop.f32.mrf.mxu1  ;;  %v9747_v13 = vpop.f32.mrf.mxu0 }
 0xd1a   : > { %v9645_v42 = vadd.f32 %v9613_v51, %v9511_v63 }
 0xd1b   : > { %v12829_v31 = vpop.f32.mrf.mxu1  ;;  %v12857_v25 = vpop.f32.mrf.mxu0 }
 0xd1c   : > { %v19653_v56 = vadd.f32 %v9747_v13, %v9645_v42 }
 0xd1d   : > { %v9616_v14 = vpop.f32.mrf.mxu1  ;;  %v9750_v62 = vpop.f32.mrf.mxu0 }
 0xd1e   : > { %v9646_v32 = vadd.f32 %v9616_v14, %v9512_v20 }
 0xd1f   : > { %v12830_v26 = vpop.f32.mrf.mxu1  ;;  %v12858_v11 = vpop.f32.mrf.mxu0 }
 0xd20   : > { %v19655_v46 = vadd.f32 %v9750_v62, %v9646_v32 }
 0xd21   : > { %v9621_v57 = vpop.f32.mrf.mxu1  ;;  %v9755_v9 = vpop.f32.mrf.mxu0 }
 0xd22   : > { %v9647_v27 = vadd.f32 %v9621_v57, %v9513_v49 }
 0xd23   : > { %v12833_v36 = vpop.f32.mrf.mxu1  ;;  %v12861_v6 = vpop.f32.mrf.mxu0 }
 0xd24   : > { %v19657_v7 = vadd.f32 %v9755_v9, %v9647_v27 }
 0xd25   : > { %v9624_v52 = vpop.f32.mrf.mxu1  ;;  %v9758_v63 = vpop.f32.mrf.mxu0 }
 0xd26   : > { %v9648_v29 = vadd.f32 %v9624_v52, %v9514_v19 }
 0xd27   : > { %v12834_v22 = vpop.f32.mrf.mxu1  ;;  %v12862_v55 = vpop.f32.mrf.mxu0 }
 0xd28   : > { %v19659_v50 = vadd.f32 %v9758_v63, %v9648_v29 }
 0xd29   : > { %v9629_v24 = vpop.f32.mrf.mxu1  ;;  %v9763_v20 = vpop.f32.mrf.mxu0 }
 0xd2a   : > { %v9649_v33 = vadd.f32 %v9629_v24, %v9515_v45 }
 0xd2b   : > { %v12837_v17 = vpop.f32.mrf.mxu1  ;;  %v12865_v30 = vpop.f32.mrf.mxu0 }
 0xd2c   : > { %v19661_v44 = vadd.f32 %v9763_v20, %v9649_v33 }
 0xd2d   : > { %v9632_v43 = vpop.f32.mrf.mxu1  ;;  %v9766_v49 = vpop.f32.mrf.mxu0 }
 0xd2e   : > { %v9650_v60 = vadd.f32 %v9632_v43, %v9516_v15 }
 0xd2f   : > { %v12838_v5 = vpop.f32.mrf.mxu1  ;;  %v12866_v0 = vpop.f32.mrf.mxu0 }
 0xd30   : > { %v19663_v58 = vadd.f32 %v9766_v49, %v9650_v60 }
 0xd31   : > { %v9637_v28 = vpop.f32.mrf.mxu1  ;;  %v9771_v19 = vpop.f32.mrf.mxu0 }
 0xd32   : > { %v9651_v4 = vadd.f32 %v9637_v28, %v9517_v21 }
 0xd33   : > { %v12841_v54 = vpop.f32.mrf.mxu1  ;;  %v12869_v37 = vpop.f32.mrf.mxu0 }
 0xd34   : > { %v19665_v18 = vadd.f32 %v9771_v19, %v9651_v4  ;;  %v19686_v4 = vld [vmem:[%s19866_s13] ss:$0 sm:$0xff] }
 0xd35   : > { %v9640_v59 = vpop.f32.mrf.mxu1  ;;  %v9774_v45 = vpop.f32.mrf.mxu0 }
 0xd37   : > { %v12842_v40 = vpop.f32.mrf.mxu1  ;;  %v12870_v47 = vpop.f32.mrf.mxu0 }
 0xd39   : > { %v9891_v10 = vpop.f32.mrf.mxu1  ;;  %v10043_v8 = vpop.f32.mrf.mxu0 }
 0xd3a   : > { %v9929_v30 = vadd.f32 %v9891_v10, %v19649_v39 }
 0xd3b   : > { %v12881_v2 = vpop.f32.mrf.mxu1  ;;  %v12909_v16 = vpop.f32.mrf.mxu0 }
 0xd3c   : > { %v10081_v0 = vadd.f32 %v10043_v8, %v9929_v30 }
 0xd3d   : > { %v9894_v15 = vpop.f32.mrf.mxu1  ;;  %v10046_v3 = vpop.f32.mrf.mxu0 }
 0xd3e   : > { %v9930_v28 = vadd.f32 %v9894_v15, %v19651_v34 }
 0xd3f   : > { %v12882_v1 = vpop.f32.mrf.mxu1  ;;  %v12910_v53 = vpop.f32.mrf.mxu0 }
 0xd40   : > { %v10082_v40 = vadd.f32 %v10046_v3, %v9930_v28 }
 0xd41   : > { %v9899_v41 = vpop.f32.mrf.mxu1  ;;  %v10051_v12 = vpop.f32.mrf.mxu0 }
 0xd42   : > { %v9931_v39 = vadd.f32 %v9899_v41, %v19653_v56 }
 0xd43   : > { %v12885_v35 = vpop.f32.mrf.mxu1  ;;  %v12913_v21 = vpop.f32.mrf.mxu0 }
 0xd44   : > { %v10083_v15 = vadd.f32 %v10051_v12, %v9931_v39 }
 0xd45   : > { %v9902_v51 = vpop.f32.mrf.mxu1  ;;  %v10054_v13 = vpop.f32.mrf.mxu0 }
 0xd46   : > { %v9932_v1 = vadd.f32 %v9902_v51, %v19655_v46 }
 0xd47   : > { %v12886_v42 = vpop.f32.mrf.mxu1  ;;  %v12914_v31 = vpop.f32.mrf.mxu0 }
 0xd48   : > { %v10084_v41 = vadd.f32 %v10054_v13, %v9932_v1  ;;  %v11882_v13 = vld [vmem:[%s20200_s25] ss:$0 sm:$0xff] }
 0xd49   : > { %v9907_v25 = vpop.f32.mrf.mxu1  ;;  %v10059_v14 = vpop.f32.mrf.mxu0 }
 0xd4a   : > { %v9933_v31 = vadd.f32 %v9907_v25, %v19657_v7 }
 0xd4b   : > { %v12889_v62 = vpop.f32.mrf.mxu1  ;;  %v12917_v32 = vpop.f32.mrf.mxu0 }
 0xd4c   : > { %v10085_v51 = vadd.f32 %v10059_v14, %v9933_v31 }
 0xd4d   : > { %v9910_v26 = vpop.f32.mrf.mxu1  ;;  %v19667_v11 = vpop.f32.mrf.mxu0 }
 0xd4f   : > { %v12890_v57 = vpop.f32.mrf.mxu1  ;;  %v12918_v9 = vpop.f32.mrf.mxu0 }
 0xd51   : > { %v19669_v27 = vpop.f32.mrf.mxu1  ;;  %v19671_v36 = vpop.f32.mrf.mxu0 }
 0xd52   : > { %v9935_v14 = vadd.f32 %v19669_v27, %v19661_v44 }
 0xd53   : > { %v12893_v6 = vpop.f32.mrf.mxu1  ;;  %v12921_v52 = vpop.f32.mrf.mxu0 }
 0xd54   : > { %v9934_v6 = vadd.f32 %v9910_v26, %v19659_v50 }
 0xd55   : > { %v19673_v63 = vpop.f32.mrf.mxu1  ;;  %v19675_v29 = vpop.f32.mrf.mxu0 }
 0xd57   : > { %v12894_v22 = vpop.f32.mrf.mxu1  ;;  %v12922_v55 = vpop.f32.mrf.mxu0 }
 0xd59   : > { %v19677_v24 = vpop.f32.mrf.mxu1  ;;  %v19679_v20 = vpop.f32.mrf.mxu0 }
 0xd5b   : > { %v12897_v33 = vpop.f32.mrf.mxu1  ;;  %v12925_v17 = vpop.f32.mrf.mxu0 }
 0xd5c   : > { %v10086_v17 = vadd.f32 %v19667_v11, %v9934_v6 }
 0xd5d   : > { %v9926_v43 = vpop.f32.mrf.mxu1  ;;  %v10078_v49 = vpop.f32.mrf.mxu0 }
 0xd5f   : > { %v12898_v60 = vpop.f32.mrf.mxu1  ;;  %v12926_v5 = vpop.f32.mrf.mxu0 }
 0xd60   : > { %v9936_v60 = vadd.f32 %v19673_v63, %v19663_v58  ;;  %v9937_v63 = vadd.f32 %v19677_v24, %v19665_v18 }
 0xd61   : > { %v10177_v19 = vpop.f32.mrf.mxu1  ;;  %v10412_v54 = vpop.f32.mrf.mxu0 }
 0xd62   : > { %v10215_v37 = vadd.f32 %v10177_v19, %v10081_v0  ;;  %v10413_v30 = vadd.f32 %v11882_v13, %v10412_v54  ;;  %v10087_v19 = vadd.f32 %v19671_v36, %v9935_v14 }
 0xd63   : > { %v12937_v59 = vpop.f32.mrf.mxu1  ;;  %v12965_v45 = vpop.f32.mrf.mxu0 }
 0xd64   : > { %v10231_v47 = vadd.f32 %v19686_v4, %v10215_v37  ;;  %13958 = vtanh.f32 %v10413_v30  ;;  %v10088_v59 = vadd.f32 %v19675_v29, %v9936_v60 }
 0xd65   : > { %v10180_v10 = vpop.f32.mrf.mxu1  ;;  %v10415_v2 = vpop.f32.mrf.mxu0 }
 0xd66   : > { %v10216_v8 = vadd.f32 %v10180_v10, %v10082_v40  ;;  %10249 = vrot.lane.b32.xlu0 %v10231_v47, %s14070_s20  ;;  %v10416_v5 = vadd.f32 %v11882_v13, %v10415_v2 }
 0xd67   : > { %v12938_v34 = vpop.f32.mrf.mxu1  ;;  %v12966_v16 = vpop.f32.mrf.mxu0 }
 0xd68   : > { %v10232_v53 = vadd.f32 %v19686_v4, %v10216_v8  ;;  %13960 = vtanh.f32 %v10416_v5  ;;  %v10089_v16 = vadd.f32 %v19679_v20, %v9937_v63 }
 0xd69   : > { %v10185_v35 = vpop.f32.mrf.mxu1  ;;  %v10420_v21 = vpop.f32.mrf.mxu0 }
 0xd6a   : > { %v10217_v42 = vadd.f32 %v10185_v35, %v10083_v15  ;;  %10251 = vrot.lane.b32.xlu1 %v10232_v53, %s14070_s20  ;;  %v10421_v11 = vadd.f32 %v11882_v13, %v10420_v21 }
 0xd6b   : > { %v12941_v56 = vpop.f32.mrf.mxu1  ;;  %v12969_v3 = vpop.f32.mrf.mxu0 }
 0xd6c   : > { %v10233_v62 = vadd.f32 %v19686_v4, %v10217_v42  ;;  %13962 = vtanh.f32 %v10421_v11 }
 0xd6d   : > { %v10188_v32 = vpop.f32.mrf.mxu1  ;;  %v10423_v57 = vpop.f32.mrf.mxu0 }
 0xd6e   : > { %v10218_v9 = vadd.f32 %v10188_v32, %v10084_v41  ;;  %10253 = vrot.lane.b32.xlu0 %v10233_v62, %s14070_s20  ;;  %v10424_v45 = vadd.f32 %v11882_v13, %v10423_v57 }
 0xd6f   : > { %v12942_v46 = vpop.f32.mrf.mxu1  ;;  %v12970_v12 = vpop.f32.mrf.mxu0 }
 0xd70   : > { %v10234_v52 = vadd.f32 %v19686_v4, %v10218_v9  ;;  %13964 = vtanh.f32 %v10424_v45 }
 0xd71   : > { %v10193_v22 = vpop.f32.mrf.mxu1  ;;  %v10428_v7 = vpop.f32.mrf.mxu0 }
 0xd72   : > { %v10219_v25 = vadd.f32 %v10193_v22, %v10085_v51  ;;  %10255 = vrot.lane.b32.xlu1 %v10234_v52, %s14070_s20  ;;  %v10429_v36 = vadd.f32 %v11882_v13, %v10428_v7  ;;  %v13959_v41 = vpop.eup %13958  ;;  %v13561_v22 = vld [vmem:[%s20201_s18] sm:$0xff]  }
 0xd73   : > { %v12945_v55 = vpop.f32.mrf.mxu1  ;;  %v12973_v33 = vpop.f32.mrf.mxu0 }
 0xd74   : > { %v10235_v50 = vadd.f32 %v19686_v4, %v10219_v25  ;;  %13966 = vtanh.f32 %v10429_v36 }
 0xd75   : > { %v10196_v26 = vpop.f32.mrf.mxu1  ;;  %v10431_v43 = vpop.f32.mrf.mxu0 }
 0xd76   : > { %v10220_v49 = vadd.f32 %v10196_v26, %v10086_v17  ;;  %10257 = vrot.lane.b32.xlu0 %v10235_v50, %s14070_s20  ;;  %v10432_v8 = vadd.f32 %v11882_v13, %v10431_v43  ;;  %v13961_v57 = vpop.eup %13960 }
 0xd77   : > { %v12946_v0 = vpop.f32.mrf.mxu1  ;;  %v12974_v28 = vpop.f32.mrf.mxu0 }
 0xd78   : > { %v10236_v44 = vadd.f32 %v19686_v4, %v10220_v49  ;;  %13968 = vtanh.f32 %v10432_v8  ;;  %v20202_v49 = vld [vmem:[#allocation30_spill] sm:$0xff]  ;;  %v20203_v28 = vld [vmem:[#allocation28_spill] sm:$0xff] }
 0xd79   : > { %v10201_v27 = vpop.f32.mrf.mxu1  ;;  %v10436_v54 = vpop.f32.mrf.mxu0 }
 0xd7a   : > { %v10221_v37 = vadd.f32 %v10201_v27, %v10087_v19  ;;  %10259 = vrot.lane.b32.xlu1 %v10236_v44, %s14070_s20  ;;  %v10437_v15 = vadd.f32 %v11882_v13, %v10436_v54  ;;  %v13963_v9 = vpop.eup %13962 }
 0xd7b   : > { %v12949_v40 = vpop.f32.mrf.mxu1  ;;  %v12977_v58 = vpop.f32.mrf.mxu0 }
 0xd7c   : > { %v10237_v39 = vadd.f32 %v19686_v4, %v10221_v37  ;;  %13970 = vtanh.f32 %v10437_v15  ;;  %v20205_v40 = vld [vmem:[#allocation24_spill] sm:$0xff]  ;;  %v20207_v15 = vld [vmem:[#allocation27_spill] sm:$0xff] }
 0xd7d   : > { %v10204_v47 = vpop.f32.mrf.mxu1  ;;  %v10439_v10 = vpop.f32.mrf.mxu0 }
 0xd7e   : > { %v10222_v2 = vadd.f32 %v10204_v47, %v10088_v59  ;;  %10261 = vrot.lane.b32.xlu0 %v10237_v39, %s14070_s20  ;;  %v10440_v35 = vadd.f32 %v11882_v13, %v10439_v10  ;;  %v13965_v46 = vpop.eup %13964  ;;  %v20206_v10 = vld [vmem:[#allocation29_spill] sm:$0xff] }
 0xd7f   : > { %v12950_v34 = vpop.f32.mrf.mxu1  ;;  %v12978_v29 = vpop.f32.mrf.mxu0 }
 0xd80   : > { %v10238_v1 = vadd.f32 %v19686_v4, %v10222_v2  ;;  %13972 = vtanh.f32 %v10440_v35 }
 0xd81   : > { %v10209_v18 = vpop.f32.mrf.mxu1  ;;  %v10444_v24 = vpop.f32.mrf.mxu0 }
 0xd82   : > { %v10223_v53 = vadd.f32 %v10209_v18, %v10089_v16  ;;  %10263 = vrot.lane.b32.xlu1 %v10238_v1, %s14070_s20  ;;  %v10445_v3 = vadd.f32 %v11882_v13, %v10444_v24  ;;  %v13560_v13 = vld [vmem:[%s20201_s18 + $0x8] sm:$0xff]  }
 0xd83   : > { %v12953_v21 = vpop.f32.mrf.mxu1  ;;  %v12981_v42 = vpop.f32.mrf.mxu0  ;;  %12984 = vmatpush3.bf16.msra.mxu1 %v13560_v13 }
 0xd84   : > { %v10239_v56 = vadd.f32 %v19686_v4, %v10223_v53  ;;  %13974 = vtanh.f32 %v10445_v3  ;;  %v13967_v4 = vpop.eup %13966  ;;  %12985 = vmatprep.subr.bf16.mxu1 %v20171_v61 }
 0xd85   : > { %v10212_v31 = vpop.f32.mrf.mxu1  ;;  %v10447_v20 = vpop.f32.mrf.mxu0 }
 0xd86   : > { %10265 = vrot.lane.b32.xlu0 %v10239_v56, %s14070_s20  ;;  %10468 = vrot.lane.b32.xlu1 %v13959_v41, %s14070_s20  ;;  %v13969_v12 = vpop.eup %13968 }
 0xd87   : > { %v12954_v62 = vpop.f32.mrf.mxu1  ;;  %v12982_v32 = vpop.f32.mrf.mxu0  ;;  %12986 = vmatpush3.bf16.msra.mxu1 %v13561_v22 }
 0xd88   : > { %v20208_v62 = vld [vmem:[#allocation18_spill] sm:$0xff] }
 0xd89   : > { %v13971_v51 = vpop.eup %13970 }
 0xd8a   : > { %10470 = vrot.lane.b32.xlu0 %v13961_v57, %s14070_s20  ;;  %10472 = vrot.lane.b32.xlu1 %v13963_v9, %s14070_s20  ;;  %v20209_v57 = vld [vmem:[#allocation19_spill] sm:$0xff] }
 0xd8d   : > { %v13973_v6 = vpop.eup %13972 }
 0xd8e   : > { %10474 = vrot.lane.b32.xlu0 %v13965_v46, %s14070_s20  ;;  %10476 = vrot.lane.b32.xlu1 %v13967_v4, %s14070_s20 }
 0xd91   : > { %v13975_v52 = vpop.eup %13974 }
 0xd92   : > { %10478 = vrot.lane.b32.xlu0 %v13969_v12, %s14070_s20  ;;  %10480 = vrot.lane.b32.xlu1 %v13971_v51, %s14070_s20 }
 0xd96   : > { %10482 = vrot.lane.b32.xlu0 %v13973_v6, %s14070_s20  ;;  %10484 = vrot.lane.b32.xlu1 %v13975_v52, %s14070_s20 }
 0xdd8   : > { %v10250_v7 = vpop.permute.xlu0 %10249 }
 0xdd9   : > { %v10276_v25 = vadd.f32 %v10250_v7, %v18650_v38 }
 0xddb   : > { %v11873_v55 = vmul.f32 -1.442695, %v10276_v25 }
 0xddc   : > { %v10252_v33 = vpop.permute.xlu1 %10251 }
 0xddd   : > { %13976 = vpow2.f32 %v11873_v55  ;;  %v10277_v17 = vadd.f32 %v10252_v33, %v18657_v48  ;;  %v20204_v48 = vld [vmem:[#allocation14_spill] sm:$0xff]  ;;  %v20210_v33 = vld [vmem:[#allocation17_spill] sm:$0xff] }
 0xddf   : > { %v11874_v14 = vmul.f32 -1.442695, %v10277_v17 }
 0xde0   : > { %v10254_v30 = vpop.permute.xlu0 %10253 }
 0xde1   : > { %13978 = vpow2.f32 %v11874_v14  ;;  %v10278_v50 = vadd.f32 %v10254_v30, %v18667_v23  ;;  %v20211_v14 = vld [vmem:[#allocation16_spill] sm:$0xff] }
 0xde3   : > { %v11875_v26 = vmul.f32 -1.442695, %v10278_v50 }
 0xde4   : > { %v10256_v43 = vpop.permute.xlu1 %10255 }
 0xde5   : > { %13980 = vpow2.f32 %v11875_v26  ;;  %v10279_v60 = vadd.f32 %v10256_v43, %v20202_v49 }
 0xde7   : > { %v11876_v5 = vmul.f32 -1.442695, %v10279_v60 }
 0xde8   : > { %v10258_v0 = vpop.permute.xlu0 %10257 }
 0xde9   : > { %13982 = vpow2.f32 %v11876_v5  ;;  %v10280_v38 = vadd.f32 %v10258_v0, %v20203_v28 }
 0xdea   : > { %v13977_v19 = vpop.eup %13976 }
 0xdeb   : > { %v10312_v11 = vadd.f32 1.0, %v13977_v19  ;;  %v11877_v44 = vmul.f32 -1.442695, %v10280_v38  ;;  %v20212_v19 = vld [vmem:[#allocation23_spill] sm:$0xff] }
 0xdec   : > { %v10260_v27 = vpop.permute.xlu1 %10259 }
 0xded   : > { %13984 = vrcp.f32 %v10312_v11  ;;  %v10281_v54 = vadd.f32 %v10260_v27, %v20204_v48 }
 0xdee   : > { %v13979_v37 = vpop.eup %13978  ;;  %13986 = vpow2.f32 %v11877_v44  ;;  %v20213_v44 = vld [vmem:[#allocation20_spill] sm:$0xff] }
 0xdef   : > { %v10313_v23 = vadd.f32 1.0, %v13979_v37  ;;  %v11878_v59 = vmul.f32 -1.442695, %v10281_v54 }
 0xdf0   : > { %v10262_v45 = vpop.permute.xlu0 %10261 }
 0xdf1   : > { %13988 = vrcp.f32 %v10313_v23  ;;  %v10282_v58 = vadd.f32 %v10262_v45, %v20205_v40 }
 0xdf2   : > { %v13981_v63 = vpop.eup %13980  ;;  %13990 = vpow2.f32 %v11878_v59 }
 0xdf3   : > { %v10314_v36 = vadd.f32 1.0, %v13981_v63  ;;  %v11879_v39 = vmul.f32 -1.442695, %v10282_v58  ;;  %v20214_v63 = vld [vmem:[#allocation21_spill] sm:$0xff] }
 0xdf4   : > { %v10264_v47 = vpop.permute.xlu1 %10263 }
 0xdf5   : > { %13992 = vrcp.f32 %v10314_v36  ;;  %v10283_v2 = vadd.f32 %v10264_v47, %v20206_v10 }
 0xdf6   : > { %v13983_v8 = vpop.eup %13982  ;;  %13994 = vpow2.f32 %v11879_v39  ;;  %v20215_v39 = vld [vmem:[#allocation26_spill] sm:$0xff] }
 0xdf7   : > { %v10315_v34 = vadd.f32 1.0, %v13983_v8  ;;  %v11880_v29 = vmul.f32 -1.442695, %v10283_v2 }
 0xdf8   : > { %v10266_v16 = vpop.permute.xlu0 %10265  ;;  %v10469_v21 = vpop.permute.xlu1 %10468 }
 0xdf9   : > { %13996 = vrcp.f32 %v10315_v34  ;;  %v10284_v1 = vadd.f32 %v10266_v16, %v20207_v15  ;;  %v20216_v34 = vld [vmem:[#allocation22_spill] sm:$0xff] }
 0xdfa   : > { %v13985_v18 = vpop.eup %13984  ;;  %13998 = vpow2.f32 %v11880_v29 }
 0xdfb   : > { %v13987_v24 = vpop.eup %13986  ;;  %v11881_v53 = vmul.f32 -1.442695, %v10284_v1  ;;  %v10495_v42 = vmul.f32 %v13985_v18, %v10469_v21 }
 0xdfc   : > { %v10316_v35 = vadd.f32 1.0, %v13987_v24  ;;  %v10471_v3 = vpop.permute.xlu0 %10470  ;;  %v10473_v6 = vpop.permute.xlu1 %10472 }
 0xdfd   : > { %14000 = vpow2.f32 %v11881_v53  ;;  %v10504_v32 = vmul.f32 %v10495_v42, %v20208_v62 }
 0xdfe   : > { %v13989_v56 = vpop.eup %13988  ;;  %14002 = vrcp.f32 %v10316_v35 }
 0xdff   : > { %v13991_v41 = vpop.eup %13990  ;;  %v10496_v31 = vmul.f32 %v13989_v56, %v10471_v3 }
 0xe00   : > { %v10317_v20 = vadd.f32 1.0, %v13991_v41  ;;  %v10475_v22 = vpop.permute.xlu0 %10474  ;;  %v10477_v60 = vpop.permute.xlu1 %10476 }
 0xe01   : > { %v10505_v9 = vmul.f32 %v10496_v31, %v20209_v57 }
 0xe02   : > { %v13993_v46 = vpop.eup %13992  ;;  %14004 = vrcp.f32 %v10317_v20 }
 0xe03   : > { %v13995_v4 = vpop.eup %13994  ;;  %v10576_v12 = vpack.c.bf16 %v10505_v9, %v10504_v32  ;;  %v10497_v52 = vmul.f32 %v13993_v46, %v10473_v6  ;;  %v10717_v6 = vld [vmem:[%s14206_s1] sm:$0xff] }
 0xe04   : > { %v10318_v51 = vadd.f32 1.0, %v13995_v4  ;;  %v10479_v28 = vpop.permute.xlu0 %10478  ;;  %v10481_v37 = vpop.permute.xlu1 %10480 }
 0xe05   : > { %10590 = vrot.lane.b32.xlu0 %v10576_v12, %s14070_s20  ;;  %v10506_v17 = vmul.f32 %v10497_v52, %v20210_v33  ;;  %v10718_v12 = vld [vmem:[%s14206_s1 + $0x8] sm:$0xff]  ;;  %v10719_v52 = vld [vmem:[%s14206_s1 + $0x10] sm:$0xff] }
 0xe06   : > { %v13997_v13 = vpop.eup %13996  ;;  %14006 = vrcp.f32 %v10318_v51 }
 0xe07   : > { %v13999_v7 = vpop.eup %13998  ;;  %v10498_v25 = vmul.f32 %v13997_v13, %v10475_v22 }
 0xe08   : > { %v10319_v55 = vadd.f32 1.0, %v13999_v7  ;;  %v10483_v45 = vpop.permute.xlu0 %10482  ;;  %v10485_v10 = vpop.permute.xlu1 %10484  ;;  %v10720_v7 = vld [vmem:[%s14206_s1 + $0x18] sm:$0xff] }
 0xe09   : > { %v10507_v30 = vmul.f32 %v10498_v25, %v20211_v14 }
 0xe0a   : > { %v14001_v50 = vpop.eup %14000  ;;  %14008 = vrcp.f32 %v10319_v55 }
 0xe0b   : > { %v14003_v26 = vpop.eup %14002  ;;  %v10320_v43 = vadd.f32 1.0, %v14001_v50  ;;  %v10577_v49 = vpack.c.bf16 %v10507_v30, %v10506_v17 }
 0xe0c   : > { %v10499_v5 = vmul.f32 %v14003_v26, %v10477_v60  ;;  %v10722_v26 = vld [vmem:[%s14206_s1 + $0x28] sm:$0xff] }
 0xe0d   : > { %14010 = vrcp.f32 %v10320_v43  ;;  %10592 = vrot.lane.b32.xlu1 %v10577_v49, %s14070_s20 }
 0xe0e   : > { %v10508_v11 = vmul.f32 %v10499_v5, %v20212_v19 }
 0xe0f   : > { %v14005_v0 = vpop.eup %14004 }
 0xe10   : > { %v10500_v38 = vmul.f32 %v14005_v0, %v10479_v28 }
 0xe12   : > { %v10509_v27 = vmul.f32 %v10500_v38, %v20213_v44 }
 0xe13   : > { %v14007_v48 = vpop.eup %14006 }
 0xe14   : > { %v10578_v54 = vpack.c.bf16 %v10509_v27, %v10508_v11  ;;  %v10501_v23 = vmul.f32 %v14007_v48, %v10481_v37 }
 0xe16   : > { %10594 = vrot.lane.b32.xlu0 %v10578_v54, %s14070_s20  ;;  %v10510_v36 = vmul.f32 %v10501_v23, %v20214_v63  ;;  %v10724_v63 = vld [vmem:[%s14206_s1 + $0x38] sm:$0xff] }
 0xe17   : > { %v14009_v59 = vpop.eup %14008 }
 0xe18   : > { %v10502_v40 = vmul.f32 %v14009_v59, %v10483_v45 }
 0xe1a   : > { %v14011_v58 = vpop.eup %14010  ;;  %v10511_v47 = vmul.f32 %v10502_v40, %v20215_v39 }
 0xe1b   : > { %v10503_v2 = vmul.f32 %v14011_v58, %v10485_v10 }
 0xe1c   : > { %v10579_v8 = vpack.c.bf16 %v10511_v47, %v10510_v36 }
 0xe1d   : > { %v10512_v29 = vmul.f32 %v10503_v2, %v20216_v34 }
 0xe1e   : > { %10596 = vrot.lane.b32.xlu1 %v10579_v8, %s14070_s20 }
 0xe1f   : > { %v10580_v16 = vpack.c.bf16 %v10512_v29, %v10512_v29 }
 0xe21   : > { %10598 = vrot.lane.b32.xlu0 %v10580_v16, %s14070_s20  ;;  %v10725_v16 = vld [vmem:[%s14206_s1 + $0x40] sm:$0xff] }
 0xe25   : > { %10522 = vrot.lane.b32.xlu0 %v10504_v32, %s14070_s20 }
 0xe29   : > { %10524 = vrot.lane.b32.xlu0 %v10505_v9, %s14070_s20 }
 0xe2d   : > { %10526 = vrot.lane.b32.xlu0 %v10506_v17, %s14070_s20  ;;  %v10721_v17 = vld [vmem:[%s14206_s1 + $0x20] sm:$0xff] }
 0xe31   : > { %10528 = vrot.lane.b32.xlu0 %v10507_v30, %s14070_s20 }
 0xe35   : > { %10530 = vrot.lane.b32.xlu0 %v10508_v11, %s14070_s20  ;;  %v10723_v11 = vld [vmem:[%s14206_s1 + $0x30] sm:$0xff] }
 0xe39   : > { %10532 = vrot.lane.b32.xlu0 %v10509_v27, %s14070_s20 }
 0xe3d   : > { %10534 = vrot.lane.b32.xlu0 %v10510_v36, %s14070_s20 }
 0xe41   : > { %10536 = vrot.lane.b32.xlu0 %v10511_v47, %s14070_s20 }
 0xe45   : > { %10538 = vrot.lane.b32.xlu0 %v10512_v29, %s14070_s20 }
 0xe77   : > { %v10591_v15 = vpop.permute.xlu0 %10590 }
 0xe78   : > { %12988 = vmatmul.mubr.msk.bf16.vlgmr.msra.gmra.mxu1 %vm3239_vm13, %v10591_v15 }
 0xe79   : > { %12991 = vmatprep.mubr.msk.bf16.mxu1 %vm14074_vm14, %v20171_v61 }
 0xe7f   : > { %v10593_v1 = vpop.permute.xlu1 %10592 }
 0xe80   : > { %12992 = vmatmul.mubr.msk.bf16.gmra.mxu1 %vm3239_vm13, %v10593_v1 }
 0xe81   : > { %12995 = vmatprep.mubr.msk.bf16.mxu1 %vm14074_vm14, %v20171_v61 }
 0xe88   : > { %v10595_v18 = vpop.permute.xlu0 %10594 }
 0xe89   : > { %12996 = vmatmul.mubr.msk.bf16.gmra.mxu1 %vm3239_vm13, %v10595_v18 }
 0xe8a   : > { %12999 = vmatprep.mubr.msk.bf16.mxu1 %vm14074_vm14, %v20171_v61 }
 0xe90   : > { %v10597_v24 = vpop.permute.xlu1 %10596 }
 0xe91   : > { %13000 = vmatmul.mubr.msk.bf16.gmra.mxu1 %vm3239_vm13, %v10597_v24 }
 0xe92   : > { %13003 = vmatprep.mubr.msk.bf16.mxu1 %vm14074_vm14, %v20171_v61 }
 0xe93   : > { %v10599_v53 = vpop.permute.xlu0 %10598 }
 0xe97   : > { %v10523_v35 = vpop.permute.xlu0 %10522 }
 0xe98   : > { %10549 = vst.msk [vmem:[#allocation5] sm:$0xff] %vm3239_vm13, %v10523_v35 }
 0xe99   : > { %13004 = vmatmul.mubr.msk.bf16.gmra.mxu1 %vm3239_vm13, %v10599_v53 }
 0xe9b   : > { %v10525_v21 = vpop.permute.xlu0 %10524 }
 0xe9c   : > { %10550 = vst.msk [vmem:[#allocation5 + $0x8] sm:$0xff] %vm3239_vm13, %v10525_v21 }
 0xe9f   : > { %v10527_v42 = vpop.permute.xlu0 %10526 }
 0xea0   : > { %10551 = vst.msk [vmem:[#allocation5 + $0x10] sm:$0xff] %vm3239_vm13, %v10527_v42 }
 0xea3   : > { %v10529_v56 = vpop.permute.xlu0 %10528 }
 0xea4   : > { %10552 = vst.msk [vmem:[#allocation5 + $0x18] sm:$0xff] %vm3239_vm13, %v10529_v56 }
 0xea7   : > { %v10531_v3 = vpop.permute.xlu0 %10530 }
 0xea8   : > { %10553 = vst.msk [vmem:[#allocation5 + $0x20] sm:$0xff] %vm3239_vm13, %v10531_v3 }
 0xeab   : > { %v10533_v61 = vpop.permute.xlu0 %10532 }
 0xeac   : > { %10554 = vst.msk [vmem:[#allocation5 + $0x28] sm:$0xff] %vm3239_vm13, %v10533_v61 }
 0xeaf   : > { %v10535_v41 = vpop.permute.xlu0 %10534 }
 0xeb0   : > { %10555 = vst.msk [vmem:[#allocation5 + $0x30] sm:$0xff] %vm3239_vm13, %v10535_v41 }
 0xeb3   : > { %v10537_v31 = vpop.permute.xlu0 %10536 }
 0xeb4   : > { %10556 = vst.msk [vmem:[#allocation5 + $0x38] sm:$0xff] %vm3239_vm13, %v10537_v31 }
 0xeb7   : > { %v10539_v20 = vpop.permute.xlu0 %10538 }
 0xeb8   : > { %10557 = vst.msk [vmem:[#allocation5 + $0x40] sm:$0xff] %vm3239_vm13, %v10539_v20 }
 0xf38   : > { %v10661_v62 = vpop.f32.mrf.mxu1 }
 0xf39   : > { %10699 = vst.msk [vmem:[#allocation9] sm:$0xff] %vm921_vm4, %v10661_v62  ;;  %10708 = vst.msk [vmem:[%s14211_s15] sm:$0xff] %vm921_vm4, %v10661_v62  ;;  %v10726_v25 = vsub.f32 %v10661_v62, %v10717_v6 }
 0xf3a   : > { %v12989_v32 = vpop.f32.mrf.mxu1 }
 0xf3b   : > { %v10736_v43 = vmul.f32 %v10726_v25, %v10726_v25 }
 0xf3c   : > { %v10664_v57 = vpop.f32.mrf.mxu1 }
 0xf3d   : > { %10700 = vst.msk [vmem:[#allocation9 + $0x8] sm:$0xff] %vm921_vm4, %v10664_v57  ;;  %10709 = vst.msk [vmem:[%s14211_s15 + $0x8] sm:$0xff] %vm921_vm4, %v10664_v57  ;;  %v10727_v13 = vsub.f32 %v10664_v57, %v10718_v12  ;;  %v10745_v44 = vsel %vm921_vm4, %v10736_v43, 0.0 }
 0xf3e   : > { %v12990_v9 = vpop.f32.mrf.mxu1 }
 0xf3f   : > { %v10737_v14 = vmul.f32 %v10727_v13, %v10727_v13 }
 0xf40   : > { %v10669_v46 = vpop.f32.mrf.mxu1 }
 0xf41   : > { %10701 = vst.msk [vmem:[#allocation9 + $0x10] sm:$0xff] %vm921_vm4, %v10669_v46  ;;  %10710 = vst.msk [vmem:[%s14211_s15 + $0x10] sm:$0xff] %vm921_vm4, %v10669_v46  ;;  %v10728_v55 = vsub.f32 %v10669_v46, %v10719_v52  ;;  %v10746_v0 = vsel %vm921_vm4, %v10737_v14, 0.0 }
 0xf42   : > { %v12993_v4 = vpop.f32.mrf.mxu1  ;;  %v10747_v54 = vadd.f32 %v10746_v0, %v10745_v44 }
 0xf43   : > { %v10738_v49 = vmul.f32 %v10728_v55, %v10728_v55 }
 0xf44   : > { %v10672_v51 = vpop.f32.mrf.mxu1 }
 0xf45   : > { %10702 = vst.msk [vmem:[#allocation9 + $0x18] sm:$0xff] %vm921_vm4, %v10672_v51  ;;  %10711 = vst.msk [vmem:[%s14211_s15 + $0x18] sm:$0xff] %vm921_vm4, %v10672_v51  ;;  %v10729_v30 = vsub.f32 %v10672_v51, %v10720_v7  ;;  %v10748_v27 = vsel %vm921_vm4, %v10738_v49, 0.0  ;;  %v10735_v51 = vld [vmem:[#allocation10] sm:$0x1] }
 0xf46   : > { %v12994_v22 = vpop.f32.mrf.mxu1  ;;  %v10749_v40 = vadd.f32 %v10748_v27, %v10747_v54 }
 0xf47   : > { %v10739_v28 = vmul.f32 %v10729_v30, %v10729_v30 }
 0xf49   : > { %v10677_v33 = vpop.f32.mrf.mxu1  ;;  %v10750_v23 = vsel %vm921_vm4, %v10739_v28, 0.0 }
 0xf4a   : > { %10703 = vst.msk [vmem:[#allocation9 + $0x20] sm:$0xff] %vm921_vm4, %v10677_v33  ;;  %10712 = vst.msk [vmem:[%s14211_s15 + $0x20] sm:$0xff] %vm921_vm4, %v10677_v33  ;;  %v10730_v60 = vsub.f32 %v10677_v33, %v10721_v17  ;;  %v10751_v47 = vadd.f32 %v10750_v23, %v10749_v40 }
 0xf4b   : > { %v12997_v50 = vpop.f32.mrf.mxu1 }
 0xf4c   : > { %v10740_v48 = vmul.f32 %v10730_v60, %v10730_v60 }
 0xf4d   : > { %v10680_v5 = vpop.f32.mrf.mxu1 }
 0xf4e   : > { %10704 = vst.msk [vmem:[#allocation9 + $0x28] sm:$0xff] %vm921_vm4, %v10680_v5  ;;  %10713 = vst.msk [vmem:[%s14211_s15 + $0x28] sm:$0xff] %vm921_vm4, %v10680_v5  ;;  %v10731_v38 = vsub.f32 %v10680_v5, %v10722_v26  ;;  %v10752_v36 = vsel %vm921_vm4, %v10740_v48, 0.0 }
 0xf4f   : > { %v12998_v19 = vpop.f32.mrf.mxu1  ;;  %v10753_v34 = vadd.f32 %v10752_v36, %v10751_v47 }
 0xf50   : > { %v10741_v59 = vmul.f32 %v10731_v38, %v10731_v38 }
 0xf51   : > { %v10685_v37 = vpop.f32.mrf.mxu1 }
 0xf52   : > { %10705 = vst.msk [vmem:[#allocation9 + $0x30] sm:$0xff] %vm921_vm4, %v10685_v37  ;;  %10714 = vst.msk [vmem:[%s14211_s15 + $0x30] sm:$0xff] %vm921_vm4, %v10685_v37  ;;  %v10732_v45 = vsub.f32 %v10685_v37, %v10723_v11  ;;  %v10754_v2 = vsel %vm921_vm4, %v10741_v59, 0.0 }
 0xf53   : > { %v13001_v58 = vpop.f32.mrf.mxu1  ;;  %v10755_v18 = vadd.f32 %v10754_v2, %v10753_v34 }
 0xf54   : > { %v10742_v39 = vmul.f32 %v10732_v45, %v10732_v45 }
 0xf55   : > { %v10688_v10 = vpop.f32.mrf.mxu1 }
 0xf56   : > { %10706 = vst.msk [vmem:[#allocation9 + $0x38] sm:$0xff] %vm921_vm4, %v10688_v10  ;;  %10715 = vst.msk [vmem:[%s14211_s15 + $0x38] sm:$0xff] %vm921_vm4, %v10688_v10  ;;  %v10733_v8 = vsub.f32 %v10688_v10, %v10724_v63  ;;  %v10756_v15 = vsel %vm921_vm4, %v10742_v39, 0.0 }
 0xf57   : > { %v13002_v29 = vpop.f32.mrf.mxu1  ;;  %v10757_v21 = vadd.f32 %v10756_v15, %v10755_v18 }
 0xf58   : > { %v10743_v1 = vmul.f32 %v10733_v8, %v10733_v8 }
 0xf59   : > { %v10693_v24 = vpop.f32.mrf.mxu1 }
 0xf5a   : > { %v10758_v53 = vsel %vm921_vm4, %v10743_v1, 0.0  ;;  %10707 = vst.msk [vmem:[#allocation9 + $0x40] sm:$0xff] %vm921_vm4, %v10693_v24  ;;  %10716 = vst.msk [vmem:[%s14211_s15 + $0x40] sm:$0xff] %vm921_vm4, %v10693_v24  ;;  %v10734_v35 = vsub.f32 %v10693_v24, %v10725_v16  ;;  %s14075_s15 = smov [#allocation10]  }
 0xf5b   : > { %v13005_v42 = vpop.f32.mrf.mxu1  ;;  %v10759_v61 = vadd.f32 %v10758_v53, %v10757_v21  ;;  %s10790_s1 = sshll.u32 %s14075_s15, 4  ;;  %s10791_s1 = int_to_ptr.vmem [resolvable:$true] %s10790_s1 }
 0xf5c   : > { %v10744_v56 = vmul.f32 %v10734_v35, %v10734_v35  ;;  %s14030_s4 = scalar_lea.vmem %s10791_s1, 16  ;;  %s14036_s30 = scalar_lea.vmem %s10791_s1, 32 }
 0xf5d   : > { %v10696_v3 = vpop.f32.mrf.mxu1  ;;  %p14031_p6 = scmp.ne.s32.totalorder %s10791_s1, %s14030_s4  ;;  %p14037_p9 = scmp.lt.s32.totalorder %s10791_s1, %s10791_s1 }
 0xf5e   : > { %v10760_v41 = vsel %vm921_vm4, %v10744_v56, 0.0  ;;  %p14038_p10 = scmp.lt.s32.totalorder %s14036_s30, %s14030_s4 }
 0xf5f   : > { %v13006_v31 = vpop.f32.mrf.mxu1  ;;  %v10761_v20 = vadd.f32 %v10760_v41, %v10759_v61  ;;  %p14032_p7 = pnand %p14031_p6, %p13014_p5 }
 0xf60   : > { %p14039_p11 = por %p14038_p10, %p14037_p9 }
 0xf61   : > { %10762 = vadd.xlane.f32.xlu1 %v10761_v20  ;;  %p14033_p8 = pneg %p14032_p7 }
 0xf63   : > { %p14040_p12 = pnand %p14039_p11, %p14033_p8 }
 0xfea   : > { %v10763_v62 = vpop.xlane.xlu1 %10762 }
 0xfeb   : > { %v10764_v32 = vrot.slane %v10763_v62, 4 }
 0xfed   : > { %v10765_v57 = vadd.f32 %v10764_v32, %v10763_v62 }
 0xfef   : > { %v10766_v9 = vrot.slane %v10765_v57, 2 }
 0xff1   : > { %v10767_v46 = vadd.f32 %v10766_v9, %v10765_v57 }
 0xff3   : > { %v10768_v4 = vrot.slane %v10767_v46, 1 }
 0xff5   : > { %v10769_v12 = vadd.f32 %v10768_v4, %v10767_v46 }
 0xff7   : > { %13008 = vpush %v10769_v12 }
0x1028   : > { %s13009_s20 = spop %13008 }
0x1029   : > { %v10771_v6 = vstv %s13009_s20 }
0x102a   : > { %v10772_v52 = vadd.f32 %v10771_v6, %v10735_v51 }
0x102c   : > { %10774 = vst.msk [vmem:[#allocation10] sm:$0x1] %vm10773_vm1, %v10772_v52 }
0x102d   : > { %14043 = shalt.err (!%p14040_p12)
}
0x102e   : > { %s20217_s23 = sld [smem:[#allocation38_spill]] }
0x1034   : > { %13011 = dma.vmem_to_hbm [thread:$0]  (%p13014_p5), %s10791_s1, 16, %s20217_s23, [#allocation11]  }
0x1035   : > { %14059 = dma.done.wait (%p13014_p5), [#allocation11], 16  }
0x1036   : > { %14061 = vsyncadd (%p13014_p5), [#allocation11], 4294967280 }
0x1037 PF: > { %s20218_s24 = sld [smem:[#allocation13_spill]] }
0x103d   : > { %s32_s1 = sadd.s32 1, %s20218_s24  }
0x103e   : > { %p29_p13 = scmp.ge.s32.totalorder %s32_s1, 9  }
0x1040   :  { %31 = sbr.rel (!%p29_p13) target bundleno = 10 (0xa), region = 185 }
0x1045   :  { %10811 = vsyncpa [#allocation11], 1 }
0x1046   :  { %10813 = vsyncpa [#allocation11 + $0x1], 1 }

</bundles_post_ra>
